<compile_context>
chip_gen: v7x
topology: tpu7x:2x2x1
jax: 0.10.0
libtpu: 0.0.40
codegen_flags: <defaults>
</compile_context>

<pallas_src>
import math
from functools import partial

import jax
import jax.numpy as jnp
from jax import lax
from jax.experimental import pallas as pl
from jax.experimental.pallas import tpu as pltpu

# ----------------------------- configuration -----------------------------
IN_FEATURES = 64      # module default 1024, shrunk for the synthetic run
HIDDEN = 32           # module default 512
NUM_CLASSES = 1
HEADS = 8
DIM_HEAD = HIDDEN // HEADS        # dim // 8
LANDMARKS = HIDDEN // 2           # dim // 2
PINV_ITERS = 6
RES_KERNEL = 33                   # nystrom_attention residual_conv_kernel default
LN_EPS = 1e-5

_BF16 = jnp.bfloat16


# ----------------------------- in-kernel helpers -----------------------------
def _softmax_rows(s):
    s = s - jnp.max(s, axis=-1, keepdims=True)
    e = jnp.exp(s)
    return e / jnp.sum(e, axis=-1, keepdims=True)


def _softmax_rows_padcols(s, n_pad_cols):
    """Softmax over the last axis as if `n_pad_cols` extra columns of value 0
    (the zero key rows of the front-padded sequence) were present.  Exact."""
    mx = jnp.max(s, axis=-1, keepdims=True)
    if n_pad_cols > 0:
        mx = jnp.maximum(mx, 0.0)           # the implicit zero columns
    e = jnp.exp(s - mx)
    den = jnp.sum(e, axis=-1, keepdims=True)
    if n_pad_cols > 0:
        den = den + n_pad_cols * jnp.exp(-mx)
    return e / den


def _mm(a, b, *, nt=False):
    """a @ b (or a @ b.T when nt=True) on the MXU: bf16 operands, f32 accumulation."""
    a = a.astype(_BF16)
    b = b.astype(_BF16)
    dims = (((1,), (1,)), ((), ())) if nt else (((1,), (0,)), ((), ()))
    return lax.dot_general(a, b, dims, preferred_element_type=jnp.float32)


def _mm_f32(a, b):
    return jnp.dot(a, b, preferred_element_type=jnp.float32)


def _row_tile(M, target=256):
    """Row tile for the linear kernels.  Prefers a multiple-of-8 divisor of M;
    otherwise returns a multiple-of-8 tile and the cdiv grid handles the tail."""
    if M <= target:
        return M
    t = target - (target % 8)
    while t >= 8:
        if M % t == 0:
            return t
        t -= 8
    return target - (target % 8)


# ----------------------------- fused [LayerNorm +] Linear [+ ReLU] -----------------------------
def _ln_linear_kernel(do_ln, has_bias, relu, *refs):
    it = iter(refs)
    x_ref = next(it)
    if do_ln:
        g_ref = next(it)
        beta_ref = next(it)
    w_ref = next(it)
    if has_bias:
        bias_ref = next(it)
    o_ref = next(it)

    x = x_ref[...].astype(jnp.float32)
    if do_ln:
        mu = jnp.mean(x, axis=-1, keepdims=True)
        xc = x - mu
        var = jnp.mean(xc * xc, axis=-1, keepdims=True)
        x = xc * lax.rsqrt(var + LN_EPS) * g_ref[...] + beta_ref[...]
    y = jnp.dot(x.astype(_BF16), w_ref[...], preferred_element_type=jnp.float32)
    if has_bias:
        y = y + bias_ref[...]
    if relu:
        y = jnp.maximum(y, 0.0)
    o_ref[...] = y.astype(o_ref.dtype)


def fused_linear(x, w, *, bias=None, ln=None, relu=False,
                 out_dtype=jnp.float32, tile_rows=256):
    """y = [relu]( [LayerNorm](x) @ w [+ bias] ), row-tiled, weight resident in VMEM."""
    M, K = x.shape
    N = w.shape[1]
    tm = _row_tile(M, tile_rows)
    do_ln = ln is not None
    has_bias = bias is not None

    arrays = [x]
    specs = [pl.BlockSpec((tm, K), lambda i: (i, 0))]
    if do_ln:
        g, beta = ln
        arrays += [g.reshape(1, K), beta.reshape(1, K)]
        specs += [pl.BlockSpec((1, K), lambda i: (0, 0)),
                  pl.BlockSpec((1, K), lambda i: (0, 0))]
    arrays.append(w.astype(_BF16))
    specs.append(pl.BlockSpec((K, N), lambda i: (0, 0)))
    if has_bias:
        arrays.append(bias.reshape(1, N))
        specs.append(pl.BlockSpec((1, N), lambda i: (0, 0)))

    return pl.pallas_call(
        partial(_ln_linear_kernel, do_ln, has_bias, relu),
        out_shape=jax.ShapeDtypeStruct((M, N), out_dtype),
        grid=(pl.cdiv(M, tm),),
        in_specs=specs,
        out_specs=pl.BlockSpec((tm, N), lambda i: (i, 0)),
        compiler_params=pltpu.CompilerParams(dimension_semantics=("parallel",)),
    )(*arrays)


# ----------------------------- Nystrom attention kernels -----------------------------
def _landmark_attn2_kernel(m, l, scale, pool_ref, qkv_ref, attn2_ref, land_ref):
    # pool (m, n): block-mean pooling over the *real* rows (the front zero-padding
    # of the Nystrom sequence contributes nothing to the landmark sums because
    # to_qkv has no bias).  One MXU matmul replaces the old strided-load chain.
    D = HIDDEN
    Dh = DIM_HEAD
    qk = qkv_ref[0][:, :2 * D]                           # (n, 2D) bf16, v not needed
    lsum = _mm(pool_ref[...], qk)                        # (m, 2D) f32
    q_l = lsum[:, :D] * (scale / l)                      # q*scale folded into the mean
    k_l = lsum[:, D:] * (1.0 / l)
    land_ref[0] = jnp.concatenate([q_l, k_l], axis=-1)   # shared with the out kernel

    q_l16 = q_l.astype(_BF16)
    k_l16 = k_l.astype(_BF16)
    for h in range(HEADS):
        sl = slice(h * Dh, (h + 1) * Dh)
        sim2 = _mm(q_l16[:, sl], k_l16[:, sl], nt=True)  # (m, m)
        attn2_ref[0, h, :, :] = _softmax_rows(sim2)


def _pinv_kernel(m, attn2_ref, denom_ref, z_ref):
    # Moore-Penrose iterative pseudo-inverse for ONE (b, h) slice, scaled by the
    # reference's *global* max(col)*max(row) (passed in as a (1,1) operand so the
    # Newton iterations can run with a parallel grid).  Stays in f32.
    x = attn2_ref[0]                                     # (m, m)
    z = jnp.transpose(x) / denom_ref[...]                # (m, m) / (1, 1) broadcast

    ridx = lax.broadcasted_iota(jnp.int32, (m, m), 0)
    cidx = lax.broadcasted_iota(jnp.int32, (m, m), 1)
    eye = (ridx == cidx).astype(jnp.float32)

    for _ in range(PINV_ITERS):
        xz = _mm_f32(x, z)
        t = 7.0 * eye - xz
        t = 15.0 * eye - _mm_f32(xz, t)
        t = 13.0 * eye - _mm_f32(xz, t)
        z = 0.25 * _mm_f32(z, t)
    z_ref[0] = z


def _attn_out_kernel(n, m, pad, scale,
                     qkv_ref, land_ref, z_ref, x_ref, rw_ref, ow_ref, ob_ref,
                     o_ref):
    # Fused: per-head Nystrom attention output + depthwise residual conv of v +
    # head-merged out-projection + TransLayer residual.  Only the surviving tail
    # rows (out[:, -n:], i.e. the real rows) are ever computed; the `pad` zero
    # rows of the padded sequence are handled analytically in the attn3 softmax.
    D = HIDDEN
    Dh = DIM_HEAD

    qkv = qkv_ref[0]                         # (n, 3D) bf16
    q = qkv[:, :D]
    k = qkv[:, D:2 * D]
    v = qkv[:, 2 * D:]

    land = land_ref[0]                       # (m, 2D) f32, q_l already scaled
    q_l = land[:, :D].astype(_BF16)          # bf16 casts hoisted out of the head loop
    k_l = land[:, D:].astype(_BF16)
    z_all = z_ref[0].astype(_BF16)           # (H, m, m)

    # Per-head attention; the 'b h n d -> b n (h d)' merge is a lane concatenation
    # so the out-projection is a single (n, D) @ (D, D) matmul after the loop.
    outs = []
    for h in range(HEADS):
        sl = slice(h * Dh, (h + 1) * Dh)
        qh, kh, vh = q[:, sl], k[:, sl], v[:, sl]
        qlh, klh = q_l[:, sl], k_l[:, sl]

        attn1 = _softmax_rows(_mm(qh, klh, nt=True) * scale)        # (n, m)
        attn3 = _softmax_rows_padcols(_mm(qlh, kh, nt=True), pad)   # (m, n)
        av = _mm(attn3, vh)                                         # (m, Dh)
        a1z = _mm(attn1, z_all[h])                                  # (n, m)
        outs.append(_mm(a1z, av))                                   # (n, Dh)
    merged = jnp.concatenate(outs, axis=-1)                         # (n, D) f32

    # Depthwise residual conv of v over the sequence (kernel 33, per (h d) channel).
    # Tail rows only depend on the real v rows plus a 16-row zero boundary; 4
    # round-robin accumulators break the 33-deep serial VALU chain.
    pad_c = RES_KERNEL // 2
    zeros = jnp.zeros((pad_c, D), jnp.float32)
    vpad = jnp.concatenate([zeros, v.astype(jnp.float32), zeros], axis=0)  # (n+32, D)
    rw = rw_ref[...]                                                        # (33, D)
    accs = [jnp.zeros((n, D), jnp.float32) for _ in range(4)]
    # TODO(synk): group taps by (kk mod 8) or use pltpu.roll to cut unaligned
    # sublane-slice copies at production sequence lengths.
    for kk in range(RES_KERNEL):
        accs[kk % 4] = accs[kk % 4] + rw[kk:kk + 1, :] * vpad[kk:kk + n, :]
    conv_tail = (accs[0] + accs[1]) + (accs[2] + accs[3])

    y = _mm(merged + conv_tail, ow_ref[...]) + ob_ref[...]
    o_ref[0] = x_ref[0] + y                  # TransLayer residual


def nystrom_translayer(x, p):
    """TransLayer: x + NystromAttention(LayerNorm(x))."""
    B, n, D = x.shape
    m = LANDMARKS
    rem = n % m
    pad = (m - rem) if rem > 0 else 0
    Np = n + pad
    l = Np // m                              # == ceil(n / m)
    scale = DIM_HEAD ** -0.5

    # Fused LayerNorm + QKV projection (to_qkv has no bias), emitted in bf16.
    # The front zero-padded rows of the Nystrom sequence are never materialized.
    qkv = fused_linear(x.reshape(B * n, D), p['qkv_w'],
                       ln=(p['norm_w'], p['norm_b']),
                       out_dtype=_BF16).reshape(B, n, 3 * D)

    # Block-mean pooling matrix over the real rows: landmark i gathers padded
    # rows [i*l, (i+1)*l); real row r sits at padded position r + pad.
    ridx = (jnp.arange(n) + pad) // l
    pool = (ridx[None, :] == jnp.arange(m)[:, None]).astype(_BF16)       # (m, n)

    # landmark sums + attn2 softmax, per batch (parallel), heads in-kernel.
    attn2, land = pl.pallas_call(
        partial(_landmark_attn2_kernel, m, l, scale),
        out_shape=(jax.ShapeDtypeStruct((B, HEADS, m, m), jnp.float32),
                   jax.ShapeDtypeStruct((B, m, 2 * D), jnp.float32)),
        grid=(B,),
        in_specs=[pl.BlockSpec((m, n), lambda b: (0, 0)),
                  pl.BlockSpec((1, n, 3 * D), lambda b: (b, 0, 0))],
        out_specs=(pl.BlockSpec((1, HEADS, m, m), lambda b: (b, 0, 0, 0)),
                   pl.BlockSpec((1, m, 2 * D), lambda b: (b, 0, 0))),
        compiler_params=pltpu.CompilerParams(dimension_semantics=("parallel",)),
    )(pool, qkv)

    # Global pinv scaling over ALL batches and heads (as in the reference); tiny
    # reduction done in glue, then the Newton iterations run batch-head parallel.
    denom = (jnp.max(jnp.sum(jnp.abs(attn2), axis=-1)) *
             jnp.max(jnp.sum(jnp.abs(attn2), axis=-2))).reshape(1, 1)

    z = pl.pallas_call(
        partial(_pinv_kernel, m),
        out_shape=jax.ShapeDtypeStruct((B * HEADS, m, m), jnp.float32),
        grid=(B * HEADS,),
        in_specs=[pl.BlockSpec((1, m, m), lambda i: (i, 0, 0)),
                  pl.BlockSpec((1, 1), lambda i: (0, 0))],
        out_specs=pl.BlockSpec((1, m, m), lambda i: (i, 0, 0)),
        compiler_params=pltpu.CompilerParams(dimension_semantics=("parallel",)),
    )(attn2.reshape(B * HEADS, m, m), denom).reshape(B, HEADS, m, m)

    # per-(h d) channel weights of the depthwise residual conv (33, D)
    w_res = jnp.repeat(p['res_conv_w'].T, DIM_HEAD, axis=1)

    # TODO(synk): at production sizes (HIDDEN=512, thousands of patches) add a row
    # tile axis to this kernel (tile the q/tail rows, keep attn3@v in a small
    # per-batch scratch) and set vmem_limit_bytes for v7x's 64 MiB VMEM.
    out = pl.pallas_call(
        partial(_attn_out_kernel, n, m, pad, scale),
        out_shape=jax.ShapeDtypeStruct((B, n, D), jnp.float32),
        grid=(B,),
        in_specs=[
            pl.BlockSpec((1, n, 3 * D), lambda b: (b, 0, 0)),
            pl.BlockSpec((1, m, 2 * D), lambda b: (b, 0, 0)),
            pl.BlockSpec((1, HEADS, m, m), lambda b: (b, 0, 0, 0)),
            pl.BlockSpec((1, n, D), lambda b: (b, 0, 0)),
            pl.BlockSpec((RES_KERNEL, D), lambda b: (0, 0)),
            pl.BlockSpec((D, D), lambda b: (0, 0)),
            pl.BlockSpec((1, D), lambda b: (0, 0)),
        ],
        out_specs=pl.BlockSpec((1, n, D), lambda b: (b, 0, 0)),
        compiler_params=pltpu.CompilerParams(dimension_semantics=("parallel",)),
    )(qkv, land, z, x, w_res, p['out_w'].astype(_BF16), p['out_b'].reshape(1, D))
    return out


# ----------------------------- PPEG -----------------------------
def _ppeg_kernel(Hs, Ws, fp_ref, w_ref, b_ref, o_ref):
    fp = fp_ref[0]                                   # (Hs+6, Ws+6, C), zero-pad 3
    w = w_ref[...]                                   # (49, C) combined 7/5/3 taps
    C = fp.shape[-1]
    accs = [fp[3:3 + Hs, 3:3 + Ws, :] + b_ref[...]]  # identity + summed conv biases
    accs += [jnp.zeros((Hs, Ws, C), jnp.float32) for _ in range(3)]
    t = 0
    # TODO(synk): replace the unaligned W slices with pltpu.roll (XLU is idle here)
    # when tuning at production dim=512 / large grids.
    for di in range(7):
        rows = fp[di:di + Hs, :, :]                  # row slice shared across dj
        for dj in range(7):
            tap = w[di * 7 + dj:di * 7 + dj + 1, :] * rows[:, dj:dj + Ws, :]
            accs[t % 4] = accs[t % 4] + tap
            t += 1
    o_ref[0] = (accs[0] + accs[1]) + (accs[2] + accs[3])


def ppeg(x, Hs, Ws, p):
    B, _, C = x.shape
    cls_tok = x[:, :1]
    feat = x[:, 1:].reshape(B, Hs, Ws, C)            # NHWC (channels on lanes)
    fp = jnp.pad(feat, ((0, 0), (3, 3), (3, 3), (0, 0)))

    # merge the 7x7 / 5x5 / 3x3 depthwise kernels into one 49-tap kernel by
    # zero-padding the smaller ones into the 7x7 offset grid (parameter-side, tiny).
    w7 = jnp.transpose(p['proj7_w'].reshape(C, 7, 7), (1, 2, 0))
    w5 = jnp.pad(jnp.transpose(p['proj5_w'].reshape(C, 5, 5), (1, 2, 0)),
                 ((1, 1), (1, 1), (0, 0)))
    w3 = jnp.pad(jnp.transpose(p['proj3_w'].reshape(C, 3, 3), (1, 2, 0)),
                 ((2, 2), (2, 2), (0, 0)))
    w_all = (w7 + w5 + w3).reshape(49, C)
    bias = (p['proj7_b'] + p['proj5_b'] + p['proj3_b']).reshape(1, 1, C)

    y = pl.pallas_call(
        partial(_ppeg_kernel, Hs, Ws),
        out_shape=jax.ShapeDtypeStruct((B, Hs, Ws, C), jnp.float32),
        grid=(B,),
        in_specs=[pl.BlockSpec((1, Hs + 6, Ws + 6, C), lambda b: (b, 0, 0, 0)),
                  pl.BlockSpec((49, C), lambda b: (0, 0)),
                  pl.BlockSpec((1, 1, C), lambda b: (0, 0, 0))],
        out_specs=pl.BlockSpec((1, Hs, Ws, C), lambda b: (b, 0, 0, 0)),
        compiler_params=pltpu.CompilerParams(dimension_semantics=("parallel",)),
    )(fp, w_all, bias)
    return jnp.concatenate([cls_tok, y.reshape(B, Hs * Ws, C)], axis=1)


# ----------------------------- TransMIL forward -----------------------------
def transmil_forward(features, params):
    B, N, Fin = features.shape
    D = HIDDEN

    # _fc1: Linear + ReLU (row-tiled, bf16 MXU)
    h = fused_linear(features.reshape(B * N, Fin), params['fc1_w'],
                     bias=params['fc1_b'], relu=True).reshape(B, N, D)

    _H = _W = int(math.ceil(math.sqrt(N)))
    add_length = _H * _W - N
    if add_length > 0:
        h = jnp.concatenate([h, h[:, :add_length, :]], axis=1)

    cls = jnp.broadcast_to(params['cls_token'], (B, 1, D))
    h = jnp.concatenate([cls, h], axis=1)

    h = nystrom_translayer(h, params['layer1'])
    h = ppeg(h, _H, _W, params['ppeg'])
    h = nystrom_translayer(h, params['layer2'])

    # final LayerNorm + classifier fused; LN is per-token so only the cls row is needed
    cls_final = h[:, 0, :]
    logits = fused_linear(cls_final, params['fc2_w'], bias=params['fc2_b'],
                          ln=(params['norm_w'], params['norm_b']))
    return logits


# ----------------------------- deterministic parameters -----------------------------
def init_params(key):
    ks = iter(jax.random.split(key, 64))

    def nrm(shape, s=0.05):
        return jax.random.normal(next(ks), shape, jnp.float32) * s

    def layer_params():
        return dict(
            norm_w=jnp.ones((HIDDEN,), jnp.float32),
            norm_b=jnp.zeros((HIDDEN,), jnp.float32),
            qkv_w=nrm((HIDDEN, 3 * HIDDEN)),             # Linear(dim, 3*inner), no bias
            out_w=nrm((HIDDEN, HIDDEN)),                 # Linear(inner, dim)
            out_b=nrm((HIDDEN,), 0.01),
            res_conv_w=nrm((HEADS, RES_KERNEL)),         # Conv2d(heads,heads,(33,1),groups=heads)
        )

    return dict(
        fc1_w=nrm((IN_FEATURES, HIDDEN)),
        fc1_b=nrm((HIDDEN,), 0.01),
        cls_token=nrm((1, 1, HIDDEN), 1.0),
        layer1=layer_params(),
        layer2=layer_params(),
        ppeg=dict(
            proj7_w=nrm((HIDDEN, 1, 7, 7)), proj7_b=nrm((HIDDEN,), 0.01),
            proj5_w=nrm((HIDDEN, 1, 5, 5)), proj5_b=nrm((HIDDEN,), 0.01),
            proj3_w=nrm((HIDDEN, 1, 3, 3)), proj3_b=nrm((HIDDEN,), 0.01),
        ),
        norm_w=jnp.ones((HIDDEN,), jnp.float32),
        norm_b=jnp.zeros((HIDDEN,), jnp.float32),
        fc2_w=nrm((HIDDEN, NUM_CLASSES)),
        fc2_b=jnp.zeros((NUM_CLASSES,), jnp.float32),
    )


# ----------------------------- run -----------------------------
if __name__ == "__main__":
    key = jax.random.PRNGKey(0)
    pkey, xkey = jax.random.split(key)
    params = init_params(pkey)
    # features: (batch=2, num_patches=12, in_features=64)
    features = jax.random.normal(xkey, (2, 12, IN_FEATURES), jnp.float32)

    logits = jax.jit(transmil_forward)(features, params)
    logits = jax.block_until_ready(logits)

    assert logits.shape == (2, NUM_CLASSES), logits.shape
    assert bool(jnp.all(jnp.isfinite(logits)))
    print("KERNEL_OK")
</pallas_src>

<mosaic_0001>
module attributes {stable_mosaic.version = 11 : i64} {
  func.func @_ln_linear_kernel(%arg0: i32, %arg1: memref<24x64xf32, #tpu.memory_space<vmem>>, %arg2: memref<64x32xbf16, #tpu.memory_space<vmem>>, %arg3: memref<1x32xf32, #tpu.memory_space<vmem>>, %arg4: memref<24x32xf32, #tpu.memory_space<vmem>>) attributes {dimension_semantics = [#tpu.dimension_semantics<parallel>], iteration_bounds = array<i64: 1>, scalar_prefetch = 0 : i64, scratch_operands = 0 : i64, tpu.core_type = #tpu.core_type<tc>, window_params = [{transform_indices = @transform_0, window_bounds = array<i64: 24, 64>}, {pipeline_mode = #tpu.pipeline_mode<synchronous>, transform_indices = @transform_1, window_bounds = array<i64: 64, 32>}, {pipeline_mode = #tpu.pipeline_mode<synchronous>, transform_indices = @transform_2, window_bounds = array<i64: 1, 32>}, {transform_indices = @transform_3, window_bounds = array<i64: 24, 32>}]} {
    %c0 = arith.constant 0 : index
    %c0_0 = arith.constant 0 : index
    %0 = vector.load %arg1[%c0, %c0_0] : memref<24x64xf32, #tpu.memory_space<vmem>>, vector<24x64xf32>
    %1 = arith.truncf %0 : vector<24x64xf32> to vector<24x64xbf16>
    %c0_1 = arith.constant 0 : index
    %c0_2 = arith.constant 0 : index
    %2 = vector.load %arg2[%c0_1, %c0_2] : memref<64x32xbf16, #tpu.memory_space<vmem>>, vector<64x32xbf16>
    %cst = arith.constant dense<0.000000e+00> : vector<24x32xf32>
    %3 = tpu.matmul %1, %2, %cst {dimension_numbers = #tpu.dot_dimension_numbers<[1], [0], [0], [1], [0, 0, 1, 1], [], []>} : vector<24x64xbf16>, vector<64x32xbf16>, vector<24x32xf32> -> vector<24x32xf32>
    %c0_3 = arith.constant 0 : index
    %c0_4 = arith.constant 0 : index
    %4 = vector.load %arg3[%c0_3, %c0_4] : memref<1x32xf32, #tpu.memory_space<vmem>>, vector<1x32xf32>
    %5 = vector.broadcast %4 : vector<1x32xf32> to vector<24x32xf32>
    %6 = arith.addf %3, %5 : vector<24x32xf32>
    %cst_5 = arith.constant 0.000000e+00 : f32
    %7 = vector.broadcast %cst_5 : f32 to vector<24x32xf32>
    %8 = arith.maximumf %6, %7 : vector<24x32xf32>
    %c0_6 = arith.constant 0 : index
    %c0_7 = arith.constant 0 : index
    %9 = vector.load %arg4[%c0_6, %c0_7] : memref<24x32xf32, #tpu.memory_space<vmem>>, vector<24x32xf32>
    tpu.vector_store %arg4[%c0_6, %c0_7], %8 {strides = array<i32>} : memref<24x32xf32, #tpu.memory_space<vmem>>, vector<24x32xf32>,
    return
  }
  func.func @transform_0(%arg0: i32) -> (i32, i32) {
    %c0_i32 = arith.constant 0 : i32
    %c0_i32_0 = arith.constant 0 : i32
    return %arg0, %c0_i32 : i32, i32
  }
  func.func @transform_1(%arg0: i32) -> (i32, i32) {
    %c0_i32 = arith.constant 0 : i32
    %c0_i32_0 = arith.constant 0 : i32
    %c0_i32_1 = arith.constant 0 : i32
    return %c0_i32, %c0_i32_0 : i32, i32
  }
  func.func @transform_2(%arg0: i32) -> (i32, i32) {
    %c0_i32 = arith.constant 0 : i32
    %c0_i32_0 = arith.constant 0 : i32
    %c0_i32_1 = arith.constant 0 : i32
    return %c0_i32, %c0_i32_0 : i32, i32
  }
  func.func @transform_3(%arg0: i32) -> (i32, i32) {
    %c0_i32 = arith.constant 0 : i32
    %c0_i32_0 = arith.constant 0 : i32
    return %arg0, %c0_i32 : i32, i32
  }
}

module attributes {stable_mosaic.version = 11 : i64} {
  func.func @_ln_linear_kernel(%arg0: i32, %arg1: memref<34x32xf32, #tpu.memory_space<vmem>>, %arg2: memref<1x32xf32, #tpu.memory_space<vmem>>, %arg3: memref<1x32xf32, #tpu.memory_space<vmem>>, %arg4: memref<32x96xbf16, #tpu.memory_space<vmem>>, %arg5: memref<34x96xbf16, #tpu.memory_space<vmem>>) attributes {dimension_semantics = [#tpu.dimension_semantics<parallel>], iteration_bounds = array<i64: 1>, scalar_prefetch = 0 : i64, scratch_operands = 0 : i64, tpu.core_type = #tpu.core_type<tc>, window_params = [{transform_indices = @transform_0, window_bounds = array<i64: 34, 32>}, {pipeline_mode = #tpu.pipeline_mode<synchronous>, transform_indices = @transform_1, window_bounds = array<i64: 1, 32>}, {pipeline_mode = #tpu.pipeline_mode<synchronous>, transform_indices = @transform_2, window_bounds = array<i64: 1, 32>}, {pipeline_mode = #tpu.pipeline_mode<synchronous>, transform_indices = @transform_3, window_bounds = array<i64: 32, 96>}, {transform_indices = @transform_4, window_bounds = array<i64: 34, 96>}]} {
    %c0 = arith.constant 0 : index
    %c0_0 = arith.constant 0 : index
    %0 = vector.load %arg1[%c0, %c0_0] : memref<34x32xf32, #tpu.memory_space<vmem>>, vector<34x32xf32>
    %cst = arith.constant dense<0.000000e+00> : vector<34xf32>
    %1 = vector.multi_reduction <add>, %0, %cst [1] : vector<34x32xf32> to vector<34xf32>
    %2 = vector.shape_cast %1 : vector<34xf32> to vector<34x1xf32>
    %cst_1 = arith.constant 3.200000e+01 : f32
    %3 = vector.broadcast %cst_1 : f32 to vector<34x1xf32>
    %4 = arith.divf %2, %3 : vector<34x1xf32>
    %5 = vector.broadcast %4 : vector<34x1xf32> to vector<34x32xf32>
    %6 = arith.subf %0, %5 : vector<34x32xf32>
    %7 = arith.mulf %6, %6 : vector<34x32xf32>
    %cst_2 = arith.constant dense<0.000000e+00> : vector<34xf32>
    %8 = vector.multi_reduction <add>, %7, %cst_2 [1] : vector<34x32xf32> to vector<34xf32>
    %9 = vector.shape_cast %8 : vector<34xf32> to vector<34x1xf32>
    %cst_3 = arith.constant 3.200000e+01 : f32
    %10 = vector.broadcast %cst_3 : f32 to vector<34x1xf32>
    %11 = arith.divf %9, %10 : vector<34x1xf32>
    %cst_4 = arith.constant 9.99999974E-6 : f32
    %12 = vector.broadcast %cst_4 : f32 to vector<34x1xf32>
    %13 = arith.addf %11, %12 : vector<34x1xf32>
    %14 = math.rsqrt %13 : vector<34x1xf32>
    %15 = vector.broadcast %14 : vector<34x1xf32> to vector<34x32xf32>
    %16 = arith.mulf %6, %15 : vector<34x32xf32>
    %c0_5 = arith.constant 0 : index
    %c0_6 = arith.constant 0 : index
    %17 = vector.load %arg2[%c0_5, %c0_6] : memref<1x32xf32, #tpu.memory_space<vmem>>, vector<1x32xf32>
    %18 = vector.broadcast %17 : vector<1x32xf32> to vector<34x32xf32>
    %19 = arith.mulf %16, %18 : vector<34x32xf32>
    %c0_7 = arith.constant 0 : index
    %c0_8 = arith.constant 0 : index
    %20 = vector.load %arg3[%c0_7, %c0_8] : memref<1x32xf32, #tpu.memory_space<vmem>>, vector<1x32xf32>
    %21 = vector.broadcast %20 : vector<1x32xf32> to vector<34x32xf32>
    %22 = arith.addf %19, %21 : vector<34x32xf32>
    %23 = arith.truncf %22 : vector<34x32xf32> to vector<34x32xbf16>
    %c0_9 = arith.constant 0 : index
    %c0_10 = arith.constant 0 : index
    %24 = vector.load %arg4[%c0_9, %c0_10] : memref<32x96xbf16, #tpu.memory_space<vmem>>, vector<32x96xbf16>
    %cst_11 = arith.constant dense<0.000000e+00> : vector<34x96xf32>
    %25 = tpu.matmul %23, %24, %cst_11 {dimension_numbers = #tpu.dot_dimension_numbers<[1], [0], [0], [1], [0, 0, 1, 1], [], []>} : vector<34x32xbf16>, vector<32x96xbf16>, vector<34x96xf32> -> vector<34x96xf32>
    %26 = arith.truncf %25 : vector<34x96xf32> to vector<34x96xbf16>
    %c0_12 = arith.constant 0 : index
    %c0_13 = arith.constant 0 : index
    %27 = vector.load %arg5[%c0_12, %c0_13] : memref<34x96xbf16, #tpu.memory_space<vmem>>, vector<34x96xbf16>
    tpu.vector_store %arg5[%c0_12, %c0_13], %26 {strides = array<i32>} : memref<34x96xbf16, #tpu.memory_space<vmem>>, vector<34x96xbf16>,
    return
  }
  func.func @transform_0(%arg0: i32) -> (i32, i32) {
    %c0_i32 = arith.constant 0 : i32
    %c0_i32_0 = arith.constant 0 : i32
    return %arg0, %c0_i32 : i32, i32
  }
  func.func @transform_1(%arg0: i32) -> (i32, i32) {
    %c0_i32 = arith.constant 0 : i32
    %c0_i32_0 = arith.constant 0 : i32
    %c0_i32_1 = arith.constant 0 : i32
    return %c0_i32, %c0_i32_0 : i32, i32
  }
  func.func @transform_2(%arg0: i32) -> (i32, i32) {
    %c0_i32 = arith.constant 0 : i32
    %c0_i32_0 = arith.constant 0 : i32
    %c0_i32_1 = arith.constant 0 : i32
    return %c0_i32, %c0_i32_0 : i32, i32
  }
  func.func @transform_3(%arg0: i32) -> (i32, i32) {
    %c0_i32 = arith.constant 0 : i32
    %c0_i32_0 = arith.constant 0 : i32
    %c0_i32_1 = arith.constant 0 : i32
    return %c0_i32, %c0_i32_0 : i32, i32
  }
  func.func @transform_4(%arg0: i32) -> (i32, i32) {
    %c0_i32 = arith.constant 0 : i32
    %c0_i32_0 = arith.constant 0 : i32
    return %arg0, %c0_i32 : i32, i32
  }
}

module attributes {stable_mosaic.version = 11 : i64} {
  func.func @_landmark_attn2_kernel(%arg0: i32, %arg1: memref<16x17xbf16, #tpu.memory_space<vmem>>, %arg2: memref<1x17x96xbf16, #tpu.memory_space<vmem>>, %arg3: memref<1x8x16x16xf32, #tpu.memory_space<vmem>>, %arg4: memref<1x16x64xf32, #tpu.memory_space<vmem>>) attributes {dimension_semantics = [#tpu.dimension_semantics<parallel>], iteration_bounds = array<i64: 2>, scalar_prefetch = 0 : i64, scratch_operands = 0 : i64, tpu.core_type = #tpu.core_type<tc>, window_params = [{pipeline_mode = #tpu.pipeline_mode<synchronous>, transform_indices = @transform_0, window_bounds = array<i64: 16, 17>}, {transform_indices = @transform_1, window_bounds = array<i64: 1, 17, 96>}, {transform_indices = @transform_2, window_bounds = array<i64: 1, 8, 16, 16>}, {transform_indices = @transform_3, window_bounds = array<i64: 1, 16, 64>}]} {
    %c0 = arith.constant 0 : index
    %c0_0 = arith.constant 0 : index
    %c0_1 = arith.constant 0 : index
    %0 = vector.load %arg2[%c0, %c0_0, %c0_1] : memref<1x17x96xbf16, #tpu.memory_space<vmem>>, vector<1x17x96xbf16>
    %1 = vector.shape_cast %0 : vector<1x17x96xbf16> to vector<17x96xbf16>
    %2 = vector.extract_strided_slice %1 {offsets = [0, 0], sizes = [17, 64], strides = [1, 1]} : vector<17x96xbf16> to vector<17x64xbf16>
    %c0_2 = arith.constant 0 : index
    %c0_3 = arith.constant 0 : index
    %3 = vector.load %arg1[%c0_2, %c0_3] : memref<16x17xbf16, #tpu.memory_space<vmem>>, vector<16x17xbf16>
    %cst = arith.constant dense<0.000000e+00> : vector<16x64xf32>
    %4 = tpu.matmul %3, %2, %cst {dimension_numbers = #tpu.dot_dimension_numbers<[1], [0], [0], [1], [0, 0, 1, 1], [], []>} : vector<16x17xbf16>, vector<17x64xbf16>, vector<16x64xf32> -> vector<16x64xf32>
    %5 = vector.extract_strided_slice %4 {offsets = [0, 0], sizes = [16, 32], strides = [1, 1]} : vector<16x64xf32> to vector<16x32xf32>
    %cst_4 = arith.constant 2.500000e-01 : f32
    %6 = vector.broadcast %cst_4 : f32 to vector<16x32xf32>
    %7 = arith.mulf %5, %6 : vector<16x32xf32>
    %8 = vector.extract_strided_slice %4 {offsets = [0, 32], sizes = [16, 32], strides = [1, 1]} : vector<16x64xf32> to vector<16x32xf32>
    %cst_5 = arith.constant 5.000000e-01 : f32
    %9 = vector.broadcast %cst_5 : f32 to vector<16x32xf32>
    %10 = arith.mulf %8, %9 : vector<16x32xf32>
    %11 = tpu.concatenate %7, %10 in 1 : vector<16x32xf32>, vector<16x32xf32> -> vector<16x64xf32>
    %c0_6 = arith.constant 0 : index
    %c0_7 = arith.constant 0 : index
    %c0_8 = arith.constant 0 : index
    %12 = vector.load %arg4[%c0_6, %c0_7, %c0_8] : memref<1x16x64xf32, #tpu.memory_space<vmem>>, vector<1x16x64xf32>
    %13 = vector.shape_cast %12 : vector<1x16x64xf32> to vector<16x64xf32>
    %14 = vector.shape_cast %11 : vector<16x64xf32> to vector<1x16x64xf32>
    tpu.vector_store %arg4[%c0_6, %c0_7, %c0_8], %14 {strides = array<i32>} : memref<1x16x64xf32, #tpu.memory_space<vmem>>, vector<1x16x64xf32>,
    %15 = arith.truncf %7 : vector<16x32xf32> to vector<16x32xbf16>
    %16 = arith.truncf %10 : vector<16x32xf32> to vector<16x32xbf16>
    %17 = vector.extract_strided_slice %15 {offsets = [0, 0], sizes = [16, 4], strides = [1, 1]} : vector<16x32xbf16> to vector<16x4xbf16>
    %18 = vector.extract_strided_slice %16 {offsets = [0, 0], sizes = [16, 4], strides = [1, 1]} : vector<16x32xbf16> to vector<16x4xbf16>
    %cst_9 = arith.constant dense<0.000000e+00> : vector<16x16xf32>
    %19 = tpu.matmul %17, %18, %cst_9 {dimension_numbers = #tpu.dot_dimension_numbers<[1], [1], [0], [0], [0, 0, 1, 0], [], []>} : vector<16x4xbf16>, vector<16x4xbf16>, vector<16x16xf32> -> vector<16x16xf32>
    %cst_10 = arith.constant dense<0xFF800000> : vector<16xf32>
    %20 = vector.multi_reduction <maximumf>, %19, %cst_10 [1] : vector<16x16xf32> to vector<16xf32>
    %21 = vector.shape_cast %20 : vector<16xf32> to vector<16x1xf32>
    %22 = vector.broadcast %21 : vector<16x1xf32> to vector<16x16xf32>
    %23 = arith.subf %19, %22 : vector<16x16xf32>
    %24 = math.exp %23 : vector<16x16xf32>
    %cst_11 = arith.constant dense<0.000000e+00> : vector<16xf32>
    %25 = vector.multi_reduction <add>, %24, %cst_11 [1] : vector<16x16xf32> to vector<16xf32>
    %26 = vector.shape_cast %25 : vector<16xf32> to vector<16x1xf32>
    %27 = vector.broadcast %26 : vector<16x1xf32> to vector<16x16xf32>
    %28 = arith.divf %24, %27 : vector<16x16xf32>
    %c0_12 = arith.constant 0 : index
    %c0_13 = arith.constant 0 : index
    %c0_14 = arith.constant 0 : index
    %c0_15 = arith.constant 0 : index
    %29 = vector.load %arg3[%c0_12, %c0_13, %c0_14, %c0_15] : memref<1x8x16x16xf32, #tpu.memory_space<vmem>>, vector<1x1x16x16xf32>
    %30 = vector.shape_cast %29 : vector<1x1x16x16xf32> to vector<16x16xf32>
    %31 = vector.shape_cast %28 : vector<16x16xf32> to vector<1x1x16x16xf32>
    tpu.vector_store %arg3[%c0_12, %c0_13, %c0_14, %c0_15], %31 {strides = array<i32>} : memref<1x8x16x16xf32, #tpu.memory_space<vmem>>, vector<1x1x16x16xf32>,
    %32 = vector.extract_strided_slice %15 {offsets = [0, 4], sizes = [16, 4], strides = [1, 1]} : vector<16x32xbf16> to vector<16x4xbf16>
    %33 = vector.extract_strided_slice %16 {offsets = [0, 4], sizes = [16, 4], strides = [1, 1]} : vector<16x32xbf16> to vector<16x4xbf16>
    %cst_16 = arith.constant dense<0.000000e+00> : vector<16x16xf32>
    %34 = tpu.matmul %32, %33, %cst_16 {dimension_numbers = #tpu.dot_dimension_numbers<[1], [1], [0], [0], [0, 0, 1, 0], [], []>} : vector<16x4xbf16>, vector<16x4xbf16>, vector<16x16xf32> -> vector<16x16xf32>
    %cst_17 = arith.constant dense<0xFF800000> : vector<16xf32>
    %35 = vector.multi_reduction <maximumf>, %34, %cst_17 [1] : vector<16x16xf32> to vector<16xf32>
    %36 = vector.shape_cast %35 : vector<16xf32> to vector<16x1xf32>
    %37 = vector.broadcast %36 : vector<16x1xf32> to vector<16x16xf32>
    %38 = arith.subf %34, %37 : vector<16x16xf32>
    %39 = math.exp %38 : vector<16x16xf32>
    %cst_18 = arith.constant dense<0.000000e+00> : vector<16xf32>
    %40 = vector.multi_reduction <add>, %39, %cst_18 [1] : vector<16x16xf32> to vector<16xf32>
    %41 = vector.shape_cast %40 : vector<16xf32> to vector<16x1xf32>
    %42 = vector.broadcast %41 : vector<16x1xf32> to vector<16x16xf32>
    %43 = arith.divf %39, %42 : vector<16x16xf32>
    %c0_19 = arith.constant 0 : index
    %c1 = arith.constant 1 : index
    %c0_20 = arith.constant 0 : index
    %c0_21 = arith.constant 0 : index
    %44 = vector.load %arg3[%c0_19, %c1, %c0_20, %c0_21] : memref<1x8x16x16xf32, #tpu.memory_space<vmem>>, vector<1x1x16x16xf32>
    %45 = vector.shape_cast %44 : vector<1x1x16x16xf32> to vector<16x16xf32>
    %46 = vector.shape_cast %43 : vector<16x16xf32> to vector<1x1x16x16xf32>
    tpu.vector_store %arg3[%c0_19, %c1, %c0_20, %c0_21], %46 {strides = array<i32>} : memref<1x8x16x16xf32, #tpu.memory_space<vmem>>, vector<1x1x16x16xf32>,
    %47 = vector.extract_strided_slice %15 {offsets = [0, 8], sizes = [16, 4], strides = [1, 1]} : vector<16x32xbf16> to vector<16x4xbf16>
    %48 = vector.extract_strided_slice %16 {offsets = [0, 8], sizes = [16, 4], strides = [1, 1]} : vector<16x32xbf16> to vector<16x4xbf16>
    %cst_22 = arith.constant dense<0.000000e+00> : vector<16x16xf32>
    %49 = tpu.matmul %47, %48, %cst_22 {dimension_numbers = #tpu.dot_dimension_numbers<[1], [1], [0], [0], [0, 0, 1, 0], [], []>} : vector<16x4xbf16>, vector<16x4xbf16>, vector<16x16xf32> -> vector<16x16xf32>
    %cst_23 = arith.constant dense<0xFF800000> : vector<16xf32>
    %50 = vector.multi_reduction <maximumf>, %49, %cst_23 [1] : vector<16x16xf32> to vector<16xf32>
    %51 = vector.shape_cast %50 : vector<16xf32> to vector<16x1xf32>
    %52 = vector.broadcast %51 : vector<16x1xf32> to vector<16x16xf32>
    %53 = arith.subf %49, %52 : vector<16x16xf32>
    %54 = math.exp %53 : vector<16x16xf32>
    %cst_24 = arith.constant dense<0.000000e+00> : vector<16xf32>
    %55 = vector.multi_reduction <add>, %54, %cst_24 [1] : vector<16x16xf32> to vector<16xf32>
    %56 = vector.shape_cast %55 : vector<16xf32> to vector<16x1xf32>
    %57 = vector.broadcast %56 : vector<16x1xf32> to vector<16x16xf32>
    %58 = arith.divf %54, %57 : vector<16x16xf32>
    %c0_25 = arith.constant 0 : index
    %c2 = arith.constant 2 : index
    %c0_26 = arith.constant 0 : index
    %c0_27 = arith.constant 0 : index
    %59 = vector.load %arg3[%c0_25, %c2, %c0_26, %c0_27] : memref<1x8x16x16xf32, #tpu.memory_space<vmem>>, vector<1x1x16x16xf32>
    %60 = vector.shape_cast %59 : vector<1x1x16x16xf32> to vector<16x16xf32>
    %61 = vector.shape_cast %58 : vector<16x16xf32> to vector<1x1x16x16xf32>
    tpu.vector_store %arg3[%c0_25, %c2, %c0_26, %c0_27], %61 {strides = array<i32>} : memref<1x8x16x16xf32, #tpu.memory_space<vmem>>, vector<1x1x16x16xf32>,
    %62 = vector.extract_strided_slice %15 {offsets = [0, 12], sizes = [16, 4], strides = [1, 1]} : vector<16x32xbf16> to vector<16x4xbf16>
    %63 = vector.extract_strided_slice %16 {offsets = [0, 12], sizes = [16, 4], strides = [1, 1]} : vector<16x32xbf16> to vector<16x4xbf16>
    %cst_28 = arith.constant dense<0.000000e+00> : vector<16x16xf32>
    %64 = tpu.matmul %62, %63, %cst_28 {dimension_numbers = #tpu.dot_dimension_numbers<[1], [1], [0], [0], [0, 0, 1, 0], [], []>} : vector<16x4xbf16>, vector<16x4xbf16>, vector<16x16xf32> -> vector<16x16xf32>
    %cst_29 = arith.constant dense<0xFF800000> : vector<16xf32>
    %65 = vector.multi_reduction <maximumf>, %64, %cst_29 [1] : vector<16x16xf32> to vector<16xf32>
    %66 = vector.shape_cast %65 : vector<16xf32> to vector<16x1xf32>
    %67 = vector.broadcast %66 : vector<16x1xf32> to vector<16x16xf32>
    %68 = arith.subf %64, %67 : vector<16x16xf32>
    %69 = math.exp %68 : vector<16x16xf32>
    %cst_30 = arith.constant dense<0.000000e+00> : vector<16xf32>
    %70 = vector.multi_reduction <add>, %69, %cst_30 [1] : vector<16x16xf32> to vector<16xf32>
    %71 = vector.shape_cast %70 : vector<16xf32> to vector<16x1xf32>
    %72 = vector.broadcast %71 : vector<16x1xf32> to vector<16x16xf32>
    %73 = arith.divf %69, %72 : vector<16x16xf32>
    %c0_31 = arith.constant 0 : index
    %c3 = arith.constant 3 : index
    %c0_32 = arith.constant 0 : index
    %c0_33 = arith.constant 0 : index
    %74 = vector.load %arg3[%c0_31, %c3, %c0_32, %c0_33] : memref<1x8x16x16xf32, #tpu.memory_space<vmem>>, vector<1x1x16x16xf32>
    %75 = vector.shape_cast %74 : vector<1x1x16x16xf32> to vector<16x16xf32>
    %76 = vector.shape_cast %73 : vector<16x16xf32> to vector<1x1x16x16xf32>
    tpu.vector_store %arg3[%c0_31, %c3, %c0_32, %c0_33], %76 {strides = array<i32>} : memref<1x8x16x16xf32, #tpu.memory_space<vmem>>, vector<1x1x16x16xf32>,
    %77 = vector.extract_strided_slice %15 {offsets = [0, 16], sizes = [16, 4], strides = [1, 1]} : vector<16x32xbf16> to vector<16x4xbf16>
    %78 = vector.extract_strided_slice %16 {offsets = [0, 16], sizes = [16, 4], strides = [1, 1]} : vector<16x32xbf16> to vector<16x4xbf16>
    %cst_34 = arith.constant dense<0.000000e+00> : vector<16x16xf32>
    %79 = tpu.matmul %77, %78, %cst_34 {dimension_numbers = #tpu.dot_dimension_numbers<[1], [1], [0], [0], [0, 0, 1, 0], [], []>} : vector<16x4xbf16>, vector<16x4xbf16>, vector<16x16xf32> -> vector<16x16xf32>
    %cst_35 = arith.constant dense<0xFF800000> : vector<16xf32>
    %80 = vector.multi_reduction <maximumf>, %79, %cst_35 [1] : vector<16x16xf32> to vector<16xf32>
    %81 = vector.shape_cast %80 : vector<16xf32> to vector<16x1xf32>
    %82 = vector.broadcast %81 : vector<16x1xf32> to vector<16x16xf32>
    %83 = arith.subf %79, %82 : vector<16x16xf32>
    %84 = math.exp %83 : vector<16x16xf32>
    %cst_36 = arith.constant dense<0.000000e+00> : vector<16xf32>
    %85 = vector.multi_reduction <add>, %84, %cst_36 [1] : vector<16x16xf32> to vector<16xf32>
    %86 = vector.shape_cast %85 : vector<16xf32> to vector<16x1xf32>
    %87 = vector.broadcast %86 : vector<16x1xf32> to vector<16x16xf32>
    %88 = arith.divf %84, %87 : vector<16x16xf32>
    %c0_37 = arith.constant 0 : index
    %c4 = arith.constant 4 : index
    %c0_38 = arith.constant 0 : index
    %c0_39 = arith.constant 0 : index
    %89 = vector.load %arg3[%c0_37, %c4, %c0_38, %c0_39] : memref<1x8x16x16xf32, #tpu.memory_space<vmem>>, vector<1x1x16x16xf32>
    %90 = vector.shape_cast %89 : vector<1x1x16x16xf32> to vector<16x16xf32>
    %91 = vector.shape_cast %88 : vector<16x16xf32> to vector<1x1x16x16xf32>
    tpu.vector_store %arg3[%c0_37, %c4, %c0_38, %c0_39], %91 {strides = array<i32>} : memref<1x8x16x16xf32, #tpu.memory_space<vmem>>, vector<1x1x16x16xf32>,
    %92 = vector.extract_strided_slice %15 {offsets = [0, 20], sizes = [16, 4], strides = [1, 1]} : vector<16x32xbf16> to vector<16x4xbf16>
    %93 = vector.extract_strided_slice %16 {offsets = [0, 20], sizes = [16, 4], strides = [1, 1]} : vector<16x32xbf16> to vector<16x4xbf16>
    %cst_40 = arith.constant dense<0.000000e+00> : vector<16x16xf32>
    %94 = tpu.matmul %92, %93, %cst_40 {dimension_numbers = #tpu.dot_dimension_numbers<[1], [1], [0], [0], [0, 0, 1, 0], [], []>} : vector<16x4xbf16>, vector<16x4xbf16>, vector<16x16xf32> -> vector<16x16xf32>
    %cst_41 = arith.constant dense<0xFF800000> : vector<16xf32>
    %95 = vector.multi_reduction <maximumf>, %94, %cst_41 [1] : vector<16x16xf32> to vector<16xf32>
    %96 = vector.shape_cast %95 : vector<16xf32> to vector<16x1xf32>
    %97 = vector.broadcast %96 : vector<16x1xf32> to vector<16x16xf32>
    %98 = arith.subf %94, %97 : vector<16x16xf32>
    %99 = math.exp %98 : vector<16x16xf32>
    %cst_42 = arith.constant dense<0.000000e+00> : vector<16xf32>
    %100 = vector.multi_reduction <add>, %99, %cst_42 [1] : vector<16x16xf32> to vector<16xf32>
    %101 = vector.shape_cast %100 : vector<16xf32> to vector<16x1xf32>
    %102 = vector.broadcast %101 : vector<16x1xf32> to vector<16x16xf32>
    %103 = arith.divf %99, %102 : vector<16x16xf32>
    %c0_43 = arith.constant 0 : index
    %c5 = arith.constant 5 : index
    %c0_44 = arith.constant 0 : index
    %c0_45 = arith.constant 0 : index
    %104 = vector.load %arg3[%c0_43, %c5, %c0_44, %c0_45] : memref<1x8x16x16xf32, #tpu.memory_space<vmem>>, vector<1x1x16x16xf32>
    %105 = vector.shape_cast %104 : vector<1x1x16x16xf32> to vector<16x16xf32>
    %106 = vector.shape_cast %103 : vector<16x16xf32> to vector<1x1x16x16xf32>
    tpu.vector_store %arg3[%c0_43, %c5, %c0_44, %c0_45], %106 {strides = array<i32>} : memref<1x8x16x16xf32, #tpu.memory_space<vmem>>, vector<1x1x16x16xf32>,
    %107 = vector.extract_strided_slice %15 {offsets = [0, 24], sizes = [16, 4], strides = [1, 1]} : vector<16x32xbf16> to vector<16x4xbf16>
    %108 = vector.extract_strided_slice %16 {offsets = [0, 24], sizes = [16, 4], strides = [1, 1]} : vector<16x32xbf16> to vector<16x4xbf16>
    %cst_46 = arith.constant dense<0.000000e+00> : vector<16x16xf32>
    %109 = tpu.matmul %107, %108, %cst_46 {dimension_numbers = #tpu.dot_dimension_numbers<[1], [1], [0], [0], [0, 0, 1, 0], [], []>} : vector<16x4xbf16>, vector<16x4xbf16>, vector<16x16xf32> -> vector<16x16xf32>
    %cst_47 = arith.constant dense<0xFF800000> : vector<16xf32>
    %110 = vector.multi_reduction <maximumf>, %109, %cst_47 [1] : vector<16x16xf32> to vector<16xf32>
    %111 = vector.shape_cast %110 : vector<16xf32> to vector<16x1xf32>
    %112 = vector.broadcast %111 : vector<16x1xf32> to vector<16x16xf32>
    %113 = arith.subf %109, %112 : vector<16x16xf32>
    %114 = math.exp %113 : vector<16x16xf32>
    %cst_48 = arith.constant dense<0.000000e+00> : vector<16xf32>
    %115 = vector.multi_reduction <add>, %114, %cst_48 [1] : vector<16x16xf32> to vector<16xf32>
    %116 = vector.shape_cast %115 : vector<16xf32> to vector<16x1xf32>
    %117 = vector.broadcast %116 : vector<16x1xf32> to vector<16x16xf32>
    %118 = arith.divf %114, %117 : vector<16x16xf32>
    %c0_49 = arith.constant 0 : index
    %c6 = arith.constant 6 : index
    %c0_50 = arith.constant 0 : index
    %c0_51 = arith.constant 0 : index
    %119 = vector.load %arg3[%c0_49, %c6, %c0_50, %c0_51] : memref<1x8x16x16xf32, #tpu.memory_space<vmem>>, vector<1x1x16x16xf32>
    %120 = vector.shape_cast %119 : vector<1x1x16x16xf32> to vector<16x16xf32>
    %121 = vector.shape_cast %118 : vector<16x16xf32> to vector<1x1x16x16xf32>
    tpu.vector_store %arg3[%c0_49, %c6, %c0_50, %c0_51], %121 {strides = array<i32>} : memref<1x8x16x16xf32, #tpu.memory_space<vmem>>, vector<1x1x16x16xf32>,
    %122 = vector.extract_strided_slice %15 {offsets = [0, 28], sizes = [16, 4], strides = [1, 1]} : vector<16x32xbf16> to vector<16x4xbf16>
    %123 = vector.extract_strided_slice %16 {offsets = [0, 28], sizes = [16, 4], strides = [1, 1]} : vector<16x32xbf16> to vector<16x4xbf16>
    %cst_52 = arith.constant dense<0.000000e+00> : vector<16x16xf32>
    %124 = tpu.matmul %122, %123, %cst_52 {dimension_numbers = #tpu.dot_dimension_numbers<[1], [1], [0], [0], [0, 0, 1, 0], [], []>} : vector<16x4xbf16>, vector<16x4xbf16>, vector<16x16xf32> -> vector<16x16xf32>
    %cst_53 = arith.constant dense<0xFF800000> : vector<16xf32>
    %125 = vector.multi_reduction <maximumf>, %124, %cst_53 [1] : vector<16x16xf32> to vector<16xf32>
    %126 = vector.shape_cast %125 : vector<16xf32> to vector<16x1xf32>
    %127 = vector.broadcast %126 : vector<16x1xf32> to vector<16x16xf32>
    %128 = arith.subf %124, %127 : vector<16x16xf32>
    %129 = math.exp %128 : vector<16x16xf32>
    %cst_54 = arith.constant dense<0.000000e+00> : vector<16xf32>
    %130 = vector.multi_reduction <add>, %129, %cst_54 [1] : vector<16x16xf32> to vector<16xf32>
    %131 = vector.shape_cast %130 : vector<16xf32> to vector<16x1xf32>
    %132 = vector.broadcast %131 : vector<16x1xf32> to vector<16x16xf32>
    %133 = arith.divf %129, %132 : vector<16x16xf32>
    %c0_55 = arith.constant 0 : index
    %c7 = arith.constant 7 : index
    %c0_56 = arith.constant 0 : index
    %c0_57 = arith.constant 0 : index
    %134 = vector.load %arg3[%c0_55, %c7, %c0_56, %c0_57] : memref<1x8x16x16xf32, #tpu.memory_space<vmem>>, vector<1x1x16x16xf32>
    %135 = vector.shape_cast %134 : vector<1x1x16x16xf32> to vector<16x16xf32>
    %136 = vector.shape_cast %133 : vector<16x16xf32> to vector<1x1x16x16xf32>
    tpu.vector_store %arg3[%c0_55, %c7, %c0_56, %c0_57], %136 {strides = array<i32>} : memref<1x8x16x16xf32, #tpu.memory_space<vmem>>, vector<1x1x16x16xf32>,
    return
  }
  func.func @transform_0(%arg0: i32) -> (i32, i32) {
    %c0_i32 = arith.constant 0 : i32
    %c0_i32_0 = arith.constant 0 : i32
    %c0_i32_1 = arith.constant 0 : i32
    return %c0_i32, %c0_i32_0 : i32, i32
  }
  func.func @transform_1(%arg0: i32) -> (i32, i32, i32) {
    %c0_i32 = arith.constant 0 : i32
    %c0_i32_0 = arith.constant 0 : i32
    %c0_i32_1 = arith.constant 0 : i32
    return %arg0, %c0_i32, %c0_i32_0 : i32, i32, i32
  }
  func.func @transform_2(%arg0: i32) -> (i32, i32, i32, i32) {
    %c0_i32 = arith.constant 0 : i32
    %c0_i32_0 = arith.constant 0 : i32
    %c0_i32_1 = arith.constant 0 : i32
    %c0_i32_2 = arith.constant 0 : i32
    return %arg0, %c0_i32, %c0_i32_0, %c0_i32_1 : i32, i32, i32, i32
  }
  func.func @transform_3(%arg0: i32) -> (i32, i32, i32) {
    %c0_i32 = arith.constant 0 : i32
    %c0_i32_0 = arith.constant 0 : i32
    %c0_i32_1 = arith.constant 0 : i32
    return %arg0, %c0_i32, %c0_i32_0 : i32, i32, i32
  }
}

module attributes {stable_mosaic.version = 11 : i64} {
  func.func @_pinv_kernel(%arg0: i32, %arg1: memref<1x16x16xf32, #tpu.memory_space<vmem>>, %arg2: memref<1x1xf32, #tpu.memory_space<vmem>>, %arg3: memref<1x16x16xf32, #tpu.memory_space<vmem>>) attributes {dimension_semantics = [#tpu.dimension_semantics<parallel>], iteration_bounds = array<i64: 16>, scalar_prefetch = 0 : i64, scratch_operands = 0 : i64, tpu.core_type = #tpu.core_type<tc>, window_params = [{transform_indices = @transform_0, window_bounds = array<i64: 1, 16, 16>}, {pipeline_mode = #tpu.pipeline_mode<synchronous>, transform_indices = @transform_1, window_bounds = array<i64: 1, 1>}, {transform_indices = @transform_2, window_bounds = array<i64: 1, 16, 16>}]} {
    %c0 = arith.constant 0 : index
    %c0_0 = arith.constant 0 : index
    %c0_1 = arith.constant 0 : index
    %0 = vector.load %arg1[%c0, %c0_0, %c0_1] : memref<1x16x16xf32, #tpu.memory_space<vmem>>, vector<1x16x16xf32>
    %1 = vector.shape_cast %0 : vector<1x16x16xf32> to vector<16x16xf32>
    %2 = tpu.transpose %1, [1, 0] : vector<16x16xf32> -> vector<16x16xf32>
    %c0_2 = arith.constant 0 : index
    %c0_3 = arith.constant 0 : index
    %3 = vector.load %arg2[%c0_2, %c0_3] : memref<1x1xf32, #tpu.memory_space<vmem>>, vector<1x1xf32>
    %4 = vector.broadcast %3 : vector<1x1xf32> to vector<16x16xf32>
    %5 = arith.divf %2, %4 : vector<16x16xf32>
    %6 = tpu.iota {dimensions = array<i32: 0>} : vector<16x16xi32>
    %7 = tpu.iota {dimensions = array<i32: 1>} : vector<16x16xi32>
    %8 = arith.cmpi eq, %6, %7 : vector<16x16xi32>
    %9 = arith.extui %8 : vector<16x16xi1> to vector<16x16xi32>
    %10 = arith.sitofp %9 : vector<16x16xi32> to vector<16x16xf32>
    %cst = arith.constant dense<0.000000e+00> : vector<16x16xf32>
    %11 = tpu.matmul %1, %5, %cst {dimension_numbers = #tpu.dot_dimension_numbers<[1], [0], [0], [1], [0, 0, 1, 1], [], []>} : vector<16x16xf32>, vector<16x16xf32>, vector<16x16xf32> -> vector<16x16xf32>
    %cst_4 = arith.constant 7.000000e+00 : f32
    %12 = vector.broadcast %cst_4 : f32 to vector<16x16xf32>
    %13 = arith.mulf %12, %10 : vector<16x16xf32>
    %14 = arith.subf %13, %11 : vector<16x16xf32>
    %cst_5 = arith.constant 1.500000e+01 : f32
    %15 = vector.broadcast %cst_5 : f32 to vector<16x16xf32>
    %16 = arith.mulf %15, %10 : vector<16x16xf32>
    %cst_6 = arith.constant dense<0.000000e+00> : vector<16x16xf32>
    %17 = tpu.matmul %11, %14, %cst_6 {dimension_numbers = #tpu.dot_dimension_numbers<[1], [0], [0], [1], [0, 0, 1, 1], [], []>} : vector<16x16xf32>, vector<16x16xf32>, vector<16x16xf32> -> vector<16x16xf32>
    %18 = arith.subf %16, %17 : vector<16x16xf32>
    %cst_7 = arith.constant 1.300000e+01 : f32
    %19 = vector.broadcast %cst_7 : f32 to vector<16x16xf32>
    %20 = arith.mulf %19, %10 : vector<16x16xf32>
    %cst_8 = arith.constant dense<0.000000e+00> : vector<16x16xf32>
    %21 = tpu.matmul %11, %18, %cst_8 {dimension_numbers = #tpu.dot_dimension_numbers<[1], [0], [0], [1], [0, 0, 1, 1], [], []>} : vector<16x16xf32>, vector<16x16xf32>, vector<16x16xf32> -> vector<16x16xf32>
    %22 = arith.subf %20, %21 : vector<16x16xf32>
    %cst_9 = arith.constant dense<0.000000e+00> : vector<16x16xf32>
    %23 = tpu.matmul %5, %22, %cst_9 {dimension_numbers = #tpu.dot_dimension_numbers<[1], [0], [0], [1], [0, 0, 1, 1], [], []>} : vector<16x16xf32>, vector<16x16xf32>, vector<16x16xf32> -> vector<16x16xf32>
    %cst_10 = arith.constant 2.500000e-01 : f32
    %24 = vector.broadcast %cst_10 : f32 to vector<16x16xf32>
    %25 = arith.mulf %24, %23 : vector<16x16xf32>
    %cst_11 = arith.constant dense<0.000000e+00> : vector<16x16xf32>
    %26 = tpu.matmul %1, %25, %cst_11 {dimension_numbers = #tpu.dot_dimension_numbers<[1], [0], [0], [1], [0, 0, 1, 1], [], []>} : vector<16x16xf32>, vector<16x16xf32>, vector<16x16xf32> -> vector<16x16xf32>
    %cst_12 = arith.constant 7.000000e+00 : f32
    %27 = vector.broadcast %cst_12 : f32 to vector<16x16xf32>
    %28 = arith.mulf %27, %10 : vector<16x16xf32>
    %29 = arith.subf %28, %26 : vector<16x16xf32>
    %cst_13 = arith.constant 1.500000e+01 : f32
    %30 = vector.broadcast %cst_13 : f32 to vector<16x16xf32>
    %31 = arith.mulf %30, %10 : vector<16x16xf32>
    %cst_14 = arith.constant dense<0.000000e+00> : vector<16x16xf32>
    %32 = tpu.matmul %26, %29, %cst_14 {dimension_numbers = #tpu.dot_dimension_numbers<[1], [0], [0], [1], [0, 0, 1, 1], [], []>} : vector<16x16xf32>, vector<16x16xf32>, vector<16x16xf32> -> vector<16x16xf32>
    %33 = arith.subf %31, %32 : vector<16x16xf32>
    %cst_15 = arith.constant 1.300000e+01 : f32
    %34 = vector.broadcast %cst_15 : f32 to vector<16x16xf32>
    %35 = arith.mulf %34, %10 : vector<16x16xf32>
    %cst_16 = arith.constant dense<0.000000e+00> : vector<16x16xf32>
    %36 = tpu.matmul %26, %33, %cst_16 {dimension_numbers = #tpu.dot_dimension_numbers<[1], [0], [0], [1], [0, 0, 1, 1], [], []>} : vector<16x16xf32>, vector<16x16xf32>, vector<16x16xf32> -> vector<16x16xf32>
    %37 = arith.subf %35, %36 : vector<16x16xf32>
    %cst_17 = arith.constant dense<0.000000e+00> : vector<16x16xf32>
    %38 = tpu.matmul %25, %37, %cst_17 {dimension_numbers = #tpu.dot_dimension_numbers<[1], [0], [0], [1], [0, 0, 1, 1], [], []>} : vector<16x16xf32>, vector<16x16xf32>, vector<16x16xf32> -> vector<16x16xf32>
    %cst_18 = arith.constant 2.500000e-01 : f32
    %39 = vector.broadcast %cst_18 : f32 to vector<16x16xf32>
    %40 = arith.mulf %39, %38 : vector<16x16xf32>
    %cst_19 = arith.constant dense<0.000000e+00> : vector<16x16xf32>
    %41 = tpu.matmul %1, %40, %cst_19 {dimension_numbers = #tpu.dot_dimension_numbers<[1], [0], [0], [1], [0, 0, 1, 1], [], []>} : vector<16x16xf32>, vector<16x16xf32>, vector<16x16xf32> -> vector<16x16xf32>
    %cst_20 = arith.constant 7.000000e+00 : f32
    %42 = vector.broadcast %cst_20 : f32 to vector<16x16xf32>
    %43 = arith.mulf %42, %10 : vector<16x16xf32>
    %44 = arith.subf %43, %41 : vector<16x16xf32>
    %cst_21 = arith.constant 1.500000e+01 : f32
    %45 = vector.broadcast %cst_21 : f32 to vector<16x16xf32>
    %46 = arith.mulf %45, %10 : vector<16x16xf32>
    %cst_22 = arith.constant dense<0.000000e+00> : vector<16x16xf32>
    %47 = tpu.matmul %41, %44, %cst_22 {dimension_numbers = #tpu.dot_dimension_numbers<[1], [0], [0], [1], [0, 0, 1, 1], [], []>} : vector<16x16xf32>, vector<16x16xf32>, vector<16x16xf32> -> vector<16x16xf32>
    %48 = arith.subf %46, %47 : vector<16x16xf32>
    %cst_23 = arith.constant 1.300000e+01 : f32
    %49 = vector.broadcast %cst_23 : f32 to vector<16x16xf32>
    %50 = arith.mulf %49, %10 : vector<16x16xf32>
    %cst_24 = arith.constant dense<0.000000e+00> : vector<16x16xf32>
    %51 = tpu.matmul %41, %48, %cst_24 {dimension_numbers = #tpu.dot_dimension_numbers<[1], [0], [0], [1], [0, 0, 1, 1], [], []>} : vector<16x16xf32>, vector<16x16xf32>, vector<16x16xf32> -> vector<16x16xf32>
    %52 = arith.subf %50, %51 : vector<16x16xf32>
    %cst_25 = arith.constant dense<0.000000e+00> : vector<16x16xf32>
    %53 = tpu.matmul %40, %52, %cst_25 {dimension_numbers = #tpu.dot_dimension_numbers<[1], [0], [0], [1], [0, 0, 1, 1], [], []>} : vector<16x16xf32>, vector<16x16xf32>, vector<16x16xf32> -> vector<16x16xf32>
    %cst_26 = arith.constant 2.500000e-01 : f32
    %54 = vector.broadcast %cst_26 : f32 to vector<16x16xf32>
    %55 = arith.mulf %54, %53 : vector<16x16xf32>
    %cst_27 = arith.constant dense<0.000000e+00> : vector<16x16xf32>
    %56 = tpu.matmul %1, %55, %cst_27 {dimension_numbers = #tpu.dot_dimension_numbers<[1], [0], [0], [1], [0, 0, 1, 1], [], []>} : vector<16x16xf32>, vector<16x16xf32>, vector<16x16xf32> -> vector<16x16xf32>
    %cst_28 = arith.constant 7.000000e+00 : f32
    %57 = vector.broadcast %cst_28 : f32 to vector<16x16xf32>
    %58 = arith.mulf %57, %10 : vector<16x16xf32>
    %59 = arith.subf %58, %56 : vector<16x16xf32>
    %cst_29 = arith.constant 1.500000e+01 : f32
    %60 = vector.broadcast %cst_29 : f32 to vector<16x16xf32>
    %61 = arith.mulf %60, %10 : vector<16x16xf32>
    %cst_30 = arith.constant dense<0.000000e+00> : vector<16x16xf32>
    %62 = tpu.matmul %56, %59, %cst_30 {dimension_numbers = #tpu.dot_dimension_numbers<[1], [0], [0], [1], [0, 0, 1, 1], [], []>} : vector<16x16xf32>, vector<16x16xf32>, vector<16x16xf32> -> vector<16x16xf32>
    %63 = arith.subf %61, %62 : vector<16x16xf32>
    %cst_31 = arith.constant 1.300000e+01 : f32
    %64 = vector.broadcast %cst_31 : f32 to vector<16x16xf32>
    %65 = arith.mulf %64, %10 : vector<16x16xf32>
    %cst_32 = arith.constant dense<0.000000e+00> : vector<16x16xf32>
    %66 = tpu.matmul %56, %63, %cst_32 {dimension_numbers = #tpu.dot_dimension_numbers<[1], [0], [0], [1], [0, 0, 1, 1], [], []>} : vector<16x16xf32>, vector<16x16xf32>, vector<16x16xf32> -> vector<16x16xf32>
    %67 = arith.subf %65, %66 : vector<16x16xf32>
    %cst_33 = arith.constant dense<0.000000e+00> : vector<16x16xf32>
    %68 = tpu.matmul %55, %67, %cst_33 {dimension_numbers = #tpu.dot_dimension_numbers<[1], [0], [0], [1], [0, 0, 1, 1], [], []>} : vector<16x16xf32>, vector<16x16xf32>, vector<16x16xf32> -> vector<16x16xf32>
    %cst_34 = arith.constant 2.500000e-01 : f32
    %69 = vector.broadcast %cst_34 : f32 to vector<16x16xf32>
    %70 = arith.mulf %69, %68 : vector<16x16xf32>
    %cst_35 = arith.constant dense<0.000000e+00> : vector<16x16xf32>
    %71 = tpu.matmul %1, %70, %cst_35 {dimension_numbers = #tpu.dot_dimension_numbers<[1], [0], [0], [1], [0, 0, 1, 1], [], []>} : vector<16x16xf32>, vector<16x16xf32>, vector<16x16xf32> -> vector<16x16xf32>
    %cst_36 = arith.constant 7.000000e+00 : f32
    %72 = vector.broadcast %cst_36 : f32 to vector<16x16xf32>
    %73 = arith.mulf %72, %10 : vector<16x16xf32>
    %74 = arith.subf %73, %71 : vector<16x16xf32>
    %cst_37 = arith.constant 1.500000e+01 : f32
    %75 = vector.broadcast %cst_37 : f32 to vector<16x16xf32>
    %76 = arith.mulf %75, %10 : vector<16x16xf32>
    %cst_38 = arith.constant dense<0.000000e+00> : vector<16x16xf32>
    %77 = tpu.matmul %71, %74, %cst_38 {dimension_numbers = #tpu.dot_dimension_numbers<[1], [0], [0], [1], [0, 0, 1, 1], [], []>} : vector<16x16xf32>, vector<16x16xf32>, vector<16x16xf32> -> vector<16x16xf32>
    %78 = arith.subf %76, %77 : vector<16x16xf32>
    %cst_39 = arith.constant 1.300000e+01 : f32
    %79 = vector.broadcast %cst_39 : f32 to vector<16x16xf32>
    %80 = arith.mulf %79, %10 : vector<16x16xf32>
    %cst_40 = arith.constant dense<0.000000e+00> : vector<16x16xf32>
    %81 = tpu.matmul %71, %78, %cst_40 {dimension_numbers = #tpu.dot_dimension_numbers<[1], [0], [0], [1], [0, 0, 1, 1], [], []>} : vector<16x16xf32>, vector<16x16xf32>, vector<16x16xf32> -> vector<16x16xf32>
    %82 = arith.subf %80, %81 : vector<16x16xf32>
    %cst_41 = arith.constant dense<0.000000e+00> : vector<16x16xf32>
    %83 = tpu.matmul %70, %82, %cst_41 {dimension_numbers = #tpu.dot_dimension_numbers<[1], [0], [0], [1], [0, 0, 1, 1], [], []>} : vector<16x16xf32>, vector<16x16xf32>, vector<16x16xf32> -> vector<16x16xf32>
    %cst_42 = arith.constant 2.500000e-01 : f32
    %84 = vector.broadcast %cst_42 : f32 to vector<16x16xf32>
    %85 = arith.mulf %84, %83 : vector<16x16xf32>
    %cst_43 = arith.constant dense<0.000000e+00> : vector<16x16xf32>
    %86 = tpu.matmul %1, %85, %cst_43 {dimension_numbers = #tpu.dot_dimension_numbers<[1], [0], [0], [1], [0, 0, 1, 1], [], []>} : vector<16x16xf32>, vector<16x16xf32>, vector<16x16xf32> -> vector<16x16xf32>
    %cst_44 = arith.constant 7.000000e+00 : f32
    %87 = vector.broadcast %cst_44 : f32 to vector<16x16xf32>
    %88 = arith.mulf %87, %10 : vector<16x16xf32>
    %89 = arith.subf %88, %86 : vector<16x16xf32>
    %cst_45 = arith.constant 1.500000e+01 : f32
    %90 = vector.broadcast %cst_45 : f32 to vector<16x16xf32>
    %91 = arith.mulf %90, %10 : vector<16x16xf32>
    %cst_46 = arith.constant dense<0.000000e+00> : vector<16x16xf32>
    %92 = tpu.matmul %86, %89, %cst_46 {dimension_numbers = #tpu.dot_dimension_numbers<[1], [0], [0], [1], [0, 0, 1, 1], [], []>} : vector<16x16xf32>, vector<16x16xf32>, vector<16x16xf32> -> vector<16x16xf32>
    %93 = arith.subf %91, %92 : vector<16x16xf32>
    %cst_47 = arith.constant 1.300000e+01 : f32
    %94 = vector.broadcast %cst_47 : f32 to vector<16x16xf32>
    %95 = arith.mulf %94, %10 : vector<16x16xf32>
    %cst_48 = arith.constant dense<0.000000e+00> : vector<16x16xf32>
    %96 = tpu.matmul %86, %93, %cst_48 {dimension_numbers = #tpu.dot_dimension_numbers<[1], [0], [0], [1], [0, 0, 1, 1], [], []>} : vector<16x16xf32>, vector<16x16xf32>, vector<16x16xf32> -> vector<16x16xf32>
    %97 = arith.subf %95, %96 : vector<16x16xf32>
    %cst_49 = arith.constant dense<0.000000e+00> : vector<16x16xf32>
    %98 = tpu.matmul %85, %97, %cst_49 {dimension_numbers = #tpu.dot_dimension_numbers<[1], [0], [0], [1], [0, 0, 1, 1], [], []>} : vector<16x16xf32>, vector<16x16xf32>, vector<16x16xf32> -> vector<16x16xf32>
    %cst_50 = arith.constant 2.500000e-01 : f32
    %99 = vector.broadcast %cst_50 : f32 to vector<16x16xf32>
    %100 = arith.mulf %99, %98 : vector<16x16xf32>
    %c0_51 = arith.constant 0 : index
    %c0_52 = arith.constant 0 : index
    %c0_53 = arith.constant 0 : index
    %101 = vector.load %arg3[%c0_51, %c0_52, %c0_53] : memref<1x16x16xf32, #tpu.memory_space<vmem>>, vector<1x16x16xf32>
    %102 = vector.shape_cast %101 : vector<1x16x16xf32> to vector<16x16xf32>
    %103 = vector.shape_cast %100 : vector<16x16xf32> to vector<1x16x16xf32>
    tpu.vector_store %arg3[%c0_51, %c0_52, %c0_53], %103 {strides = array<i32>} : memref<1x16x16xf32, #tpu.memory_space<vmem>>, vector<1x16x16xf32>,
    return
  }
  func.func @transform_0(%arg0: i32) -> (i32, i32, i32) {
    %c0_i32 = arith.constant 0 : i32
    %c0_i32_0 = arith.constant 0 : i32
    %c0_i32_1 = arith.constant 0 : i32
    return %arg0, %c0_i32, %c0_i32_0 : i32, i32, i32
  }
  func.func @transform_1(%arg0: i32) -> (i32, i32) {
    %c0_i32 = arith.constant 0 : i32
    %c0_i32_0 = arith.constant 0 : i32
    %c0_i32_1 = arith.constant 0 : i32
    return %c0_i32, %c0_i32_0 : i32, i32
  }
  func.func @transform_2(%arg0: i32) -> (i32, i32, i32) {
    %c0_i32 = arith.constant 0 : i32
    %c0_i32_0 = arith.constant 0 : i32
    %c0_i32_1 = arith.constant 0 : i32
    return %arg0, %c0_i32, %c0_i32_0 : i32, i32, i32
  }
}

module attributes {stable_mosaic.version = 11 : i64} {
  func.func @_ppeg_kernel(%arg0: i32, %arg1: memref<1x10x10x32xf32, #tpu.memory_space<vmem>>, %arg2: memref<49x32xf32, #tpu.memory_space<vmem>>, %arg3: memref<1x1x32xf32, #tpu.memory_space<vmem>>, %arg4: memref<1x4x4x32xf32, #tpu.memory_space<vmem>>) attributes {dimension_semantics = [#tpu.dimension_semantics<parallel>], iteration_bounds = array<i64: 2>, scalar_prefetch = 0 : i64, scratch_operands = 0 : i64, tpu.core_type = #tpu.core_type<tc>, window_params = [{transform_indices = @transform_0, window_bounds = array<i64: 1, 10, 10, 32>}, {pipeline_mode = #tpu.pipeline_mode<synchronous>, transform_indices = @transform_1, window_bounds = array<i64: 49, 32>}, {pipeline_mode = #tpu.pipeline_mode<synchronous>, transform_indices = @transform_2, window_bounds = array<i64: 1, 1, 32>}, {transform_indices = @transform_3, window_bounds = array<i64: 1, 4, 4, 32>}]} {
    %c0 = arith.constant 0 : index
    %c0_0 = arith.constant 0 : index
    %c0_1 = arith.constant 0 : index
    %c0_2 = arith.constant 0 : index
    %0 = vector.load %arg1[%c0, %c0_0, %c0_1, %c0_2] : memref<1x10x10x32xf32, #tpu.memory_space<vmem>>, vector<1x10x10x32xf32>
    %1 = vector.shape_cast %0 : vector<1x10x10x32xf32> to vector<10x10x32xf32>
    %c0_3 = arith.constant 0 : index
    %c0_4 = arith.constant 0 : index
    %2 = vector.load %arg2[%c0_3, %c0_4] : memref<49x32xf32, #tpu.memory_space<vmem>>, vector<49x32xf32>
    %3 = vector.extract_strided_slice %1 {offsets = [3, 3, 0], sizes = [4, 4, 32], strides = [1, 1, 1]} : vector<10x10x32xf32> to vector<4x4x32xf32>
    %c0_5 = arith.constant 0 : index
    %c0_6 = arith.constant 0 : index
    %c0_7 = arith.constant 0 : index
    %4 = vector.load %arg3[%c0_5, %c0_6, %c0_7] : memref<1x1x32xf32, #tpu.memory_space<vmem>>, vector<1x1x32xf32>
    %5 = vector.broadcast %4 : vector<1x1x32xf32> to vector<4x4x32xf32>
    %6 = arith.addf %3, %5 : vector<4x4x32xf32>
    %cst = arith.constant 0.000000e+00 : f32
    %7 = vector.broadcast %cst : f32 to vector<4x4x32xf32>
    %cst_8 = arith.constant 0.000000e+00 : f32
    %8 = vector.broadcast %cst_8 : f32 to vector<4x4x32xf32>
    %cst_9 = arith.constant 0.000000e+00 : f32
    %9 = vector.broadcast %cst_9 : f32 to vector<4x4x32xf32>
    %10 = vector.extract_strided_slice %1 {offsets = [0, 0, 0], sizes = [4, 10, 32], strides = [1, 1, 1]} : vector<10x10x32xf32> to vector<4x10x32xf32>
    %11 = vector.extract_strided_slice %2 {offsets = [0, 0], sizes = [1, 32], strides = [1, 1]} : vector<49x32xf32> to vector<1x32xf32>
    %12 = vector.extract_strided_slice %10 {offsets = [0, 0, 0], sizes = [4, 4, 32], strides = [1, 1, 1]} : vector<4x10x32xf32> to vector<4x4x32xf32>
    %13 = vector.shape_cast %11 : vector<1x32xf32> to vector<1x1x32xf32>
    %14 = vector.broadcast %13 : vector<1x1x32xf32> to vector<4x4x32xf32>
    %15 = arith.mulf %14, %12 : vector<4x4x32xf32>
    %16 = arith.addf %6, %15 : vector<4x4x32xf32>
    %17 = vector.extract_strided_slice %2 {offsets = [1, 0], sizes = [1, 32], strides = [1, 1]} : vector<49x32xf32> to vector<1x32xf32>
    %18 = vector.extract_strided_slice %10 {offsets = [0, 1, 0], sizes = [4, 4, 32], strides = [1, 1, 1]} : vector<4x10x32xf32> to vector<4x4x32xf32>
    %19 = vector.shape_cast %17 : vector<1x32xf32> to vector<1x1x32xf32>
    %20 = vector.broadcast %19 : vector<1x1x32xf32> to vector<4x4x32xf32>
    %21 = arith.mulf %20, %18 : vector<4x4x32xf32>
    %22 = arith.addf %7, %21 : vector<4x4x32xf32>
    %23 = vector.extract_strided_slice %2 {offsets = [2, 0], sizes = [1, 32], strides = [1, 1]} : vector<49x32xf32> to vector<1x32xf32>
    %24 = vector.extract_strided_slice %10 {offsets = [0, 2, 0], sizes = [4, 4, 32], strides = [1, 1, 1]} : vector<4x10x32xf32> to vector<4x4x32xf32>
    %25 = vector.shape_cast %23 : vector<1x32xf32> to vector<1x1x32xf32>
    %26 = vector.broadcast %25 : vector<1x1x32xf32> to vector<4x4x32xf32>
    %27 = arith.mulf %26, %24 : vector<4x4x32xf32>
    %28 = arith.addf %8, %27 : vector<4x4x32xf32>
    %29 = vector.extract_strided_slice %2 {offsets = [3, 0], sizes = [1, 32], strides = [1, 1]} : vector<49x32xf32> to vector<1x32xf32>
    %30 = vector.extract_strided_slice %10 {offsets = [0, 3, 0], sizes = [4, 4, 32], strides = [1, 1, 1]} : vector<4x10x32xf32> to vector<4x4x32xf32>
    %31 = vector.shape_cast %29 : vector<1x32xf32> to vector<1x1x32xf32>
    %32 = vector.broadcast %31 : vector<1x1x32xf32> to vector<4x4x32xf32>
    %33 = arith.mulf %32, %30 : vector<4x4x32xf32>
    %34 = arith.addf %9, %33 : vector<4x4x32xf32>
    %35 = vector.extract_strided_slice %2 {offsets = [4, 0], sizes = [1, 32], strides = [1, 1]} : vector<49x32xf32> to vector<1x32xf32>
    %36 = vector.extract_strided_slice %10 {offsets = [0, 4, 0], sizes = [4, 4, 32], strides = [1, 1, 1]} : vector<4x10x32xf32> to vector<4x4x32xf32>
    %37 = vector.shape_cast %35 : vector<1x32xf32> to vector<1x1x32xf32>
    %38 = vector.broadcast %37 : vector<1x1x32xf32> to vector<4x4x32xf32>
    %39 = arith.mulf %38, %36 : vector<4x4x32xf32>
    %40 = arith.addf %16, %39 : vector<4x4x32xf32>
    %41 = vector.extract_strided_slice %2 {offsets = [5, 0], sizes = [1, 32], strides = [1, 1]} : vector<49x32xf32> to vector<1x32xf32>
    %42 = vector.extract_strided_slice %10 {offsets = [0, 5, 0], sizes = [4, 4, 32], strides = [1, 1, 1]} : vector<4x10x32xf32> to vector<4x4x32xf32>
    %43 = vector.shape_cast %41 : vector<1x32xf32> to vector<1x1x32xf32>
    %44 = vector.broadcast %43 : vector<1x1x32xf32> to vector<4x4x32xf32>
    %45 = arith.mulf %44, %42 : vector<4x4x32xf32>
    %46 = arith.addf %22, %45 : vector<4x4x32xf32>
    %47 = vector.extract_strided_slice %2 {offsets = [6, 0], sizes = [1, 32], strides = [1, 1]} : vector<49x32xf32> to vector<1x32xf32>
    %48 = vector.extract_strided_slice %10 {offsets = [0, 6, 0], sizes = [4, 4, 32], strides = [1, 1, 1]} : vector<4x10x32xf32> to vector<4x4x32xf32>
    %49 = vector.shape_cast %47 : vector<1x32xf32> to vector<1x1x32xf32>
    %50 = vector.broadcast %49 : vector<1x1x32xf32> to vector<4x4x32xf32>
    %51 = arith.mulf %50, %48 : vector<4x4x32xf32>
    %52 = arith.addf %28, %51 : vector<4x4x32xf32>
    %53 = vector.extract_strided_slice %1 {offsets = [1, 0, 0], sizes = [4, 10, 32], strides = [1, 1, 1]} : vector<10x10x32xf32> to vector<4x10x32xf32>
    %54 = vector.extract_strided_slice %2 {offsets = [7, 0], sizes = [1, 32], strides = [1, 1]} : vector<49x32xf32> to vector<1x32xf32>
    %55 = vector.extract_strided_slice %53 {offsets = [0, 0, 0], sizes = [4, 4, 32], strides = [1, 1, 1]} : vector<4x10x32xf32> to vector<4x4x32xf32>
    %56 = vector.shape_cast %54 : vector<1x32xf32> to vector<1x1x32xf32>
    %57 = vector.broadcast %56 : vector<1x1x32xf32> to vector<4x4x32xf32>
    %58 = arith.mulf %57, %55 : vector<4x4x32xf32>
    %59 = arith.addf %34, %58 : vector<4x4x32xf32>
    %60 = vector.extract_strided_slice %2 {offsets = [8, 0], sizes = [1, 32], strides = [1, 1]} : vector<49x32xf32> to vector<1x32xf32>
    %61 = vector.extract_strided_slice %53 {offsets = [0, 1, 0], sizes = [4, 4, 32], strides = [1, 1, 1]} : vector<4x10x32xf32> to vector<4x4x32xf32>
    %62 = vector.shape_cast %60 : vector<1x32xf32> to vector<1x1x32xf32>
    %63 = vector.broadcast %62 : vector<1x1x32xf32> to vector<4x4x32xf32>
    %64 = arith.mulf %63, %61 : vector<4x4x32xf32>
    %65 = arith.addf %40, %64 : vector<4x4x32xf32>
    %66 = vector.extract_strided_slice %2 {offsets = [9, 0], sizes = [1, 32], strides = [1, 1]} : vector<49x32xf32> to vector<1x32xf32>
    %67 = vector.extract_strided_slice %53 {offsets = [0, 2, 0], sizes = [4, 4, 32], strides = [1, 1, 1]} : vector<4x10x32xf32> to vector<4x4x32xf32>
    %68 = vector.shape_cast %66 : vector<1x32xf32> to vector<1x1x32xf32>
    %69 = vector.broadcast %68 : vector<1x1x32xf32> to vector<4x4x32xf32>
    %70 = arith.mulf %69, %67 : vector<4x4x32xf32>
    %71 = arith.addf %46, %70 : vector<4x4x32xf32>
    %72 = vector.extract_strided_slice %2 {offsets = [10, 0], sizes = [1, 32], strides = [1, 1]} : vector<49x32xf32> to vector<1x32xf32>
    %73 = vector.extract_strided_slice %53 {offsets = [0, 3, 0], sizes = [4, 4, 32], strides = [1, 1, 1]} : vector<4x10x32xf32> to vector<4x4x32xf32>
    %74 = vector.shape_cast %72 : vector<1x32xf32> to vector<1x1x32xf32>
    %75 = vector.broadcast %74 : vector<1x1x32xf32> to vector<4x4x32xf32>
    %76 = arith.mulf %75, %73 : vector<4x4x32xf32>
    %77 = arith.addf %52, %76 : vector<4x4x32xf32>
    %78 = vector.extract_strided_slice %2 {offsets = [11, 0], sizes = [1, 32], strides = [1, 1]} : vector<49x32xf32> to vector<1x32xf32>
    %79 = vector.extract_strided_slice %53 {offsets = [0, 4, 0], sizes = [4, 4, 32], strides = [1, 1, 1]} : vector<4x10x32xf32> to vector<4x4x32xf32>
    %80 = vector.shape_cast %78 : vector<1x32xf32> to vector<1x1x32xf32>
    %81 = vector.broadcast %80 : vector<1x1x32xf32> to vector<4x4x32xf32>
    %82 = arith.mulf %81, %79 : vector<4x4x32xf32>
    %83 = arith.addf %59, %82 : vector<4x4x32xf32>
    %84 = vector.extract_strided_slice %2 {offsets = [12, 0], sizes = [1, 32], strides = [1, 1]} : vector<49x32xf32> to vector<1x32xf32>
    %85 = vector.extract_strided_slice %53 {offsets = [0, 5, 0], sizes = [4, 4, 32], strides = [1, 1, 1]} : vector<4x10x32xf32> to vector<4x4x32xf32>
    %86 = vector.shape_cast %84 : vector<1x32xf32> to vector<1x1x32xf32>
    %87 = vector.broadcast %86 : vector<1x1x32xf32> to vector<4x4x32xf32>
    %88 = arith.mulf %87, %85 : vector<4x4x32xf32>
    %89 = arith.addf %65, %88 : vector<4x4x32xf32>
    %90 = vector.extract_strided_slice %2 {offsets = [13, 0], sizes = [1, 32], strides = [1, 1]} : vector<49x32xf32> to vector<1x32xf32>
    %91 = vector.extract_strided_slice %53 {offsets = [0, 6, 0], sizes = [4, 4, 32], strides = [1, 1, 1]} : vector<4x10x32xf32> to vector<4x4x32xf32>
    %92 = vector.shape_cast %90 : vector<1x32xf32> to vector<1x1x32xf32>
    %93 = vector.broadcast %92 : vector<1x1x32xf32> to vector<4x4x32xf32>
    %94 = arith.mulf %93, %91 : vector<4x4x32xf32>
    %95 = arith.addf %71, %94 : vector<4x4x32xf32>
    %96 = vector.extract_strided_slice %1 {offsets = [2, 0, 0], sizes = [4, 10, 32], strides = [1, 1, 1]} : vector<10x10x32xf32> to vector<4x10x32xf32>
    %97 = vector.extract_strided_slice %2 {offsets = [14, 0], sizes = [1, 32], strides = [1, 1]} : vector<49x32xf32> to vector<1x32xf32>
    %98 = vector.extract_strided_slice %96 {offsets = [0, 0, 0], sizes = [4, 4, 32], strides = [1, 1, 1]} : vector<4x10x32xf32> to vector<4x4x32xf32>
    %99 = vector.shape_cast %97 : vector<1x32xf32> to vector<1x1x32xf32>
    %100 = vector.broadcast %99 : vector<1x1x32xf32> to vector<4x4x32xf32>
    %101 = arith.mulf %100, %98 : vector<4x4x32xf32>
    %102 = arith.addf %77, %101 : vector<4x4x32xf32>
    %103 = vector.extract_strided_slice %2 {offsets = [15, 0], sizes = [1, 32], strides = [1, 1]} : vector<49x32xf32> to vector<1x32xf32>
    %104 = vector.extract_strided_slice %96 {offsets = [0, 1, 0], sizes = [4, 4, 32], strides = [1, 1, 1]} : vector<4x10x32xf32> to vector<4x4x32xf32>
    %105 = vector.shape_cast %103 : vector<1x32xf32> to vector<1x1x32xf32>
    %106 = vector.broadcast %105 : vector<1x1x32xf32> to vector<4x4x32xf32>
    %107 = arith.mulf %106, %104 : vector<4x4x32xf32>
    %108 = arith.addf %83, %107 : vector<4x4x32xf32>
    %109 = vector.extract_strided_slice %2 {offsets = [16, 0], sizes = [1, 32], strides = [1, 1]} : vector<49x32xf32> to vector<1x32xf32>
    %110 = vector.extract_strided_slice %96 {offsets = [0, 2, 0], sizes = [4, 4, 32], strides = [1, 1, 1]} : vector<4x10x32xf32> to vector<4x4x32xf32>
    %111 = vector.shape_cast %109 : vector<1x32xf32> to vector<1x1x32xf32>
    %112 = vector.broadcast %111 : vector<1x1x32xf32> to vector<4x4x32xf32>
    %113 = arith.mulf %112, %110 : vector<4x4x32xf32>
    %114 = arith.addf %89, %113 : vector<4x4x32xf32>
    %115 = vector.extract_strided_slice %2 {offsets = [17, 0], sizes = [1, 32], strides = [1, 1]} : vector<49x32xf32> to vector<1x32xf32>
    %116 = vector.extract_strided_slice %96 {offsets = [0, 3, 0], sizes = [4, 4, 32], strides = [1, 1, 1]} : vector<4x10x32xf32> to vector<4x4x32xf32>
    %117 = vector.shape_cast %115 : vector<1x32xf32> to vector<1x1x32xf32>
    %118 = vector.broadcast %117 : vector<1x1x32xf32> to vector<4x4x32xf32>
    %119 = arith.mulf %118, %116 : vector<4x4x32xf32>
    %120 = arith.addf %95, %119 : vector<4x4x32xf32>
    %121 = vector.extract_strided_slice %2 {offsets = [18, 0], sizes = [1, 32], strides = [1, 1]} : vector<49x32xf32> to vector<1x32xf32>
    %122 = vector.extract_strided_slice %96 {offsets = [0, 4, 0], sizes = [4, 4, 32], strides = [1, 1, 1]} : vector<4x10x32xf32> to vector<4x4x32xf32>
    %123 = vector.shape_cast %121 : vector<1x32xf32> to vector<1x1x32xf32>
    %124 = vector.broadcast %123 : vector<1x1x32xf32> to vector<4x4x32xf32>
    %125 = arith.mulf %124, %122 : vector<4x4x32xf32>
    %126 = arith.addf %102, %125 : vector<4x4x32xf32>
    %127 = vector.extract_strided_slice %2 {offsets = [19, 0], sizes = [1, 32], strides = [1, 1]} : vector<49x32xf32> to vector<1x32xf32>
    %128 = vector.extract_strided_slice %96 {offsets = [0, 5, 0], sizes = [4, 4, 32], strides = [1, 1, 1]} : vector<4x10x32xf32> to vector<4x4x32xf32>
    %129 = vector.shape_cast %127 : vector<1x32xf32> to vector<1x1x32xf32>
    %130 = vector.broadcast %129 : vector<1x1x32xf32> to vector<4x4x32xf32>
    %131 = arith.mulf %130, %128 : vector<4x4x32xf32>
    %132 = arith.addf %108, %131 : vector<4x4x32xf32>
    %133 = vector.extract_strided_slice %2 {offsets = [20, 0], sizes = [1, 32], strides = [1, 1]} : vector<49x32xf32> to vector<1x32xf32>
    %134 = vector.extract_strided_slice %96 {offsets = [0, 6, 0], sizes = [4, 4, 32], strides = [1, 1, 1]} : vector<4x10x32xf32> to vector<4x4x32xf32>
    %135 = vector.shape_cast %133 : vector<1x32xf32> to vector<1x1x32xf32>
    %136 = vector.broadcast %135 : vector<1x1x32xf32> to vector<4x4x32xf32>
    %137 = arith.mulf %136, %134 : vector<4x4x32xf32>
    %138 = arith.addf %114, %137 : vector<4x4x32xf32>
    %139 = vector.extract_strided_slice %1 {offsets = [3, 0, 0], sizes = [4, 10, 32], strides = [1, 1, 1]} : vector<10x10x32xf32> to vector<4x10x32xf32>
    %140 = vector.extract_strided_slice %2 {offsets = [21, 0], sizes = [1, 32], strides = [1, 1]} : vector<49x32xf32> to vector<1x32xf32>
    %141 = vector.extract_strided_slice %139 {offsets = [0, 0, 0], sizes = [4, 4, 32], strides = [1, 1, 1]} : vector<4x10x32xf32> to vector<4x4x32xf32>
    %142 = vector.shape_cast %140 : vector<1x32xf32> to vector<1x1x32xf32>
    %143 = vector.broadcast %142 : vector<1x1x32xf32> to vector<4x4x32xf32>
    %144 = arith.mulf %143, %141 : vector<4x4x32xf32>
    %145 = arith.addf %120, %144 : vector<4x4x32xf32>
    %146 = vector.extract_strided_slice %2 {offsets = [22, 0], sizes = [1, 32], strides = [1, 1]} : vector<49x32xf32> to vector<1x32xf32>
    %147 = vector.extract_strided_slice %139 {offsets = [0, 1, 0], sizes = [4, 4, 32], strides = [1, 1, 1]} : vector<4x10x32xf32> to vector<4x4x32xf32>
    %148 = vector.shape_cast %146 : vector<1x32xf32> to vector<1x1x32xf32>
    %149 = vector.broadcast %148 : vector<1x1x32xf32> to vector<4x4x32xf32>
    %150 = arith.mulf %149, %147 : vector<4x4x32xf32>
    %151 = arith.addf %126, %150 : vector<4x4x32xf32>
    %152 = vector.extract_strided_slice %2 {offsets = [23, 0], sizes = [1, 32], strides = [1, 1]} : vector<49x32xf32> to vector<1x32xf32>
    %153 = vector.extract_strided_slice %139 {offsets = [0, 2, 0], sizes = [4, 4, 32], strides = [1, 1, 1]} : vector<4x10x32xf32> to vector<4x4x32xf32>
    %154 = vector.shape_cast %152 : vector<1x32xf32> to vector<1x1x32xf32>
    %155 = vector.broadcast %154 : vector<1x1x32xf32> to vector<4x4x32xf32>
    %156 = arith.mulf %155, %153 : vector<4x4x32xf32>
    %157 = arith.addf %132, %156 : vector<4x4x32xf32>
    %158 = vector.extract_strided_slice %2 {offsets = [24, 0], sizes = [1, 32], strides = [1, 1]} : vector<49x32xf32> to vector<1x32xf32>
    %159 = vector.extract_strided_slice %139 {offsets = [0, 3, 0], sizes = [4, 4, 32], strides = [1, 1, 1]} : vector<4x10x32xf32> to vector<4x4x32xf32>
    %160 = vector.shape_cast %158 : vector<1x32xf32> to vector<1x1x32xf32>
    %161 = vector.broadcast %160 : vector<1x1x32xf32> to vector<4x4x32xf32>
    %162 = arith.mulf %161, %159 : vector<4x4x32xf32>
    %163 = arith.addf %138, %162 : vector<4x4x32xf32>
    %164 = vector.extract_strided_slice %2 {offsets = [25, 0], sizes = [1, 32], strides = [1, 1]} : vector<49x32xf32> to vector<1x32xf32>
    %165 = vector.extract_strided_slice %139 {offsets = [0, 4, 0], sizes = [4, 4, 32], strides = [1, 1, 1]} : vector<4x10x32xf32> to vector<4x4x32xf32>
    %166 = vector.shape_cast %164 : vector<1x32xf32> to vector<1x1x32xf32>
    %167 = vector.broadcast %166 : vector<1x1x32xf32> to vector<4x4x32xf32>
    %168 = arith.mulf %167, %165 : vector<4x4x32xf32>
    %169 = arith.addf %145, %168 : vector<4x4x32xf32>
    %170 = vector.extract_strided_slice %2 {offsets = [26, 0], sizes = [1, 32], strides = [1, 1]} : vector<49x32xf32> to vector<1x32xf32>
    %171 = vector.extract_strided_slice %139 {offsets = [0, 5, 0], sizes = [4, 4, 32], strides = [1, 1, 1]} : vector<4x10x32xf32> to vector<4x4x32xf32>
    %172 = vector.shape_cast %170 : vector<1x32xf32> to vector<1x1x32xf32>
    %173 = vector.broadcast %172 : vector<1x1x32xf32> to vector<4x4x32xf32>
    %174 = arith.mulf %173, %171 : vector<4x4x32xf32>
    %175 = arith.addf %151, %174 : vector<4x4x32xf32>
    %176 = vector.extract_strided_slice %2 {offsets = [27, 0], sizes = [1, 32], strides = [1, 1]} : vector<49x32xf32> to vector<1x32xf32>
    %177 = vector.extract_strided_slice %139 {offsets = [0, 6, 0], sizes = [4, 4, 32], strides = [1, 1, 1]} : vector<4x10x32xf32> to vector<4x4x32xf32>
    %178 = vector.shape_cast %176 : vector<1x32xf32> to vector<1x1x32xf32>
    %179 = vector.broadcast %178 : vector<1x1x32xf32> to vector<4x4x32xf32>
    %180 = arith.mulf %179, %177 : vector<4x4x32xf32>
    %181 = arith.addf %157, %180 : vector<4x4x32xf32>
    %182 = vector.extract_strided_slice %1 {offsets = [4, 0, 0], sizes = [4, 10, 32], strides = [1, 1, 1]} : vector<10x10x32xf32> to vector<4x10x32xf32>
    %183 = vector.extract_strided_slice %2 {offsets = [28, 0], sizes = [1, 32], strides = [1, 1]} : vector<49x32xf32> to vector<1x32xf32>
    %184 = vector.extract_strided_slice %182 {offsets = [0, 0, 0], sizes = [4, 4, 32], strides = [1, 1, 1]} : vector<4x10x32xf32> to vector<4x4x32xf32>
    %185 = vector.shape_cast %183 : vector<1x32xf32> to vector<1x1x32xf32>
    %186 = vector.broadcast %185 : vector<1x1x32xf32> to vector<4x4x32xf32>
    %187 = arith.mulf %186, %184 : vector<4x4x32xf32>
    %188 = arith.addf %163, %187 : vector<4x4x32xf32>
    %189 = vector.extract_strided_slice %2 {offsets = [29, 0], sizes = [1, 32], strides = [1, 1]} : vector<49x32xf32> to vector<1x32xf32>
    %190 = vector.extract_strided_slice %182 {offsets = [0, 1, 0], sizes = [4, 4, 32], strides = [1, 1, 1]} : vector<4x10x32xf32> to vector<4x4x32xf32>
    %191 = vector.shape_cast %189 : vector<1x32xf32> to vector<1x1x32xf32>
    %192 = vector.broadcast %191 : vector<1x1x32xf32> to vector<4x4x32xf32>
    %193 = arith.mulf %192, %190 : vector<4x4x32xf32>
    %194 = arith.addf %169, %193 : vector<4x4x32xf32>
    %195 = vector.extract_strided_slice %2 {offsets = [30, 0], sizes = [1, 32], strides = [1, 1]} : vector<49x32xf32> to vector<1x32xf32>
    %196 = vector.extract_strided_slice %182 {offsets = [0, 2, 0], sizes = [4, 4, 32], strides = [1, 1, 1]} : vector<4x10x32xf32> to vector<4x4x32xf32>
    %197 = vector.shape_cast %195 : vector<1x32xf32> to vector<1x1x32xf32>
    %198 = vector.broadcast %197 : vector<1x1x32xf32> to vector<4x4x32xf32>
    %199 = arith.mulf %198, %196 : vector<4x4x32xf32>
    %200 = arith.addf %175, %199 : vector<4x4x32xf32>
    %201 = vector.extract_strided_slice %2 {offsets = [31, 0], sizes = [1, 32], strides = [1, 1]} : vector<49x32xf32> to vector<1x32xf32>
    %202 = vector.extract_strided_slice %182 {offsets = [0, 3, 0], sizes = [4, 4, 32], strides = [1, 1, 1]} : vector<4x10x32xf32> to vector<4x4x32xf32>
    %203 = vector.shape_cast %201 : vector<1x32xf32> to vector<1x1x32xf32>
    %204 = vector.broadcast %203 : vector<1x1x32xf32> to vector<4x4x32xf32>
    %205 = arith.mulf %204, %202 : vector<4x4x32xf32>
    %206 = arith.addf %181, %205 : vector<4x4x32xf32>
    %207 = vector.extract_strided_slice %2 {offsets = [32, 0], sizes = [1, 32], strides = [1, 1]} : vector<49x32xf32> to vector<1x32xf32>
    %208 = vector.extract_strided_slice %182 {offsets = [0, 4, 0], sizes = [4, 4, 32], strides = [1, 1, 1]} : vector<4x10x32xf32> to vector<4x4x32xf32>
    %209 = vector.shape_cast %207 : vector<1x32xf32> to vector<1x1x32xf32>
    %210 = vector.broadcast %209 : vector<1x1x32xf32> to vector<4x4x32xf32>
    %211 = arith.mulf %210, %208 : vector<4x4x32xf32>
    %212 = arith.addf %188, %211 : vector<4x4x32xf32>
    %213 = vector.extract_strided_slice %2 {offsets = [33, 0], sizes = [1, 32], strides = [1, 1]} : vector<49x32xf32> to vector<1x32xf32>
    %214 = vector.extract_strided_slice %182 {offsets = [0, 5, 0], sizes = [4, 4, 32], strides = [1, 1, 1]} : vector<4x10x32xf32> to vector<4x4x32xf32>
    %215 = vector.shape_cast %213 : vector<1x32xf32> to vector<1x1x32xf32>
    %216 = vector.broadcast %215 : vector<1x1x32xf32> to vector<4x4x32xf32>
    %217 = arith.mulf %216, %214 : vector<4x4x32xf32>
    %218 = arith.addf %194, %217 : vector<4x4x32xf32>
    %219 = vector.extract_strided_slice %2 {offsets = [34, 0], sizes = [1, 32], strides = [1, 1]} : vector<49x32xf32> to vector<1x32xf32>
    %220 = vector.extract_strided_slice %182 {offsets = [0, 6, 0], sizes = [4, 4, 32], strides = [1, 1, 1]} : vector<4x10x32xf32> to vector<4x4x32xf32>
    %221 = vector.shape_cast %219 : vector<1x32xf32> to vector<1x1x32xf32>
    %222 = vector.broadcast %221 : vector<1x1x32xf32> to vector<4x4x32xf32>
    %223 = arith.mulf %222, %220 : vector<4x4x32xf32>
    %224 = arith.addf %200, %223 : vector<4x4x32xf32>
    %225 = vector.extract_strided_slice %1 {offsets = [5, 0, 0], sizes = [4, 10, 32], strides = [1, 1, 1]} : vector<10x10x32xf32> to vector<4x10x32xf32>
    %226 = vector.extract_strided_slice %2 {offsets = [35, 0], sizes = [1, 32], strides = [1, 1]} : vector<49x32xf32> to vector<1x32xf32>
    %227 = vector.extract_strided_slice %225 {offsets = [0, 0, 0], sizes = [4, 4, 32], strides = [1, 1, 1]} : vector<4x10x32xf32> to vector<4x4x32xf32>
    %228 = vector.shape_cast %226 : vector<1x32xf32> to vector<1x1x32xf32>
    %229 = vector.broadcast %228 : vector<1x1x32xf32> to vector<4x4x32xf32>
    %230 = arith.mulf %229, %227 : vector<4x4x32xf32>
    %231 = arith.addf %206, %230 : vector<4x4x32xf32>
    %232 = vector.extract_strided_slice %2 {offsets = [36, 0], sizes = [1, 32], strides = [1, 1]} : vector<49x32xf32> to vector<1x32xf32>
    %233 = vector.extract_strided_slice %225 {offsets = [0, 1, 0], sizes = [4, 4, 32], strides = [1, 1, 1]} : vector<4x10x32xf32> to vector<4x4x32xf32>
    %234 = vector.shape_cast %232 : vector<1x32xf32> to vector<1x1x32xf32>
    %235 = vector.broadcast %234 : vector<1x1x32xf32> to vector<4x4x32xf32>
    %236 = arith.mulf %235, %233 : vector<4x4x32xf32>
    %237 = arith.addf %212, %236 : vector<4x4x32xf32>
    %238 = vector.extract_strided_slice %2 {offsets = [37, 0], sizes = [1, 32], strides = [1, 1]} : vector<49x32xf32> to vector<1x32xf32>
    %239 = vector.extract_strided_slice %225 {offsets = [0, 2, 0], sizes = [4, 4, 32], strides = [1, 1, 1]} : vector<4x10x32xf32> to vector<4x4x32xf32>
    %240 = vector.shape_cast %238 : vector<1x32xf32> to vector<1x1x32xf32>
    %241 = vector.broadcast %240 : vector<1x1x32xf32> to vector<4x4x32xf32>
    %242 = arith.mulf %241, %239 : vector<4x4x32xf32>
    %243 = arith.addf %218, %242 : vector<4x4x32xf32>
    %244 = vector.extract_strided_slice %2 {offsets = [38, 0], sizes = [1, 32], strides = [1, 1]} : vector<49x32xf32> to vector<1x32xf32>
    %245 = vector.extract_strided_slice %225 {offsets = [0, 3, 0], sizes = [4, 4, 32], strides = [1, 1, 1]} : vector<4x10x32xf32> to vector<4x4x32xf32>
    %246 = vector.shape_cast %244 : vector<1x32xf32> to vector<1x1x32xf32>
    %247 = vector.broadcast %246 : vector<1x1x32xf32> to vector<4x4x32xf32>
    %248 = arith.mulf %247, %245 : vector<4x4x32xf32>
    %249 = arith.addf %224, %248 : vector<4x4x32xf32>
    %250 = vector.extract_strided_slice %2 {offsets = [39, 0], sizes = [1, 32], strides = [1, 1]} : vector<49x32xf32> to vector<1x32xf32>
    %251 = vector.extract_strided_slice %225 {offsets = [0, 4, 0], sizes = [4, 4, 32], strides = [1, 1, 1]} : vector<4x10x32xf32> to vector<4x4x32xf32>
    %252 = vector.shape_cast %250 : vector<1x32xf32> to vector<1x1x32xf32>
    %253 = vector.broadcast %252 : vector<1x1x32xf32> to vector<4x4x32xf32>
    %254 = arith.mulf %253, %251 : vector<4x4x32xf32>
    %255 = arith.addf %231, %254 : vector<4x4x32xf32>
    %256 = vector.extract_strided_slice %2 {offsets = [40, 0], sizes = [1, 32], strides = [1, 1]} : vector<49x32xf32> to vector<1x32xf32>
    %257 = vector.extract_strided_slice %225 {offsets = [0, 5, 0], sizes = [4, 4, 32], strides = [1, 1, 1]} : vector<4x10x32xf32> to vector<4x4x32xf32>
    %258 = vector.shape_cast %256 : vector<1x32xf32> to vector<1x1x32xf32>
    %259 = vector.broadcast %258 : vector<1x1x32xf32> to vector<4x4x32xf32>
    %260 = arith.mulf %259, %257 : vector<4x4x32xf32>
    %261 = arith.addf %237, %260 : vector<4x4x32xf32>
    %262 = vector.extract_strided_slice %2 {offsets = [41, 0], sizes = [1, 32], strides = [1, 1]} : vector<49x32xf32> to vector<1x32xf32>
    %263 = vector.extract_strided_slice %225 {offsets = [0, 6, 0], sizes = [4, 4, 32], strides = [1, 1, 1]} : vector<4x10x32xf32> to vector<4x4x32xf32>
    %264 = vector.shape_cast %262 : vector<1x32xf32> to vector<1x1x32xf32>
    %265 = vector.broadcast %264 : vector<1x1x32xf32> to vector<4x4x32xf32>
    %266 = arith.mulf %265, %263 : vector<4x4x32xf32>
    %267 = arith.addf %243, %266 : vector<4x4x32xf32>
    %268 = vector.extract_strided_slice %1 {offsets = [6, 0, 0], sizes = [4, 10, 32], strides = [1, 1, 1]} : vector<10x10x32xf32> to vector<4x10x32xf32>
    %269 = vector.extract_strided_slice %2 {offsets = [42, 0], sizes = [1, 32], strides = [1, 1]} : vector<49x32xf32> to vector<1x32xf32>
    %270 = vector.extract_strided_slice %268 {offsets = [0, 0, 0], sizes = [4, 4, 32], strides = [1, 1, 1]} : vector<4x10x32xf32> to vector<4x4x32xf32>
    %271 = vector.shape_cast %269 : vector<1x32xf32> to vector<1x1x32xf32>
    %272 = vector.broadcast %271 : vector<1x1x32xf32> to vector<4x4x32xf32>
    %273 = arith.mulf %272, %270 : vector<4x4x32xf32>
    %274 = arith.addf %249, %273 : vector<4x4x32xf32>
    %275 = vector.extract_strided_slice %2 {offsets = [43, 0], sizes = [1, 32], strides = [1, 1]} : vector<49x32xf32> to vector<1x32xf32>
    %276 = vector.extract_strided_slice %268 {offsets = [0, 1, 0], sizes = [4, 4, 32], strides = [1, 1, 1]} : vector<4x10x32xf32> to vector<4x4x32xf32>
    %277 = vector.shape_cast %275 : vector<1x32xf32> to vector<1x1x32xf32>
    %278 = vector.broadcast %277 : vector<1x1x32xf32> to vector<4x4x32xf32>
    %279 = arith.mulf %278, %276 : vector<4x4x32xf32>
    %280 = arith.addf %255, %279 : vector<4x4x32xf32>
    %281 = vector.extract_strided_slice %2 {offsets = [44, 0], sizes = [1, 32], strides = [1, 1]} : vector<49x32xf32> to vector<1x32xf32>
    %282 = vector.extract_strided_slice %268 {offsets = [0, 2, 0], sizes = [4, 4, 32], strides = [1, 1, 1]} : vector<4x10x32xf32> to vector<4x4x32xf32>
    %283 = vector.shape_cast %281 : vector<1x32xf32> to vector<1x1x32xf32>
    %284 = vector.broadcast %283 : vector<1x1x32xf32> to vector<4x4x32xf32>
    %285 = arith.mulf %284, %282 : vector<4x4x32xf32>
    %286 = arith.addf %261, %285 : vector<4x4x32xf32>
    %287 = vector.extract_strided_slice %2 {offsets = [45, 0], sizes = [1, 32], strides = [1, 1]} : vector<49x32xf32> to vector<1x32xf32>
    %288 = vector.extract_strided_slice %268 {offsets = [0, 3, 0], sizes = [4, 4, 32], strides = [1, 1, 1]} : vector<4x10x32xf32> to vector<4x4x32xf32>
    %289 = vector.shape_cast %287 : vector<1x32xf32> to vector<1x1x32xf32>
    %290 = vector.broadcast %289 : vector<1x1x32xf32> to vector<4x4x32xf32>
    %291 = arith.mulf %290, %288 : vector<4x4x32xf32>
    %292 = arith.addf %267, %291 : vector<4x4x32xf32>
    %293 = vector.extract_strided_slice %2 {offsets = [46, 0], sizes = [1, 32], strides = [1, 1]} : vector<49x32xf32> to vector<1x32xf32>
    %294 = vector.extract_strided_slice %268 {offsets = [0, 4, 0], sizes = [4, 4, 32], strides = [1, 1, 1]} : vector<4x10x32xf32> to vector<4x4x32xf32>
    %295 = vector.shape_cast %293 : vector<1x32xf32> to vector<1x1x32xf32>
    %296 = vector.broadcast %295 : vector<1x1x32xf32> to vector<4x4x32xf32>
    %297 = arith.mulf %296, %294 : vector<4x4x32xf32>
    %298 = arith.addf %274, %297 : vector<4x4x32xf32>
    %299 = vector.extract_strided_slice %2 {offsets = [47, 0], sizes = [1, 32], strides = [1, 1]} : vector<49x32xf32> to vector<1x32xf32>
    %300 = vector.extract_strided_slice %268 {offsets = [0, 5, 0], sizes = [4, 4, 32], strides = [1, 1, 1]} : vector<4x10x32xf32> to vector<4x4x32xf32>
    %301 = vector.shape_cast %299 : vector<1x32xf32> to vector<1x1x32xf32>
    %302 = vector.broadcast %301 : vector<1x1x32xf32> to vector<4x4x32xf32>
    %303 = arith.mulf %302, %300 : vector<4x4x32xf32>
    %304 = arith.addf %280, %303 : vector<4x4x32xf32>
    %305 = vector.extract_strided_slice %2 {offsets = [48, 0], sizes = [1, 32], strides = [1, 1]} : vector<49x32xf32> to vector<1x32xf32>
    %306 = vector.extract_strided_slice %268 {offsets = [0, 6, 0], sizes = [4, 4, 32], strides = [1, 1, 1]} : vector<4x10x32xf32> to vector<4x4x32xf32>
    %307 = vector.shape_cast %305 : vector<1x32xf32> to vector<1x1x32xf32>
    %308 = vector.broadcast %307 : vector<1x1x32xf32> to vector<4x4x32xf32>
    %309 = arith.mulf %308, %306 : vector<4x4x32xf32>
    %310 = arith.addf %286, %309 : vector<4x4x32xf32>
    %311 = arith.addf %310, %292 : vector<4x4x32xf32>
    %312 = arith.addf %298, %304 : vector<4x4x32xf32>
    %313 = arith.addf %311, %312 : vector<4x4x32xf32>
    %c0_10 = arith.constant 0 : index
    %c0_11 = arith.constant 0 : index
    %c0_12 = arith.constant 0 : index
    %c0_13 = arith.constant 0 : index
    %314 = vector.load %arg4[%c0_10, %c0_11, %c0_12, %c0_13] : memref<1x4x4x32xf32, #tpu.memory_space<vmem>>, vector<1x4x4x32xf32>
    %315 = vector.shape_cast %314 : vector<1x4x4x32xf32> to vector<4x4x32xf32>
    %316 = vector.shape_cast %313 : vector<4x4x32xf32> to vector<1x4x4x32xf32>
    tpu.vector_store %arg4[%c0_10, %c0_11, %c0_12, %c0_13], %316 {strides = array<i32>} : memref<1x4x4x32xf32, #tpu.memory_space<vmem>>, vector<1x4x4x32xf32>,
    return
  }
  func.func @transform_0(%arg0: i32) -> (i32, i32, i32, i32) {
    %c0_i32 = arith.constant 0 : i32
    %c0_i32_0 = arith.constant 0 : i32
    %c0_i32_1 = arith.constant 0 : i32
    %c0_i32_2 = arith.constant 0 : i32
    return %arg0, %c0_i32, %c0_i32_0, %c0_i32_1 : i32, i32, i32, i32
  }
  func.func @transform_1(%arg0: i32) -> (i32, i32) {
    %c0_i32 = arith.constant 0 : i32
    %c0_i32_0 = arith.constant 0 : i32
    %c0_i32_1 = arith.constant 0 : i32
    return %c0_i32, %c0_i32_0 : i32, i32
  }
  func.func @transform_2(%arg0: i32) -> (i32, i32, i32) {
    %c0_i32 = arith.constant 0 : i32
    %c0_i32_0 = arith.constant 0 : i32
    %c0_i32_1 = arith.constant 0 : i32
    %c0_i32_2 = arith.constant 0 : i32
    return %c0_i32, %c0_i32_0, %c0_i32_1 : i32, i32, i32
  }
  func.func @transform_3(%arg0: i32) -> (i32, i32, i32, i32) {
    %c0_i32 = arith.constant 0 : i32
    %c0_i32_0 = arith.constant 0 : i32
    %c0_i32_1 = arith.constant 0 : i32
    %c0_i32_2 = arith.constant 0 : i32
    return %arg0, %c0_i32, %c0_i32_0, %c0_i32_1 : i32, i32, i32, i32
  }
}

module attributes {stable_mosaic.version = 11 : i64} {
  func.func @_attn_out_kernel(%arg0: i32, %arg1: memref<1x17x96xbf16, #tpu.memory_space<vmem>>, %arg2: memref<1x16x64xf32, #tpu.memory_space<vmem>>, %arg3: memref<1x8x16x16xf32, #tpu.memory_space<vmem>>, %arg4: memref<1x17x32xf32, #tpu.memory_space<vmem>>, %arg5: memref<33x32xf32, #tpu.memory_space<vmem>>, %arg6: memref<32x32xbf16, #tpu.memory_space<vmem>>, %arg7: memref<1x32xf32, #tpu.memory_space<vmem>>, %arg8: memref<1x17x32xf32, #tpu.memory_space<vmem>>) attributes {dimension_semantics = [#tpu.dimension_semantics<parallel>], iteration_bounds = array<i64: 2>, scalar_prefetch = 0 : i64, scratch_operands = 0 : i64, tpu.core_type = #tpu.core_type<tc>, window_params = [{transform_indices = @transform_0, window_bounds = array<i64: 1, 17, 96>}, {transform_indices = @transform_1, window_bounds = array<i64: 1, 16, 64>}, {transform_indices = @transform_2, window_bounds = array<i64: 1, 8, 16, 16>}, {transform_indices = @transform_3, window_bounds = array<i64: 1, 17, 32>}, {pipeline_mode = #tpu.pipeline_mode<synchronous>, transform_indices = @transform_4, window_bounds = array<i64: 33, 32>}, {pipeline_mode = #tpu.pipeline_mode<synchronous>, transform_indices = @transform_5, window_bounds = array<i64: 32, 32>}, {pipeline_mode = #tpu.pipeline_mode<synchronous>, transform_indices = @transform_6, window_bounds = array<i64: 1, 32>}, {transform_indices = @transform_7, window_bounds = array<i64: 1, 17, 32>}]} {
    %c0 = arith.constant 0 : index
    %c0_0 = arith.constant 0 : index
    %c0_1 = arith.constant 0 : index
    %0 = vector.load %arg1[%c0, %c0_0, %c0_1] : memref<1x17x96xbf16, #tpu.memory_space<vmem>>, vector<1x17x96xbf16>
    %1 = vector.shape_cast %0 : vector<1x17x96xbf16> to vector<17x96xbf16>
    %2 = vector.extract_strided_slice %1 {offsets = [0, 0], sizes = [17, 32], strides = [1, 1]} : vector<17x96xbf16> to vector<17x32xbf16>
    %3 = vector.extract_strided_slice %1 {offsets = [0, 32], sizes = [17, 32], strides = [1, 1]} : vector<17x96xbf16> to vector<17x32xbf16>
    %4 = vector.extract_strided_slice %1 {offsets = [0, 64], sizes = [17, 32], strides = [1, 1]} : vector<17x96xbf16> to vector<17x32xbf16>
    %c0_2 = arith.constant 0 : index
    %c0_3 = arith.constant 0 : index
    %c0_4 = arith.constant 0 : index
    %5 = vector.load %arg2[%c0_2, %c0_3, %c0_4] : memref<1x16x64xf32, #tpu.memory_space<vmem>>, vector<1x16x64xf32>
    %6 = vector.shape_cast %5 : vector<1x16x64xf32> to vector<16x64xf32>
    %7 = vector.extract_strided_slice %6 {offsets = [0, 0], sizes = [16, 32], strides = [1, 1]} : vector<16x64xf32> to vector<16x32xf32>
    %8 = arith.truncf %7 : vector<16x32xf32> to vector<16x32xbf16>
    %9 = vector.extract_strided_slice %6 {offsets = [0, 32], sizes = [16, 32], strides = [1, 1]} : vector<16x64xf32> to vector<16x32xf32>
    %10 = arith.truncf %9 : vector<16x32xf32> to vector<16x32xbf16>
    %c0_5 = arith.constant 0 : index
    %c0_6 = arith.constant 0 : index
    %c0_7 = arith.constant 0 : index
    %c0_8 = arith.constant 0 : index
    %11 = vector.load %arg3[%c0_5, %c0_6, %c0_7, %c0_8] : memref<1x8x16x16xf32, #tpu.memory_space<vmem>>, vector<1x8x16x16xf32>
    %12 = vector.shape_cast %11 : vector<1x8x16x16xf32> to vector<8x16x16xf32>
    %13 = arith.truncf %12 : vector<8x16x16xf32> to vector<8x16x16xbf16>
    %14 = vector.extract_strided_slice %2 {offsets = [0, 0], sizes = [17, 4], strides = [1, 1]} : vector<17x32xbf16> to vector<17x4xbf16>
    %15 = vector.extract_strided_slice %3 {offsets = [0, 0], sizes = [17, 4], strides = [1, 1]} : vector<17x32xbf16> to vector<17x4xbf16>
    %16 = vector.extract_strided_slice %4 {offsets = [0, 0], sizes = [17, 4], strides = [1, 1]} : vector<17x32xbf16> to vector<17x4xbf16>
    %17 = vector.extract_strided_slice %8 {offsets = [0, 0], sizes = [16, 4], strides = [1, 1]} : vector<16x32xbf16> to vector<16x4xbf16>
    %18 = vector.extract_strided_slice %10 {offsets = [0, 0], sizes = [16, 4], strides = [1, 1]} : vector<16x32xbf16> to vector<16x4xbf16>
    %cst = arith.constant dense<0.000000e+00> : vector<17x16xf32>
    %19 = tpu.matmul %14, %18, %cst {dimension_numbers = #tpu.dot_dimension_numbers<[1], [1], [0], [0], [0, 0, 1, 0], [], []>} : vector<17x4xbf16>, vector<16x4xbf16>, vector<17x16xf32> -> vector<17x16xf32>
    %cst_9 = arith.constant 5.000000e-01 : f32
    %20 = vector.broadcast %cst_9 : f32 to vector<17x16xf32>
    %21 = arith.mulf %19, %20 : vector<17x16xf32>
    %cst_10 = arith.constant dense<0xFF800000> : vector<17xf32>
    %22 = vector.multi_reduction <maximumf>, %21, %cst_10 [1] : vector<17x16xf32> to vector<17xf32>
    %23 = vector.shape_cast %22 : vector<17xf32> to vector<17x1xf32>
    %24 = vector.broadcast %23 : vector<17x1xf32> to vector<17x16xf32>
    %25 = arith.subf %21, %24 : vector<17x16xf32>
    %26 = math.exp %25 : vector<17x16xf32>
    %cst_11 = arith.constant dense<0.000000e+00> : vector<17xf32>
    %27 = vector.multi_reduction <add>, %26, %cst_11 [1] : vector<17x16xf32> to vector<17xf32>
    %28 = vector.shape_cast %27 : vector<17xf32> to vector<17x1xf32>
    %29 = vector.broadcast %28 : vector<17x1xf32> to vector<17x16xf32>
    %30 = arith.divf %26, %29 : vector<17x16xf32>
    %cst_12 = arith.constant dense<0.000000e+00> : vector<16x17xf32>
    %31 = tpu.matmul %17, %15, %cst_12 {dimension_numbers = #tpu.dot_dimension_numbers<[1], [1], [0], [0], [0, 0, 1, 0], [], []>} : vector<16x4xbf16>, vector<17x4xbf16>, vector<16x17xf32> -> vector<16x17xf32>
    %cst_13 = arith.constant dense<0xFF800000> : vector<16xf32>
    %32 = vector.multi_reduction <maximumf>, %31, %cst_13 [1] : vector<16x17xf32> to vector<16xf32>
    %33 = vector.shape_cast %32 : vector<16xf32> to vector<16x1xf32>
    %cst_14 = arith.constant 0.000000e+00 : f32
    %34 = vector.broadcast %cst_14 : f32 to vector<16x1xf32>
    %35 = arith.maximumf %33, %34 : vector<16x1xf32>
    %36 = vector.broadcast %35 : vector<16x1xf32> to vector<16x17xf32>
    %37 = arith.subf %31, %36 : vector<16x17xf32>
    %38 = math.exp %37 : vector<16x17xf32>
    %cst_15 = arith.constant dense<0.000000e+00> : vector<16xf32>
    %39 = vector.multi_reduction <add>, %38, %cst_15 [1] : vector<16x17xf32> to vector<16xf32>
    %40 = vector.shape_cast %39 : vector<16xf32> to vector<16x1xf32>
    %cst_16 = arith.constant 0.000000e+00 : f32
    %41 = vector.broadcast %cst_16 : f32 to vector<16x1xf32>
    %42 = arith.subf %41, %35 : vector<16x1xf32>
    %43 = math.exp %42 : vector<16x1xf32>
    %cst_17 = arith.constant 1.500000e+01 : f32
    %44 = vector.broadcast %cst_17 : f32 to vector<16x1xf32>
    %45 = arith.mulf %44, %43 : vector<16x1xf32>
    %46 = arith.addf %40, %45 : vector<16x1xf32>
    %47 = vector.broadcast %46 : vector<16x1xf32> to vector<16x17xf32>
    %48 = arith.divf %38, %47 : vector<16x17xf32>
    %49 = arith.truncf %48 : vector<16x17xf32> to vector<16x17xbf16>
    %cst_18 = arith.constant dense<0.000000e+00> : vector<16x4xf32>
    %50 = tpu.matmul %49, %16, %cst_18 {dimension_numbers = #tpu.dot_dimension_numbers<[1], [0], [0], [1], [0, 0, 1, 1], [], []>} : vector<16x17xbf16>, vector<17x4xbf16>, vector<16x4xf32> -> vector<16x4xf32>
    %51 = vector.extract_strided_slice %13 {offsets = [0, 0, 0], sizes = [1, 16, 16], strides = [1, 1, 1]} : vector<8x16x16xbf16> to vector<1x16x16xbf16>
    %52 = vector.shape_cast %51 : vector<1x16x16xbf16> to vector<16x16xbf16>
    %53 = arith.truncf %30 : vector<17x16xf32> to vector<17x16xbf16>
    %cst_19 = arith.constant dense<0.000000e+00> : vector<17x16xf32>
    %54 = tpu.matmul %53, %52, %cst_19 {dimension_numbers = #tpu.dot_dimension_numbers<[1], [0], [0], [1], [0, 0, 1, 1], [], []>} : vector<17x16xbf16>, vector<16x16xbf16>, vector<17x16xf32> -> vector<17x16xf32>
    %55 = arith.truncf %54 : vector<17x16xf32> to vector<17x16xbf16>
    %56 = arith.truncf %50 : vector<16x4xf32> to vector<16x4xbf16>
    %cst_20 = arith.constant dense<0.000000e+00> : vector<17x4xf32>
    %57 = tpu.matmul %55, %56, %cst_20 {dimension_numbers = #tpu.dot_dimension_numbers<[1], [0], [0], [1], [0, 0, 1, 1], [], []>} : vector<17x16xbf16>, vector<16x4xbf16>, vector<17x4xf32> -> vector<17x4xf32>
    %58 = vector.extract_strided_slice %2 {offsets = [0, 4], sizes = [17, 4], strides = [1, 1]} : vector<17x32xbf16> to vector<17x4xbf16>
    %59 = vector.extract_strided_slice %3 {offsets = [0, 4], sizes = [17, 4], strides = [1, 1]} : vector<17x32xbf16> to vector<17x4xbf16>
    %60 = vector.extract_strided_slice %4 {offsets = [0, 4], sizes = [17, 4], strides = [1, 1]} : vector<17x32xbf16> to vector<17x4xbf16>
    %61 = vector.extract_strided_slice %8 {offsets = [0, 4], sizes = [16, 4], strides = [1, 1]} : vector<16x32xbf16> to vector<16x4xbf16>
    %62 = vector.extract_strided_slice %10 {offsets = [0, 4], sizes = [16, 4], strides = [1, 1]} : vector<16x32xbf16> to vector<16x4xbf16>
    %cst_21 = arith.constant dense<0.000000e+00> : vector<17x16xf32>
    %63 = tpu.matmul %58, %62, %cst_21 {dimension_numbers = #tpu.dot_dimension_numbers<[1], [1], [0], [0], [0, 0, 1, 0], [], []>} : vector<17x4xbf16>, vector<16x4xbf16>, vector<17x16xf32> -> vector<17x16xf32>
    %cst_22 = arith.constant 5.000000e-01 : f32
    %64 = vector.broadcast %cst_22 : f32 to vector<17x16xf32>
    %65 = arith.mulf %63, %64 : vector<17x16xf32>
    %cst_23 = arith.constant dense<0xFF800000> : vector<17xf32>
    %66 = vector.multi_reduction <maximumf>, %65, %cst_23 [1] : vector<17x16xf32> to vector<17xf32>
    %67 = vector.shape_cast %66 : vector<17xf32> to vector<17x1xf32>
    %68 = vector.broadcast %67 : vector<17x1xf32> to vector<17x16xf32>
    %69 = arith.subf %65, %68 : vector<17x16xf32>
    %70 = math.exp %69 : vector<17x16xf32>
    %cst_24 = arith.constant dense<0.000000e+00> : vector<17xf32>
    %71 = vector.multi_reduction <add>, %70, %cst_24 [1] : vector<17x16xf32> to vector<17xf32>
    %72 = vector.shape_cast %71 : vector<17xf32> to vector<17x1xf32>
    %73 = vector.broadcast %72 : vector<17x1xf32> to vector<17x16xf32>
    %74 = arith.divf %70, %73 : vector<17x16xf32>
    %cst_25 = arith.constant dense<0.000000e+00> : vector<16x17xf32>
    %75 = tpu.matmul %61, %59, %cst_25 {dimension_numbers = #tpu.dot_dimension_numbers<[1], [1], [0], [0], [0, 0, 1, 0], [], []>} : vector<16x4xbf16>, vector<17x4xbf16>, vector<16x17xf32> -> vector<16x17xf32>
    %cst_26 = arith.constant dense<0xFF800000> : vector<16xf32>
    %76 = vector.multi_reduction <maximumf>, %75, %cst_26 [1] : vector<16x17xf32> to vector<16xf32>
    %77 = vector.shape_cast %76 : vector<16xf32> to vector<16x1xf32>
    %cst_27 = arith.constant 0.000000e+00 : f32
    %78 = vector.broadcast %cst_27 : f32 to vector<16x1xf32>
    %79 = arith.maximumf %77, %78 : vector<16x1xf32>
    %80 = vector.broadcast %79 : vector<16x1xf32> to vector<16x17xf32>
    %81 = arith.subf %75, %80 : vector<16x17xf32>
    %82 = math.exp %81 : vector<16x17xf32>
    %cst_28 = arith.constant dense<0.000000e+00> : vector<16xf32>
    %83 = vector.multi_reduction <add>, %82, %cst_28 [1] : vector<16x17xf32> to vector<16xf32>
    %84 = vector.shape_cast %83 : vector<16xf32> to vector<16x1xf32>
    %cst_29 = arith.constant 0.000000e+00 : f32
    %85 = vector.broadcast %cst_29 : f32 to vector<16x1xf32>
    %86 = arith.subf %85, %79 : vector<16x1xf32>
    %87 = math.exp %86 : vector<16x1xf32>
    %cst_30 = arith.constant 1.500000e+01 : f32
    %88 = vector.broadcast %cst_30 : f32 to vector<16x1xf32>
    %89 = arith.mulf %88, %87 : vector<16x1xf32>
    %90 = arith.addf %84, %89 : vector<16x1xf32>
    %91 = vector.broadcast %90 : vector<16x1xf32> to vector<16x17xf32>
    %92 = arith.divf %82, %91 : vector<16x17xf32>
    %93 = arith.truncf %92 : vector<16x17xf32> to vector<16x17xbf16>
    %cst_31 = arith.constant dense<0.000000e+00> : vector<16x4xf32>
    %94 = tpu.matmul %93, %60, %cst_31 {dimension_numbers = #tpu.dot_dimension_numbers<[1], [0], [0], [1], [0, 0, 1, 1], [], []>} : vector<16x17xbf16>, vector<17x4xbf16>, vector<16x4xf32> -> vector<16x4xf32>
    %95 = vector.extract_strided_slice %13 {offsets = [1, 0, 0], sizes = [1, 16, 16], strides = [1, 1, 1]} : vector<8x16x16xbf16> to vector<1x16x16xbf16>
    %96 = vector.shape_cast %95 : vector<1x16x16xbf16> to vector<16x16xbf16>
    %97 = arith.truncf %74 : vector<17x16xf32> to vector<17x16xbf16>
    %cst_32 = arith.constant dense<0.000000e+00> : vector<17x16xf32>
    %98 = tpu.matmul %97, %96, %cst_32 {dimension_numbers = #tpu.dot_dimension_numbers<[1], [0], [0], [1], [0, 0, 1, 1], [], []>} : vector<17x16xbf16>, vector<16x16xbf16>, vector<17x16xf32> -> vector<17x16xf32>
    %99 = arith.truncf %98 : vector<17x16xf32> to vector<17x16xbf16>
    %100 = arith.truncf %94 : vector<16x4xf32> to vector<16x4xbf16>
    %cst_33 = arith.constant dense<0.000000e+00> : vector<17x4xf32>
    %101 = tpu.matmul %99, %100, %cst_33 {dimension_numbers = #tpu.dot_dimension_numbers<[1], [0], [0], [1], [0, 0, 1, 1], [], []>} : vector<17x16xbf16>, vector<16x4xbf16>, vector<17x4xf32> -> vector<17x4xf32>
    %102 = vector.extract_strided_slice %2 {offsets = [0, 8], sizes = [17, 4], strides = [1, 1]} : vector<17x32xbf16> to vector<17x4xbf16>
    %103 = vector.extract_strided_slice %3 {offsets = [0, 8], sizes = [17, 4], strides = [1, 1]} : vector<17x32xbf16> to vector<17x4xbf16>
    %104 = vector.extract_strided_slice %4 {offsets = [0, 8], sizes = [17, 4], strides = [1, 1]} : vector<17x32xbf16> to vector<17x4xbf16>
    %105 = vector.extract_strided_slice %8 {offsets = [0, 8], sizes = [16, 4], strides = [1, 1]} : vector<16x32xbf16> to vector<16x4xbf16>
    %106 = vector.extract_strided_slice %10 {offsets = [0, 8], sizes = [16, 4], strides = [1, 1]} : vector<16x32xbf16> to vector<16x4xbf16>
    %cst_34 = arith.constant dense<0.000000e+00> : vector<17x16xf32>
    %107 = tpu.matmul %102, %106, %cst_34 {dimension_numbers = #tpu.dot_dimension_numbers<[1], [1], [0], [0], [0, 0, 1, 0], [], []>} : vector<17x4xbf16>, vector<16x4xbf16>, vector<17x16xf32> -> vector<17x16xf32>
    %cst_35 = arith.constant 5.000000e-01 : f32
    %108 = vector.broadcast %cst_35 : f32 to vector<17x16xf32>
    %109 = arith.mulf %107, %108 : vector<17x16xf32>
    %cst_36 = arith.constant dense<0xFF800000> : vector<17xf32>
    %110 = vector.multi_reduction <maximumf>, %109, %cst_36 [1] : vector<17x16xf32> to vector<17xf32>
    %111 = vector.shape_cast %110 : vector<17xf32> to vector<17x1xf32>
    %112 = vector.broadcast %111 : vector<17x1xf32> to vector<17x16xf32>
    %113 = arith.subf %109, %112 : vector<17x16xf32>
    %114 = math.exp %113 : vector<17x16xf32>
    %cst_37 = arith.constant dense<0.000000e+00> : vector<17xf32>
    %115 = vector.multi_reduction <add>, %114, %cst_37 [1] : vector<17x16xf32> to vector<17xf32>
    %116 = vector.shape_cast %115 : vector<17xf32> to vector<17x1xf32>
    %117 = vector.broadcast %116 : vector<17x1xf32> to vector<17x16xf32>
    %118 = arith.divf %114, %117 : vector<17x16xf32>
    %cst_38 = arith.constant dense<0.000000e+00> : vector<16x17xf32>
    %119 = tpu.matmul %105, %103, %cst_38 {dimension_numbers = #tpu.dot_dimension_numbers<[1], [1], [0], [0], [0, 0, 1, 0], [], []>} : vector<16x4xbf16>, vector<17x4xbf16>, vector<16x17xf32> -> vector<16x17xf32>
    %cst_39 = arith.constant dense<0xFF800000> : vector<16xf32>
    %120 = vector.multi_reduction <maximumf>, %119, %cst_39 [1] : vector<16x17xf32> to vector<16xf32>
    %121 = vector.shape_cast %120 : vector<16xf32> to vector<16x1xf32>
    %cst_40 = arith.constant 0.000000e+00 : f32
    %122 = vector.broadcast %cst_40 : f32 to vector<16x1xf32>
    %123 = arith.maximumf %121, %122 : vector<16x1xf32>
    %124 = vector.broadcast %123 : vector<16x1xf32> to vector<16x17xf32>
    %125 = arith.subf %119, %124 : vector<16x17xf32>
    %126 = math.exp %125 : vector<16x17xf32>
    %cst_41 = arith.constant dense<0.000000e+00> : vector<16xf32>
    %127 = vector.multi_reduction <add>, %126, %cst_41 [1] : vector<16x17xf32> to vector<16xf32>
    %128 = vector.shape_cast %127 : vector<16xf32> to vector<16x1xf32>
    %cst_42 = arith.constant 0.000000e+00 : f32
    %129 = vector.broadcast %cst_42 : f32 to vector<16x1xf32>
    %130 = arith.subf %129, %123 : vector<16x1xf32>
    %131 = math.exp %130 : vector<16x1xf32>
    %cst_43 = arith.constant 1.500000e+01 : f32
    %132 = vector.broadcast %cst_43 : f32 to vector<16x1xf32>
    %133 = arith.mulf %132, %131 : vector<16x1xf32>
    %134 = arith.addf %128, %133 : vector<16x1xf32>
    %135 = vector.broadcast %134 : vector<16x1xf32> to vector<16x17xf32>
    %136 = arith.divf %126, %135 : vector<16x17xf32>
    %137 = arith.truncf %136 : vector<16x17xf32> to vector<16x17xbf16>
    %cst_44 = arith.constant dense<0.000000e+00> : vector<16x4xf32>
    %138 = tpu.matmul %137, %104, %cst_44 {dimension_numbers = #tpu.dot_dimension_numbers<[1], [0], [0], [1], [0, 0, 1, 1], [], []>} : vector<16x17xbf16>, vector<17x4xbf16>, vector<16x4xf32> -> vector<16x4xf32>
    %139 = vector.extract_strided_slice %13 {offsets = [2, 0, 0], sizes = [1, 16, 16], strides = [1, 1, 1]} : vector<8x16x16xbf16> to vector<1x16x16xbf16>
    %140 = vector.shape_cast %139 : vector<1x16x16xbf16> to vector<16x16xbf16>
    %141 = arith.truncf %118 : vector<17x16xf32> to vector<17x16xbf16>
    %cst_45 = arith.constant dense<0.000000e+00> : vector<17x16xf32>
    %142 = tpu.matmul %141, %140, %cst_45 {dimension_numbers = #tpu.dot_dimension_numbers<[1], [0], [0], [1], [0, 0, 1, 1], [], []>} : vector<17x16xbf16>, vector<16x16xbf16>, vector<17x16xf32> -> vector<17x16xf32>
    %143 = arith.truncf %142 : vector<17x16xf32> to vector<17x16xbf16>
    %144 = arith.truncf %138 : vector<16x4xf32> to vector<16x4xbf16>
    %cst_46 = arith.constant dense<0.000000e+00> : vector<17x4xf32>
    %145 = tpu.matmul %143, %144, %cst_46 {dimension_numbers = #tpu.dot_dimension_numbers<[1], [0], [0], [1], [0, 0, 1, 1], [], []>} : vector<17x16xbf16>, vector<16x4xbf16>, vector<17x4xf32> -> vector<17x4xf32>
    %146 = vector.extract_strided_slice %2 {offsets = [0, 12], sizes = [17, 4], strides = [1, 1]} : vector<17x32xbf16> to vector<17x4xbf16>
    %147 = vector.extract_strided_slice %3 {offsets = [0, 12], sizes = [17, 4], strides = [1, 1]} : vector<17x32xbf16> to vector<17x4xbf16>
    %148 = vector.extract_strided_slice %4 {offsets = [0, 12], sizes = [17, 4], strides = [1, 1]} : vector<17x32xbf16> to vector<17x4xbf16>
    %149 = vector.extract_strided_slice %8 {offsets = [0, 12], sizes = [16, 4], strides = [1, 1]} : vector<16x32xbf16> to vector<16x4xbf16>
    %150 = vector.extract_strided_slice %10 {offsets = [0, 12], sizes = [16, 4], strides = [1, 1]} : vector<16x32xbf16> to vector<16x4xbf16>
    %cst_47 = arith.constant dense<0.000000e+00> : vector<17x16xf32>
    %151 = tpu.matmul %146, %150, %cst_47 {dimension_numbers = #tpu.dot_dimension_numbers<[1], [1], [0], [0], [0, 0, 1, 0], [], []>} : vector<17x4xbf16>, vector<16x4xbf16>, vector<17x16xf32> -> vector<17x16xf32>
    %cst_48 = arith.constant 5.000000e-01 : f32
    %152 = vector.broadcast %cst_48 : f32 to vector<17x16xf32>
    %153 = arith.mulf %151, %152 : vector<17x16xf32>
    %cst_49 = arith.constant dense<0xFF800000> : vector<17xf32>
    %154 = vector.multi_reduction <maximumf>, %153, %cst_49 [1] : vector<17x16xf32> to vector<17xf32>
    %155 = vector.shape_cast %154 : vector<17xf32> to vector<17x1xf32>
    %156 = vector.broadcast %155 : vector<17x1xf32> to vector<17x16xf32>
    %157 = arith.subf %153, %156 : vector<17x16xf32>
    %158 = math.exp %157 : vector<17x16xf32>
    %cst_50 = arith.constant dense<0.000000e+00> : vector<17xf32>
    %159 = vector.multi_reduction <add>, %158, %cst_50 [1] : vector<17x16xf32> to vector<17xf32>
    %160 = vector.shape_cast %159 : vector<17xf32> to vector<17x1xf32>
    %161 = vector.broadcast %160 : vector<17x1xf32> to vector<17x16xf32>
    %162 = arith.divf %158, %161 : vector<17x16xf32>
    %cst_51 = arith.constant dense<0.000000e+00> : vector<16x17xf32>
    %163 = tpu.matmul %149, %147, %cst_51 {dimension_numbers = #tpu.dot_dimension_numbers<[1], [1], [0], [0], [0, 0, 1, 0], [], []>} : vector<16x4xbf16>, vector<17x4xbf16>, vector<16x17xf32> -> vector<16x17xf32>
    %cst_52 = arith.constant dense<0xFF800000> : vector<16xf32>
    %164 = vector.multi_reduction <maximumf>, %163, %cst_52 [1] : vector<16x17xf32> to vector<16xf32>
    %165 = vector.shape_cast %164 : vector<16xf32> to vector<16x1xf32>
    %cst_53 = arith.constant 0.000000e+00 : f32
    %166 = vector.broadcast %cst_53 : f32 to vector<16x1xf32>
    %167 = arith.maximumf %165, %166 : vector<16x1xf32>
    %168 = vector.broadcast %167 : vector<16x1xf32> to vector<16x17xf32>
    %169 = arith.subf %163, %168 : vector<16x17xf32>
    %170 = math.exp %169 : vector<16x17xf32>
    %cst_54 = arith.constant dense<0.000000e+00> : vector<16xf32>
    %171 = vector.multi_reduction <add>, %170, %cst_54 [1] : vector<16x17xf32> to vector<16xf32>
    %172 = vector.shape_cast %171 : vector<16xf32> to vector<16x1xf32>
    %cst_55 = arith.constant 0.000000e+00 : f32
    %173 = vector.broadcast %cst_55 : f32 to vector<16x1xf32>
    %174 = arith.subf %173, %167 : vector<16x1xf32>
    %175 = math.exp %174 : vector<16x1xf32>
    %cst_56 = arith.constant 1.500000e+01 : f32
    %176 = vector.broadcast %cst_56 : f32 to vector<16x1xf32>
    %177 = arith.mulf %176, %175 : vector<16x1xf32>
    %178 = arith.addf %172, %177 : vector<16x1xf32>
    %179 = vector.broadcast %178 : vector<16x1xf32> to vector<16x17xf32>
    %180 = arith.divf %170, %179 : vector<16x17xf32>
    %181 = arith.truncf %180 : vector<16x17xf32> to vector<16x17xbf16>
    %cst_57 = arith.constant dense<0.000000e+00> : vector<16x4xf32>
    %182 = tpu.matmul %181, %148, %cst_57 {dimension_numbers = #tpu.dot_dimension_numbers<[1], [0], [0], [1], [0, 0, 1, 1], [], []>} : vector<16x17xbf16>, vector<17x4xbf16>, vector<16x4xf32> -> vector<16x4xf32>
    %183 = vector.extract_strided_slice %13 {offsets = [3, 0, 0], sizes = [1, 16, 16], strides = [1, 1, 1]} : vector<8x16x16xbf16> to vector<1x16x16xbf16>
    %184 = vector.shape_cast %183 : vector<1x16x16xbf16> to vector<16x16xbf16>
    %185 = arith.truncf %162 : vector<17x16xf32> to vector<17x16xbf16>
    %cst_58 = arith.constant dense<0.000000e+00> : vector<17x16xf32>
    %186 = tpu.matmul %185, %184, %cst_58 {dimension_numbers = #tpu.dot_dimension_numbers<[1], [0], [0], [1], [0, 0, 1, 1], [], []>} : vector<17x16xbf16>, vector<16x16xbf16>, vector<17x16xf32> -> vector<17x16xf32>
    %187 = arith.truncf %186 : vector<17x16xf32> to vector<17x16xbf16>
    %188 = arith.truncf %182 : vector<16x4xf32> to vector<16x4xbf16>
    %cst_59 = arith.constant dense<0.000000e+00> : vector<17x4xf32>
    %189 = tpu.matmul %187, %188, %cst_59 {dimension_numbers = #tpu.dot_dimension_numbers<[1], [0], [0], [1], [0, 0, 1, 1], [], []>} : vector<17x16xbf16>, vector<16x4xbf16>, vector<17x4xf32> -> vector<17x4xf32>
    %190 = vector.extract_strided_slice %2 {offsets = [0, 16], sizes = [17, 4], strides = [1, 1]} : vector<17x32xbf16> to vector<17x4xbf16>
    %191 = vector.extract_strided_slice %3 {offsets = [0, 16], sizes = [17, 4], strides = [1, 1]} : vector<17x32xbf16> to vector<17x4xbf16>
    %192 = vector.extract_strided_slice %4 {offsets = [0, 16], sizes = [17, 4], strides = [1, 1]} : vector<17x32xbf16> to vector<17x4xbf16>
    %193 = vector.extract_strided_slice %8 {offsets = [0, 16], sizes = [16, 4], strides = [1, 1]} : vector<16x32xbf16> to vector<16x4xbf16>
    %194 = vector.extract_strided_slice %10 {offsets = [0, 16], sizes = [16, 4], strides = [1, 1]} : vector<16x32xbf16> to vector<16x4xbf16>
    %cst_60 = arith.constant dense<0.000000e+00> : vector<17x16xf32>
    %195 = tpu.matmul %190, %194, %cst_60 {dimension_numbers = #tpu.dot_dimension_numbers<[1], [1], [0], [0], [0, 0, 1, 0], [], []>} : vector<17x4xbf16>, vector<16x4xbf16>, vector<17x16xf32> -> vector<17x16xf32>
    %cst_61 = arith.constant 5.000000e-01 : f32
    %196 = vector.broadcast %cst_61 : f32 to vector<17x16xf32>
    %197 = arith.mulf %195, %196 : vector<17x16xf32>
    %cst_62 = arith.constant dense<0xFF800000> : vector<17xf32>
    %198 = vector.multi_reduction <maximumf>, %197, %cst_62 [1] : vector<17x16xf32> to vector<17xf32>
    %199 = vector.shape_cast %198 : vector<17xf32> to vector<17x1xf32>
    %200 = vector.broadcast %199 : vector<17x1xf32> to vector<17x16xf32>
    %201 = arith.subf %197, %200 : vector<17x16xf32>
    %202 = math.exp %201 : vector<17x16xf32>
    %cst_63 = arith.constant dense<0.000000e+00> : vector<17xf32>
    %203 = vector.multi_reduction <add>, %202, %cst_63 [1] : vector<17x16xf32> to vector<17xf32>
    %204 = vector.shape_cast %203 : vector<17xf32> to vector<17x1xf32>
    %205 = vector.broadcast %204 : vector<17x1xf32> to vector<17x16xf32>
    %206 = arith.divf %202, %205 : vector<17x16xf32>
    %cst_64 = arith.constant dense<0.000000e+00> : vector<16x17xf32>
    %207 = tpu.matmul %193, %191, %cst_64 {dimension_numbers = #tpu.dot_dimension_numbers<[1], [1], [0], [0], [0, 0, 1, 0], [], []>} : vector<16x4xbf16>, vector<17x4xbf16>, vector<16x17xf32> -> vector<16x17xf32>
    %cst_65 = arith.constant dense<0xFF800000> : vector<16xf32>
    %208 = vector.multi_reduction <maximumf>, %207, %cst_65 [1] : vector<16x17xf32> to vector<16xf32>
    %209 = vector.shape_cast %208 : vector<16xf32> to vector<16x1xf32>
    %cst_66 = arith.constant 0.000000e+00 : f32
    %210 = vector.broadcast %cst_66 : f32 to vector<16x1xf32>
    %211 = arith.maximumf %209, %210 : vector<16x1xf32>
    %212 = vector.broadcast %211 : vector<16x1xf32> to vector<16x17xf32>
    %213 = arith.subf %207, %212 : vector<16x17xf32>
    %214 = math.exp %213 : vector<16x17xf32>
    %cst_67 = arith.constant dense<0.000000e+00> : vector<16xf32>
    %215 = vector.multi_reduction <add>, %214, %cst_67 [1] : vector<16x17xf32> to vector<16xf32>
    %216 = vector.shape_cast %215 : vector<16xf32> to vector<16x1xf32>
    %cst_68 = arith.constant 0.000000e+00 : f32
    %217 = vector.broadcast %cst_68 : f32 to vector<16x1xf32>
    %218 = arith.subf %217, %211 : vector<16x1xf32>
    %219 = math.exp %218 : vector<16x1xf32>
    %cst_69 = arith.constant 1.500000e+01 : f32
    %220 = vector.broadcast %cst_69 : f32 to vector<16x1xf32>
    %221 = arith.mulf %220, %219 : vector<16x1xf32>
    %222 = arith.addf %216, %221 : vector<16x1xf32>
    %223 = vector.broadcast %222 : vector<16x1xf32> to vector<16x17xf32>
    %224 = arith.divf %214, %223 : vector<16x17xf32>
    %225 = arith.truncf %224 : vector<16x17xf32> to vector<16x17xbf16>
    %cst_70 = arith.constant dense<0.000000e+00> : vector<16x4xf32>
    %226 = tpu.matmul %225, %192, %cst_70 {dimension_numbers = #tpu.dot_dimension_numbers<[1], [0], [0], [1], [0, 0, 1, 1], [], []>} : vector<16x17xbf16>, vector<17x4xbf16>, vector<16x4xf32> -> vector<16x4xf32>
    %227 = vector.extract_strided_slice %13 {offsets = [4, 0, 0], sizes = [1, 16, 16], strides = [1, 1, 1]} : vector<8x16x16xbf16> to vector<1x16x16xbf16>
    %228 = vector.shape_cast %227 : vector<1x16x16xbf16> to vector<16x16xbf16>
    %229 = arith.truncf %206 : vector<17x16xf32> to vector<17x16xbf16>
    %cst_71 = arith.constant dense<0.000000e+00> : vector<17x16xf32>
    %230 = tpu.matmul %229, %228, %cst_71 {dimension_numbers = #tpu.dot_dimension_numbers<[1], [0], [0], [1], [0, 0, 1, 1], [], []>} : vector<17x16xbf16>, vector<16x16xbf16>, vector<17x16xf32> -> vector<17x16xf32>
    %231 = arith.truncf %230 : vector<17x16xf32> to vector<17x16xbf16>
    %232 = arith.truncf %226 : vector<16x4xf32> to vector<16x4xbf16>
    %cst_72 = arith.constant dense<0.000000e+00> : vector<17x4xf32>
    %233 = tpu.matmul %231, %232, %cst_72 {dimension_numbers = #tpu.dot_dimension_numbers<[1], [0], [0], [1], [0, 0, 1, 1], [], []>} : vector<17x16xbf16>, vector<16x4xbf16>, vector<17x4xf32> -> vector<17x4xf32>
    %234 = vector.extract_strided_slice %2 {offsets = [0, 20], sizes = [17, 4], strides = [1, 1]} : vector<17x32xbf16> to vector<17x4xbf16>
    %235 = vector.extract_strided_slice %3 {offsets = [0, 20], sizes = [17, 4], strides = [1, 1]} : vector<17x32xbf16> to vector<17x4xbf16>
    %236 = vector.extract_strided_slice %4 {offsets = [0, 20], sizes = [17, 4], strides = [1, 1]} : vector<17x32xbf16> to vector<17x4xbf16>
    %237 = vector.extract_strided_slice %8 {offsets = [0, 20], sizes = [16, 4], strides = [1, 1]} : vector<16x32xbf16> to vector<16x4xbf16>
    %238 = vector.extract_strided_slice %10 {offsets = [0, 20], sizes = [16, 4], strides = [1, 1]} : vector<16x32xbf16> to vector<16x4xbf16>
    %cst_73 = arith.constant dense<0.000000e+00> : vector<17x16xf32>
    %239 = tpu.matmul %234, %238, %cst_73 {dimension_numbers = #tpu.dot_dimension_numbers<[1], [1], [0], [0], [0, 0, 1, 0], [], []>} : vector<17x4xbf16>, vector<16x4xbf16>, vector<17x16xf32> -> vector<17x16xf32>
    %cst_74 = arith.constant 5.000000e-01 : f32
    %240 = vector.broadcast %cst_74 : f32 to vector<17x16xf32>
    %241 = arith.mulf %239, %240 : vector<17x16xf32>
    %cst_75 = arith.constant dense<0xFF800000> : vector<17xf32>
    %242 = vector.multi_reduction <maximumf>, %241, %cst_75 [1] : vector<17x16xf32> to vector<17xf32>
    %243 = vector.shape_cast %242 : vector<17xf32> to vector<17x1xf32>
    %244 = vector.broadcast %243 : vector<17x1xf32> to vector<17x16xf32>
    %245 = arith.subf %241, %244 : vector<17x16xf32>
    %246 = math.exp %245 : vector<17x16xf32>
    %cst_76 = arith.constant dense<0.000000e+00> : vector<17xf32>
    %247 = vector.multi_reduction <add>, %246, %cst_76 [1] : vector<17x16xf32> to vector<17xf32>
    %248 = vector.shape_cast %247 : vector<17xf32> to vector<17x1xf32>
    %249 = vector.broadcast %248 : vector<17x1xf32> to vector<17x16xf32>
    %250 = arith.divf %246, %249 : vector<17x16xf32>
    %cst_77 = arith.constant dense<0.000000e+00> : vector<16x17xf32>
    %251 = tpu.matmul %237, %235, %cst_77 {dimension_numbers = #tpu.dot_dimension_numbers<[1], [1], [0], [0], [0, 0, 1, 0], [], []>} : vector<16x4xbf16>, vector<17x4xbf16>, vector<16x17xf32> -> vector<16x17xf32>
    %cst_78 = arith.constant dense<0xFF800000> : vector<16xf32>
    %252 = vector.multi_reduction <maximumf>, %251, %cst_78 [1] : vector<16x17xf32> to vector<16xf32>
    %253 = vector.shape_cast %252 : vector<16xf32> to vector<16x1xf32>
    %cst_79 = arith.constant 0.000000e+00 : f32
    %254 = vector.broadcast %cst_79 : f32 to vector<16x1xf32>
    %255 = arith.maximumf %253, %254 : vector<16x1xf32>
    %256 = vector.broadcast %255 : vector<16x1xf32> to vector<16x17xf32>
    %257 = arith.subf %251, %256 : vector<16x17xf32>
    %258 = math.exp %257 : vector<16x17xf32>
    %cst_80 = arith.constant dense<0.000000e+00> : vector<16xf32>
    %259 = vector.multi_reduction <add>, %258, %cst_80 [1] : vector<16x17xf32> to vector<16xf32>
    %260 = vector.shape_cast %259 : vector<16xf32> to vector<16x1xf32>
    %cst_81 = arith.constant 0.000000e+00 : f32
    %261 = vector.broadcast %cst_81 : f32 to vector<16x1xf32>
    %262 = arith.subf %261, %255 : vector<16x1xf32>
    %263 = math.exp %262 : vector<16x1xf32>
    %cst_82 = arith.constant 1.500000e+01 : f32
    %264 = vector.broadcast %cst_82 : f32 to vector<16x1xf32>
    %265 = arith.mulf %264, %263 : vector<16x1xf32>
    %266 = arith.addf %260, %265 : vector<16x1xf32>
    %267 = vector.broadcast %266 : vector<16x1xf32> to vector<16x17xf32>
    %268 = arith.divf %258, %267 : vector<16x17xf32>
    %269 = arith.truncf %268 : vector<16x17xf32> to vector<16x17xbf16>
    %cst_83 = arith.constant dense<0.000000e+00> : vector<16x4xf32>
    %270 = tpu.matmul %269, %236, %cst_83 {dimension_numbers = #tpu.dot_dimension_numbers<[1], [0], [0], [1], [0, 0, 1, 1], [], []>} : vector<16x17xbf16>, vector<17x4xbf16>, vector<16x4xf32> -> vector<16x4xf32>
    %271 = vector.extract_strided_slice %13 {offsets = [5, 0, 0], sizes = [1, 16, 16], strides = [1, 1, 1]} : vector<8x16x16xbf16> to vector<1x16x16xbf16>
    %272 = vector.shape_cast %271 : vector<1x16x16xbf16> to vector<16x16xbf16>
    %273 = arith.truncf %250 : vector<17x16xf32> to vector<17x16xbf16>
    %cst_84 = arith.constant dense<0.000000e+00> : vector<17x16xf32>
    %274 = tpu.matmul %273, %272, %cst_84 {dimension_numbers = #tpu.dot_dimension_numbers<[1], [0], [0], [1], [0, 0, 1, 1], [], []>} : vector<17x16xbf16>, vector<16x16xbf16>, vector<17x16xf32> -> vector<17x16xf32>
    %275 = arith.truncf %274 : vector<17x16xf32> to vector<17x16xbf16>
    %276 = arith.truncf %270 : vector<16x4xf32> to vector<16x4xbf16>
    %cst_85 = arith.constant dense<0.000000e+00> : vector<17x4xf32>
    %277 = tpu.matmul %275, %276, %cst_85 {dimension_numbers = #tpu.dot_dimension_numbers<[1], [0], [0], [1], [0, 0, 1, 1], [], []>} : vector<17x16xbf16>, vector<16x4xbf16>, vector<17x4xf32> -> vector<17x4xf32>
    %278 = vector.extract_strided_slice %2 {offsets = [0, 24], sizes = [17, 4], strides = [1, 1]} : vector<17x32xbf16> to vector<17x4xbf16>
    %279 = vector.extract_strided_slice %3 {offsets = [0, 24], sizes = [17, 4], strides = [1, 1]} : vector<17x32xbf16> to vector<17x4xbf16>
    %280 = vector.extract_strided_slice %4 {offsets = [0, 24], sizes = [17, 4], strides = [1, 1]} : vector<17x32xbf16> to vector<17x4xbf16>
    %281 = vector.extract_strided_slice %8 {offsets = [0, 24], sizes = [16, 4], strides = [1, 1]} : vector<16x32xbf16> to vector<16x4xbf16>
    %282 = vector.extract_strided_slice %10 {offsets = [0, 24], sizes = [16, 4], strides = [1, 1]} : vector<16x32xbf16> to vector<16x4xbf16>
    %cst_86 = arith.constant dense<0.000000e+00> : vector<17x16xf32>
    %283 = tpu.matmul %278, %282, %cst_86 {dimension_numbers = #tpu.dot_dimension_numbers<[1], [1], [0], [0], [0, 0, 1, 0], [], []>} : vector<17x4xbf16>, vector<16x4xbf16>, vector<17x16xf32> -> vector<17x16xf32>
    %cst_87 = arith.constant 5.000000e-01 : f32
    %284 = vector.broadcast %cst_87 : f32 to vector<17x16xf32>
    %285 = arith.mulf %283, %284 : vector<17x16xf32>
    %cst_88 = arith.constant dense<0xFF800000> : vector<17xf32>
    %286 = vector.multi_reduction <maximumf>, %285, %cst_88 [1] : vector<17x16xf32> to vector<17xf32>
    %287 = vector.shape_cast %286 : vector<17xf32> to vector<17x1xf32>
    %288 = vector.broadcast %287 : vector<17x1xf32> to vector<17x16xf32>
    %289 = arith.subf %285, %288 : vector<17x16xf32>
    %290 = math.exp %289 : vector<17x16xf32>
    %cst_89 = arith.constant dense<0.000000e+00> : vector<17xf32>
    %291 = vector.multi_reduction <add>, %290, %cst_89 [1] : vector<17x16xf32> to vector<17xf32>
    %292 = vector.shape_cast %291 : vector<17xf32> to vector<17x1xf32>
    %293 = vector.broadcast %292 : vector<17x1xf32> to vector<17x16xf32>
    %294 = arith.divf %290, %293 : vector<17x16xf32>
    %cst_90 = arith.constant dense<0.000000e+00> : vector<16x17xf32>
    %295 = tpu.matmul %281, %279, %cst_90 {dimension_numbers = #tpu.dot_dimension_numbers<[1], [1], [0], [0], [0, 0, 1, 0], [], []>} : vector<16x4xbf16>, vector<17x4xbf16>, vector<16x17xf32> -> vector<16x17xf32>
    %cst_91 = arith.constant dense<0xFF800000> : vector<16xf32>
    %296 = vector.multi_reduction <maximumf>, %295, %cst_91 [1] : vector<16x17xf32> to vector<16xf32>
    %297 = vector.shape_cast %296 : vector<16xf32> to vector<16x1xf32>
    %cst_92 = arith.constant 0.000000e+00 : f32
    %298 = vector.broadcast %cst_92 : f32 to vector<16x1xf32>
    %299 = arith.maximumf %297, %298 : vector<16x1xf32>
    %300 = vector.broadcast %299 : vector<16x1xf32> to vector<16x17xf32>
    %301 = arith.subf %295, %300 : vector<16x17xf32>
    %302 = math.exp %301 : vector<16x17xf32>
    %cst_93 = arith.constant dense<0.000000e+00> : vector<16xf32>
    %303 = vector.multi_reduction <add>, %302, %cst_93 [1] : vector<16x17xf32> to vector<16xf32>
    %304 = vector.shape_cast %303 : vector<16xf32> to vector<16x1xf32>
    %cst_94 = arith.constant 0.000000e+00 : f32
    %305 = vector.broadcast %cst_94 : f32 to vector<16x1xf32>
    %306 = arith.subf %305, %299 : vector<16x1xf32>
    %307 = math.exp %306 : vector<16x1xf32>
    %cst_95 = arith.constant 1.500000e+01 : f32
    %308 = vector.broadcast %cst_95 : f32 to vector<16x1xf32>
    %309 = arith.mulf %308, %307 : vector<16x1xf32>
    %310 = arith.addf %304, %309 : vector<16x1xf32>
    %311 = vector.broadcast %310 : vector<16x1xf32> to vector<16x17xf32>
    %312 = arith.divf %302, %311 : vector<16x17xf32>
    %313 = arith.truncf %312 : vector<16x17xf32> to vector<16x17xbf16>
    %cst_96 = arith.constant dense<0.000000e+00> : vector<16x4xf32>
    %314 = tpu.matmul %313, %280, %cst_96 {dimension_numbers = #tpu.dot_dimension_numbers<[1], [0], [0], [1], [0, 0, 1, 1], [], []>} : vector<16x17xbf16>, vector<17x4xbf16>, vector<16x4xf32> -> vector<16x4xf32>
    %315 = vector.extract_strided_slice %13 {offsets = [6, 0, 0], sizes = [1, 16, 16], strides = [1, 1, 1]} : vector<8x16x16xbf16> to vector<1x16x16xbf16>
    %316 = vector.shape_cast %315 : vector<1x16x16xbf16> to vector<16x16xbf16>
    %317 = arith.truncf %294 : vector<17x16xf32> to vector<17x16xbf16>
    %cst_97 = arith.constant dense<0.000000e+00> : vector<17x16xf32>
    %318 = tpu.matmul %317, %316, %cst_97 {dimension_numbers = #tpu.dot_dimension_numbers<[1], [0], [0], [1], [0, 0, 1, 1], [], []>} : vector<17x16xbf16>, vector<16x16xbf16>, vector<17x16xf32> -> vector<17x16xf32>
    %319 = arith.truncf %318 : vector<17x16xf32> to vector<17x16xbf16>
    %320 = arith.truncf %314 : vector<16x4xf32> to vector<16x4xbf16>
    %cst_98 = arith.constant dense<0.000000e+00> : vector<17x4xf32>
    %321 = tpu.matmul %319, %320, %cst_98 {dimension_numbers = #tpu.dot_dimension_numbers<[1], [0], [0], [1], [0, 0, 1, 1], [], []>} : vector<17x16xbf16>, vector<16x4xbf16>, vector<17x4xf32> -> vector<17x4xf32>
    %322 = vector.extract_strided_slice %2 {offsets = [0, 28], sizes = [17, 4], strides = [1, 1]} : vector<17x32xbf16> to vector<17x4xbf16>
    %323 = vector.extract_strided_slice %3 {offsets = [0, 28], sizes = [17, 4], strides = [1, 1]} : vector<17x32xbf16> to vector<17x4xbf16>
    %324 = vector.extract_strided_slice %4 {offsets = [0, 28], sizes = [17, 4], strides = [1, 1]} : vector<17x32xbf16> to vector<17x4xbf16>
    %325 = vector.extract_strided_slice %8 {offsets = [0, 28], sizes = [16, 4], strides = [1, 1]} : vector<16x32xbf16> to vector<16x4xbf16>
    %326 = vector.extract_strided_slice %10 {offsets = [0, 28], sizes = [16, 4], strides = [1, 1]} : vector<16x32xbf16> to vector<16x4xbf16>
    %cst_99 = arith.constant dense<0.000000e+00> : vector<17x16xf32>
    %327 = tpu.matmul %322, %326, %cst_99 {dimension_numbers = #tpu.dot_dimension_numbers<[1], [1], [0], [0], [0, 0, 1, 0], [], []>} : vector<17x4xbf16>, vector<16x4xbf16>, vector<17x16xf32> -> vector<17x16xf32>
    %cst_100 = arith.constant 5.000000e-01 : f32
    %328 = vector.broadcast %cst_100 : f32 to vector<17x16xf32>
    %329 = arith.mulf %327, %328 : vector<17x16xf32>
    %cst_101 = arith.constant dense<0xFF800000> : vector<17xf32>
    %330 = vector.multi_reduction <maximumf>, %329, %cst_101 [1] : vector<17x16xf32> to vector<17xf32>
    %331 = vector.shape_cast %330 : vector<17xf32> to vector<17x1xf32>
    %332 = vector.broadcast %331 : vector<17x1xf32> to vector<17x16xf32>
    %333 = arith.subf %329, %332 : vector<17x16xf32>
    %334 = math.exp %333 : vector<17x16xf32>
    %cst_102 = arith.constant dense<0.000000e+00> : vector<17xf32>
    %335 = vector.multi_reduction <add>, %334, %cst_102 [1] : vector<17x16xf32> to vector<17xf32>
    %336 = vector.shape_cast %335 : vector<17xf32> to vector<17x1xf32>
    %337 = vector.broadcast %336 : vector<17x1xf32> to vector<17x16xf32>
    %338 = arith.divf %334, %337 : vector<17x16xf32>
    %cst_103 = arith.constant dense<0.000000e+00> : vector<16x17xf32>
    %339 = tpu.matmul %325, %323, %cst_103 {dimension_numbers = #tpu.dot_dimension_numbers<[1], [1], [0], [0], [0, 0, 1, 0], [], []>} : vector<16x4xbf16>, vector<17x4xbf16>, vector<16x17xf32> -> vector<16x17xf32>
    %cst_104 = arith.constant dense<0xFF800000> : vector<16xf32>
    %340 = vector.multi_reduction <maximumf>, %339, %cst_104 [1] : vector<16x17xf32> to vector<16xf32>
    %341 = vector.shape_cast %340 : vector<16xf32> to vector<16x1xf32>
    %cst_105 = arith.constant 0.000000e+00 : f32
    %342 = vector.broadcast %cst_105 : f32 to vector<16x1xf32>
    %343 = arith.maximumf %341, %342 : vector<16x1xf32>
    %344 = vector.broadcast %343 : vector<16x1xf32> to vector<16x17xf32>
    %345 = arith.subf %339, %344 : vector<16x17xf32>
    %346 = math.exp %345 : vector<16x17xf32>
    %cst_106 = arith.constant dense<0.000000e+00> : vector<16xf32>
    %347 = vector.multi_reduction <add>, %346, %cst_106 [1] : vector<16x17xf32> to vector<16xf32>
    %348 = vector.shape_cast %347 : vector<16xf32> to vector<16x1xf32>
    %cst_107 = arith.constant 0.000000e+00 : f32
    %349 = vector.broadcast %cst_107 : f32 to vector<16x1xf32>
    %350 = arith.subf %349, %343 : vector<16x1xf32>
    %351 = math.exp %350 : vector<16x1xf32>
    %cst_108 = arith.constant 1.500000e+01 : f32
    %352 = vector.broadcast %cst_108 : f32 to vector<16x1xf32>
    %353 = arith.mulf %352, %351 : vector<16x1xf32>
    %354 = arith.addf %348, %353 : vector<16x1xf32>
    %355 = vector.broadcast %354 : vector<16x1xf32> to vector<16x17xf32>
    %356 = arith.divf %346, %355 : vector<16x17xf32>
    %357 = arith.truncf %356 : vector<16x17xf32> to vector<16x17xbf16>
    %cst_109 = arith.constant dense<0.000000e+00> : vector<16x4xf32>
    %358 = tpu.matmul %357, %324, %cst_109 {dimension_numbers = #tpu.dot_dimension_numbers<[1], [0], [0], [1], [0, 0, 1, 1], [], []>} : vector<16x17xbf16>, vector<17x4xbf16>, vector<16x4xf32> -> vector<16x4xf32>
    %359 = vector.extract_strided_slice %13 {offsets = [7, 0, 0], sizes = [1, 16, 16], strides = [1, 1, 1]} : vector<8x16x16xbf16> to vector<1x16x16xbf16>
    %360 = vector.shape_cast %359 : vector<1x16x16xbf16> to vector<16x16xbf16>
    %361 = arith.truncf %338 : vector<17x16xf32> to vector<17x16xbf16>
    %cst_110 = arith.constant dense<0.000000e+00> : vector<17x16xf32>
    %362 = tpu.matmul %361, %360, %cst_110 {dimension_numbers = #tpu.dot_dimension_numbers<[1], [0], [0], [1], [0, 0, 1, 1], [], []>} : vector<17x16xbf16>, vector<16x16xbf16>, vector<17x16xf32> -> vector<17x16xf32>
    %363 = arith.truncf %362 : vector<17x16xf32> to vector<17x16xbf16>
    %364 = arith.truncf %358 : vector<16x4xf32> to vector<16x4xbf16>
    %cst_111 = arith.constant dense<0.000000e+00> : vector<17x4xf32>
    %365 = tpu.matmul %363, %364, %cst_111 {dimension_numbers = #tpu.dot_dimension_numbers<[1], [0], [0], [1], [0, 0, 1, 1], [], []>} : vector<17x16xbf16>, vector<16x4xbf16>, vector<17x4xf32> -> vector<17x4xf32>
    %366 = tpu.concatenate %57, %101, %145, %189, %233, %277, %321, %365 in 1 : vector<17x4xf32>, vector<17x4xf32>, vector<17x4xf32>, vector<17x4xf32>, vector<17x4xf32>, vector<17x4xf32>, vector<17x4xf32>, vector<17x4xf32> -> vector<17x32xf32>
    %cst_112 = arith.constant 0.000000e+00 : f32
    %367 = vector.broadcast %cst_112 : f32 to vector<16x32xf32>
    %368 = arith.extf %4 : vector<17x32xbf16> to vector<17x32xf32>
    %369 = tpu.concatenate %367, %368, %367 in 0 : vector<16x32xf32>, vector<17x32xf32>, vector<16x32xf32> -> vector<49x32xf32>
    %c0_113 = arith.constant 0 : index
    %c0_114 = arith.constant 0 : index
    %370 = vector.load %arg5[%c0_113, %c0_114] : memref<33x32xf32, #tpu.memory_space<vmem>>, vector<33x32xf32>
    %cst_115 = arith.constant 0.000000e+00 : f32
    %371 = vector.broadcast %cst_115 : f32 to vector<17x32xf32>
    %cst_116 = arith.constant 0.000000e+00 : f32
    %372 = vector.broadcast %cst_116 : f32 to vector<17x32xf32>
    %cst_117 = arith.constant 0.000000e+00 : f32
    %373 = vector.broadcast %cst_117 : f32 to vector<17x32xf32>
    %cst_118 = arith.constant 0.000000e+00 : f32
    %374 = vector.broadcast %cst_118 : f32 to vector<17x32xf32>
    %375 = vector.extract_strided_slice %370 {offsets = [0, 0], sizes = [1, 32], strides = [1, 1]} : vector<33x32xf32> to vector<1x32xf32>
    %376 = vector.extract_strided_slice %369 {offsets = [0, 0], sizes = [17, 32], strides = [1, 1]} : vector<49x32xf32> to vector<17x32xf32>
    %377 = vector.broadcast %375 : vector<1x32xf32> to vector<17x32xf32>
    %378 = arith.mulf %377, %376 : vector<17x32xf32>
    %379 = arith.addf %371, %378 : vector<17x32xf32>
    %380 = vector.extract_strided_slice %370 {offsets = [1, 0], sizes = [1, 32], strides = [1, 1]} : vector<33x32xf32> to vector<1x32xf32>
    %381 = vector.extract_strided_slice %369 {offsets = [1, 0], sizes = [17, 32], strides = [1, 1]} : vector<49x32xf32> to vector<17x32xf32>
    %382 = vector.broadcast %380 : vector<1x32xf32> to vector<17x32xf32>
    %383 = arith.mulf %382, %381 : vector<17x32xf32>
    %384 = arith.addf %372, %383 : vector<17x32xf32>
    %385 = vector.extract_strided_slice %370 {offsets = [2, 0], sizes = [1, 32], strides = [1, 1]} : vector<33x32xf32> to vector<1x32xf32>
    %386 = vector.extract_strided_slice %369 {offsets = [2, 0], sizes = [17, 32], strides = [1, 1]} : vector<49x32xf32> to vector<17x32xf32>
    %387 = vector.broadcast %385 : vector<1x32xf32> to vector<17x32xf32>
    %388 = arith.mulf %387, %386 : vector<17x32xf32>
    %389 = arith.addf %373, %388 : vector<17x32xf32>
    %390 = vector.extract_strided_slice %370 {offsets = [3, 0], sizes = [1, 32], strides = [1, 1]} : vector<33x32xf32> to vector<1x32xf32>
    %391 = vector.extract_strided_slice %369 {offsets = [3, 0], sizes = [17, 32], strides = [1, 1]} : vector<49x32xf32> to vector<17x32xf32>
    %392 = vector.broadcast %390 : vector<1x32xf32> to vector<17x32xf32>
    %393 = arith.mulf %392, %391 : vector<17x32xf32>
    %394 = arith.addf %374, %393 : vector<17x32xf32>
    %395 = vector.extract_strided_slice %370 {offsets = [4, 0], sizes = [1, 32], strides = [1, 1]} : vector<33x32xf32> to vector<1x32xf32>
    %396 = vector.extract_strided_slice %369 {offsets = [4, 0], sizes = [17, 32], strides = [1, 1]} : vector<49x32xf32> to vector<17x32xf32>
    %397 = vector.broadcast %395 : vector<1x32xf32> to vector<17x32xf32>
    %398 = arith.mulf %397, %396 : vector<17x32xf32>
    %399 = arith.addf %379, %398 : vector<17x32xf32>
    %400 = vector.extract_strided_slice %370 {offsets = [5, 0], sizes = [1, 32], strides = [1, 1]} : vector<33x32xf32> to vector<1x32xf32>
    %401 = vector.extract_strided_slice %369 {offsets = [5, 0], sizes = [17, 32], strides = [1, 1]} : vector<49x32xf32> to vector<17x32xf32>
    %402 = vector.broadcast %400 : vector<1x32xf32> to vector<17x32xf32>
    %403 = arith.mulf %402, %401 : vector<17x32xf32>
    %404 = arith.addf %384, %403 : vector<17x32xf32>
    %405 = vector.extract_strided_slice %370 {offsets = [6, 0], sizes = [1, 32], strides = [1, 1]} : vector<33x32xf32> to vector<1x32xf32>
    %406 = vector.extract_strided_slice %369 {offsets = [6, 0], sizes = [17, 32], strides = [1, 1]} : vector<49x32xf32> to vector<17x32xf32>
    %407 = vector.broadcast %405 : vector<1x32xf32> to vector<17x32xf32>
    %408 = arith.mulf %407, %406 : vector<17x32xf32>
    %409 = arith.addf %389, %408 : vector<17x32xf32>
    %410 = vector.extract_strided_slice %370 {offsets = [7, 0], sizes = [1, 32], strides = [1, 1]} : vector<33x32xf32> to vector<1x32xf32>
    %411 = vector.extract_strided_slice %369 {offsets = [7, 0], sizes = [17, 32], strides = [1, 1]} : vector<49x32xf32> to vector<17x32xf32>
    %412 = vector.broadcast %410 : vector<1x32xf32> to vector<17x32xf32>
    %413 = arith.mulf %412, %411 : vector<17x32xf32>
    %414 = arith.addf %394, %413 : vector<17x32xf32>
    %415 = vector.extract_strided_slice %370 {offsets = [8, 0], sizes = [1, 32], strides = [1, 1]} : vector<33x32xf32> to vector<1x32xf32>
    %416 = vector.extract_strided_slice %369 {offsets = [8, 0], sizes = [17, 32], strides = [1, 1]} : vector<49x32xf32> to vector<17x32xf32>
    %417 = vector.broadcast %415 : vector<1x32xf32> to vector<17x32xf32>
    %418 = arith.mulf %417, %416 : vector<17x32xf32>
    %419 = arith.addf %399, %418 : vector<17x32xf32>
    %420 = vector.extract_strided_slice %370 {offsets = [9, 0], sizes = [1, 32], strides = [1, 1]} : vector<33x32xf32> to vector<1x32xf32>
    %421 = vector.extract_strided_slice %369 {offsets = [9, 0], sizes = [17, 32], strides = [1, 1]} : vector<49x32xf32> to vector<17x32xf32>
    %422 = vector.broadcast %420 : vector<1x32xf32> to vector<17x32xf32>
    %423 = arith.mulf %422, %421 : vector<17x32xf32>
    %424 = arith.addf %404, %423 : vector<17x32xf32>
    %425 = vector.extract_strided_slice %370 {offsets = [10, 0], sizes = [1, 32], strides = [1, 1]} : vector<33x32xf32> to vector<1x32xf32>
    %426 = vector.extract_strided_slice %369 {offsets = [10, 0], sizes = [17, 32], strides = [1, 1]} : vector<49x32xf32> to vector<17x32xf32>
    %427 = vector.broadcast %425 : vector<1x32xf32> to vector<17x32xf32>
    %428 = arith.mulf %427, %426 : vector<17x32xf32>
    %429 = arith.addf %409, %428 : vector<17x32xf32>
    %430 = vector.extract_strided_slice %370 {offsets = [11, 0], sizes = [1, 32], strides = [1, 1]} : vector<33x32xf32> to vector<1x32xf32>
    %431 = vector.extract_strided_slice %369 {offsets = [11, 0], sizes = [17, 32], strides = [1, 1]} : vector<49x32xf32> to vector<17x32xf32>
    %432 = vector.broadcast %430 : vector<1x32xf32> to vector<17x32xf32>
    %433 = arith.mulf %432, %431 : vector<17x32xf32>
    %434 = arith.addf %414, %433 : vector<17x32xf32>
    %435 = vector.extract_strided_slice %370 {offsets = [12, 0], sizes = [1, 32], strides = [1, 1]} : vector<33x32xf32> to vector<1x32xf32>
    %436 = vector.extract_strided_slice %369 {offsets = [12, 0], sizes = [17, 32], strides = [1, 1]} : vector<49x32xf32> to vector<17x32xf32>
    %437 = vector.broadcast %435 : vector<1x32xf32> to vector<17x32xf32>
    %438 = arith.mulf %437, %436 : vector<17x32xf32>
    %439 = arith.addf %419, %438 : vector<17x32xf32>
    %440 = vector.extract_strided_slice %370 {offsets = [13, 0], sizes = [1, 32], strides = [1, 1]} : vector<33x32xf32> to vector<1x32xf32>
    %441 = vector.extract_strided_slice %369 {offsets = [13, 0], sizes = [17, 32], strides = [1, 1]} : vector<49x32xf32> to vector<17x32xf32>
    %442 = vector.broadcast %440 : vector<1x32xf32> to vector<17x32xf32>
    %443 = arith.mulf %442, %441 : vector<17x32xf32>
    %444 = arith.addf %424, %443 : vector<17x32xf32>
    %445 = vector.extract_strided_slice %370 {offsets = [14, 0], sizes = [1, 32], strides = [1, 1]} : vector<33x32xf32> to vector<1x32xf32>
    %446 = vector.extract_strided_slice %369 {offsets = [14, 0], sizes = [17, 32], strides = [1, 1]} : vector<49x32xf32> to vector<17x32xf32>
    %447 = vector.broadcast %445 : vector<1x32xf32> to vector<17x32xf32>
    %448 = arith.mulf %447, %446 : vector<17x32xf32>
    %449 = arith.addf %429, %448 : vector<17x32xf32>
    %450 = vector.extract_strided_slice %370 {offsets = [15, 0], sizes = [1, 32], strides = [1, 1]} : vector<33x32xf32> to vector<1x32xf32>
    %451 = vector.extract_strided_slice %369 {offsets = [15, 0], sizes = [17, 32], strides = [1, 1]} : vector<49x32xf32> to vector<17x32xf32>
    %452 = vector.broadcast %450 : vector<1x32xf32> to vector<17x32xf32>
    %453 = arith.mulf %452, %451 : vector<17x32xf32>
    %454 = arith.addf %434, %453 : vector<17x32xf32>
    %455 = vector.extract_strided_slice %370 {offsets = [16, 0], sizes = [1, 32], strides = [1, 1]} : vector<33x32xf32> to vector<1x32xf32>
    %456 = vector.extract_strided_slice %369 {offsets = [16, 0], sizes = [17, 32], strides = [1, 1]} : vector<49x32xf32> to vector<17x32xf32>
    %457 = vector.broadcast %455 : vector<1x32xf32> to vector<17x32xf32>
    %458 = arith.mulf %457, %456 : vector<17x32xf32>
    %459 = arith.addf %439, %458 : vector<17x32xf32>
    %460 = vector.extract_strided_slice %370 {offsets = [17, 0], sizes = [1, 32], strides = [1, 1]} : vector<33x32xf32> to vector<1x32xf32>
    %461 = vector.extract_strided_slice %369 {offsets = [17, 0], sizes = [17, 32], strides = [1, 1]} : vector<49x32xf32> to vector<17x32xf32>
    %462 = vector.broadcast %460 : vector<1x32xf32> to vector<17x32xf32>
    %463 = arith.mulf %462, %461 : vector<17x32xf32>
    %464 = arith.addf %444, %463 : vector<17x32xf32>
    %465 = vector.extract_strided_slice %370 {offsets = [18, 0], sizes = [1, 32], strides = [1, 1]} : vector<33x32xf32> to vector<1x32xf32>
    %466 = vector.extract_strided_slice %369 {offsets = [18, 0], sizes = [17, 32], strides = [1, 1]} : vector<49x32xf32> to vector<17x32xf32>
    %467 = vector.broadcast %465 : vector<1x32xf32> to vector<17x32xf32>
    %468 = arith.mulf %467, %466 : vector<17x32xf32>
    %469 = arith.addf %449, %468 : vector<17x32xf32>
    %470 = vector.extract_strided_slice %370 {offsets = [19, 0], sizes = [1, 32], strides = [1, 1]} : vector<33x32xf32> to vector<1x32xf32>
    %471 = vector.extract_strided_slice %369 {offsets = [19, 0], sizes = [17, 32], strides = [1, 1]} : vector<49x32xf32> to vector<17x32xf32>
    %472 = vector.broadcast %470 : vector<1x32xf32> to vector<17x32xf32>
    %473 = arith.mulf %472, %471 : vector<17x32xf32>
    %474 = arith.addf %454, %473 : vector<17x32xf32>
    %475 = vector.extract_strided_slice %370 {offsets = [20, 0], sizes = [1, 32], strides = [1, 1]} : vector<33x32xf32> to vector<1x32xf32>
    %476 = vector.extract_strided_slice %369 {offsets = [20, 0], sizes = [17, 32], strides = [1, 1]} : vector<49x32xf32> to vector<17x32xf32>
    %477 = vector.broadcast %475 : vector<1x32xf32> to vector<17x32xf32>
    %478 = arith.mulf %477, %476 : vector<17x32xf32>
    %479 = arith.addf %459, %478 : vector<17x32xf32>
    %480 = vector.extract_strided_slice %370 {offsets = [21, 0], sizes = [1, 32], strides = [1, 1]} : vector<33x32xf32> to vector<1x32xf32>
    %481 = vector.extract_strided_slice %369 {offsets = [21, 0], sizes = [17, 32], strides = [1, 1]} : vector<49x32xf32> to vector<17x32xf32>
    %482 = vector.broadcast %480 : vector<1x32xf32> to vector<17x32xf32>
    %483 = arith.mulf %482, %481 : vector<17x32xf32>
    %484 = arith.addf %464, %483 : vector<17x32xf32>
    %485 = vector.extract_strided_slice %370 {offsets = [22, 0], sizes = [1, 32], strides = [1, 1]} : vector<33x32xf32> to vector<1x32xf32>
    %486 = vector.extract_strided_slice %369 {offsets = [22, 0], sizes = [17, 32], strides = [1, 1]} : vector<49x32xf32> to vector<17x32xf32>
    %487 = vector.broadcast %485 : vector<1x32xf32> to vector<17x32xf32>
    %488 = arith.mulf %487, %486 : vector<17x32xf32>
    %489 = arith.addf %469, %488 : vector<17x32xf32>
    %490 = vector.extract_strided_slice %370 {offsets = [23, 0], sizes = [1, 32], strides = [1, 1]} : vector<33x32xf32> to vector<1x32xf32>
    %491 = vector.extract_strided_slice %369 {offsets = [23, 0], sizes = [17, 32], strides = [1, 1]} : vector<49x32xf32> to vector<17x32xf32>
    %492 = vector.broadcast %490 : vector<1x32xf32> to vector<17x32xf32>
    %493 = arith.mulf %492, %491 : vector<17x32xf32>
    %494 = arith.addf %474, %493 : vector<17x32xf32>
    %495 = vector.extract_strided_slice %370 {offsets = [24, 0], sizes = [1, 32], strides = [1, 1]} : vector<33x32xf32> to vector<1x32xf32>
    %496 = vector.extract_strided_slice %369 {offsets = [24, 0], sizes = [17, 32], strides = [1, 1]} : vector<49x32xf32> to vector<17x32xf32>
    %497 = vector.broadcast %495 : vector<1x32xf32> to vector<17x32xf32>
    %498 = arith.mulf %497, %496 : vector<17x32xf32>
    %499 = arith.addf %479, %498 : vector<17x32xf32>
    %500 = vector.extract_strided_slice %370 {offsets = [25, 0], sizes = [1, 32], strides = [1, 1]} : vector<33x32xf32> to vector<1x32xf32>
    %501 = vector.extract_strided_slice %369 {offsets = [25, 0], sizes = [17, 32], strides = [1, 1]} : vector<49x32xf32> to vector<17x32xf32>
    %502 = vector.broadcast %500 : vector<1x32xf32> to vector<17x32xf32>
    %503 = arith.mulf %502, %501 : vector<17x32xf32>
    %504 = arith.addf %484, %503 : vector<17x32xf32>
    %505 = vector.extract_strided_slice %370 {offsets = [26, 0], sizes = [1, 32], strides = [1, 1]} : vector<33x32xf32> to vector<1x32xf32>
    %506 = vector.extract_strided_slice %369 {offsets = [26, 0], sizes = [17, 32], strides = [1, 1]} : vector<49x32xf32> to vector<17x32xf32>
    %507 = vector.broadcast %505 : vector<1x32xf32> to vector<17x32xf32>
    %508 = arith.mulf %507, %506 : vector<17x32xf32>
    %509 = arith.addf %489, %508 : vector<17x32xf32>
    %510 = vector.extract_strided_slice %370 {offsets = [27, 0], sizes = [1, 32], strides = [1, 1]} : vector<33x32xf32> to vector<1x32xf32>
    %511 = vector.extract_strided_slice %369 {offsets = [27, 0], sizes = [17, 32], strides = [1, 1]} : vector<49x32xf32> to vector<17x32xf32>
    %512 = vector.broadcast %510 : vector<1x32xf32> to vector<17x32xf32>
    %513 = arith.mulf %512, %511 : vector<17x32xf32>
    %514 = arith.addf %494, %513 : vector<17x32xf32>
    %515 = vector.extract_strided_slice %370 {offsets = [28, 0], sizes = [1, 32], strides = [1, 1]} : vector<33x32xf32> to vector<1x32xf32>
    %516 = vector.extract_strided_slice %369 {offsets = [28, 0], sizes = [17, 32], strides = [1, 1]} : vector<49x32xf32> to vector<17x32xf32>
    %517 = vector.broadcast %515 : vector<1x32xf32> to vector<17x32xf32>
    %518 = arith.mulf %517, %516 : vector<17x32xf32>
    %519 = arith.addf %499, %518 : vector<17x32xf32>
    %520 = vector.extract_strided_slice %370 {offsets = [29, 0], sizes = [1, 32], strides = [1, 1]} : vector<33x32xf32> to vector<1x32xf32>
    %521 = vector.extract_strided_slice %369 {offsets = [29, 0], sizes = [17, 32], strides = [1, 1]} : vector<49x32xf32> to vector<17x32xf32>
    %522 = vector.broadcast %520 : vector<1x32xf32> to vector<17x32xf32>
    %523 = arith.mulf %522, %521 : vector<17x32xf32>
    %524 = arith.addf %504, %523 : vector<17x32xf32>
    %525 = vector.extract_strided_slice %370 {offsets = [30, 0], sizes = [1, 32], strides = [1, 1]} : vector<33x32xf32> to vector<1x32xf32>
    %526 = vector.extract_strided_slice %369 {offsets = [30, 0], sizes = [17, 32], strides = [1, 1]} : vector<49x32xf32> to vector<17x32xf32>
    %527 = vector.broadcast %525 : vector<1x32xf32> to vector<17x32xf32>
    %528 = arith.mulf %527, %526 : vector<17x32xf32>
    %529 = arith.addf %509, %528 : vector<17x32xf32>
    %530 = vector.extract_strided_slice %370 {offsets = [31, 0], sizes = [1, 32], strides = [1, 1]} : vector<33x32xf32> to vector<1x32xf32>
    %531 = vector.extract_strided_slice %369 {offsets = [31, 0], sizes = [17, 32], strides = [1, 1]} : vector<49x32xf32> to vector<17x32xf32>
    %532 = vector.broadcast %530 : vector<1x32xf32> to vector<17x32xf32>
    %533 = arith.mulf %532, %531 : vector<17x32xf32>
    %534 = arith.addf %514, %533 : vector<17x32xf32>
    %535 = vector.extract_strided_slice %370 {offsets = [32, 0], sizes = [1, 32], strides = [1, 1]} : vector<33x32xf32> to vector<1x32xf32>
    %536 = vector.extract_strided_slice %369 {offsets = [32, 0], sizes = [17, 32], strides = [1, 1]} : vector<49x32xf32> to vector<17x32xf32>
    %537 = vector.broadcast %535 : vector<1x32xf32> to vector<17x32xf32>
    %538 = arith.mulf %537, %536 : vector<17x32xf32>
    %539 = arith.addf %519, %538 : vector<17x32xf32>
    %540 = arith.addf %539, %524 : vector<17x32xf32>
    %541 = arith.addf %529, %534 : vector<17x32xf32>
    %542 = arith.addf %540, %541 : vector<17x32xf32>
    %543 = arith.addf %366, %542 : vector<17x32xf32>
    %c0_119 = arith.constant 0 : index
    %c0_120 = arith.constant 0 : index
    %544 = vector.load %arg6[%c0_119, %c0_120] : memref<32x32xbf16, #tpu.memory_space<vmem>>, vector<32x32xbf16>
    %545 = arith.truncf %543 : vector<17x32xf32> to vector<17x32xbf16>
    %cst_121 = arith.constant dense<0.000000e+00> : vector<17x32xf32>
    %546 = tpu.matmul %545, %544, %cst_121 {dimension_numbers = #tpu.dot_dimension_numbers<[1], [0], [0], [1], [0, 0, 1, 1], [], []>} : vector<17x32xbf16>, vector<32x32xbf16>, vector<17x32xf32> -> vector<17x32xf32>
    %c0_122 = arith.constant 0 : index
    %c0_123 = arith.constant 0 : index
    %547 = vector.load %arg7[%c0_122, %c0_123] : memref<1x32xf32, #tpu.memory_space<vmem>>, vector<1x32xf32>
    %548 = vector.broadcast %547 : vector<1x32xf32> to vector<17x32xf32>
    %549 = arith.addf %546, %548 : vector<17x32xf32>
    %c0_124 = arith.constant 0 : index
    %c0_125 = arith.constant 0 : index
    %c0_126 = arith.constant 0 : index
    %550 = vector.load %arg4[%c0_124, %c0_125, %c0_126] : memref<1x17x32xf32, #tpu.memory_space<vmem>>, vector<1x17x32xf32>
    %551 = vector.shape_cast %550 : vector<1x17x32xf32> to vector<17x32xf32>
    %552 = arith.addf %551, %549 : vector<17x32xf32>
    %c0_127 = arith.constant 0 : index
    %c0_128 = arith.constant 0 : index
    %c0_129 = arith.constant 0 : index
    %553 = vector.load %arg8[%c0_127, %c0_128, %c0_129] : memref<1x17x32xf32, #tpu.memory_space<vmem>>, vector<1x17x32xf32>
    %554 = vector.shape_cast %553 : vector<1x17x32xf32> to vector<17x32xf32>
    %555 = vector.shape_cast %552 : vector<17x32xf32> to vector<1x17x32xf32>
    tpu.vector_store %arg8[%c0_127, %c0_128, %c0_129], %555 {strides = array<i32>} : memref<1x17x32xf32, #tpu.memory_space<vmem>>, vector<1x17x32xf32>,
    return
  }
  func.func @transform_0(%arg0: i32) -> (i32, i32, i32) {
    %c0_i32 = arith.constant 0 : i32
    %c0_i32_0 = arith.constant 0 : i32
    %c0_i32_1 = arith.constant 0 : i32
    return %arg0, %c0_i32, %c0_i32_0 : i32, i32, i32
  }
  func.func @transform_1(%arg0: i32) -> (i32, i32, i32) {
    %c0_i32 = arith.constant 0 : i32
    %c0_i32_0 = arith.constant 0 : i32
    %c0_i32_1 = arith.constant 0 : i32
    return %arg0, %c0_i32, %c0_i32_0 : i32, i32, i32
  }
  func.func @transform_2(%arg0: i32) -> (i32, i32, i32, i32) {
    %c0_i32 = arith.constant 0 : i32
    %c0_i32_0 = arith.constant 0 : i32
    %c0_i32_1 = arith.constant 0 : i32
    %c0_i32_2 = arith.constant 0 : i32
    return %arg0, %c0_i32, %c0_i32_0, %c0_i32_1 : i32, i32, i32, i32
  }
  func.func @transform_3(%arg0: i32) -> (i32, i32, i32) {
    %c0_i32 = arith.constant 0 : i32
    %c0_i32_0 = arith.constant 0 : i32
    %c0_i32_1 = arith.constant 0 : i32
    return %arg0, %c0_i32, %c0_i32_0 : i32, i32, i32
  }
  func.func @transform_4(%arg0: i32) -> (i32, i32) {
    %c0_i32 = arith.constant 0 : i32
    %c0_i32_0 = arith.constant 0 : i32
    %c0_i32_1 = arith.constant 0 : i32
    return %c0_i32, %c0_i32_0 : i32, i32
  }
  func.func @transform_5(%arg0: i32) -> (i32, i32) {
    %c0_i32 = arith.constant 0 : i32
    %c0_i32_0 = arith.constant 0 : i32
    %c0_i32_1 = arith.constant 0 : i32
    return %c0_i32, %c0_i32_0 : i32, i32
  }
  func.func @transform_6(%arg0: i32) -> (i32, i32) {
    %c0_i32 = arith.constant 0 : i32
    %c0_i32_0 = arith.constant 0 : i32
    %c0_i32_1 = arith.constant 0 : i32
    return %c0_i32, %c0_i32_0 : i32, i32
  }
  func.func @transform_7(%arg0: i32) -> (i32, i32, i32) {
    %c0_i32 = arith.constant 0 : i32
    %c0_i32_0 = arith.constant 0 : i32
    %c0_i32_1 = arith.constant 0 : i32
    return %arg0, %c0_i32, %c0_i32_0 : i32, i32, i32
  }
}

module attributes {stable_mosaic.version = 11 : i64} {
  func.func @_ln_linear_kernel(%arg0: i32, %arg1: memref<2x32xf32, #tpu.memory_space<vmem>>, %arg2: memref<1x32xf32, #tpu.memory_space<vmem>>, %arg3: memref<1x32xf32, #tpu.memory_space<vmem>>, %arg4: memref<32x1xbf16, #tpu.memory_space<vmem>>, %arg5: memref<1x1xf32, #tpu.memory_space<vmem>>, %arg6: memref<2x1xf32, #tpu.memory_space<vmem>>) attributes {dimension_semantics = [#tpu.dimension_semantics<parallel>], iteration_bounds = array<i64: 1>, scalar_prefetch = 0 : i64, scratch_operands = 0 : i64, tpu.core_type = #tpu.core_type<tc>, window_params = [{transform_indices = @transform_0, window_bounds = array<i64: 2, 32>}, {pipeline_mode = #tpu.pipeline_mode<synchronous>, transform_indices = @transform_1, window_bounds = array<i64: 1, 32>}, {pipeline_mode = #tpu.pipeline_mode<synchronous>, transform_indices = @transform_2, window_bounds = array<i64: 1, 32>}, {pipeline_mode = #tpu.pipeline_mode<synchronous>, transform_indices = @transform_3, window_bounds = array<i64: 32, 1>}, {pipeline_mode = #tpu.pipeline_mode<synchronous>, transform_indices = @transform_4, window_bounds = array<i64: 1, 1>}, {transform_indices = @transform_5, window_bounds = array<i64: 2, 1>}]} {
    %c0 = arith.constant 0 : index
    %c0_0 = arith.constant 0 : index
    %0 = vector.load %arg1[%c0, %c0_0] : memref<2x32xf32, #tpu.memory_space<vmem>>, vector<2x32xf32>
    %cst = arith.constant dense<0.000000e+00> : vector<2xf32>
    %1 = vector.multi_reduction <add>, %0, %cst [1] : vector<2x32xf32> to vector<2xf32>
    %2 = vector.shape_cast %1 : vector<2xf32> to vector<2x1xf32>
    %cst_1 = arith.constant 3.200000e+01 : f32
    %3 = vector.broadcast %cst_1 : f32 to vector<2x1xf32>
    %4 = arith.divf %2, %3 : vector<2x1xf32>
    %5 = vector.broadcast %4 : vector<2x1xf32> to vector<2x32xf32>
    %6 = arith.subf %0, %5 : vector<2x32xf32>
    %7 = arith.mulf %6, %6 : vector<2x32xf32>
    %cst_2 = arith.constant dense<0.000000e+00> : vector<2xf32>
    %8 = vector.multi_reduction <add>, %7, %cst_2 [1] : vector<2x32xf32> to vector<2xf32>
    %9 = vector.shape_cast %8 : vector<2xf32> to vector<2x1xf32>
    %cst_3 = arith.constant 3.200000e+01 : f32
    %10 = vector.broadcast %cst_3 : f32 to vector<2x1xf32>
    %11 = arith.divf %9, %10 : vector<2x1xf32>
    %cst_4 = arith.constant 9.99999974E-6 : f32
    %12 = vector.broadcast %cst_4 : f32 to vector<2x1xf32>
    %13 = arith.addf %11, %12 : vector<2x1xf32>
    %14 = math.rsqrt %13 : vector<2x1xf32>
    %15 = vector.broadcast %14 : vector<2x1xf32> to vector<2x32xf32>
    %16 = arith.mulf %6, %15 : vector<2x32xf32>
    %c0_5 = arith.constant 0 : index
    %c0_6 = arith.constant 0 : index
    %17 = vector.load %arg2[%c0_5, %c0_6] : memref<1x32xf32, #tpu.memory_space<vmem>>, vector<1x32xf32>
    %18 = vector.broadcast %17 : vector<1x32xf32> to vector<2x32xf32>
    %19 = arith.mulf %16, %18 : vector<2x32xf32>
    %c0_7 = arith.constant 0 : index
    %c0_8 = arith.constant 0 : index
    %20 = vector.load %arg3[%c0_7, %c0_8] : memref<1x32xf32, #tpu.memory_space<vmem>>, vector<1x32xf32>
    %21 = vector.broadcast %20 : vector<1x32xf32> to vector<2x32xf32>
    %22 = arith.addf %19, %21 : vector<2x32xf32>
    %23 = arith.truncf %22 : vector<2x32xf32> to vector<2x32xbf16>
    %c0_9 = arith.constant 0 : index
    %c0_10 = arith.constant 0 : index
    %24 = vector.load %arg4[%c0_9, %c0_10] : memref<32x1xbf16, #tpu.memory_space<vmem>>, vector<32x1xbf16>
    %cst_11 = arith.constant dense<0.000000e+00> : vector<2x1xf32>
    %25 = tpu.matmul %23, %24, %cst_11 {dimension_numbers = #tpu.dot_dimension_numbers<[1], [0], [0], [1], [0, 0, 1, 1], [], []>} : vector<2x32xbf16>, vector<32x1xbf16>, vector<2x1xf32> -> vector<2x1xf32>
    %c0_12 = arith.constant 0 : index
    %c0_13 = arith.constant 0 : index
    %26 = vector.load %arg5[%c0_12, %c0_13] : memref<1x1xf32, #tpu.memory_space<vmem>>, vector<1x1xf32>
    %27 = vector.broadcast %26 : vector<1x1xf32> to vector<2x1xf32>
    %28 = arith.addf %25, %27 : vector<2x1xf32>
    %c0_14 = arith.constant 0 : index
    %c0_15 = arith.constant 0 : index
    %29 = vector.load %arg6[%c0_14, %c0_15] : memref<2x1xf32, #tpu.memory_space<vmem>>, vector<2x1xf32>
    tpu.vector_store %arg6[%c0_14, %c0_15], %28 {strides = array<i32>} : memref<2x1xf32, #tpu.memory_space<vmem>>, vector<2x1xf32>,
    return
  }
  func.func @transform_0(%arg0: i32) -> (i32, i32) {
    %c0_i32 = arith.constant 0 : i32
    %c0_i32_0 = arith.constant 0 : i32
    return %arg0, %c0_i32 : i32, i32
  }
  func.func @transform_1(%arg0: i32) -> (i32, i32) {
    %c0_i32 = arith.constant 0 : i32
    %c0_i32_0 = arith.constant 0 : i32
    %c0_i32_1 = arith.constant 0 : i32
    return %c0_i32, %c0_i32_0 : i32, i32
  }
  func.func @transform_2(%arg0: i32) -> (i32, i32) {
    %c0_i32 = arith.constant 0 : i32
    %c0_i32_0 = arith.constant 0 : i32
    %c0_i32_1 = arith.constant 0 : i32
    return %c0_i32, %c0_i32_0 : i32, i32
  }
  func.func @transform_3(%arg0: i32) -> (i32, i32) {
    %c0_i32 = arith.constant 0 : i32
    %c0_i32_0 = arith.constant 0 : i32
    %c0_i32_1 = arith.constant 0 : i32
    return %c0_i32, %c0_i32_0 : i32, i32
  }
  func.func @transform_4(%arg0: i32) -> (i32, i32) {
    %c0_i32 = arith.constant 0 : i32
    %c0_i32_0 = arith.constant 0 : i32
    %c0_i32_1 = arith.constant 0 : i32
    return %c0_i32, %c0_i32_0 : i32, i32
  }
  func.func @transform_5(%arg0: i32) -> (i32, i32) {
    %c0_i32 = arith.constant 0 : i32
    %c0_i32_0 = arith.constant 0 : i32
    return %arg0, %c0_i32 : i32, i32
  }
}

</mosaic_0001>

<bundles_post_ra>
// kernel: transmil_forward.12
= control target key start
LH: loop header
LB: loop body
LE: loop exit
PB: predicated region body
PF: predicated region fallthrough
CT: control target
= control target key end

     0   :  { %vm23_vm0 = vcmask 261120   ;;  %vm36_vm1 = vcmask 254976   ;;  %v287_v36 = vmov 0.0   ;;  %vm288_vm2 = vmmov 0   ;;  %s391_s0 = inlined_call_operand.vmem [shape: f32[34,32], index: 0, kind: input, shape index: {}]   ;;  %s392_s3 = inlined_call_operand.vmem [shape: bf16[32,96], index: 3, kind: input, shape index: {}]   ;;  %s393_s1 = inlined_call_operand.vmem [shape: f32[1,32], index: 1, kind: input, shape index: {}]   ;;  %s394_s2 = inlined_call_operand.vmem [shape: f32[1,32], index: 2, kind: input, shape index: {}]   ;;  %s395_s4 = inlined_call_operand.vmem [shape: bf16[34,96], index: 4, kind: output, shape index: {}]  }
   0x1   :  { %v20_v0 = vld [vmem:[%s391_s0 + $0x10] sm:$0xff]  ;;  %v21_v1 = vld [vmem:[%s391_s0 + $0x18] sm:$0xff]  ;;  %v18_v2 = vld [vmem:[%s391_s0] sm:$0xff]  ;;  %269 = vmatprep.subr.bf16.mxu1 %v287_v36  ;;  %253 = vmatprep.subr.bf16.mxu0 %v287_v36  ;;  %vm220_vm3 = vcmask 781312   ;;  %vm225_vm4 = vcmask 778240  }
   0x2   :  { %v30_v3 = vsel %vm23_vm0, %v20_v0, 0.0  ;;  %v24_v4 = vsel %vm23_vm0, %v18_v2, 0.0  ;;  %v19_v5 = vld [vmem:[%s391_s0 + $0x8] sm:$0xff]  ;;  %v33_v6 = vsel %vm23_vm0, %v21_v1, 0.0  ;;  %v22_v8 = vld [vmem:[%s391_s0 + $0x20] sm:$0x3]  ;;  %261 = vmatprep.mubr.msk.bf16.mxu1 %vm288_vm2, %v287_v36  ;;  %257 = vmatprep.mubr.msk.bf16.mxu0 %vm288_vm2, %v287_v36 }
   0x3   :  { %31 = vadd.xlane.f32.xlu0 %v30_v3  ;;  %25 = vadd.xlane.f32.xlu1 %v24_v4  ;;  %v27_v7 = vsel %vm23_vm0, %v19_v5, 0.0  ;;  %v37_v9 = vsel %vm36_vm1, %v22_v8, 0.0  ;;  %v275_v35 = vld [vmem:[%s392_s3] sm:$0xff]   ;;  %v276_v37 = vld [vmem:[%s392_s3 + $0x8] sm:$0xff]  }
   0x4   :  { %271 = vmatpush3.bf16.msra.mxu1 %v275_v35  ;;  %254 = vmatpush3.bf16.msra.mxu0 %v275_v35  ;;  %v231_v55 = vld [vmem:[%s393_s1] ss:$0 sm:$0xff] }
   0x5   :  { %270 = vmatprep.subr.bf16.mxu1 %v287_v36  ;;  %255 = vmatprep.subr.bf16.mxu0 %v287_v36  ;;  %v232_v61 = vld [vmem:[%s394_s2] ss:$0 sm:$0xff] }
   0x7   :  { %34 = vadd.xlane.f32.xlu0 %v33_v6  ;;  %28 = vadd.xlane.f32.xlu1 %v27_v7 }
   0x8   :  { %272 = vmatpush3.bf16.msra.mxu1 %v276_v37  ;;  %256 = vmatpush3.bf16.msra.mxu0 %v276_v37 }
   0xb   :  { %38 = vadd.xlane.f32.xlu0 %v37_v9 }
  0x90   :  { %v32_v10 = vpop.xlane.xlu0 %31  ;;  %v26_v11 = vpop.xlane.xlu1 %25 }
  0x91   :  { %v43_v12 = vmul.f32 0.03125, %v32_v10  ;;  %v41_v13 = vmul.f32 0.03125, %v26_v11 }
  0x93   :  { %v334_v14 = vsub.f32 %v20_v0, %v43_v12  ;;  %v336_v15 = vsub.f32 %v18_v2, %v41_v13 }
  0x94   :  { %v35_v16 = vpop.xlane.xlu0 %34  ;;  %v29_v17 = vpop.xlane.xlu1 %28 }
  0x95   :  { %v44_v18 = vmul.f32 0.03125, %v35_v16  ;;  %v53_v19 = vmul.f32 %v334_v14, %v334_v14  ;;  %v42_v20 = vmul.f32 0.03125, %v29_v17  ;;  %v51_v21 = vmul.f32 %v336_v15, %v336_v15 }
  0x97   :  { %v49_v22 = vsub.f32 %v21_v1, %v44_v18  ;;  %v62_v23 = vsel %vm23_vm0, %v53_v19, 0.0  ;;  %v343_v24 = vsub.f32 %v19_v5, %v42_v20  ;;  %v56_v28 = vsel %vm23_vm0, %v51_v21, 0.0 }
  0x98   :  { %v39_v25 = vpop.xlane.xlu0 %38  ;;  %63 = vadd.xlane.f32.xlu1 %v62_v23 }
  0x99   :  { %v45_v26 = vmul.f32 0.03125, %v39_v25  ;;  %v54_v27 = vmul.f32 %v49_v22, %v49_v22  ;;  %v52_v29 = vmul.f32 %v343_v24, %v343_v24 }
  0x9b   :  { %v50_v30 = vsub.f32 %v22_v8, %v45_v26  ;;  %v65_v31 = vsel %vm23_vm0, %v54_v27, 0.0  ;;  %v59_v33 = vsel %vm23_vm0, %v52_v29, 0.0 }
  0x9c   :  { %66 = vadd.xlane.f32.xlu0 %v65_v31  ;;  %57 = vadd.xlane.f32.xlu1 %v56_v28 }
  0x9d   :  { %v55_v32 = vmul.f32 %v50_v30, %v50_v30 }
  0x9f   :  { %v68_v34 = vsel %vm36_vm1, %v55_v32, 0.0 }
  0xa0   :  { %69 = vadd.xlane.f32.xlu1 %v68_v34  ;;  %60 = vadd.xlane.f32.xlu0 %v59_v33 }
 0x125   :  { %v64_v38 = vpop.xlane.xlu1 %63 }
 0x126   :  { %v73_v39 = vmul.f32 0.03125, %v64_v38 }
 0x128   :  { %v78_v40 = vadd.f32 1e-05, %v73_v39 }
 0x129   :  { %v67_v41 = vpop.xlane.xlu0 %66  ;;  %v58_v42 = vpop.xlane.xlu1 %57 }
 0x12a   :  { %277 = vrsqrt.f32 %v78_v40  ;;  %v74_v43 = vmul.f32 0.03125, %v67_v41  ;;  %v71_v44 = vmul.f32 0.03125, %v58_v42 }
 0x12c   :  { %v79_v45 = vadd.f32 1e-05, %v74_v43  ;;  %v76_v46 = vadd.f32 1e-05, %v71_v44 }
 0x12d   :  { %v61_v47 = vpop.xlane.xlu0 %60  ;;  %v70_v48 = vpop.xlane.xlu1 %69 }
 0x12e   :  { %279 = vrsqrt.f32 %v79_v45  ;;  %v72_v49 = vmul.f32 0.03125, %v61_v47  ;;  %v75_v50 = vmul.f32 0.03125, %v70_v48 }
 0x12f   :  { %281 = vrsqrt.f32 %v76_v46 }
 0x130   :  { %v77_v51 = vadd.f32 1e-05, %v72_v49  ;;  %v80_v52 = vadd.f32 1e-05, %v75_v50 }
 0x132   :  { %283 = vrsqrt.f32 %v77_v51 }
 0x133   :  { %285 = vrsqrt.f32 %v80_v52 }
 0x134   :  { %v278_v53 = vpop.eup %277 }
 0x135   :  { %v88_v54 = vmul.f32 %v278_v53, %v334_v14 }
 0x137   :  { %v100_v59 = vmul.f32 %v231_v55, %v88_v54 }
 0x138   :  { %v280_v56 = vpop.eup %279 }
 0x139   :  { %v282_v57 = vpop.eup %281  ;;  %v89_v58 = vmul.f32 %v280_v56, %v49_v22  ;;  %v112_v2 = vadd.f32 %v232_v61, %v100_v59 }
 0x13a   :  { %v86_v60 = vmul.f32 %v282_v57, %v336_v15 }
 0x13b   :  { %v101_v62 = vmul.f32 %v231_v55, %v89_v58 }
 0x13c   :  { %v284_v63 = vpop.eup %283  ;;  %v98_v4 = vmul.f32 %v231_v55, %v86_v60 }
 0x13d   :  { %v286_v0 = vpop.eup %285  ;;  %v87_v1 = vmul.f32 %v284_v63, %v343_v24  ;;  %v113_v3 = vadd.f32 %v232_v61, %v101_v62 }
 0x13e   :  { %v90_v5 = vmul.f32 %v286_v0, %v50_v30  ;;  %v110_v9 = vadd.f32 %v232_v61, %v98_v4 }
 0x13f   :  { %v116_v6 = vpack.c.bf16 %v113_v3, %v112_v2  ;;  %v99_v7 = vmul.f32 %v231_v55, %v87_v1 }
 0x140   :  { %v102_v8 = vmul.f32 %v231_v55, %v90_v5 }
 0x141   :  { %262 = vmatmul.mubr.msk.bf16.vlgmr.msra.gmra.mrb[0].mxu1 %vm23_vm0, %v116_v6  ;;  %v111_v10 = vadd.f32 %v232_v61, %v99_v7 }
 0x142   :  { %265 = vmatprep.mubr.msk.bf16.mxu1 %vm288_vm2, %v287_v36  ;;  %v114_v12 = vadd.f32 %v232_v61, %v102_v8 }
 0x143   :  { %v115_v11 = vpack.c.bf16 %v111_v10, %v110_v9 }
 0x144   :  { %v117_v13 = vpack.c.bf16 %v114_v12, %v114_v12 }
 0x145   :  { %258 = vmatmul.mubr.msk.bf16.vlgmr.msra.gmra.mrb[0].mxu0 %vm23_vm0, %v115_v11 }
 0x149   :  { %266 = vmatmul.mubr.msk.bf16.gmra.mrb[4].mxu1 %vm23_vm0, %v117_v13 }
 0x214   :  { %v185_v14 = vpop.f32.mrb[0].mxu1 }
 0x215   :  { %v245_v15 = vpack.c.bf16 %v185_v14, %v185_v14  ;;  %v263_v16 = vpop.f32.mrb[1].mxu1 }
 0x216   :  { %v188_v17 = vpop.f32.mrb[2].mxu1 }
 0x217   :  { %223 = vst.msk [vmem:[%s395_s4 + $0x8] sm:$0xf] %vm220_vm3, %v245_v15  ;;  %v246_v18 = vpack.c.bf16 %v188_v17, %v188_v17  ;;  %v264_v19 = vpop.f32.mrb[3].mxu1 }
 0x218   :  { %v177_v20 = vpop.f32.mrb[0].mxu0 }
 0x219   :  { %224 = vst.msk [vmem:[%s395_s4 + $0xc] sm:$0xf] %vm220_vm3, %v246_v18  ;;  %v243_v21 = vpack.c.bf16 %v177_v20, %v177_v20  ;;  %v259_v22 = vpop.f32.mrb[1].mxu0 }
 0x21a   :  { %v180_v23 = vpop.f32.mrb[2].mxu0 }
 0x21b   :  { %221 = vst.msk [vmem:[%s395_s4] sm:$0xf] %vm220_vm3, %v243_v21  ;;  %v244_v24 = vpack.c.bf16 %v180_v23, %v180_v23  ;;  %v260_v25 = vpop.f32.mrb[3].mxu0 }
 0x21c   :  { %v193_v26 = vpop.f32.mrb[4].mxu1 }
 0x21d   :  { %222 = vst.msk [vmem:[%s395_s4 + $0x4] sm:$0xf] %vm220_vm3, %v244_v24  ;;  %v247_v27 = vpack.c.bf16 %v193_v26, %v193_v26  ;;  %v267_v28 = vpop.f32.mrb[5].mxu1 }
 0x21e   :  { %v196_v29 = vpop.f32.mrb[6].mxu1 }
 0x21f   :  { %226 = vst.msk [vmem:[%s395_s4 + $0x10] sm:$0x1] %vm225_vm4, %v247_v27  ;;  %v268_v30 = vpop.f32.mrb[7].mxu1 }

// kernel: transmil_forward.11
= control target key start
LH: loop header
LB: loop body
LE: loop exit
PB: predicated region body
PF: predicated region fallthrough
CT: control target
= control target key end

     0   :  { %vm59_vm0 = vcmask 523264   ;;  %vm117_vm1 = vcmask 261120   ;;  %s207_s1 = inlined_call_operand.vmem [shape: bf16[64,32], index: 1, kind: input, shape index: {}]   ;;  %s208_s0 = inlined_call_operand.vmem [shape: f32[24,64], index: 0, kind: input, shape index: {}]   ;;  %s209_s2 = inlined_call_operand.vmem [shape: f32[1,32], index: 2, kind: input, shape index: {}]   ;;  %s210_s3 = inlined_call_operand.vmem [shape: f32[24,32], index: 3, kind: output, shape index: {}]  }
   0x1   :  { %v150_v0 = vld [vmem:[%s207_s1] sm:$0xff]   ;;  %v151_v1 = vld [vmem:[%s207_s1 + $0x8] sm:$0xff]   ;;  %v152_v2 = vld [vmem:[%s207_s1 + $0x10] sm:$0xff]  }
   0x2   :  { %138 = vmatprep.subr.bf16.mxu0 %v150_v0  ;;  %v15_v3 = vld [vmem:[%s208_s0] sm:$0xff]  ;;  %v16_v4 = vld [vmem:[%s208_s0 + $0x8] sm:$0xff]  ;;  %v153_v6 = vld [vmem:[%s207_s1 + $0x18] sm:$0xff]  }
   0x3   :  { %139 = vmatpush3.bf16.msra.mxu0 %v150_v0  ;;  %v18_v5 = vpack.c.bf16 %v16_v4, %v15_v3  ;;  %v17_v7 = vld [vmem:[%s208_s0 + $0x10] sm:$0xff]  ;;  %v125_v9 = vld [vmem:[%s209_s2] ss:$0 sm:$0xff] }
   0x4   :  { %140 = vmatprep.subr.bf16.mxu0 %v151_v1  ;;  %v19_v8 = vpack.c.bf16 %v17_v7, %v17_v7 }
   0x5   :  { %146 = vmatprep.mubr.msk.bf16.mxu0 %vm59_vm0, %v18_v5 }
   0x7   :  { %141 = vmatpush3.bf16.msra.mxu0 %v151_v1 }
   0x8   :  { %142 = vmatprep.subr.bf16.mxu0 %v152_v2 }
   0xb   :  { %143 = vmatpush3.bf16.msra.mxu0 %v152_v2 }
   0xc   :  { %144 = vmatprep.subr.bf16.mxu0 %v153_v6 }
   0xf   :  { %145 = vmatpush3.bf16.msra.mxu0 %v153_v6 }
  0x12   :  { %147 = vmatmul.mubr.msk.bf16.vlgmr.msra.gmra.mrb[0].mxu0 %vm59_vm0, %v19_v8 }
  0xe5   :  { %v148_v10 = vpop.f32.mrb[0].mxu0 }
  0xe6   :  { %v109_v11 = vadd.f32 %v148_v10, %v125_v9  ;;  %v100_v12 = vpop.f32.mrb[1].mxu0 }
  0xe7   :  { %v101_v13 = vadd.f32 %v125_v9, %v100_v12  ;;  %v149_v14 = vpop.f32.mrb[2].mxu0 }
  0xe8   :  { %v116_v15 = vmax.f32 %v109_v11, 0.0  ;;  %v103_v16 = vpop.f32.mrb[3].mxu0 }
  0xe9   :  { %v114_v17 = vmax.f32 %v101_v13, 0.0  ;;  %v104_v18 = vadd.f32 %v125_v9, %v103_v16 }
  0xea   :  { %120 = vst.msk [vmem:[%s210_s3 + $0x10] sm:$0xff] %vm117_vm1, %v116_v15 }
  0xeb   :  { %118 = vst.msk [vmem:[%s210_s3] sm:$0xff] %vm117_vm1, %v114_v17  ;;  %v115_v19 = vmax.f32 %v104_v18, 0.0 }
  0xed   :  { %119 = vst.msk [vmem:[%s210_s3 + $0x8] sm:$0xff] %vm117_vm1, %v115_v19 }

// kernel: transmil_forward.13
= control target key start
LH: loop header
LB: loop body
LE: loop exit
PB: predicated region body
PF: predicated region fallthrough
CT: control target
= control target key end

     0   :  { %s1219_s12 = smov 0   ;;  %s1485_s0 = inlined_call_operand.vmem [shape: bf16[16,17], index: 0, kind: input, shape index: {}]   ;;  %s1486_s1 = inlined_call_operand.vmem [shape: bf16[2,17,96], index: 1, kind: input, shape index: {}]   ;;  %s1487_s2 = inlined_call_operand.vmem [shape: f32[2,8,16,16], index: 2, kind: output, shape index: {0}]   ;;  %s1488_s3 = inlined_call_operand.vmem [shape: f32[2,16,64], index: 3, kind: output, shape index: {1}]  }
   0x1 LB: > { %s964_s13 = sadd.s32 4294967295, %s1179_s12   ;;  %p968_p0 = scmp.ge.s32.totalorder %s1179_s12, 1  ;;  %s1179_s12 = sphi %s1219_s12, %s14_s12  }
   0x2   : > { %p140_p1 = scmp.lt.s32.totalorder %s1179_s12, 3 }
   0x4   : > { %p141_p2 = pnand %p968_p0, %p140_p1 }
   0x5   : > { %p169_p3 = scmp.lt.s32.totalorder (!%p141_p2), %s964_s13, 1  ;;  %v1181_v0 = vmov (!%p141_p2), 0.0   ;;  %vm1182_vm0 = vmmov (!%p141_p2), 0   ;;  %vm208_vm1 = vcmask (!%p141_p2), 1040384   ;;  %v1183_v2 = vmov (!%p141_p2), 0   ;;  %v1108_v6 = vld [vmem:[%s1485_s0] sm:$0xff] (!%p141_p2)  }
   0x6   : > { %144 = sbr.rel (%p141_p2) target bundleno = 930 (0x3a2), region = 28  ;;  %1023 = vmatprep.subr.bf16.mxu0 (!%p141_p2), %v1181_v0  ;;  %1027 = vmatprep.mubr.msk.bf16.mxu0 (!%p141_p2), %vm1182_vm0, %v1181_v0  ;;  %v210_v3 = vsel (!%p141_p2), %vm208_vm1, 65535, %v1183_v2  ;;  %vm204_vm2 = vcmask (!%p141_p2), 138240   ;;  %vm259_vm3 = vcmask (!%p141_p2), 261120   ;;  %vm262_vm4 = vcmask (!%p141_p2), 523264   ;;  %s1184_s24 = smov (!%p141_p2), 96  }
   0x7   : > { %1031 = vmatprep.subr.bf16.mxu1 (!%p141_p2), %v1181_v0  ;;  %1033 = vmatprep.mubr.msk.bf16.mxu1 (!%p141_p2), %vm1182_vm0, %v1181_v0  ;;  %s1185_s25 = smov (!%p141_p2), 124   ;;  %s1186_s26 = smov (!%p141_p2), 92   ;;  %vm270_vm5 = vcmask (!%p141_p2), 31744   ;;  %vm318_vm6 = vcmask (!%p141_p2), 130048  }
   0x8   : > { %s1187_s27 = smov (!%p141_p2), 88   ;;  %s1188_s28 = smov (!%p141_p2), 84  }
   0x9   : > { %s1189_s29 = smov (!%p141_p2), 120   ;;  %s1190_s30 = smov (!%p141_p2), 116  }
   0xa   : > { %s1191_s4 = smov (!%p141_p2), 80   ;;  %s1192_s5 = smov (!%p141_p2), 76  }
   0xb   : > { %s1193_s6 = smov (!%p141_p2), 112   ;;  %s1194_s7 = smov (!%p141_p2), 108  }
   0xc   : > { %s1195_s8 = smov (!%p141_p2), 72   ;;  %s1196_s9 = smov (!%p141_p2), 68  }
   0xd   : > { %s1490_s13 = smov (!%p169_p3, %s964_s13), 1  ;;  %s1197_s10 = smov 104  }
   0xe   : > { %s1079_s14 = smul.u32 12, %s1490_s13  ;;  %s1003_s20 = sshll.u32 %s1490_s13, 4 }
   0xf   : > { %s183_s23 = scalar_lea.vmem %s1488_s3, %s1003_s20  ;;  %s1198_s11 = smov 100  }
  0x10   : > { %s173_s17 = scalar_lea.vmem %s1486_s1, %s1079_s14  ;;  %s1002_s14 = sshll.u32 %s1490_s13, 7 }
  0x11   : > { %v1106_v1 = vld [vmem:[%s173_s17] sm:$0xff]   ;;  %v1107_v4 = vld [vmem:[%s173_s17 + $0x8] ss:$0 sps:$4 sm:$0x11]   ;;  %s1432_s17 = scalar_lea.vmem %s1487_s2, %s1002_s14 }
  0x12   : > { %1024 = vmatpush3.bf16.msra.mxu0 %v1106_v1  ;;  %v212_v5 = vand.u32 %v1107_v4, %v210_v3 }
  0x13   : > { %1025 = vmatprep.subr.bf16.mxu0 %v1181_v0 }
  0x16   : > { %1026 = vmatpush3.bf16.msra.mxu0 %v212_v5 }
  0x17   : > { %1037 = vmatprep.subr.bf16.mxu0 %v1181_v0 }
  0x19   : > { %1028 = vmatmul.mubr.msk.bf16.vlgmr.msra.gmra.mrb[0].mxu0 %vm204_vm2, %v1108_v6 }
  0x1a   : > { %1039 = vmatprep.mubr.msk.bf16.mxu0 %vm1182_vm0, %v1181_v0 }
  0xec   : > { %v248_v7 = vpop.f32.mrb[0].mxu0 }
  0xed   : > { %v255_v8 = vmul.f32 0.25, %v248_v7  ;;  %v257_v9 = vmul.f32 0.5, %v248_v7  ;;  %v1029_v10 = vpop.f32.mrb[1].mxu0 }
  0xee   : > { %v251_v11 = vpop.f32.mrb[2].mxu0 }
  0xef   : > { %v260_v12 = vsel %vm259_vm3, %v255_v8, %v257_v9  ;;  %v256_v13 = vmul.f32 0.25, %v251_v11  ;;  %v258_v14 = vmul.f32 0.5, %v251_v11  ;;  %v1030_v15 = vpop.f32.mrb[3].mxu0 }
  0xf0   : > { %263 = vst.msk [vmem:[%s183_s23] sm:$0xff] %vm262_vm4, %v260_v12 }
  0xf1   : > { %v261_v16 = vsel %vm259_vm3, %v256_v13, %v258_v14  ;;  %v265_v17 = vpack.c.bf16 %v256_v13, %v255_v8  ;;  %v266_v18 = vpack.c.bf16 %v258_v14, %v257_v9 }
  0xf2   : > { %264 = vst.msk [vmem:[%s183_s23 + $0x8] sm:$0xff] %vm262_vm4, %v261_v16 }
  0xf3   : > { %268 = vrot.lane.b32.xlu0 %v266_v18, %s1184_s24  ;;  %344 = vrot.lane.b32.xlu1 %v265_v17, %s1185_s25 }
  0xf7   : > { %346 = vrot.lane.b32.xlu0 %v266_v18, %s1186_s26  ;;  %422 = vrot.lane.b32.xlu1 %v266_v18, %s1187_s27 }
  0xfb   : > { %498 = vrot.lane.b32.xlu0 %v266_v18, %s1188_s28  ;;  %420 = vrot.lane.b32.xlu1 %v265_v17, %s1189_s29 }
  0xff   : > { %496 = vrot.lane.b32.xlu0 %v265_v17, %s1190_s30  ;;  %574 = vrot.lane.b32.xlu1 %v266_v18, %s1191_s4 }
 0x103   : > { %650 = vrot.lane.b32.xlu0 %v266_v18, %s1192_s5  ;;  %572 = vrot.lane.b32.xlu1 %v265_v17, %s1193_s6 }
 0x107   : > { %648 = vrot.lane.b32.xlu0 %v265_v17, %s1194_s7  ;;  %726 = vrot.lane.b32.xlu1 %v266_v18, %s1195_s8 }
 0x10b   : > { %802 = vrot.lane.b32.xlu0 %v266_v18, %s1196_s9  ;;  %724 = vrot.lane.b32.xlu1 %v265_v17, %s1197_s10 }
 0x10f   : > { %800 = vrot.lane.b32.xlu0 %v265_v17, %s1198_s11 }
 0x165   : > { %v269_v19 = vpop.permute.xlu0 %268  ;;  %v345_v20 = vpop.permute.xlu1 %344 }
 0x166   : > { %v275_v21 = vsel %vm270_vm5, %v269_v19, 0 }
 0x167   : > { %1032 = vmatpush3.bf16.xpose.msra.mxu1 %v275_v21 }
 0x168   : > { %1043 = vmatprep.subr.bf16.mxu1 %v1181_v0 }
 0x169   : > { %v347_v22 = vpop.permute.xlu0 %346  ;;  %v423_v23 = vpop.permute.xlu1 %422 }
 0x16a   : > { %v352_v24 = vsel %vm270_vm5, %v347_v22, 0  ;;  %v428_v27 = vsel %vm270_vm5, %v423_v23, 0 }
 0x16b   : > { %1038 = vmatpush3.bf16.xpose.msra.mxu0 %v352_v24 }
 0x16c   : > { %1049 = vmatprep.subr.bf16.mxu0 %v1181_v0 }
 0x16d   : > { %v499_v25 = vpop.permute.xlu0 %498  ;;  %v421_v26 = vpop.permute.xlu1 %420 }
 0x16e   : > { %1034 = vmatmul.mubr.msk.bf16.vlgmr.msra.gmra.mrb[0].mxu1 %vm270_vm5, %v265_v17  ;;  %v504_v30 = vsel %vm270_vm5, %v499_v25, 0 }
 0x16f   : > { %1044 = vmatpush3.bf16.xpose.msra.mxu1 %v428_v27  ;;  %1045 = vmatprep.mubr.msk.bf16.mxu1 %vm1182_vm0, %v1181_v0 }
 0x170   : > { %1055 = vmatprep.subr.bf16.mxu1 %v1181_v0 }
 0x171   : > { %v497_v28 = vpop.permute.xlu0 %496  ;;  %v575_v29 = vpop.permute.xlu1 %574 }
 0x172   : > { %1040 = vmatmul.mubr.msk.bf16.vlgmr.msra.gmra.mrb[4].mxu0 %vm270_vm5, %v345_v20  ;;  %v580_v33 = vsel %vm270_vm5, %v575_v29, 0 }
 0x173   : > { %1050 = vmatpush3.bf16.xpose.msra.mxu0 %v504_v30  ;;  %1051 = vmatprep.mubr.msk.bf16.mxu0 %vm1182_vm0, %v1181_v0 }
 0x174   : > { %1061 = vmatprep.subr.bf16.mxu0 %v1181_v0 }
 0x175   : > { %v651_v31 = vpop.permute.xlu0 %650  ;;  %v573_v32 = vpop.permute.xlu1 %572 }
 0x176   : > { %1046 = vmatmul.mubr.msk.bf16.vlgmr.msra.gmra.mrb[4].mxu1 %vm270_vm5, %v421_v26  ;;  %v656_v35 = vsel %vm270_vm5, %v651_v31, 0 }
 0x177   : > { %1056 = vmatpush3.bf16.xpose.msra.mxu1 %v580_v33  ;;  %1057 = vmatprep.mubr.msk.bf16.mxu1 %vm1182_vm0, %v1181_v0 }
 0x178   : > { %1067 = vmatprep.subr.bf16.mxu1 %v1181_v0 }
 0x179   : > { %v649_v34 = vpop.permute.xlu0 %648  ;;  %v727_v36 = vpop.permute.xlu1 %726 }
 0x17a   : > { %1052 = vmatmul.mubr.msk.bf16.vlgmr.msra.gmra.mrb[8].mxu0 %vm270_vm5, %v497_v28  ;;  %v732_v37 = vsel %vm270_vm5, %v727_v36, 0 }
 0x17b   : > { %1062 = vmatpush3.bf16.xpose.msra.mxu0 %v656_v35  ;;  %1063 = vmatprep.mubr.msk.bf16.mxu0 %vm1182_vm0, %v1181_v0 }
 0x17c   : > { %1073 = vmatprep.subr.bf16.mxu0 %v1181_v0 }
 0x17d   : > { %v803_v38 = vpop.permute.xlu0 %802  ;;  %v725_v40 = vpop.permute.xlu1 %724 }
 0x17e   : > { %1058 = vmatmul.mubr.msk.bf16.vlgmr.msra.gmra.mrb[8].mxu1 %vm270_vm5, %v573_v32  ;;  %v808_v39 = vsel %vm270_vm5, %v803_v38, 0 }
 0x17f   : > { %1068 = vmatpush3.bf16.xpose.msra.mxu1 %v732_v37  ;;  %1069 = vmatprep.mubr.msk.bf16.mxu1 %vm1182_vm0, %v1181_v0 }
 0x181   : > { %v801_v41 = vpop.permute.xlu0 %800 }
 0x182   : > { %1064 = vmatmul.mubr.msk.bf16.vlgmr.msra.gmra.mrb[12].mxu0 %vm270_vm5, %v649_v34 }
 0x183   : > { %1074 = vmatpush3.bf16.xpose.msra.mxu0 %v808_v39  ;;  %1075 = vmatprep.mubr.msk.bf16.mxu0 %vm1182_vm0, %v1181_v0 }
 0x186   : > { %1070 = vmatmul.mubr.msk.bf16.vlgmr.msra.gmra.mrb[12].mxu1 %vm270_vm5, %v725_v40 }
 0x18a   : > { %1076 = vmatmul.mubr.msk.bf16.vlgmr.msra.gmra.mrb[16].mxu0 %vm270_vm5, %v801_v41 }
 0x241   : > { %v1284_v42 = vpop.f32.mrb[0].mxu1 }
 0x242   : > { %v1035_v43 = vpop.f32.mrb[1].mxu1  ;;  %v319_v44 = vsel %vm318_vm6, %v1284_v42, -inf }
 0x243   : > { %320 = vmax.xlane.f32.xlu1 %v319_v44  ;;  %v1288_v45 = vpop.f32.mrb[2].mxu1 }
 0x244   : > { %v1036_v46 = vpop.f32.mrb[3].mxu1  ;;  %v322_v55 = vsel %vm318_vm6, %v1288_v45, -inf }
 0x245   : > { %v1290_v47 = vpop.f32.mrb[4].mxu0 }
 0x246   : > { %v1041_v48 = vpop.f32.mrb[5].mxu0  ;;  %v395_v49 = vsel %vm318_vm6, %v1290_v47, -inf }
 0x247   : > { %396 = vmax.xlane.f32.xlu0 %v395_v49  ;;  %v1294_v50 = vpop.f32.mrb[6].mxu0 }
 0x248   : > { %v1042_v51 = vpop.f32.mrb[7].mxu0  ;;  %v398_v52 = vsel %vm318_vm6, %v1294_v50, -inf }
 0x249   : > { %v1298_v53 = vpop.f32.mrb[4].mxu1  ;;  %399 = vmax.xlane.f32.xlu1 %v398_v52 }
 0x24a   : > { %v1047_v54 = vpop.f32.mrb[5].mxu1  ;;  %v471_v61 = vsel %vm318_vm6, %v1298_v53, -inf }
 0x24b   : > { %v1302_v56 = vpop.f32.mrb[6].mxu1  ;;  %323 = vmax.xlane.f32.xlu0 %v322_v55 }
 0x24c   : > { %v1048_v57 = vpop.f32.mrb[7].mxu1  ;;  %v474_v58 = vsel %vm318_vm6, %v1302_v56, -inf }
 0x24d   : > { %475 = vmax.xlane.f32.xlu1 %v474_v58  ;;  %v1306_v59 = vpop.f32.mrb[8].mxu0 }
 0x24e   : > { %v1053_v60 = vpop.f32.mrb[9].mxu0  ;;  %v547_v3 = vsel %vm318_vm6, %v1306_v59, -inf }
 0x24f   : > { %472 = vmax.xlane.f32.xlu0 %v471_v61  ;;  %v1310_v62 = vpop.f32.mrb[10].mxu0 }
 0x250   : > { %v1054_v63 = vpop.f32.mrb[11].mxu0  ;;  %v550_v0 = vsel %vm318_vm6, %v1310_v62, -inf }
 0x251   : > { %v1314_v1 = vpop.f32.mrb[8].mxu1  ;;  %551 = vmax.xlane.f32.xlu1 %v550_v0 }
 0x252   : > { %v1059_v2 = vpop.f32.mrb[9].mxu1  ;;  %v623_v9 = vsel %vm318_vm6, %v1314_v1, -inf }
 0x253   : > { %v1318_v4 = vpop.f32.mrb[10].mxu1  ;;  %548 = vmax.xlane.f32.xlu0 %v547_v3 }
 0x254   : > { %v1060_v5 = vpop.f32.mrb[11].mxu1  ;;  %v626_v6 = vsel %vm318_vm6, %v1318_v4, -inf }
 0x255   : > { %627 = vmax.xlane.f32.xlu1 %v626_v6  ;;  %v1322_v7 = vpop.f32.mrb[12].mxu0 }
 0x256   : > { %v1065_v8 = vpop.f32.mrb[13].mxu0  ;;  %v699_v15 = vsel %vm318_vm6, %v1322_v7, -inf }
 0x257   : > { %624 = vmax.xlane.f32.xlu0 %v623_v9  ;;  %v1326_v10 = vpop.f32.mrb[14].mxu0 }
 0x258   : > { %v1066_v11 = vpop.f32.mrb[15].mxu0  ;;  %v702_v12 = vsel %vm318_vm6, %v1326_v10, -inf }
 0x259   : > { %v1330_v13 = vpop.f32.mrb[12].mxu1  ;;  %703 = vmax.xlane.f32.xlu1 %v702_v12 }
 0x25a   : > { %v1071_v14 = vpop.f32.mrb[13].mxu1  ;;  %v775_v21 = vsel %vm318_vm6, %v1330_v13, -inf }
 0x25b   : > { %v1334_v16 = vpop.f32.mrb[14].mxu1  ;;  %700 = vmax.xlane.f32.xlu0 %v699_v15 }
 0x25c   : > { %v1072_v17 = vpop.f32.mrb[15].mxu1  ;;  %v778_v18 = vsel %vm318_vm6, %v1334_v16, -inf }
 0x25d   : > { %779 = vmax.xlane.f32.xlu1 %v778_v18  ;;  %v1338_v19 = vpop.f32.mrb[16].mxu0 }
 0x25e   : > { %v1077_v20 = vpop.f32.mrb[17].mxu0  ;;  %v851_v25 = vsel %vm318_vm6, %v1338_v19, -inf }
 0x25f   : > { %776 = vmax.xlane.f32.xlu0 %v775_v21  ;;  %v1342_v22 = vpop.f32.mrb[18].mxu0 }
 0x260   : > { %v1078_v23 = vpop.f32.mrb[19].mxu0  ;;  %v854_v24 = vsel %vm318_vm6, %v1342_v22, -inf }
 0x261   : > { %855 = vmax.xlane.f32.xlu1 %v854_v24 }
 0x263   : > { %852 = vmax.xlane.f32.xlu0 %v851_v25 }
 0x2d0   : > { %v321_v26 = vpop.xlane.xlu1 %320 }
 0x2d1   : > { %v325_v27 = vsub.f32 %v1284_v42, %v321_v26 }
 0x2d3   : > { %v327_v28 = vmul.f32 1.442695, %v325_v27 }
 0x2d4   : > { %v397_v29 = vpop.xlane.xlu0 %396 }
 0x2d5   : > { %1109 = vpow2.f32 %v327_v28  ;;  %v401_v30 = vsub.f32 %v1290_v47, %v397_v29 }
 0x2d6   : > { %v400_v31 = vpop.xlane.xlu1 %399 }
 0x2d7   : > { %v403_v32 = vmul.f32 1.442695, %v401_v30  ;;  %v402_v33 = vsub.f32 %v1294_v50, %v400_v31 }
 0x2d8   : > { %v324_v34 = vpop.xlane.xlu0 %323 }
 0x2d9   : > { %1111 = vpow2.f32 %v403_v32  ;;  %v326_v35 = vsub.f32 %v1288_v45, %v324_v34  ;;  %v405_v37 = vmul.f32 1.442695, %v402_v33 }
 0x2da   : > { %v476_v36 = vpop.xlane.xlu1 %475 }
 0x2db   : > { %v329_v38 = vmul.f32 1.442695, %v326_v35  ;;  %v478_v39 = vsub.f32 %v1302_v56, %v476_v36 }
 0x2dc   : > { %v473_v40 = vpop.xlane.xlu0 %472 }
 0x2dd   : > { %1113 = vpow2.f32 %v329_v38  ;;  %v477_v41 = vsub.f32 %v1298_v53, %v473_v40  ;;  %v481_v44 = vmul.f32 1.442695, %v478_v39 }
 0x2de   : > { %v552_v42 = vpop.xlane.xlu1 %551  ;;  %1115 = vpow2.f32 %v405_v37 }
 0x2df   : > { %v1354_v43 = vpop.eup %1109  ;;  %v479_v46 = vmul.f32 1.442695, %v477_v41  ;;  %v554_v47 = vsub.f32 %v1310_v62, %v552_v42 }
 0x2e0   : > { %v549_v48 = vpop.xlane.xlu0 %548  ;;  %v331_v45 = vsel %vm318_vm6, %v1354_v43, 0.0 }
 0x2e1   : > { %1117 = vpow2.f32 %v479_v46  ;;  %v553_v49 = vsub.f32 %v1306_v59, %v549_v48  ;;  %332 = vadd.xlane.f32.xlu0 %v331_v45  ;;  %v557_v52 = vmul.f32 1.442695, %v554_v47 }
 0x2e2   : > { %v628_v50 = vpop.xlane.xlu1 %627  ;;  %1119 = vpow2.f32 %v481_v44 }
 0x2e3   : > { %v1360_v51 = vpop.eup %1111  ;;  %v555_v53 = vmul.f32 1.442695, %v553_v49  ;;  %v630_v54 = vsub.f32 %v1318_v4, %v628_v50 }
 0x2e4   : > { %v625_v55 = vpop.xlane.xlu0 %624  ;;  %v407_v56 = vsel %vm318_vm6, %v1360_v51, 0.0 }
 0x2e5   : > { %1121 = vpow2.f32 %v555_v53  ;;  %v629_v57 = vsub.f32 %v1314_v1, %v625_v55  ;;  %408 = vadd.xlane.f32.xlu0 %v407_v56  ;;  %v633_v59 = vmul.f32 1.442695, %v630_v54 }
 0x2e6   : > { %v704_v58 = vpop.xlane.xlu1 %703  ;;  %1123 = vpow2.f32 %v557_v52 }
 0x2e7   : > { %v1366_v60 = vpop.eup %1113  ;;  %v631_v61 = vmul.f32 1.442695, %v629_v57  ;;  %v706_v62 = vsub.f32 %v1326_v10, %v704_v58 }
 0x2e8   : > { %v701_v63 = vpop.xlane.xlu0 %700  ;;  %v334_v0 = vsel %vm318_vm6, %v1366_v60, 0.0  ;;  %v1371_v2 = vpop.eup %1115 }
 0x2e9   : > { %1125 = vpow2.f32 %v631_v61  ;;  %v705_v3 = vsub.f32 %v1322_v7, %v701_v63  ;;  %335 = vadd.xlane.f32.xlu1 %v334_v0  ;;  %v709_v5 = vmul.f32 1.442695, %v706_v62  ;;  %v410_v11 = vsel %vm318_vm6, %v1371_v2, 0.0 }
 0x2ea   : > { %v780_v1 = vpop.xlane.xlu1 %779  ;;  %1127 = vpow2.f32 %v633_v59 }
 0x2eb   : > { %v1374_v4 = vpop.eup %1117  ;;  %v707_v6 = vmul.f32 1.442695, %v705_v3  ;;  %v782_v8 = vsub.f32 %v1334_v16, %v780_v1 }
 0x2ec   : > { %v777_v9 = vpop.xlane.xlu0 %776  ;;  %v483_v10 = vsel %vm318_vm6, %v1374_v4, 0.0  ;;  %v1381_v12 = vpop.eup %1119 }
 0x2ed   : > { %1129 = vpow2.f32 %v707_v6  ;;  %v781_v7 = vsub.f32 %v1330_v13, %v777_v9  ;;  %484 = vadd.xlane.f32.xlu0 %v483_v10  ;;  %411 = vadd.xlane.f32.xlu1 %v410_v11  ;;  %v785_v17 = vmul.f32 1.442695, %v782_v8  ;;  %v486_v23 = vsel %vm318_vm6, %v1381_v12, 0.0 }
 0x2ee   : > { %v856_v14 = vpop.xlane.xlu1 %855  ;;  %1131 = vpow2.f32 %v709_v5 }
 0x2ef   : > { %v1384_v15 = vpop.eup %1121  ;;  %v783_v16 = vmul.f32 1.442695, %v781_v7  ;;  %v858_v18 = vsub.f32 %v1342_v22, %v856_v14 }
 0x2f0   : > { %v853_v20 = vpop.xlane.xlu0 %852  ;;  %v559_v21 = vsel %vm318_vm6, %v1384_v15, 0.0  ;;  %v1391_v24 = vpop.eup %1123 }
 0x2f1   : > { %1133 = vpow2.f32 %v783_v16  ;;  %v857_v13 = vsub.f32 %v1338_v19, %v853_v20  ;;  %560 = vadd.xlane.f32.xlu0 %v559_v21  ;;  %487 = vadd.xlane.f32.xlu1 %v486_v23  ;;  %v861_v26 = vmul.f32 1.442695, %v858_v18  ;;  %v562_v28 = vsel %vm318_vm6, %v1391_v24, 0.0 }
 0x2f2   : > { %1135 = vpow2.f32 %v785_v17 }
 0x2f3   : > { %v1394_v25 = vpop.eup %1125  ;;  %v859_v27 = vmul.f32 1.442695, %v857_v13 }
 0x2f4   : > { %v635_v22 = vsel %vm318_vm6, %v1394_v25, 0.0  ;;  %v1400_v29 = vpop.eup %1127 }
 0x2f5   : > { %1137 = vpow2.f32 %v859_v27  ;;  %636 = vadd.xlane.f32.xlu0 %v635_v22  ;;  %563 = vadd.xlane.f32.xlu1 %v562_v28  ;;  %v638_v31 = vsel %vm318_vm6, %v1400_v29, 0.0 }
 0x2f6   : > { %1139 = vpow2.f32 %v861_v26 }
 0x2f7   : > { %v1402_v30 = vpop.eup %1129 }
 0x2f8   : > { %v711_v19 = vsel %vm318_vm6, %v1402_v30, 0.0  ;;  %v1408_v32 = vpop.eup %1131 }
 0x2f9   : > { %712 = vadd.xlane.f32.xlu0 %v711_v19  ;;  %639 = vadd.xlane.f32.xlu1 %v638_v31  ;;  %v714_v35 = vsel %vm318_vm6, %v1408_v32, 0.0 }
 0x2fb   : > { %v1410_v33 = vpop.eup %1133 }
 0x2fc   : > { %v787_v34 = vsel %vm318_vm6, %v1410_v33, 0.0  ;;  %v1416_v36 = vpop.eup %1135 }
 0x2fd   : > { %788 = vadd.xlane.f32.xlu0 %v787_v34  ;;  %715 = vadd.xlane.f32.xlu1 %v714_v35  ;;  %v790_v39 = vsel %vm318_vm6, %v1416_v36, 0.0 }
 0x2ff   : > { %v1418_v37 = vpop.eup %1137 }
 0x300   : > { %v863_v38 = vsel %vm318_vm6, %v1418_v37, 0.0  ;;  %v1424_v40 = vpop.eup %1139 }
 0x301   : > { %864 = vadd.xlane.f32.xlu0 %v863_v38  ;;  %791 = vadd.xlane.f32.xlu1 %v790_v39  ;;  %v866_v41 = vsel %vm318_vm6, %v1424_v40, 0.0 }
 0x305   : > { %867 = vadd.xlane.f32.xlu1 %v866_v41 }
 0x36e   : > { %v333_v42 = vpop.xlane.xlu0 %332 }
 0x36f   : > { %1141 = vrcp.f32 %v333_v42 }
 0x372   : > { %v409_v44 = vpop.xlane.xlu0 %408 }
 0x373   : > { %1143 = vrcp.f32 %v409_v44 }
 0x376   : > { %v336_v46 = vpop.xlane.xlu1 %335 }
 0x377   : > { %1145 = vrcp.f32 %v336_v46 }
 0x379   : > { %v1142_v47 = vpop.eup %1141 }
 0x37a   : > { %v338_v48 = vmul.f32 %v1142_v47, %v1354_v43  ;;  %v485_v45 = vpop.xlane.xlu0 %484  ;;  %v412_v49 = vpop.xlane.xlu1 %411 }
 0x37b   : > { %1147 = vrcp.f32 %v485_v45 }
 0x37c   : > { %341 = vst.msk [vmem:[%s1432_s17] sm:$0xff] %vm318_vm6, %v338_v48  ;;  %1149 = vrcp.f32 %v412_v49 }
 0x37d   : > { %v1144_v50 = vpop.eup %1143 }
 0x37e   : > { %v414_v52 = vmul.f32 %v1144_v50, %v1360_v51  ;;  %v561_v53 = vpop.xlane.xlu0 %560  ;;  %v488_v54 = vpop.xlane.xlu1 %487 }
 0x37f   : > { %1151 = vrcp.f32 %v561_v53 }
 0x380   : > { %980 = vst.msk [vmem:[%s1432_s17 + $0x10] sm:$0xff] %vm318_vm6, %v414_v52  ;;  %1153 = vrcp.f32 %v488_v54 }
 0x381   : > { %v1146_v55 = vpop.eup %1145 }
 0x382   : > { %v340_v43 = vmul.f32 %v1146_v55, %v1366_v60  ;;  %v637_v56 = vpop.xlane.xlu0 %636  ;;  %v564_v57 = vpop.xlane.xlu1 %563 }
 0x383   : > { %1155 = vrcp.f32 %v637_v56 }
 0x384   : > { %342 = vst.msk [vmem:[%s1432_s17 + $0x8] sm:$0xff] %vm318_vm6, %v340_v43  ;;  %1157 = vrcp.f32 %v564_v57 }
 0x385   : > { %v1148_v58 = vpop.eup %1147 }
 0x386   : > { %v1150_v59 = vpop.eup %1149  ;;  %v490_v51 = vmul.f32 %v1148_v58, %v1374_v4  ;;  %v713_v61 = vpop.xlane.xlu0 %712 }
 0x387   : > { %v640_v62 = vpop.xlane.xlu1 %639  ;;  %v416_v63 = vmul.f32 %v1150_v59, %v1371_v2  ;;  %1159 = vrcp.f32 %v713_v61 }
 0x388   : > { %983 = vst.msk [vmem:[%s1432_s17 + $0x20] sm:$0xff] %vm318_vm6, %v490_v51  ;;  %1161 = vrcp.f32 %v640_v62 }
 0x389   : > { %v1152_v60 = vpop.eup %1151  ;;  %981 = vst.msk [vmem:[%s1432_s17 + $0x18] sm:$0xff] %vm318_vm6, %v416_v63 }
 0x38a   : > { %v1154_v0 = vpop.eup %1153  ;;  %v566_v3 = vmul.f32 %v1152_v60, %v1384_v15  ;;  %v789_v1 = vpop.xlane.xlu0 %788 }
 0x38b   : > { %v716_v5 = vpop.xlane.xlu1 %715  ;;  %v492_v4 = vmul.f32 %v1154_v0, %v1381_v12  ;;  %1163 = vrcp.f32 %v789_v1 }
 0x38c   : > { %986 = vst.msk [vmem:[%s1432_s17 + $0x30] sm:$0xff] %vm318_vm6, %v566_v3  ;;  %1165 = vrcp.f32 %v716_v5 }
 0x38d   : > { %v1156_v2 = vpop.eup %1155  ;;  %984 = vst.msk [vmem:[%s1432_s17 + $0x28] sm:$0xff] %vm318_vm6, %v492_v4 }
 0x38e   : > { %v1158_v6 = vpop.eup %1157  ;;  %v642_v8 = vmul.f32 %v1156_v2, %v1394_v25  ;;  %v865_v9 = vpop.xlane.xlu0 %864 }
 0x38f   : > { %v792_v10 = vpop.xlane.xlu1 %791  ;;  %v568_v11 = vmul.f32 %v1158_v6, %v1391_v24  ;;  %1167 = vrcp.f32 %v865_v9 }
 0x390   : > { %989 = vst.msk [vmem:[%s1432_s17 + $0x40] sm:$0xff] %vm318_vm6, %v642_v8  ;;  %1169 = vrcp.f32 %v792_v10 }
 0x391   : > { %v1160_v12 = vpop.eup %1159  ;;  %987 = vst.msk [vmem:[%s1432_s17 + $0x38] sm:$0xff] %vm318_vm6, %v568_v11 }
 0x392   : > { %v1162_v7 = vpop.eup %1161  ;;  %v718_v14 = vmul.f32 %v1160_v12, %v1402_v30 }
 0x393   : > { %v868_v15 = vpop.xlane.xlu1 %867  ;;  %v644_v17 = vmul.f32 %v1162_v7, %v1400_v29 }
 0x394   : > { %1171 = vrcp.f32 %v868_v15  ;;  %992 = vst.msk [vmem:[%s1432_s17 + $0x50] sm:$0xff] %vm318_vm6, %v718_v14 }
 0x395   : > { %v1164_v16 = vpop.eup %1163  ;;  %990 = vst.msk [vmem:[%s1432_s17 + $0x48] sm:$0xff] %vm318_vm6, %v644_v17 }
 0x396   : > { %v1166_v18 = vpop.eup %1165  ;;  %v794_v20 = vmul.f32 %v1164_v16, %v1410_v33 }
 0x397   : > { %v720_v21 = vmul.f32 %v1166_v18, %v1408_v32 }
 0x398   : > { %995 = vst.msk [vmem:[%s1432_s17 + $0x60] sm:$0xff] %vm318_vm6, %v794_v20 }
 0x399   : > { %v1168_v23 = vpop.eup %1167  ;;  %993 = vst.msk [vmem:[%s1432_s17 + $0x58] sm:$0xff] %vm318_vm6, %v720_v21 }
 0x39a   : > { %v1170_v24 = vpop.eup %1169  ;;  %v870_v13 = vmul.f32 %v1168_v23, %v1418_v37 }
 0x39b   : > { %v796_v25 = vmul.f32 %v1170_v24, %v1416_v36 }
 0x39c   : > { %998 = vst.msk [vmem:[%s1432_s17 + $0x70] sm:$0xff] %vm318_vm6, %v870_v13 }
 0x39d   : > { %996 = vst.msk [vmem:[%s1432_s17 + $0x68] sm:$0xff] %vm318_vm6, %v796_v25 }
 0x39e   : > { %v1172_v26 = vpop.eup %1171 }
 0x39f   : > { %v872_v27 = vmul.f32 %v1172_v26, %v1424_v40 }
 0x3a1   : > { %999 = vst.msk [vmem:[%s1432_s17 + $0x78] sm:$0xff] %vm318_vm6, %v872_v27 }
 0x3a2 PF: > { %s14_s12 = sadd.s32 1, %s1179_s12  }
 0x3a3   : > { %p11_p4 = scmp.ge.s32.totalorder %s14_s12, 4  }
 0x3a5   :  { %13 = sbr.rel (!%p11_p4) target bundleno = 1 (0x1), region = 77 }

// kernel: transmil_forward.14
= control target key start
LH: loop header
LB: loop body
LE: loop exit
PB: predicated region body
PF: predicated region fallthrough
CT: control target
= control target key end

     0   :  { %s2659_s11 = smov 0   ;;  %s2799_s0 = inlined_call_operand.vmem [shape: f32[16,16,16], index: 0, kind: input, shape index: {}]   ;;  %s2800_s1 = inlined_call_operand.<no memory space> [shape: f32[1,1], index: 1, kind: input, shape index: {}]   ;;  %s2801_s2 = inlined_call_operand.vmem [shape: f32[16,16,16], index: 2, kind: output, shape index: {}]  }
   0x1   :  { %v7_v0 = vstv %s2800_s1 }
   0x2   :  { %8 = vst [vmem:[#allocation2] sm:$0x1] %v7_v0 }
   0x3 LB: > { %s2194_s12 = sadd.s32 4294967295, %s2637_s11   ;;  %p2198_p0 = scmp.ge.s32.totalorder %s2637_s11, 1  ;;  %s2637_s11 = sphi %s2659_s11, %s14_s11  }
   0x4   : > { %p114_p1 = scmp.lt.s32.totalorder %s2637_s11, 17 }
   0x6   : > { %p115_p2 = pnand %p2198_p0, %p114_p1 }
   0x7   : > { %v2639_v2 = vmov (!%p115_p2), 0   ;;  %p136_p3 = scmp.lt.s32.totalorder (!%p115_p2), %s2194_s12, 15  ;;  %vm204_vm0 = vcmask (!%p115_p2), 130048   ;;  %v193_v12 = vlaneseq (!%p115_p2)  ;;  %v2640_v16 = vmov (!%p115_p2), 0.0  }
   0x8   : > { %118 = sbr.rel (%p115_p2) target bundleno = 5480 (0x1568), region = 28  ;;  %2628 = vset.pattern.permute.xlu0 (!%p115_p2), %v2639_v2 }
   0x9   : > { %v2203_v1 = vld [vmem:[#allocation2] ss:$0 sm:$0xff] (!%p115_p2)  ;;  %v194_v13 = vshrl.u32 (!%p115_p2), %v193_v12, 7  ;;  %v197_v15 = vand.u32 (!%p115_p2), 127, %v193_v12 }
   0xa   : > { %187 = vperm.xlu0 (!%p115_p2), %2628, %v2203_v1  }
   0xb   : > { %v195_v14 = vadd.s32 (!%p115_p2), 8, %v194_v13  ;;  %vm198_vm2 = vcmp.eq.s32.totalorder (!%p115_p2), %v194_v13, %v197_v15 }
   0xc   : > { %v2204_v18 = vsel (!%p115_p2), %vm198_vm2, 1.0, %v2640_v16 }
   0xd   : > { %vm199_vm1 = vcmp.eq.s32.totalorder (!%p115_p2), %v195_v14, %v197_v15  ;;  %v2687_v20 = vmul.f32 (!%p115_p2), 7.0, %v2204_v18  ;;  %v2697_v27 = vmul.f32 (!%p115_p2), 15.0, %v2204_v18  ;;  %v2706_v34 = vmul.f32 (!%p115_p2), 13.0, %v2204_v18 }
   0xe   : > { %v2205_v17 = vsel (!%p115_p2), %vm199_vm1, 1.0, %v2640_v16 }
   0xf   : > { %s2803_s12 = smov (!%p136_p3, %s2194_s12), 15  ;;  %v2685_v19 = vmul.f32 7.0, %v2205_v17  ;;  %v2695_v26 = vmul.f32 15.0, %v2205_v17  ;;  %v2704_v33 = vmul.f32 13.0, %v2205_v17 }
  0x10   : > { %s2256_s1 = sshll.u32 %s2803_s12, 4 }
  0x11   : > { %s140_s15 = scalar_lea.vmem %s2799_s0, %s2256_s1  ;;  %s145_s18 = scalar_lea.vmem %s2801_s2, %s2256_s1 }
  0x12   : > { %v2675_v3 = vld [vmem:[%s140_s15] sm:$0xff]  ;;  %v2678_v4 = vld [vmem:[%s140_s15 + $0x8] sm:$0xff] }
  0x13   : > { %2358 = vmatprep.mubr.msk.f32.mxu0 %vm204_vm0, %v2675_v3 }
  0x28   : > { %148 = vxpose.xlu0.b32.start [1/2] (short) (narrow) %v2675_v3, 16 }
  0x2c   : > { %149 = vxpose.xlu0.b32.end [2/2] (short) (narrow) %v2678_v4, 16 }
  0x89   : > { %v188_v5 = vpop.permute.xlu0 %187 }
  0x8a   : > { %2629 = vrcp.f32 %v188_v5 }
  0x94   : > { %v2630_v7 = vpop.eup %2629 }
  0xa8   : > { %v164_v6 = vpop.trf.xlu0 }
  0xa9   : > { %v191_v9 = vmul.f32 %v2630_v7, %v164_v6 }
  0xac   : > { %v165_v8 = vpop.trf.xlu0 }
  0xad   : > { %v192_v10 = vmul.f32 %v2630_v7, %v165_v8 }
  0xaf   : > { %v2522_v11 = vpack.c.bf16 %v192_v10, %v191_v9 }
  0xb1   : > { %2523 = vmatprep.subr.bf16.mxu0 %v2522_v11 }
  0xb2   : > { %2525 = vmatpush3.bf16.msra.mxu0 %v2522_v11 }
  0xb5   : > { %2359 = vmatmul.mubr.msk.f32.vlgmr.msra.gmra.mrb[0].mxu0 %vm204_vm0, %v2678_v4 }
 0x188   : > { %v2360_v21 = vpop.f32.mrb[0].mxu0 }
 0x189   : > { %v277_v22 = vpop.f32.mrb[1].mxu0  ;;  %v289_v23 = vsub.f32 %v2685_v19, %v2360_v21 }
 0x18a   : > { %2365 = vmatprep.mubr.msk.f32.mxu1 %vm204_vm0, %v277_v22  ;;  %2372 = vmatprep.mubr.msk.f32.mxu0 %vm204_vm0, %v277_v22  ;;  %v288_v24 = vsub.f32 %v2687_v20, %v277_v22 }
 0x18c   : > { %v2526_v25 = vpack.c.bf16 %v289_v23, %v288_v24 }
 0x18e   : > { %2527 = vmatprep.subr.bf16.mxu1 %v2526_v25 }
 0x18f   : > { %2529 = vmatpush3.bf16.msra.mxu1 %v2526_v25 }
 0x192   : > { %2366 = vmatmul.mubr.msk.f32.vlgmr.msra.gmra.mrb[0].mxu1 %vm204_vm0, %v2360_v21 }
 0x193   : > { %2379 = vmatprep.mubr.msk.f32.mxu1 %vm204_vm0, %v191_v9 }
 0x265   : > { %v2367_v28 = vpop.f32.mrb[0].mxu1 }
 0x266   : > { %v374_v29 = vsub.f32 %v2695_v26, %v2367_v28  ;;  %v364_v30 = vpop.f32.mrb[1].mxu1 }
 0x267   : > { %v373_v31 = vsub.f32 %v2697_v27, %v364_v30 }
 0x269   : > { %v2530_v32 = vpack.c.bf16 %v374_v29, %v373_v31 }
 0x26b   : > { %2531 = vmatprep.subr.bf16.mxu0 %v2530_v32 }
 0x26c   : > { %2533 = vmatpush3.bf16.msra.mxu0 %v2530_v32 }
 0x26f   : > { %2373 = vmatmul.mubr.msk.f32.vlgmr.msra.gmra.mrb[2].mxu0 %vm204_vm0, %v2360_v21 }
 0x270   : > { %2386 = vmatprep.mubr.msk.f32.mxu0 %vm204_vm0, %v2675_v3 }
 0x342   : > { %v2374_v35 = vpop.f32.mrb[2].mxu0 }
 0x343   : > { %v453_v36 = vsub.f32 %v2704_v33, %v2374_v35  ;;  %v443_v37 = vpop.f32.mrb[3].mxu0 }
 0x344   : > { %v452_v38 = vsub.f32 %v2706_v34, %v443_v37 }
 0x346   : > { %v2534_v39 = vpack.c.bf16 %v453_v36, %v452_v38 }
 0x348   : > { %2535 = vmatprep.subr.bf16.mxu1 %v2534_v39 }
 0x349   : > { %2537 = vmatpush3.bf16.msra.mxu1 %v2534_v39 }
 0x34c   : > { %2380 = vmatmul.mubr.msk.f32.vlgmr.msra.gmra.mrb[2].mxu1 %vm204_vm0, %v192_v10 }
 0x41f   : > { %v2381_v40 = vpop.f32.mrb[2].mxu1 }
 0x420   : > { %v536_v41 = vmul.f32 0.25, %v2381_v40  ;;  %v526_v42 = vpop.f32.mrb[3].mxu1 }
 0x421   : > { %v535_v43 = vmul.f32 0.25, %v526_v42 }
 0x423   : > { %v2538_v44 = vpack.c.bf16 %v536_v41, %v535_v43 }
 0x425   : > { %2539 = vmatprep.subr.bf16.mxu0 %v2538_v44 }
 0x426   : > { %2541 = vmatpush3.bf16.msra.mxu0 %v2538_v44 }
 0x429   : > { %2387 = vmatmul.mubr.msk.f32.vlgmr.msra.gmra.mrb[4].mxu0 %vm204_vm0, %v2678_v4 }
 0x4fc   : > { %v2388_v45 = vpop.f32.mrb[4].mxu0 }
 0x4fd   : > { %v613_v46 = vsub.f32 %v2685_v19, %v2388_v45  ;;  %v603_v47 = vpop.f32.mrb[5].mxu0 }
 0x4fe   : > { %v612_v48 = vsub.f32 %v2687_v20, %v603_v47  ;;  %2393 = vmatprep.mubr.msk.f32.mxu1 %vm204_vm0, %v603_v47  ;;  %2400 = vmatprep.mubr.msk.f32.mxu0 %vm204_vm0, %v603_v47 }
 0x500   : > { %v2542_v49 = vpack.c.bf16 %v613_v46, %v612_v48 }
 0x502   : > { %2543 = vmatprep.subr.bf16.mxu1 %v2542_v49 }
 0x503   : > { %2545 = vmatpush3.bf16.msra.mxu1 %v2542_v49 }
 0x506   : > { %2394 = vmatmul.mubr.msk.f32.vlgmr.msra.gmra.mrb[4].mxu1 %vm204_vm0, %v2388_v45 }
 0x507   : > { %2407 = vmatprep.mubr.msk.f32.mxu1 %vm204_vm0, %v535_v43 }
 0x5d9   : > { %v2395_v50 = vpop.f32.mrb[4].mxu1 }
 0x5da   : > { %v696_v51 = vsub.f32 %v2695_v26, %v2395_v50  ;;  %v686_v52 = vpop.f32.mrb[5].mxu1 }
 0x5db   : > { %v695_v53 = vsub.f32 %v2697_v27, %v686_v52 }
 0x5dd   : > { %v2546_v54 = vpack.c.bf16 %v696_v51, %v695_v53 }
 0x5df   : > { %2547 = vmatprep.subr.bf16.mxu0 %v2546_v54 }
 0x5e0   : > { %2549 = vmatpush3.bf16.msra.mxu0 %v2546_v54 }
 0x5e3   : > { %2401 = vmatmul.mubr.msk.f32.vlgmr.msra.gmra.mrb[6].mxu0 %vm204_vm0, %v2388_v45 }
 0x5e4   : > { %2414 = vmatprep.mubr.msk.f32.mxu0 %vm204_vm0, %v2675_v3 }
 0x6b6   : > { %v2402_v55 = vpop.f32.mrb[6].mxu0 }
 0x6b7   : > { %v773_v56 = vsub.f32 %v2704_v33, %v2402_v55  ;;  %v763_v57 = vpop.f32.mrb[7].mxu0 }
 0x6b8   : > { %v772_v58 = vsub.f32 %v2706_v34, %v763_v57 }
 0x6ba   : > { %v2550_v59 = vpack.c.bf16 %v773_v56, %v772_v58 }
 0x6bc   : > { %2551 = vmatprep.subr.bf16.mxu1 %v2550_v59 }
 0x6bd   : > { %2553 = vmatpush3.bf16.msra.mxu1 %v2550_v59 }
 0x6c0   : > { %2408 = vmatmul.mubr.msk.f32.vlgmr.msra.gmra.mrb[6].mxu1 %vm204_vm0, %v536_v41 }
 0x793   : > { %v2409_v60 = vpop.f32.mrb[6].mxu1 }
 0x794   : > { %v856_v61 = vmul.f32 0.25, %v2409_v60  ;;  %v846_v62 = vpop.f32.mrb[7].mxu1 }
 0x795   : > { %v855_v63 = vmul.f32 0.25, %v846_v62 }
 0x797   : > { %v2554_v0 = vpack.c.bf16 %v856_v61, %v855_v63 }
 0x799   : > { %2555 = vmatprep.subr.bf16.mxu0 %v2554_v0 }
 0x79a   : > { %2557 = vmatpush3.bf16.msra.mxu0 %v2554_v0 }
 0x79d   : > { %2415 = vmatmul.mubr.msk.f32.vlgmr.msra.gmra.mrb[8].mxu0 %vm204_vm0, %v2678_v4 }
 0x870   : > { %v2416_v1 = vpop.f32.mrb[8].mxu0 }
 0x871   : > { %v933_v2 = vsub.f32 %v2685_v19, %v2416_v1  ;;  %v923_v5 = vpop.f32.mrb[9].mxu0 }
 0x872   : > { %v932_v6 = vsub.f32 %v2687_v20, %v923_v5  ;;  %2421 = vmatprep.mubr.msk.f32.mxu1 %vm204_vm0, %v923_v5  ;;  %2428 = vmatprep.mubr.msk.f32.mxu0 %vm204_vm0, %v923_v5 }
 0x874   : > { %v2558_v7 = vpack.c.bf16 %v933_v2, %v932_v6 }
 0x876   : > { %2559 = vmatprep.subr.bf16.mxu1 %v2558_v7 }
 0x877   : > { %2561 = vmatpush3.bf16.msra.mxu1 %v2558_v7 }
 0x87a   : > { %2422 = vmatmul.mubr.msk.f32.vlgmr.msra.gmra.mrb[8].mxu1 %vm204_vm0, %v2416_v1 }
 0x87b   : > { %2435 = vmatprep.mubr.msk.f32.mxu1 %vm204_vm0, %v855_v63 }
 0x94d   : > { %v2423_v8 = vpop.f32.mrb[8].mxu1 }
 0x94e   : > { %v1016_v9 = vsub.f32 %v2695_v26, %v2423_v8  ;;  %v1006_v10 = vpop.f32.mrb[9].mxu1 }
 0x94f   : > { %v1015_v11 = vsub.f32 %v2697_v27, %v1006_v10 }
 0x951   : > { %v2562_v12 = vpack.c.bf16 %v1016_v9, %v1015_v11 }
 0x953   : > { %2563 = vmatprep.subr.bf16.mxu0 %v2562_v12 }
 0x954   : > { %2565 = vmatpush3.bf16.msra.mxu0 %v2562_v12 }
 0x957   : > { %2429 = vmatmul.mubr.msk.f32.vlgmr.msra.gmra.mrb[10].mxu0 %vm204_vm0, %v2416_v1 }
 0x958   : > { %2442 = vmatprep.mubr.msk.f32.mxu0 %vm204_vm0, %v2675_v3 }
 0xa2a   : > { %v2430_v13 = vpop.f32.mrb[10].mxu0 }
 0xa2b   : > { %v1093_v14 = vsub.f32 %v2704_v33, %v2430_v13  ;;  %v1083_v15 = vpop.f32.mrb[11].mxu0 }
 0xa2c   : > { %v1092_v16 = vsub.f32 %v2706_v34, %v1083_v15 }
 0xa2e   : > { %v2566_v17 = vpack.c.bf16 %v1093_v14, %v1092_v16 }
 0xa30   : > { %2567 = vmatprep.subr.bf16.mxu1 %v2566_v17 }
 0xa31   : > { %2569 = vmatpush3.bf16.msra.mxu1 %v2566_v17 }
 0xa34   : > { %2436 = vmatmul.mubr.msk.f32.vlgmr.msra.gmra.mrb[10].mxu1 %vm204_vm0, %v856_v61 }
 0xb07   : > { %v2437_v18 = vpop.f32.mrb[10].mxu1 }
 0xb08   : > { %v1176_v21 = vmul.f32 0.25, %v2437_v18  ;;  %v1166_v22 = vpop.f32.mrb[11].mxu1 }
 0xb09   : > { %v1175_v23 = vmul.f32 0.25, %v1166_v22 }
 0xb0b   : > { %v2570_v24 = vpack.c.bf16 %v1176_v21, %v1175_v23 }
 0xb0d   : > { %2571 = vmatprep.subr.bf16.mxu0 %v2570_v24 }
 0xb0e   : > { %2573 = vmatpush3.bf16.msra.mxu0 %v2570_v24 }
 0xb11   : > { %2443 = vmatmul.mubr.msk.f32.vlgmr.msra.gmra.mrb[12].mxu0 %vm204_vm0, %v2678_v4 }
 0xbe4   : > { %v2444_v25 = vpop.f32.mrb[12].mxu0 }
 0xbe5   : > { %v1253_v28 = vsub.f32 %v2685_v19, %v2444_v25  ;;  %v1243_v29 = vpop.f32.mrb[13].mxu0 }
 0xbe6   : > { %v1252_v30 = vsub.f32 %v2687_v20, %v1243_v29  ;;  %2449 = vmatprep.mubr.msk.f32.mxu1 %vm204_vm0, %v1243_v29  ;;  %2456 = vmatprep.mubr.msk.f32.mxu0 %vm204_vm0, %v1243_v29 }
 0xbe8   : > { %v2574_v31 = vpack.c.bf16 %v1253_v28, %v1252_v30 }
 0xbea   : > { %2575 = vmatprep.subr.bf16.mxu1 %v2574_v31 }
 0xbeb   : > { %2577 = vmatpush3.bf16.msra.mxu1 %v2574_v31 }
 0xbee   : > { %2450 = vmatmul.mubr.msk.f32.vlgmr.msra.gmra.mrb[12].mxu1 %vm204_vm0, %v2444_v25 }
 0xbef   : > { %2463 = vmatprep.mubr.msk.f32.mxu1 %vm204_vm0, %v1175_v23 }
 0xcc1   : > { %v2451_v32 = vpop.f32.mrb[12].mxu1 }
 0xcc2   : > { %v1336_v35 = vsub.f32 %v2695_v26, %v2451_v32  ;;  %v1326_v36 = vpop.f32.mrb[13].mxu1 }
 0xcc3   : > { %v1335_v37 = vsub.f32 %v2697_v27, %v1326_v36 }
 0xcc5   : > { %v2578_v38 = vpack.c.bf16 %v1336_v35, %v1335_v37 }
 0xcc7   : > { %2579 = vmatprep.subr.bf16.mxu0 %v2578_v38 }
 0xcc8   : > { %2581 = vmatpush3.bf16.msra.mxu0 %v2578_v38 }
 0xccb   : > { %2457 = vmatmul.mubr.msk.f32.vlgmr.msra.gmra.mrb[14].mxu0 %vm204_vm0, %v2444_v25 }
 0xccc   : > { %2470 = vmatprep.mubr.msk.f32.mxu0 %vm204_vm0, %v2675_v3 }
 0xd9e   : > { %v2458_v39 = vpop.f32.mrb[14].mxu0 }
 0xd9f   : > { %v1413_v40 = vsub.f32 %v2704_v33, %v2458_v39  ;;  %v1403_v41 = vpop.f32.mrb[15].mxu0 }
 0xda0   : > { %v1412_v42 = vsub.f32 %v2706_v34, %v1403_v41 }
 0xda2   : > { %v2582_v43 = vpack.c.bf16 %v1413_v40, %v1412_v42 }
 0xda4   : > { %2583 = vmatprep.subr.bf16.mxu1 %v2582_v43 }
 0xda5   : > { %2585 = vmatpush3.bf16.msra.mxu1 %v2582_v43 }
 0xda8   : > { %2464 = vmatmul.mubr.msk.f32.vlgmr.msra.gmra.mrb[14].mxu1 %vm204_vm0, %v1176_v21 }
 0xe7b   : > { %v2465_v44 = vpop.f32.mrb[14].mxu1 }
 0xe7c   : > { %v1496_v45 = vmul.f32 0.25, %v2465_v44  ;;  %v1486_v46 = vpop.f32.mrb[15].mxu1 }
 0xe7d   : > { %v1495_v47 = vmul.f32 0.25, %v1486_v46 }
 0xe7f   : > { %v2586_v48 = vpack.c.bf16 %v1496_v45, %v1495_v47 }
 0xe81   : > { %2587 = vmatprep.subr.bf16.mxu0 %v2586_v48 }
 0xe82   : > { %2589 = vmatpush3.bf16.msra.mxu0 %v2586_v48 }
 0xe85   : > { %2471 = vmatmul.mubr.msk.f32.vlgmr.msra.gmra.mrb[16].mxu0 %vm204_vm0, %v2678_v4 }
 0xf58   : > { %v2472_v49 = vpop.f32.mrb[16].mxu0 }
 0xf59   : > { %v1573_v50 = vsub.f32 %v2685_v19, %v2472_v49  ;;  %v1563_v51 = vpop.f32.mrb[17].mxu0 }
 0xf5a   : > { %v1572_v52 = vsub.f32 %v2687_v20, %v1563_v51  ;;  %2477 = vmatprep.mubr.msk.f32.mxu1 %vm204_vm0, %v1563_v51  ;;  %2484 = vmatprep.mubr.msk.f32.mxu0 %vm204_vm0, %v1563_v51 }
 0xf5c   : > { %v2590_v53 = vpack.c.bf16 %v1573_v50, %v1572_v52 }
 0xf5e   : > { %2591 = vmatprep.subr.bf16.mxu1 %v2590_v53 }
 0xf5f   : > { %2593 = vmatpush3.bf16.msra.mxu1 %v2590_v53 }
 0xf62   : > { %2478 = vmatmul.mubr.msk.f32.vlgmr.msra.gmra.mrb[16].mxu1 %vm204_vm0, %v2472_v49 }
 0xf63   : > { %2491 = vmatprep.mubr.msk.f32.mxu1 %vm204_vm0, %v1495_v47 }
0x1035   : > { %v2479_v54 = vpop.f32.mrb[16].mxu1 }
0x1036   : > { %v1656_v55 = vsub.f32 %v2695_v26, %v2479_v54  ;;  %v1646_v56 = vpop.f32.mrb[17].mxu1 }
0x1037   : > { %v1655_v57 = vsub.f32 %v2697_v27, %v1646_v56 }
0x1039   : > { %v2594_v58 = vpack.c.bf16 %v1656_v55, %v1655_v57 }
0x103b   : > { %2595 = vmatprep.subr.bf16.mxu0 %v2594_v58 }
0x103c   : > { %2597 = vmatpush3.bf16.msra.mxu0 %v2594_v58 }
0x103f   : > { %2485 = vmatmul.mubr.msk.f32.vlgmr.msra.gmra.mrb[18].mxu0 %vm204_vm0, %v2472_v49 }
0x1040   : > { %2498 = vmatprep.mubr.msk.f32.mxu0 %vm204_vm0, %v2675_v3 }
0x1112   : > { %v2486_v59 = vpop.f32.mrb[18].mxu0 }
0x1113   : > { %v1733_v60 = vsub.f32 %v2704_v33, %v2486_v59  ;;  %v1723_v61 = vpop.f32.mrb[19].mxu0 }
0x1114   : > { %v1732_v62 = vsub.f32 %v2706_v34, %v1723_v61 }
0x1116   : > { %v2598_v63 = vpack.c.bf16 %v1733_v60, %v1732_v62 }
0x1118   : > { %2599 = vmatprep.subr.bf16.mxu1 %v2598_v63 }
0x1119   : > { %2601 = vmatpush3.bf16.msra.mxu1 %v2598_v63 }
0x111c   : > { %2492 = vmatmul.mubr.msk.f32.vlgmr.msra.gmra.mrb[18].mxu1 %vm204_vm0, %v1496_v45 }
0x11ef   : > { %v2493_v0 = vpop.f32.mrb[18].mxu1 }
0x11f0   : > { %v1816_v1 = vmul.f32 0.25, %v2493_v0  ;;  %v1806_v2 = vpop.f32.mrb[19].mxu1 }
0x11f1   : > { %v1815_v5 = vmul.f32 0.25, %v1806_v2 }
0x11f3   : > { %v2602_v6 = vpack.c.bf16 %v1816_v1, %v1815_v5 }
0x11f5   : > { %2603 = vmatprep.subr.bf16.mxu0 %v2602_v6 }
0x11f6   : > { %2605 = vmatpush3.bf16.msra.mxu0 %v2602_v6 }
0x11f9   : > { %2499 = vmatmul.mubr.msk.f32.vlgmr.msra.gmra.mrb[20].mxu0 %vm204_vm0, %v2678_v4 }
0x12cc   : > { %v2500_v3 = vpop.f32.mrb[20].mxu0 }
0x12cd   : > { %v1893_v7 = vsub.f32 %v2685_v19, %v2500_v3  ;;  %v1883_v8 = vpop.f32.mrb[21].mxu0 }
0x12ce   : > { %v1892_v9 = vsub.f32 %v2687_v20, %v1883_v8  ;;  %2505 = vmatprep.mubr.msk.f32.mxu1 %vm204_vm0, %v1883_v8  ;;  %2512 = vmatprep.mubr.msk.f32.mxu0 %vm204_vm0, %v1883_v8 }
0x12d0   : > { %v2606_v10 = vpack.c.bf16 %v1893_v7, %v1892_v9 }
0x12d2   : > { %2607 = vmatprep.subr.bf16.mxu1 %v2606_v10 }
0x12d3   : > { %2609 = vmatpush3.bf16.msra.mxu1 %v2606_v10 }
0x12d6   : > { %2506 = vmatmul.mubr.msk.f32.vlgmr.msra.gmra.mrb[20].mxu1 %vm204_vm0, %v2500_v3 }
0x12d7   : > { %2519 = vmatprep.mubr.msk.f32.mxu1 %vm204_vm0, %v1815_v5 }
0x13a9   : > { %v2507_v11 = vpop.f32.mrb[20].mxu1 }
0x13aa   : > { %v1976_v4 = vsub.f32 %v2695_v26, %v2507_v11  ;;  %v1966_v12 = vpop.f32.mrb[21].mxu1 }
0x13ab   : > { %v1975_v19 = vsub.f32 %v2697_v27, %v1966_v12 }
0x13ad   : > { %v2610_v13 = vpack.c.bf16 %v1976_v4, %v1975_v19 }
0x13af   : > { %2611 = vmatprep.subr.bf16.mxu0 %v2610_v13 }
0x13b0   : > { %2613 = vmatpush3.bf16.msra.mxu0 %v2610_v13 }
0x13b3   : > { %2513 = vmatmul.mubr.msk.f32.vlgmr.msra.gmra.mrb[22].mxu0 %vm204_vm0, %v2500_v3 }
0x1486   : > { %v2514_v20 = vpop.f32.mrb[22].mxu0 }
0x1487   : > { %v2053_v14 = vsub.f32 %v2704_v33, %v2514_v20  ;;  %v2043_v15 = vpop.f32.mrb[23].mxu0 }
0x1488   : > { %v2052_v16 = vsub.f32 %v2706_v34, %v2043_v15 }
0x148a   : > { %v2614_v17 = vpack.c.bf16 %v2053_v14, %v2052_v16 }
0x148c   : > { %2615 = vmatprep.subr.bf16.mxu1 %v2614_v17 }
0x148d   : > { %2617 = vmatpush3.bf16.msra.mxu1 %v2614_v17 }
0x1490   : > { %2520 = vmatmul.mubr.msk.f32.vlgmr.msra.gmra.mrb[22].mxu1 %vm204_vm0, %v1816_v1 }
0x1563   : > { %v2521_v26 = vpop.f32.mrb[22].mxu1 }
0x1564   : > { %v2136_v27 = vmul.f32 0.25, %v2521_v26  ;;  %v2126_v18 = vpop.f32.mrb[23].mxu1 }
0x1565   : > { %v2135_v21 = vmul.f32 0.25, %v2126_v18 }
0x1566   : > { %2138 = vst.msk [vmem:[%s145_s18 + $0x8] sm:$0xff] %vm204_vm0, %v2136_v27 }
0x1567   : > { %2137 = vst.msk [vmem:[%s145_s18] sm:$0xff] %vm204_vm0, %v2135_v21 }
0x1568 PF: > { %s14_s11 = sadd.s32 1, %s2637_s11  }
0x1569   : > { %p11_p4 = scmp.ge.s32.totalorder %s14_s11, 18  }
0x156b   :  { %13 = sbr.rel (!%p11_p4) target bundleno = 3 (0x3), region = 58 }

// kernel: transmil_forward.21
= control target key start
LH: loop header
LB: loop body
LE: loop exit
PB: predicated region body
PF: predicated region fallthrough
CT: control target
= control target key end

     0   :  { %vm24_vm0 = vcmask 254976   ;;  %v152_v8 = vmov 0.0   ;;  %vm153_vm1 = vmmov 0   ;;  %vm79_vm2 = vcmask 261120   ;;  %s205_s0 = inlined_call_operand.vmem [shape: f32[2,32], index: 0, kind: input, shape index: {}]   ;;  %s206_s3 = inlined_call_operand.vmem [shape: bf16[32,1], index: 3, kind: input, shape index: {}]   ;;  %s207_s4 = inlined_call_operand.<no memory space> [shape: f32[1,1], index: 4, kind: input, shape index: {}]   ;;  %s208_s1 = inlined_call_operand.vmem [shape: f32[1,32], index: 1, kind: input, shape index: {}]   ;;  %s209_s2 = inlined_call_operand.vmem [shape: f32[1,32], index: 2, kind: input, shape index: {}]   ;;  %s210_s5 = inlined_call_operand.vmem [shape: f32[2,1], index: 5, kind: output, shape index: {}]  }
   0x1   :  { %v23_v0 = vld [vmem:[%s205_s0] sm:$0x3]  ;;  %138 = vmatprep.subr.bf16.mxu0 %v152_v8  ;;  %v149_v9 = vld [vmem:[%s206_s3 + $0x8] sm:$0xff]   ;;  %142 = vmatprep.mubr.msk.bf16.mxu0 %vm153_vm1, %v152_v8  ;;  %v10_v10 = vstv %s207_s4  ;;  %vm123_vm3 = vcmask 1024  }
   0x2   :  { %v25_v1 = vsel %vm24_vm0, %v23_v0, 0.0  ;;  %v148_v7 = vld [vmem:[%s206_s3] sm:$0xff]   ;;  %11 = vst [vmem:[#allocation2] sm:$0x1] %v10_v10 }
   0x3   :  { %26 = vadd.xlane.f32.xlu0 %v25_v1  ;;  %139 = vmatpush3.bf16.msra.mxu0 %v148_v7  ;;  %v129_v15 = vld [vmem:[%s208_s1] ss:$0 sm:$0xff] }
   0x4   :  { %140 = vmatprep.subr.bf16.mxu0 %v152_v8  ;;  %v130_v17 = vld [vmem:[%s209_s2] ss:$0 sm:$0xff] }
   0x7   :  { %141 = vmatpush3.bf16.msra.mxu0 %v149_v9 }
   0x9   :  { %v131_v21 = vld [vmem:[#allocation2] ss:$0 sm:$0xff] }
  0x90   :  { %v27_v2 = vpop.xlane.xlu0 %26 }
  0x91   :  { %v29_v3 = vmul.f32 0.03125, %v27_v2 }
  0x93   :  { %v30_v4 = vsub.f32 %v23_v0, %v29_v3 }
  0x95   :  { %v31_v5 = vmul.f32 %v30_v4, %v30_v4 }
  0x97   :  { %v32_v6 = vsel %vm24_vm0, %v31_v5, 0.0 }
  0x98   :  { %33 = vadd.xlane.f32.xlu0 %v32_v6 }
 0x125   :  { %v34_v11 = vpop.xlane.xlu0 %33 }
 0x126   :  { %v35_v12 = vmul.f32 0.03125, %v34_v11 }
 0x128   :  { %v36_v13 = vadd.f32 1e-05, %v35_v12 }
 0x12a   :  { %150 = vrsqrt.f32 %v36_v13 }
 0x134   :  { %v151_v14 = vpop.eup %150 }
 0x135   :  { %v38_v16 = vmul.f32 %v151_v14, %v30_v4 }
 0x137   :  { %v46_v18 = vmul.f32 %v129_v15, %v38_v16 }
 0x139   :  { %v54_v19 = vadd.f32 %v130_v17, %v46_v18 }
 0x13b   :  { %v55_v20 = vpack.c.bf16 %v54_v19, %v54_v19 }
 0x13d   :  { %143 = vmatmul.mubr.msk.bf16.vlgmr.msra.gmra.mrb[0].mxu0 %vm79_vm2, %v55_v20 }
 0x210   :  { %v117_v22 = vpop.f32.mrb[0].mxu0 }
 0x211   :  { %v118_v23 = vadd.f32 %v131_v21, %v117_v22  ;;  %v144_v24 = vpop.f32.mrb[1].mxu0 }
 0x212   :  { %v120_v25 = vpop.f32.mrb[2].mxu0 }
 0x213   :  { %124 = vst.msk [vmem:[%s210_s5] sm:$0x3] %vm123_vm3, %v118_v23  ;;  %v145_v26 = vpop.f32.mrb[3].mxu0 }

// kernel: transmil_forward.16
= control target key start
LH: loop header
LB: loop body
LE: loop exit
PB: predicated region body
PF: predicated region fallthrough
CT: control target
= control target key end

     0   :  { %s1690_s12 = smov 0   ;;  %s2622_s0 = inlined_call_operand.vmem [shape: f32[2,10,10,32], index: 0, kind: input, shape index: {}]   ;;  %s2623_s1 = inlined_call_operand.vmem [shape: f32[49,32], index: 1, kind: input, shape index: {}]   ;;  %s2624_s2 = inlined_call_operand.vmem [shape: f32[1,1,32], index: 2, kind: input, shape index: {}]   ;;  %s2625_s3 = inlined_call_operand.vmem [shape: f32[2,4,4,32], index: 3, kind: output, shape index: {}]  }
   0x1 LB: > { %s1637_s13 = sadd.s32 4294967295, %s1668_s12   ;;  %p1641_p0 = scmp.ge.s32.totalorder %s1668_s12, 1  ;;  %s1668_s12 = sphi %s1690_s12, %s13_s12  }
   0x2   : > { %p137_p1 = scmp.lt.s32.totalorder %s1668_s12, 3 }
   0x4   : > { %p138_p2 = pnand %p1641_p0, %p137_p1 }
   0x5   : > { %p161_p3 = scmp.lt.s32.totalorder (!%p138_p2), %s1637_s13, 1  ;;  %v209_v0 = vlaneseq (!%p138_p2)  ;;  %v191_v2 = vld [vmem:[%s2623_s1] sm:$0xff] (!%p138_p2)  ;;  %vm313_vm0 = vcmask (!%p138_p2), 1043456   ;;  %vm514_vm1 = vcmask (!%p138_p2), 1045504   ;;  %vm555_vm2 = vcmask (!%p138_p2), 1042432  }
   0x6   : > { %141 = sbr.rel (%p138_p2) target bundleno = 219 (0xdb), region = 32  ;;  %v1645_v17 = vld [vmem:[%s2624_s2] ss:$0 sm:$0xff] (!%p138_p2)  ;;  %vm756_vm3 = vcmask (!%p138_p2), 1044480   ;;  %vm1577_vm4 = vcmask (!%p138_p2), 260099  }
   0x7   : > { %v210_v1 = vshrl.u32 (!%p138_p2), %v209_v0, 7 }
   0x9   : > { %v1704_v3 = vsub.s32 (!%p138_p2), 0, %v210_v1  ;;  %v1706_v4 = vsub.s32 (!%p138_p2), 1, %v210_v1  ;;  %v1708_v5 = vsub.s32 (!%p138_p2), 2, %v210_v1  ;;  %v1710_v6 = vsub.s32 (!%p138_p2), 3, %v210_v1 }
   0xa   : > { %v1712_v7 = vsub.s32 (!%p138_p2), 4, %v210_v1  ;;  %v1714_v8 = vsub.s32 (!%p138_p2), 5, %v210_v1  ;;  %v1716_v9 = vsub.s32 (!%p138_p2), 6, %v210_v1  ;;  %v1718_v10 = vsub.s32 (!%p138_p2), 7, %v210_v1 }
   0xb   : > { %v212_v11 = vrot.slane (!%p138_p2), %v191_v2, %v1704_v3  ;;  %v236_v12 = vrot.slane (!%p138_p2), %v191_v2, %v1706_v4  ;;  %v248_v13 = vrot.slane (!%p138_p2), %v191_v2, %v1708_v5  ;;  %v260_v14 = vrot.slane (!%p138_p2), %v191_v2, %v1710_v6 }
   0xc   : > { %v272_v18 = vrot.slane (!%p138_p2), %v191_v2, %v1712_v7  ;;  %v296_v19 = vrot.slane (!%p138_p2), %v191_v2, %v1714_v8  ;;  %v1741_v20 = vrot.slane (!%p138_p2), %v191_v2, %v1716_v9  ;;  %v1744_v21 = vrot.slane (!%p138_p2), %v191_v2, %v1718_v10 }
   0xd   : > { %s2627_s13 = smov (!%p161_p3, %s1637_s13), 1 }
   0xe   : > { %s1650_s16 = smul.u32 160, %s2627_s13  ;;  %s1649_s7 = sshll.u32 %s2627_s13, 4 }
   0xf   : > { %s170_s10 = scalar_lea.vmem %s2625_s3, %s1649_s7 }
  0x10   : > { %s1723_s19 = scalar_lea.vmem %s2622_s0, %s1650_s16 }
  0x11   : > { %v1730_v15 = vld [vmem:[%s1723_s19] sm:$0xff]  ;;  %v1733_v16 = vld [vmem:[%s1723_s19 + $0x10] sm:$0xff]  ;;  %v172_v47 = vld [vmem:[%s1723_s19 + $0x8] sm:$0x3] }
  0x12   : > { %v1747_v22 = vld [vmem:[%s1723_s19 + $0x20] sm:$0xff]  ;;  %v213_v23 = vmul.f32 %v212_v11, %v1730_v15  ;;  %v214_v24 = vmul.f32 %v212_v11, %v1733_v16  ;;  %v1752_v25 = vmul.f32 %v236_v12, %v1730_v15  ;;  %v1755_v26 = vmul.f32 %v236_v12, %v1733_v16  ;;  %v1758_v27 = vld [vmem:[%s1723_s19 + $0x30] sm:$0xff]  ;;  %v1790_v48 = vld [vmem:[%s1723_s19 + $0x18] sm:$0x3] }
  0x13   : > { %v1761_v28 = vld [vmem:[%s1723_s19 + $0x40] sm:$0xff]  ;;  %v215_v29 = vmul.f32 %v212_v11, %v1747_v22  ;;  %v1765_v30 = vmul.f32 %v236_v12, %v1747_v22  ;;  %v1768_v31 = vmul.f32 %v248_v13, %v1730_v15  ;;  %v1771_v32 = vmul.f32 %v248_v13, %v1733_v16  ;;  %v1774_v33 = vld [vmem:[%s1723_s19 + $0x50] sm:$0xff]  ;;  %v1808_v57 = vld [vmem:[%s1723_s19 + $0x28] sm:$0x3] }
  0x14   : > { %v205_v34 = vadd.f32 %v1645_v17, %v1758_v27  ;;  %v206_v35 = vadd.f32 %v1645_v17, %v1761_v28  ;;  %v216_v36 = vmul.f32 %v212_v11, %v1758_v27  ;;  %v221_v37 = vrot.slane %v213_v23, 5  ;;  %v1780_v38 = vld [vmem:[%s1723_s19 + $0x60] sm:$0xff]  ;;  %v1811_v58 = vld [vmem:[%s1723_s19 + $0x38] sm:$0x3] }
  0x15   : > { %v207_v39 = vadd.f32 %v1645_v17, %v1774_v33  ;;  %v222_v40 = vrot.slane %v214_v24, 5  ;;  %v223_v41 = vrot.slane %v215_v29, 5  ;;  %v240_v42 = vmul.f32 %v236_v12, %v1758_v27 }
  0x16   : > { %v208_v43 = vadd.f32 %v1645_v17, %v1780_v38  ;;  %v224_v44 = vrot.slane %v216_v36, 5  ;;  %v229_v45 = vadd.f32 %v221_v37, %v205_v34  ;;  %v1786_v46 = vmul.f32 %v248_v13, %v1747_v22 }
  0x17   : > { %v230_v49 = vadd.f32 %v222_v40, %v206_v35  ;;  %v231_v50 = vadd.f32 %v223_v41, %v207_v39  ;;  %v1793_v51 = vmul.f32 %v248_v13, %v1758_v27  ;;  %v1796_v52 = vmul.f32 %v260_v14, %v1730_v15 }
  0x18   : > { %v232_v53 = vadd.f32 %v224_v44, %v208_v43  ;;  %v1799_v54 = vmul.f32 %v260_v14, %v1733_v16  ;;  %v1802_v55 = vmul.f32 %v260_v14, %v1747_v22  ;;  %v1805_v56 = vmul.f32 %v260_v14, %v1758_v27 }
  0x19   : > { %v273_v59 = vmul.f32 %v272_v18, %v1730_v15  ;;  %v274_v60 = vmul.f32 %v272_v18, %v1733_v16  ;;  %v275_v61 = vmul.f32 %v272_v18, %v1747_v22  ;;  %v276_v62 = vmul.f32 %v272_v18, %v1758_v27 }
  0x1a   : > { %v297_v63 = vmul.f32 %v296_v19, %v1730_v15  ;;  %v298_v0 = vmul.f32 %v296_v19, %v172_v47  ;;  %v299_v1 = vmul.f32 %v296_v19, %v1733_v16  ;;  %v300_v2 = vmul.f32 %v296_v19, %v1790_v48 }
  0x1b   : > { %v281_v11 = vrot.slane %v273_v59, 1  ;;  %v282_v12 = vrot.slane %v274_v60, 1  ;;  %v283_v13 = vrot.slane %v275_v61, 1  ;;  %v284_v14 = vrot.slane %v276_v62, 1 }
  0x1c   : > { %v301_v17 = vmul.f32 %v296_v19, %v1747_v22  ;;  %v302_v23 = vmul.f32 %v296_v19, %v1808_v57  ;;  %v303_v24 = vmul.f32 %v296_v19, %v1758_v27  ;;  %v304_v29 = vmul.f32 %v296_v19, %v1811_v58 }
  0x1d   : > { %v1824_v18 = vadd.f32 %v281_v11, %v229_v45  ;;  %v1826_v34 = vadd.f32 %v282_v12, %v230_v49  ;;  %v1828_v35 = vadd.f32 %v283_v13, %v231_v50  ;;  %v1830_v36 = vadd.f32 %v284_v14, %v232_v53 }
  0x1e   : > { %v314_v37 = vrot.slane %v297_v63, 4  ;;  %v315_v39 = vrot.slane %v298_v0, 4  ;;  %v317_v40 = vrot.slane %v299_v1, 4  ;;  %v318_v41 = vrot.slane %v300_v2, 4 }
  0x1f   : > { %v320_v43 = vrot.slane %v301_v17, 4  ;;  %v321_v44 = vrot.slane %v302_v23, 4  ;;  %v323_v59 = vrot.slane %v303_v24, 4  ;;  %v324_v60 = vrot.slane %v304_v29, 4 }
  0x20   : > { %v316_v61 = vsel %vm313_vm0, %v314_v37, %v315_v39  ;;  %v319_v19 = vsel %vm313_vm0, %v317_v40, %v318_v41  ;;  %v338_v45 = vmul.f32 %v1741_v20, %v1730_v15  ;;  %v339_v49 = vmul.f32 %v1741_v20, %v172_v47 }
  0x21   : > { %v322_v50 = vsel %vm313_vm0, %v320_v43, %v321_v44  ;;  %v325_v53 = vsel %vm313_vm0, %v323_v59, %v324_v60  ;;  %v1840_v62 = vadd.f32 %v316_v61, %v1752_v25  ;;  %v1843_v63 = vadd.f32 %v319_v19, %v1755_v26 }
  0x22   : > { %v1846_v0 = vadd.f32 %v322_v50, %v1765_v30  ;;  %v1848_v1 = vadd.f32 %v325_v53, %v240_v42  ;;  %v340_v15 = vmul.f32 %v1741_v20, %v1733_v16  ;;  %v341_v47 = vmul.f32 %v1741_v20, %v1790_v48 }
  0x23   : > { %v342_v2 = vmul.f32 %v1741_v20, %v1747_v22  ;;  %v343_v25 = vmul.f32 %v1741_v20, %v1808_v57  ;;  %v344_v26 = vmul.f32 %v1741_v20, %v1758_v27  ;;  %v345_v30 = vmul.f32 %v1741_v20, %v1811_v58  ;;  %v1871_v20 = vld [vmem:[%s2623_s1 + $0x8] sm:$0xff] }
  0x24   : > { %v354_v42 = vrot.slane %v338_v45, 4  ;;  %v355_v11 = vrot.slane %v339_v49, 4  ;;  %v357_v12 = vrot.slane %v340_v15, 4  ;;  %v358_v13 = vrot.slane %v341_v47, 4 }
  0x25   : > { %v360_v14 = vrot.slane %v342_v2, 4  ;;  %v361_v17 = vrot.slane %v343_v25, 4  ;;  %v363_v23 = vrot.slane %v344_v26, 4  ;;  %v364_v24 = vrot.slane %v345_v30, 4 }
  0x26   : > { %v356_v29 = vsel %vm313_vm0, %v354_v42, %v355_v11  ;;  %v359_v37 = vsel %vm313_vm0, %v357_v12, %v358_v13  ;;  %v378_v39 = vmul.f32 %v1744_v21, %v1733_v16  ;;  %v379_v40 = vmul.f32 %v1744_v21, %v1747_v22 }
  0x27   : > { %v362_v41 = vsel %vm313_vm0, %v360_v14, %v361_v17  ;;  %v365_v43 = vsel %vm313_vm0, %v363_v23, %v364_v24  ;;  %v370_v44 = vadd.f32 %v356_v29, %v1768_v31  ;;  %v371_v59 = vadd.f32 %v359_v37, %v1771_v32 }
  0x28   : > { %v372_v60 = vadd.f32 %v362_v41, %v1786_v46  ;;  %v373_v61 = vadd.f32 %v365_v43, %v1793_v51  ;;  %v380_v19 = vmul.f32 %v1744_v21, %v1758_v27  ;;  %v381_v45 = vmul.f32 %v1744_v21, %v1761_v28 }
  0x29   : > { %v386_v49 = vrot.slane %v378_v39, 5  ;;  %v387_v50 = vrot.slane %v379_v40, 5  ;;  %v401_v53 = vrot.slane %v1871_v20, %v1704_v3  ;;  %v425_v31 = vrot.slane %v1871_v20, %v1706_v4 }
  0x2a   : > { %v388_v15 = vrot.slane %v380_v19, 5  ;;  %v389_v32 = vrot.slane %v381_v45, 5  ;;  %v449_v46 = vrot.slane %v1871_v20, %v1708_v5  ;;  %v473_v51 = vrot.slane %v1871_v20, %v1710_v6 }
  0x2b   : > { %v394_v47 = vadd.f32 %v386_v49, %v1796_v52  ;;  %v395_v21 = vadd.f32 %v387_v50, %v1799_v54  ;;  %v402_v2 = vmul.f32 %v401_v53, %v1733_v16  ;;  %v403_v25 = vmul.f32 %v401_v53, %v1747_v22 }
  0x2c   : > { %v396_v26 = vadd.f32 %v388_v15, %v1802_v55  ;;  %v397_v30 = vadd.f32 %v389_v32, %v1805_v56  ;;  %v404_v42 = vmul.f32 %v401_v53, %v1758_v27  ;;  %v405_v11 = vmul.f32 %v401_v53, %v1761_v28 }
  0x2d   : > { %v410_v12 = vrot.slane %v402_v2, 6  ;;  %v411_v13 = vrot.slane %v403_v25, 6  ;;  %v426_v14 = vmul.f32 %v425_v31, %v1733_v16  ;;  %v427_v52 = vmul.f32 %v425_v31, %v1747_v22 }
  0x2e   : > { %v412_v17 = vrot.slane %v404_v42, 6  ;;  %v413_v54 = vrot.slane %v405_v11, 6  ;;  %v428_v23 = vmul.f32 %v425_v31, %v1758_v27  ;;  %v429_v24 = vmul.f32 %v425_v31, %v1761_v28 }
  0x2f   : > { %v1904_v55 = vadd.f32 %v410_v12, %v1824_v18  ;;  %v1907_v56 = vadd.f32 %v411_v13, %v1826_v34  ;;  %v434_v29 = vrot.slane %v426_v14, 1  ;;  %v435_v37 = vrot.slane %v427_v52, 1  ;;  %v1944_v52 = vld [vmem:[%s1723_s19 + $0x48] sm:$0x3] }
  0x30   : > { %v1910_v39 = vadd.f32 %v412_v17, %v1828_v35  ;;  %v1913_v40 = vadd.f32 %v413_v54, %v1830_v36  ;;  %v436_v41 = vrot.slane %v428_v23, 1  ;;  %v437_v43 = vrot.slane %v429_v24, 1 }
  0x31   : > { %v1916_v19 = vadd.f32 %v434_v29, %v1840_v62  ;;  %v1919_v45 = vadd.f32 %v435_v37, %v1843_v63  ;;  %v450_v18 = vmul.f32 %v449_v46, %v1733_v16  ;;  %v451_v34 = vmul.f32 %v449_v46, %v1747_v22 }
  0x32   : > { %v1924_v49 = vadd.f32 %v436_v41, %v1846_v0  ;;  %v1927_v35 = vadd.f32 %v437_v43, %v1848_v1  ;;  %v452_v36 = vmul.f32 %v449_v46, %v1758_v27  ;;  %v453_v50 = vmul.f32 %v449_v46, %v1761_v28 }
  0x33   : > { %v458_v62 = vrot.slane %v450_v18, 1  ;;  %v459_v53 = vrot.slane %v451_v34, 1  ;;  %v474_v63 = vmul.f32 %v473_v51, %v1733_v16  ;;  %v475_v31 = vmul.f32 %v473_v51, %v1747_v22 }
  0x34   : > { %v460_v15 = vrot.slane %v452_v36, 1  ;;  %v461_v32 = vrot.slane %v453_v50, 1  ;;  %v476_v0 = vmul.f32 %v473_v51, %v1758_v27  ;;  %v477_v2 = vmul.f32 %v473_v51, %v1761_v28 }
  0x35   : > { %v1935_v1 = vadd.f32 %v458_v62, %v370_v44  ;;  %v1937_v25 = vadd.f32 %v459_v53, %v371_v59  ;;  %v482_v42 = vrot.slane %v474_v63, 1  ;;  %v483_v46 = vrot.slane %v475_v31, 1 }
  0x36   : > { %v1939_v11 = vadd.f32 %v460_v15, %v372_v60  ;;  %v1941_v12 = vadd.f32 %v461_v32, %v373_v61  ;;  %v484_v13 = vrot.slane %v476_v0, 1  ;;  %v485_v14 = vrot.slane %v477_v2, 1 }
  0x37   : > { %v1946_v17 = vadd.f32 %v482_v42, %v394_v47  ;;  %v1948_v54 = vadd.f32 %v483_v46, %v395_v21  ;;  %v497_v44 = vrot.slane %v1871_v20, %v1712_v7  ;;  %v538_v59 = vrot.slane %v1871_v20, %v1714_v8 }
  0x38   : > { %v1954_v51 = vadd.f32 %v484_v13, %v396_v26  ;;  %v1956_v60 = vadd.f32 %v485_v14, %v397_v30  ;;  %v579_v61 = vrot.slane %v1871_v20, %v1716_v9  ;;  %v603_v47 = vrot.slane %v1871_v20, %v1718_v10 }
  0x39   : > { %v498_v21 = vmul.f32 %v497_v44, %v1733_v16  ;;  %v499_v23 = vmul.f32 %v497_v44, %v1790_v48  ;;  %v500_v24 = vmul.f32 %v497_v44, %v1747_v22  ;;  %v501_v29 = vmul.f32 %v497_v44, %v1808_v57 }
  0x3a   : > { %v502_v26 = vmul.f32 %v497_v44, %v1758_v27  ;;  %v503_v30 = vmul.f32 %v497_v44, %v1811_v58  ;;  %v504_v37 = vmul.f32 %v497_v44, %v1761_v28  ;;  %v505_v41 = vmul.f32 %v497_v44, %v1944_v52 }
  0x3b   : > { %v515_v43 = vrot.slane %v498_v21, 2  ;;  %v516_v18 = vrot.slane %v499_v23, 2  ;;  %v518_v34 = vrot.slane %v500_v24, 2  ;;  %v519_v20 = vrot.slane %v501_v29, 2 }
  0x3c   : > { %v521_v36 = vrot.slane %v502_v26, 2  ;;  %v522_v50 = vrot.slane %v503_v30, 2  ;;  %v524_v62 = vrot.slane %v504_v37, 2  ;;  %v525_v53 = vrot.slane %v505_v41, 2 }
  0x3d   : > { %v517_v63 = vsel %vm514_vm1, %v515_v43, %v516_v18  ;;  %v520_v31 = vsel %vm514_vm1, %v518_v34, %v519_v20  ;;  %v539_v15 = vmul.f32 %v538_v59, %v1733_v16  ;;  %v540_v32 = vmul.f32 %v538_v59, %v1790_v48 }
  0x3e   : > { %v523_v0 = vsel %vm514_vm1, %v521_v36, %v522_v50  ;;  %v526_v2 = vsel %vm514_vm1, %v524_v62, %v525_v53  ;;  %v1977_v42 = vadd.f32 %v517_v63, %v1904_v55  ;;  %v1980_v46 = vadd.f32 %v520_v31, %v1907_v56 }
  0x3f   : > { %v1983_v13 = vadd.f32 %v523_v0, %v1910_v39  ;;  %v1986_v14 = vadd.f32 %v526_v2, %v1913_v40  ;;  %v541_v16 = vmul.f32 %v538_v59, %v1747_v22  ;;  %v542_v48 = vmul.f32 %v538_v59, %v1808_v57 }
  0x40   : > { %v543_v44 = vmul.f32 %v538_v59, %v1758_v27  ;;  %v544_v21 = vmul.f32 %v538_v59, %v1811_v58  ;;  %v545_v55 = vmul.f32 %v538_v59, %v1761_v28  ;;  %v546_v23 = vmul.f32 %v538_v59, %v1944_v52 }
  0x41   : > { %v556_v56 = vrot.slane %v539_v15, 5  ;;  %v557_v24 = vrot.slane %v540_v32, 5  ;;  %v559_v29 = vrot.slane %v541_v16, 5  ;;  %v560_v39 = vrot.slane %v542_v48, 5 }
  0x42   : > { %v562_v26 = vrot.slane %v543_v44, 5  ;;  %v563_v30 = vrot.slane %v544_v21, 5  ;;  %v565_v40 = vrot.slane %v545_v55, 5  ;;  %v566_v37 = vrot.slane %v546_v23, 5 }
  0x43   : > { %v558_v41 = vsel %vm555_vm2, %v556_v56, %v557_v24  ;;  %v561_v43 = vsel %vm555_vm2, %v559_v29, %v560_v39  ;;  %v580_v18 = vmul.f32 %v579_v61, %v1747_v22  ;;  %v581_v34 = vmul.f32 %v579_v61, %v1758_v27 }
  0x44   : > { %v564_v20 = vsel %vm555_vm2, %v562_v26, %v563_v30  ;;  %v567_v59 = vsel %vm555_vm2, %v565_v40, %v566_v37  ;;  %v572_v36 = vadd.f32 %v558_v41, %v1916_v19  ;;  %v573_v50 = vadd.f32 %v561_v43, %v1919_v45 }
  0x45   : > { %v574_v62 = vadd.f32 %v564_v20, %v1924_v49  ;;  %v575_v53 = vadd.f32 %v567_v59, %v1927_v35  ;;  %v582_v63 = vmul.f32 %v579_v61, %v1761_v28  ;;  %v583_v31 = vmul.f32 %v579_v61, %v1774_v33  ;;  %v2013_v49 = vld [vmem:[%s2623_s1 + $0x10] sm:$0xff] }
  0x46   : > { %v588_v15 = vrot.slane %v580_v18, 6  ;;  %v589_v32 = vrot.slane %v581_v34, 6  ;;  %v604_v0 = vmul.f32 %v603_v47, %v1747_v22  ;;  %v605_v2 = vmul.f32 %v603_v47, %v1758_v27 }
  0x47   : > { %v590_v16 = vrot.slane %v582_v63, 6  ;;  %v591_v48 = vrot.slane %v583_v31, 6  ;;  %v606_v19 = vmul.f32 %v603_v47, %v1761_v28  ;;  %v607_v45 = vmul.f32 %v603_v47, %v1774_v33 }
  0x48   : > { %v596_v35 = vadd.f32 %v588_v15, %v1935_v1  ;;  %v597_v61 = vadd.f32 %v589_v32, %v1937_v25  ;;  %v612_v44 = vrot.slane %v604_v0, 6  ;;  %v613_v21 = vrot.slane %v605_v2, 6 }
  0x49   : > { %v598_v55 = vadd.f32 %v590_v16, %v1939_v11  ;;  %v599_v23 = vadd.f32 %v591_v48, %v1941_v12  ;;  %v614_v56 = vrot.slane %v606_v19, 6  ;;  %v615_v24 = vrot.slane %v607_v45, 6 }
  0x4a   : > { %v2020_v29 = vadd.f32 %v612_v44, %v1946_v17  ;;  %v2023_v47 = vadd.f32 %v613_v21, %v1948_v54  ;;  %v627_v39 = vrot.slane %v2013_v49, %v1704_v3  ;;  %v651_v1 = vrot.slane %v2013_v49, %v1706_v4  ;;  %v2068_v21 = vld [vmem:[%s1723_s19 + $0x58] sm:$0x3] }
  0x4b   : > { %v2030_v25 = vadd.f32 %v614_v56, %v1954_v51  ;;  %v2033_v11 = vadd.f32 %v615_v24, %v1956_v60  ;;  %v675_v12 = vrot.slane %v2013_v49, %v1708_v5  ;;  %v699_v17 = vrot.slane %v2013_v49, %v1710_v6 }
  0x4c   : > { %v628_v54 = vmul.f32 %v627_v39, %v1747_v22  ;;  %v629_v26 = vmul.f32 %v627_v39, %v1758_v27  ;;  %v630_v30 = vmul.f32 %v627_v39, %v1761_v28  ;;  %v631_v40 = vmul.f32 %v627_v39, %v1774_v33 }
  0x4d   : > { %v652_v51 = vmul.f32 %v651_v1, %v1747_v22  ;;  %v653_v37 = vmul.f32 %v651_v1, %v1758_v27  ;;  %v654_v60 = vmul.f32 %v651_v1, %v1761_v28  ;;  %v655_v41 = vmul.f32 %v651_v1, %v1774_v33 }
  0x4e   : > { %v636_v43 = vrot.slane %v628_v54, 7  ;;  %v637_v18 = vrot.slane %v629_v26, 7  ;;  %v638_v34 = vrot.slane %v630_v30, 7  ;;  %v639_v20 = vrot.slane %v631_v40, 7 }
  0x4f   : > { %v660_v59 = vrot.slane %v652_v51, 2  ;;  %v661_v63 = vrot.slane %v653_v37, 2  ;;  %v662_v31 = vrot.slane %v654_v60, 2  ;;  %v663_v15 = vrot.slane %v655_v41, 2 }
  0x50   : > { %v2048_v32 = vadd.f32 %v636_v43, %v1977_v42  ;;  %v2051_v0 = vadd.f32 %v637_v18, %v1980_v46  ;;  %v2054_v2 = vadd.f32 %v638_v34, %v1983_v13  ;;  %v2057_v16 = vadd.f32 %v639_v20, %v1986_v14 }
  0x51   : > { %v2059_v48 = vadd.f32 %v660_v59, %v572_v36  ;;  %v2061_v19 = vadd.f32 %v661_v63, %v573_v50  ;;  %v2063_v45 = vadd.f32 %v662_v31, %v574_v62  ;;  %v2065_v44 = vadd.f32 %v663_v15, %v575_v53 }
  0x52   : > { %v676_v42 = vmul.f32 %v675_v12, %v1747_v22  ;;  %v677_v46 = vmul.f32 %v675_v12, %v1758_v27  ;;  %v678_v13 = vmul.f32 %v675_v12, %v1761_v28  ;;  %v679_v56 = vmul.f32 %v675_v12, %v1774_v33 }
  0x53   : > { %v700_v14 = vmul.f32 %v699_v17, %v1747_v22  ;;  %v701_v36 = vmul.f32 %v699_v17, %v1808_v57  ;;  %v702_v50 = vmul.f32 %v699_v17, %v1758_v27  ;;  %v703_v62 = vmul.f32 %v699_v17, %v1811_v58 }
  0x54   : > { %v684_v53 = vrot.slane %v676_v42, 2  ;;  %v685_v24 = vrot.slane %v677_v46, 2  ;;  %v686_v39 = vrot.slane %v678_v13, 2  ;;  %v687_v1 = vrot.slane %v679_v56, 2 }
  0x55   : > { %v704_v54 = vmul.f32 %v699_v17, %v1761_v28  ;;  %v705_v26 = vmul.f32 %v699_v17, %v1944_v52  ;;  %v706_v30 = vmul.f32 %v699_v17, %v1774_v33  ;;  %v707_v12 = vmul.f32 %v699_v17, %v2068_v21 }
  0x56   : > { %v2082_v40 = vadd.f32 %v684_v53, %v596_v35  ;;  %v2084_v51 = vadd.f32 %v685_v24, %v597_v61  ;;  %v2086_v37 = vadd.f32 %v686_v39, %v598_v55  ;;  %v2088_v60 = vadd.f32 %v687_v1, %v599_v23 }
  0x57   : > { %v716_v41 = vrot.slane %v700_v14, 2  ;;  %v717_v43 = vrot.slane %v701_v36, 2  ;;  %v719_v18 = vrot.slane %v702_v50, 2  ;;  %v720_v34 = vrot.slane %v703_v62, 2 }
  0x58   : > { %v722_v20 = vrot.slane %v704_v54, 2  ;;  %v723_v59 = vrot.slane %v705_v26, 2  ;;  %v725_v63 = vrot.slane %v706_v30, 2  ;;  %v726_v31 = vrot.slane %v707_v12, 2 }
  0x59   : > { %v718_v15 = vsel %vm514_vm1, %v716_v41, %v717_v43  ;;  %v721_v17 = vsel %vm514_vm1, %v719_v18, %v720_v34  ;;  %v739_v35 = vrot.slane %v2013_v49, %v1712_v7  ;;  %v780_v61 = vrot.slane %v2013_v49, %v1714_v8 }
  0x5a   : > { %v724_v55 = vsel %vm514_vm1, %v722_v20, %v723_v59  ;;  %v727_v23 = vsel %vm514_vm1, %v725_v63, %v726_v31  ;;  %v2099_v42 = vadd.f32 %v718_v15, %v2020_v29  ;;  %v2102_v46 = vadd.f32 %v721_v17, %v2023_v47  ;;  %v2131_v15 = vld [vmem:[%s2623_s1 + $0x18] sm:$0xff] }
  0x5b   : > { %v2105_v13 = vadd.f32 %v724_v55, %v2030_v25  ;;  %v2108_v56 = vadd.f32 %v727_v23, %v2033_v11  ;;  %v740_v14 = vmul.f32 %v739_v35, %v1747_v22  ;;  %v741_v36 = vmul.f32 %v739_v35, %v1808_v57 }
  0x5c   : > { %v742_v50 = vmul.f32 %v739_v35, %v1758_v27  ;;  %v743_v62 = vmul.f32 %v739_v35, %v1811_v58  ;;  %v744_v29 = vmul.f32 %v739_v35, %v1761_v28  ;;  %v745_v53 = vmul.f32 %v739_v35, %v1944_v52 }
  0x5d   : > { %v746_v47 = vmul.f32 %v739_v35, %v1774_v33  ;;  %v747_v25 = vmul.f32 %v739_v35, %v2068_v21  ;;  %v757_v24 = vrot.slane %v740_v14, 3  ;;  %v758_v39 = vrot.slane %v741_v36, 3 }
  0x5e   : > { %v760_v11 = vrot.slane %v742_v50, 3  ;;  %v761_v1 = vrot.slane %v743_v62, 3  ;;  %v763_v54 = vrot.slane %v744_v29, 3  ;;  %v764_v22 = vrot.slane %v745_v53, 3 }
  0x5f   : > { %v759_v57 = vsel %vm756_vm3, %v757_v24, %v758_v39  ;;  %v766_v26 = vrot.slane %v746_v47, 3  ;;  %v767_v30 = vrot.slane %v747_v25, 3  ;;  %v781_v12 = vmul.f32 %v780_v61, %v1758_v27 }
  0x60   : > { %v762_v41 = vsel %vm756_vm3, %v760_v11, %v761_v1  ;;  %v765_v43 = vsel %vm756_vm3, %v763_v54, %v764_v22  ;;  %v773_v18 = vadd.f32 %v759_v57, %v2048_v32  ;;  %v782_v34 = vmul.f32 %v780_v61, %v1761_v28 }
  0x61   : > { %v768_v20 = vsel %vm756_vm3, %v766_v26, %v767_v30  ;;  %v774_v59 = vadd.f32 %v762_v41, %v2051_v0  ;;  %v775_v63 = vadd.f32 %v765_v43, %v2054_v2  ;;  %v783_v31 = vmul.f32 %v780_v61, %v1774_v33 }
  0x62   : > { %v776_v17 = vadd.f32 %v768_v20, %v2057_v16  ;;  %v784_v35 = vmul.f32 %v780_v61, %v1780_v38  ;;  %v789_v32 = vrot.slane %v781_v12, 7  ;;  %v790_v55 = vrot.slane %v782_v34, 7 }
  0x63   : > { %v791_v23 = vrot.slane %v783_v31, 7  ;;  %v804_v14 = vrot.slane %v2013_v49, %v1716_v9  ;;  %v828_v0 = vrot.slane %v2013_v49, %v1718_v10  ;;  %v852_v2 = vrot.slane %v2131_v15, %v1704_v3 }
  0x64   : > { %v792_v36 = vrot.slane %v784_v35, 7  ;;  %v797_v50 = vadd.f32 %v789_v32, %v2059_v48  ;;  %v798_v62 = vadd.f32 %v790_v55, %v2061_v19  ;;  %v864_v16 = vrot.slane %v2131_v15, %v1706_v4 }
  0x65   : > { %v799_v61 = vadd.f32 %v791_v23, %v2063_v45  ;;  %v805_v29 = vmul.f32 %v804_v14, %v1758_v27  ;;  %v806_v53 = vmul.f32 %v804_v14, %v1761_v28  ;;  %v807_v47 = vmul.f32 %v804_v14, %v1774_v33 }
  0x66   : > { %v800_v49 = vadd.f32 %v792_v36, %v2065_v44  ;;  %v808_v25 = vmul.f32 %v804_v14, %v1780_v38  ;;  %v829_v24 = vmul.f32 %v828_v0, %v1758_v27  ;;  %v830_v48 = vmul.f32 %v828_v0, %v1761_v28 }
  0x67   : > { %v813_v19 = vrot.slane %v805_v29, 7  ;;  %v814_v39 = vrot.slane %v806_v53, 7  ;;  %v815_v11 = vrot.slane %v807_v47, 7  ;;  %v831_v1 = vmul.f32 %v828_v0, %v1774_v33 }
  0x68   : > { %v816_v45 = vrot.slane %v808_v25, 7  ;;  %v832_v54 = vmul.f32 %v828_v0, %v1780_v38  ;;  %v837_v22 = vrot.slane %v829_v24, 7  ;;  %v838_v57 = vrot.slane %v830_v48, 7 }
  0x69   : > { %v821_v26 = vadd.f32 %v813_v19, %v2082_v40  ;;  %v822_v44 = vadd.f32 %v814_v39, %v2084_v51  ;;  %v823_v30 = vadd.f32 %v815_v11, %v2086_v37  ;;  %v839_v12 = vrot.slane %v831_v1, 7  ;;  %v2207_v19 = vld [vmem:[%s1723_s19 + $0x68] sm:$0x3] }
  0x6a   : > { %v824_v41 = vadd.f32 %v816_v45, %v2088_v60  ;;  %v840_v43 = vrot.slane %v832_v54, 7  ;;  %v2160_v34 = vadd.f32 %v837_v22, %v2099_v42  ;;  %v2163_v20 = vadd.f32 %v838_v57, %v2102_v46 }
  0x6b   : > { %v2166_v31 = vadd.f32 %v839_v12, %v2105_v13  ;;  %v853_v35 = vmul.f32 %v852_v2, %v1758_v27  ;;  %v854_v40 = vmul.f32 %v852_v2, %v1761_v28  ;;  %v855_v51 = vmul.f32 %v852_v2, %v1774_v33 }
  0x6c   : > { %v2172_v37 = vadd.f32 %v840_v43, %v2108_v56  ;;  %v856_v60 = vmul.f32 %v852_v2, %v1780_v38  ;;  %v865_v42 = vmul.f32 %v864_v16, %v1758_v27  ;;  %v866_v32 = vmul.f32 %v864_v16, %v1761_v28 }
  0x6d   : > { %v2177_v46 = vadd.f32 %v853_v35, %v773_v18  ;;  %v2179_v55 = vadd.f32 %v854_v40, %v774_v59  ;;  %v2181_v13 = vadd.f32 %v855_v51, %v775_v63  ;;  %v867_v23 = vmul.f32 %v864_v16, %v1774_v33 }
  0x6e   : > { %v2184_v14 = vadd.f32 %v856_v60, %v776_v17  ;;  %v868_v56 = vmul.f32 %v864_v16, %v1780_v38  ;;  %v873_v0 = vrot.slane %v865_v42, 3  ;;  %v874_v36 = vrot.slane %v866_v32, 3 }
  0x6f   : > { %v875_v2 = vrot.slane %v867_v23, 3  ;;  %v888_v29 = vrot.slane %v2131_v15, %v1708_v5  ;;  %v928_v18 = vrot.slane %v2131_v15, %v1710_v6  ;;  %v968_v59 = vrot.slane %v2131_v15, %v1712_v7 }
  0x70   : > { %v876_v63 = vrot.slane %v868_v56, 3  ;;  %v2193_v53 = vadd.f32 %v873_v0, %v797_v50  ;;  %v2195_v17 = vadd.f32 %v874_v36, %v798_v62  ;;  %v2199_v16 = vrot.slane %v2131_v15, %v1714_v8 }
  0x71   : > { %v2201_v47 = vadd.f32 %v875_v2, %v799_v61  ;;  %v889_v25 = vmul.f32 %v888_v29, %v1758_v27  ;;  %v890_v24 = vmul.f32 %v888_v29, %v1811_v58  ;;  %v891_v48 = vmul.f32 %v888_v29, %v1761_v28 }
  0x72   : > { %v2209_v39 = vadd.f32 %v876_v63, %v800_v49  ;;  %v892_v50 = vmul.f32 %v888_v29, %v1944_v52  ;;  %v893_v62 = vmul.f32 %v888_v29, %v1774_v33  ;;  %v894_v11 = vmul.f32 %v888_v29, %v2068_v21 }
  0x73   : > { %v895_v1 = vmul.f32 %v888_v29, %v1780_v38  ;;  %v896_v61 = vmul.f32 %v888_v29, %v2207_v19  ;;  %v905_v45 = vrot.slane %v889_v25, 3  ;;  %v906_v54 = vrot.slane %v890_v24, 3 }
  0x74   : > { %v908_v22 = vrot.slane %v891_v48, 3  ;;  %v909_v57 = vrot.slane %v892_v50, 3  ;;  %v911_v12 = vrot.slane %v893_v62, 3  ;;  %v912_v43 = vrot.slane %v894_v11, 3 }
  0x75   : > { %v907_v35 = vsel %vm756_vm3, %v905_v45, %v906_v54  ;;  %v914_v49 = vrot.slane %v895_v1, 3  ;;  %v915_v40 = vrot.slane %v896_v61, 3  ;;  %v929_v51 = vmul.f32 %v928_v18, %v1758_v27 }
  0x76   : > { %v910_v60 = vsel %vm756_vm3, %v908_v22, %v909_v57  ;;  %v913_v42 = vsel %vm756_vm3, %v911_v12, %v912_v43  ;;  %v2220_v32 = vadd.f32 %v907_v35, %v821_v26  ;;  %v930_v23 = vmul.f32 %v928_v18, %v1811_v58 }
  0x77   : > { %v916_v56 = vsel %vm756_vm3, %v914_v49, %v915_v40  ;;  %v922_v0 = vadd.f32 %v910_v60, %v822_v44  ;;  %v923_v36 = vadd.f32 %v913_v42, %v823_v30  ;;  %v931_v2 = vmul.f32 %v928_v18, %v1761_v28  ;;  %v2231_v30 = vld [vmem:[%s1723_s19 + $0x70] sm:$0xff] }
  0x78   : > { %v924_v29 = vadd.f32 %v916_v56, %v824_v41  ;;  %v932_v63 = vmul.f32 %v928_v18, %v1944_v52  ;;  %v933_v27 = vmul.f32 %v928_v18, %v1774_v33  ;;  %v934_v25 = vmul.f32 %v928_v18, %v2068_v21 }
  0x79   : > { %v935_v24 = vmul.f32 %v928_v18, %v1780_v38  ;;  %v936_v26 = vmul.f32 %v928_v18, %v2207_v19  ;;  %v945_v48 = vrot.slane %v929_v51, 3  ;;  %v946_v58 = vrot.slane %v930_v23, 3 }
  0x7a   : > { %v948_v50 = vrot.slane %v931_v2, 3  ;;  %v949_v62 = vrot.slane %v932_v63, 3  ;;  %v951_v11 = vrot.slane %v933_v27, 3  ;;  %v952_v44 = vrot.slane %v934_v25, 3 }
  0x7b   : > { %v947_v41 = vsel %vm756_vm3, %v945_v48, %v946_v58  ;;  %v954_v1 = vrot.slane %v935_v24, 3  ;;  %v955_v61 = vrot.slane %v936_v26, 3  ;;  %v969_v45 = vmul.f32 %v968_v59, %v1761_v28 }
  0x7c   : > { %v950_v54 = vsel %vm756_vm3, %v948_v50, %v949_v62  ;;  %v953_v22 = vsel %vm756_vm3, %v951_v11, %v952_v44  ;;  %v961_v18 = vadd.f32 %v947_v41, %v2160_v34  ;;  %v970_v57 = vmul.f32 %v968_v59, %v1774_v33 }
  0x7d   : > { %v956_v12 = vsel %vm756_vm3, %v954_v1, %v955_v61  ;;  %v962_v43 = vadd.f32 %v950_v54, %v2163_v20  ;;  %v963_v35 = vadd.f32 %v953_v22, %v2166_v31  ;;  %v971_v49 = vmul.f32 %v968_v59, %v1780_v38  ;;  %v2254_v31 = vld [vmem:[%s2623_s1 + $0x20] sm:$0xff] }
  0x7e   : > { %v964_v40 = vadd.f32 %v956_v12, %v2172_v37  ;;  %v972_v51 = vmul.f32 %v968_v59, %v2231_v30  ;;  %v977_v60 = vrot.slane %v969_v45, 5  ;;  %v978_v42 = vrot.slane %v970_v57, 5 }
  0x7f   : > { %v979_v23 = vrot.slane %v971_v49, 5  ;;  %v993_v34 = vmul.f32 %v2199_v16, %v1761_v28  ;;  %v994_v56 = vmul.f32 %v2199_v16, %v1774_v33  ;;  %v995_v20 = vmul.f32 %v2199_v16, %v1780_v38  ;;  %v2314_v49 = vld [vmem:[%s1723_s19 + $0x78] sm:$0x3] }
  0x80   : > { %v980_v37 = vrot.slane %v972_v51, 5  ;;  %v985_v59 = vadd.f32 %v977_v60, %v2177_v46  ;;  %v986_v2 = vadd.f32 %v978_v42, %v2179_v55  ;;  %v996_v63 = vmul.f32 %v2199_v16, %v2231_v30 }
  0x81   : > { %v987_v27 = vadd.f32 %v979_v23, %v2181_v13  ;;  %v2262_v25 = vadd.f32 %v993_v34, %v2193_v53  ;;  %v2265_v24 = vadd.f32 %v994_v56, %v2195_v17  ;;  %v2268_v26 = vadd.f32 %v995_v20, %v2201_v47 }
  0x82   : > { %v988_v48 = vadd.f32 %v980_v37, %v2184_v14  ;;  %v1000_v46 = vadd.f32 %v996_v63, %v2209_v39  ;;  %v1004_v55 = vrot.slane %v2131_v15, %v1716_v9  ;;  %v1016_v16 = vrot.slane %v2131_v15, %v1718_v10 }
  0x83   : > { %v1028_v13 = vrot.slane %v2254_v31, %v1704_v3  ;;  %v1052_v53 = vrot.slane %v2254_v31, %v1706_v4  ;;  %v2282_v17 = vrot.slane %v2254_v31, %v1708_v5  ;;  %v2286_v14 = vrot.slane %v2254_v31, %v1710_v6 }
  0x84   : > { %v1005_v47 = vmul.f32 %v1004_v55, %v1761_v28  ;;  %v1006_v39 = vmul.f32 %v1004_v55, %v1774_v33  ;;  %v1007_v15 = vmul.f32 %v1004_v55, %v1780_v38  ;;  %v1008_v58 = vmul.f32 %v1004_v55, %v2231_v30 }
  0x85   : > { %v1017_v50 = vmul.f32 %v1016_v16, %v1761_v28  ;;  %v1018_v62 = vmul.f32 %v1016_v16, %v1774_v33  ;;  %v1019_v11 = vmul.f32 %v1016_v16, %v1780_v38  ;;  %v1020_v44 = vmul.f32 %v1016_v16, %v2231_v30 }
  0x86   : > { %v2297_v41 = vadd.f32 %v1005_v47, %v2220_v32  ;;  %v2299_v1 = vadd.f32 %v1006_v39, %v922_v0  ;;  %v2301_v61 = vadd.f32 %v1007_v15, %v923_v36  ;;  %v2303_v45 = vadd.f32 %v1008_v58, %v924_v29 }
  0x87   : > { %v2305_v54 = vadd.f32 %v1017_v50, %v961_v18  ;;  %v2307_v22 = vadd.f32 %v1018_v62, %v962_v43  ;;  %v2309_v57 = vadd.f32 %v1019_v11, %v963_v35  ;;  %v2311_v12 = vadd.f32 %v1020_v44, %v964_v40 }
  0x88   : > { %v1029_v51 = vmul.f32 %v1028_v13, %v1761_v28  ;;  %v1030_v32 = vmul.f32 %v1028_v13, %v1774_v33  ;;  %v1031_v0 = vmul.f32 %v1028_v13, %v1780_v38  ;;  %v1032_v36 = vmul.f32 %v1028_v13, %v2231_v30 }
  0x89   : > { %v1053_v29 = vmul.f32 %v1052_v53, %v1761_v28  ;;  %v1054_v18 = vmul.f32 %v1052_v53, %v1944_v52  ;;  %v1055_v43 = vmul.f32 %v1052_v53, %v1774_v33  ;;  %v1056_v35 = vmul.f32 %v1052_v53, %v2068_v21 }
  0x8a   : > { %v1037_v40 = vrot.slane %v1029_v51, 1  ;;  %v1038_v60 = vrot.slane %v1030_v32, 1  ;;  %v1039_v42 = vrot.slane %v1031_v0, 1  ;;  %v1040_v23 = vrot.slane %v1032_v36, 1  ;;  %v2356_v36 = vld [vmem:[%s1723_s19 + $0x50] sm:$0xff] }
  0x8b   : > { %v1057_v34 = vmul.f32 %v1052_v53, %v1780_v38  ;;  %v1058_v56 = vmul.f32 %v1052_v53, %v2207_v19  ;;  %v1059_v20 = vmul.f32 %v1052_v53, %v2231_v30  ;;  %v1060_v37 = vmul.f32 %v1052_v53, %v2314_v49 }
  0x8c   : > { %v2328_v28 = vadd.f32 %v1037_v40, %v985_v59  ;;  %v2330_v63 = vadd.f32 %v1038_v60, %v986_v2  ;;  %v2332_v33 = vadd.f32 %v1039_v42, %v987_v27  ;;  %v2334_v55 = vadd.f32 %v1040_v23, %v988_v48  ;;  %v1659_v2 = vld [vmem:[%s1723_s19 + $0x40] sm:$0xff] }
  0x8d   : > { %v1069_v16 = vrot.slane %v1053_v29, 4  ;;  %v1070_v13 = vrot.slane %v1054_v18, 4  ;;  %v1072_v47 = vrot.slane %v1055_v43, 4  ;;  %v1073_v39 = vrot.slane %v1056_v35, 4  ;;  %v2363_v18 = vld [vmem:[%s1723_s19 + $0x60] sm:$0xff] }
  0x8e   : > { %v1075_v38 = vrot.slane %v1057_v34, 4  ;;  %v1076_v15 = vrot.slane %v1058_v56, 4  ;;  %v1078_v58 = vrot.slane %v1059_v20, 4  ;;  %v1079_v50 = vrot.slane %v1060_v37, 4  ;;  %v2374_v42 = vld [vmem:[%s1723_s19 + $0x80] sm:$0xff] }
  0x8f   : > { %v1071_v53 = vsel %vm313_vm0, %v1069_v16, %v1070_v13  ;;  %v1074_v59 = vsel %vm313_vm0, %v1072_v47, %v1073_v39  ;;  %v1093_v27 = vmul.f32 %v1659_v2, %v2282_v17  ;;  %v1094_v48 = vmul.f32 %v2282_v17, %v1944_v52 }
  0x90   : > { %v1077_v62 = vsel %vm313_vm0, %v1075_v38, %v1076_v15  ;;  %v1080_v11 = vsel %vm313_vm0, %v1078_v58, %v1079_v50  ;;  %v2345_v44 = vadd.f32 %v1071_v53, %v2262_v25  ;;  %v2348_v51 = vadd.f32 %v1074_v59, %v2265_v24 }
  0x91   : > { %v2351_v32 = vadd.f32 %v1077_v62, %v2268_v26  ;;  %v2353_v0 = vadd.f32 %v1080_v11, %v1000_v46  ;;  %v1095_v52 = vmul.f32 %v2356_v36, %v2282_v17  ;;  %v1096_v29 = vmul.f32 %v2282_v17, %v2068_v21 }
  0x92   : > { %v1097_v25 = vmul.f32 %v2363_v18, %v2282_v17  ;;  %v1098_v24 = vmul.f32 %v2282_v17, %v2207_v19  ;;  %v1099_v26 = vmul.f32 %v2282_v17, %v2231_v30  ;;  %v1100_v46 = vmul.f32 %v2282_v17, %v2314_v49 }
  0x93   : > { %v1109_v43 = vrot.slane %v1093_v27, 4  ;;  %v1110_v35 = vrot.slane %v1094_v48, 4  ;;  %v1112_v40 = vrot.slane %v1095_v52, 4  ;;  %v1113_v60 = vrot.slane %v1096_v29, 4 }
  0x94   : > { %v1115_v23 = vrot.slane %v1097_v25, 4  ;;  %v1116_v34 = vrot.slane %v1098_v24, 4  ;;  %v1118_v56 = vrot.slane %v1099_v26, 4  ;;  %v1119_v20 = vrot.slane %v1100_v46, 4 }
  0x95   : > { %v1111_v37 = vsel %vm313_vm0, %v1109_v43, %v1110_v35  ;;  %v1114_v16 = vsel %vm313_vm0, %v1112_v40, %v1113_v60  ;;  %v1133_v13 = vmul.f32 %v2356_v36, %v2286_v14  ;;  %v1134_v17 = vmul.f32 %v2363_v18, %v2286_v14 }
  0x96   : > { %v1117_v47 = vsel %vm313_vm0, %v1115_v23, %v1116_v34  ;;  %v1120_v39 = vsel %vm313_vm0, %v1118_v56, %v1119_v20  ;;  %v1125_v38 = vadd.f32 %v1111_v37, %v2297_v41  ;;  %v1126_v15 = vadd.f32 %v1114_v16, %v2299_v1 }
  0x97   : > { %v1127_v58 = vadd.f32 %v1117_v47, %v2301_v61  ;;  %v1128_v50 = vadd.f32 %v1120_v39, %v2303_v45  ;;  %v1135_v53 = vmul.f32 %v2286_v14, %v2231_v30  ;;  %v1136_v59 = vmul.f32 %v2286_v14, %v2374_v42 }
  0x98   : > { %v1141_v2 = vrot.slane %v1133_v13, 5  ;;  %v1142_v27 = vrot.slane %v1134_v17, 5  ;;  %v1156_v48 = vrot.slane %v2254_v31, %v1712_v7  ;;  %v1180_v41 = vrot.slane %v2254_v31, %v1714_v8 }
  0x99   : > { %v1143_v62 = vrot.slane %v1135_v53, 5  ;;  %v1144_v1 = vrot.slane %v1136_v59, 5  ;;  %v1204_v61 = vrot.slane %v2254_v31, %v1716_v9  ;;  %v1228_v45 = vrot.slane %v2254_v31, %v1718_v10 }
  0x9a   : > { %v1149_v11 = vadd.f32 %v1141_v2, %v2305_v54  ;;  %v1150_v14 = vadd.f32 %v1142_v27, %v2307_v22  ;;  %v1157_v52 = vmul.f32 %v2356_v36, %v1156_v48  ;;  %v1158_v29 = vmul.f32 %v2363_v18, %v1156_v48  ;;  %v2441_v27 = vld [vmem:[%s2623_s1 + $0x28] sm:$0xff] }
  0x9b   : > { %v1151_v25 = vadd.f32 %v1143_v62, %v2309_v57  ;;  %v1152_v24 = vadd.f32 %v1144_v1, %v2311_v12  ;;  %v1159_v26 = vmul.f32 %v1156_v48, %v2231_v30  ;;  %v1160_v46 = vmul.f32 %v1156_v48, %v2374_v42 }
  0x9c   : > { %v1165_v43 = vrot.slane %v1157_v52, 6  ;;  %v1166_v35 = vrot.slane %v1158_v29, 6  ;;  %v1181_v31 = vmul.f32 %v2356_v36, %v1180_v41  ;;  %v1182_v54 = vmul.f32 %v2363_v18, %v1180_v41 }
  0x9d   : > { %v1167_v40 = vrot.slane %v1159_v26, 6  ;;  %v1168_v22 = vrot.slane %v1160_v46, 6  ;;  %v1183_v60 = vmul.f32 %v1180_v41, %v2231_v30  ;;  %v1184_v23 = vmul.f32 %v1180_v41, %v2374_v42 }
  0x9e   : > { %v2413_v57 = vadd.f32 %v1165_v43, %v2328_v28  ;;  %v2416_v12 = vadd.f32 %v1166_v35, %v2330_v63  ;;  %v1189_v34 = vrot.slane %v1181_v31, 1  ;;  %v1190_v56 = vrot.slane %v1182_v54, 1  ;;  %v2454_v35 = vld [vmem:[%s1723_s19 + $0x88] sm:$0x3] }
  0x9f   : > { %v1175_v20 = vadd.f32 %v1167_v40, %v2332_v33  ;;  %v1176_v37 = vadd.f32 %v1168_v22, %v2334_v55  ;;  %v1191_v16 = vrot.slane %v1183_v60, 1  ;;  %v1192_v13 = vrot.slane %v1184_v23, 1 }
  0xa0   : > { %v2421_v17 = vadd.f32 %v1189_v34, %v2345_v44  ;;  %v2424_v47 = vadd.f32 %v1190_v56, %v2348_v51  ;;  %v1205_v28 = vmul.f32 %v2356_v36, %v1204_v61  ;;  %v1206_v39 = vmul.f32 %v2363_v18, %v1204_v61 }
  0xa1   : > { %v2429_v63 = vadd.f32 %v1191_v16, %v2351_v32  ;;  %v2432_v53 = vadd.f32 %v1192_v13, %v2353_v0  ;;  %v1207_v33 = vmul.f32 %v1204_v61, %v2231_v30  ;;  %v1208_v55 = vmul.f32 %v1204_v61, %v2374_v42 }
  0xa2   : > { %v1213_v59 = vrot.slane %v1205_v28, 1  ;;  %v1214_v44 = vrot.slane %v1206_v39, 1  ;;  %v1229_v51 = vmul.f32 %v2356_v36, %v1228_v45  ;;  %v1230_v2 = vmul.f32 %v2363_v18, %v1228_v45 }
  0xa3   : > { %v1215_v32 = vrot.slane %v1207_v33, 1  ;;  %v1216_v48 = vrot.slane %v1208_v55, 1  ;;  %v1231_v0 = vmul.f32 %v1228_v45, %v2231_v30  ;;  %v1232_v41 = vmul.f32 %v1228_v45, %v2374_v42 }
  0xa4   : > { %v2445_v62 = vadd.f32 %v1213_v59, %v1125_v38  ;;  %v2447_v1 = vadd.f32 %v1214_v44, %v1126_v15  ;;  %v1237_v61 = vrot.slane %v1229_v51, 1  ;;  %v1238_v52 = vrot.slane %v1230_v2, 1 }
  0xa5   : > { %v2449_v29 = vadd.f32 %v1215_v32, %v1127_v58  ;;  %v2451_v26 = vadd.f32 %v1216_v48, %v1128_v50  ;;  %v1239_v46 = vrot.slane %v1231_v0, 1  ;;  %v1240_v43 = vrot.slane %v1232_v41, 1 }
  0xa6   : > { %v2456_v31 = vadd.f32 %v1237_v61, %v1149_v11  ;;  %v2458_v54 = vadd.f32 %v1238_v52, %v1150_v14  ;;  %v1252_v38 = vrot.slane %v2441_v27, %v1704_v3  ;;  %v1292_v15 = vrot.slane %v2441_v27, %v1706_v4 }
  0xa7   : > { %v2464_v45 = vadd.f32 %v1239_v46, %v1151_v25  ;;  %v2466_v58 = vadd.f32 %v1240_v43, %v1152_v24  ;;  %v1332_v50 = vrot.slane %v2441_v27, %v1708_v5  ;;  %v1356_v40 = vrot.slane %v2441_v27, %v1710_v6 }
  0xa8   : > { %v1253_v11 = vmul.f32 %v2356_v36, %v1252_v38  ;;  %v1254_v14 = vmul.f32 %v1252_v38, %v2068_v21  ;;  %v1255_v22 = vmul.f32 %v2363_v18, %v1252_v38  ;;  %v1256_v3 = vmul.f32 %v1252_v38, %v2207_v19 }
  0xa9   : > { %v1257_v4 = vmul.f32 %v1252_v38, %v2231_v30  ;;  %v1258_v25 = vmul.f32 %v1252_v38, %v2314_v49  ;;  %v1259_v24 = vmul.f32 %v1252_v38, %v2374_v42  ;;  %v1260_v60 = vmul.f32 %v1252_v38, %v2454_v35 }
  0xaa   : > { %v1269_v5 = vrot.slane %v1253_v11, 2  ;;  %v1270_v23 = vrot.slane %v1254_v14, 2  ;;  %v1272_v34 = vrot.slane %v1255_v22, 2  ;;  %v1273_v6 = vrot.slane %v1256_v3, 2 }
  0xab   : > { %v1275_v56 = vrot.slane %v1257_v4, 2  ;;  %v1276_v16 = vrot.slane %v1258_v25, 2  ;;  %v1278_v13 = vrot.slane %v1259_v24, 2  ;;  %v1279_v28 = vrot.slane %v1260_v60, 2  ;;  %v2507_v24 = vld [vmem:[%s1723_s19 + $0x90] sm:$0xff] }
  0xac   : > { %v1271_v39 = vsel %vm514_vm1, %v1269_v5, %v1270_v23  ;;  %v1274_v33 = vsel %vm514_vm1, %v1272_v34, %v1273_v6  ;;  %v1293_v55 = vmul.f32 %v2356_v36, %v1292_v15  ;;  %v1294_v59 = vmul.f32 %v1292_v15, %v2068_v21 }
  0xad   : > { %v1277_v44 = vsel %vm514_vm1, %v1275_v56, %v1276_v16  ;;  %v1280_v51 = vsel %vm514_vm1, %v1278_v13, %v1279_v28  ;;  %v2487_v2 = vadd.f32 %v1271_v39, %v2413_v57  ;;  %v2490_v32 = vadd.f32 %v1274_v33, %v2416_v12 }
  0xae   : > { %v2492_v48 = vadd.f32 %v1277_v44, %v1175_v20  ;;  %v2494_v0 = vadd.f32 %v1280_v51, %v1176_v37  ;;  %v1295_v41 = vmul.f32 %v2363_v18, %v1292_v15  ;;  %v1296_v36 = vmul.f32 %v1292_v15, %v2207_v19 }
  0xaf   : > { %v1297_v21 = vmul.f32 %v1292_v15, %v2231_v30  ;;  %v1298_v61 = vmul.f32 %v1292_v15, %v2314_v49  ;;  %v1299_v52 = vmul.f32 %v1292_v15, %v2374_v42  ;;  %v1300_v57 = vmul.f32 %v1292_v15, %v2454_v35 }
  0xb0   : > { %v1309_v46 = vrot.slane %v1293_v55, 5  ;;  %v1310_v12 = vrot.slane %v1294_v59, 5  ;;  %v1312_v43 = vrot.slane %v1295_v41, 5  ;;  %v1313_v20 = vrot.slane %v1296_v36, 5 }
  0xb1   : > { %v1315_v38 = vrot.slane %v1297_v21, 5  ;;  %v1316_v37 = vrot.slane %v1298_v61, 5  ;;  %v1318_v11 = vrot.slane %v1299_v52, 5  ;;  %v1319_v14 = vrot.slane %v1300_v57, 5 }
  0xb2   : > { %v1311_v22 = vsel %vm555_vm2, %v1309_v46, %v1310_v12  ;;  %v1314_v3 = vsel %vm555_vm2, %v1312_v43, %v1313_v20  ;;  %v1333_v4 = vmul.f32 %v2363_v18, %v1332_v50  ;;  %v1334_v25 = vmul.f32 %v1332_v50, %v2231_v30 }
  0xb3   : > { %v1317_v15 = vsel %vm555_vm2, %v1315_v38, %v1316_v37  ;;  %v1320_v60 = vsel %vm555_vm2, %v1318_v11, %v1319_v14  ;;  %v1325_v5 = vadd.f32 %v1311_v22, %v2421_v17  ;;  %v1326_v23 = vadd.f32 %v1314_v3, %v2424_v47 }
  0xb4   : > { %v1327_v34 = vadd.f32 %v1317_v15, %v2429_v63  ;;  %v1328_v6 = vadd.f32 %v1320_v60, %v2432_v53  ;;  %v1335_v56 = vmul.f32 %v1332_v50, %v2374_v42  ;;  %v1336_v16 = vmul.f32 %v1332_v50, %v2507_v24 }
  0xb5   : > { %v1341_v13 = vrot.slane %v1333_v4, 6  ;;  %v1342_v28 = vrot.slane %v1334_v25, 6  ;;  %v1357_v39 = vmul.f32 %v2363_v18, %v1356_v40  ;;  %v1358_v33 = vmul.f32 %v1356_v40, %v2231_v30 }
  0xb6   : > { %v1343_v55 = vrot.slane %v1335_v56, 6  ;;  %v1344_v59 = vrot.slane %v1336_v16, 6  ;;  %v1359_v17 = vmul.f32 %v1356_v40, %v2374_v42  ;;  %v1360_v47 = vmul.f32 %v1356_v40, %v2507_v24  ;;  %v190_v16 = vld [vmem:[%s1723_s19 + $0x98] sm:$0x3] }
  0xb7   : > { %v1349_v63 = vadd.f32 %v1341_v13, %v2445_v62  ;;  %v1350_v53 = vadd.f32 %v1342_v28, %v2447_v1  ;;  %v1365_v44 = vrot.slane %v1357_v39, 6  ;;  %v1366_v51 = vrot.slane %v1358_v33, 6 }
  0xb8   : > { %v1351_v50 = vadd.f32 %v1343_v55, %v2449_v29  ;;  %v1352_v41 = vadd.f32 %v1344_v59, %v2451_v26  ;;  %v1367_v36 = vrot.slane %v1359_v17, 6  ;;  %v1368_v21 = vrot.slane %v1360_v47, 6 }
  0xb9   : > { %v2526_v61 = vadd.f32 %v1365_v44, %v2456_v31  ;;  %v2529_v52 = vadd.f32 %v1366_v51, %v2458_v54  ;;  %v1380_v40 = vrot.slane %v2441_v27, %v1712_v7  ;;  %v1404_v62 = vrot.slane %v2441_v27, %v1714_v8  ;;  %v1646_v44 = vld [vmem:[%s2623_s1 + $0x30] ss:$0 sm:$0xff] }
  0xba   : > { %v2536_v1 = vadd.f32 %v1367_v36, %v2464_v45  ;;  %v2539_v29 = vadd.f32 %v1368_v21, %v2466_v58  ;;  %v1428_v26 = vrot.slane %v2441_v27, %v1716_v9  ;;  %v1452_v31 = vrot.slane %v2441_v27, %v1718_v10 }
  0xbb   : > { %v1381_v54 = vmul.f32 %v2363_v18, %v1380_v40  ;;  %v1382_v57 = vmul.f32 %v1380_v40, %v2231_v30  ;;  %v1383_v7 = vmul.f32 %v1380_v40, %v2374_v42  ;;  %v1384_v8 = vmul.f32 %v1380_v40, %v2507_v24 }
  0xbc   : > { %v1405_v45 = vmul.f32 %v2363_v18, %v1404_v62  ;;  %v1406_v46 = vmul.f32 %v1404_v62, %v2231_v30  ;;  %v1407_v58 = vmul.f32 %v1404_v62, %v2374_v42  ;;  %v1408_v12 = vmul.f32 %v1404_v62, %v2507_v24 }
  0xbd   : > { %v1389_v9 = vrot.slane %v1381_v54, 7  ;;  %v1390_v43 = vrot.slane %v1382_v57, 7  ;;  %v1391_v10 = vrot.slane %v1383_v7, 7  ;;  %v1392_v27 = vrot.slane %v1384_v8, 7 }
  0xbe   : > { %v1413_v20 = vrot.slane %v1405_v45, 2  ;;  %v1414_v38 = vrot.slane %v1406_v46, 2  ;;  %v1415_v37 = vrot.slane %v1407_v58, 2  ;;  %v1416_v11 = vrot.slane %v1408_v12, 2 }
  0xbf   : > { %v2554_v14 = vadd.f32 %v1389_v9, %v2487_v2  ;;  %v2557_v22 = vadd.f32 %v1390_v43, %v2490_v32  ;;  %v2560_v3 = vadd.f32 %v1391_v10, %v2492_v48  ;;  %v2563_v4 = vadd.f32 %v1392_v27, %v2494_v0 }
  0xc0   : > { %v2565_v25 = vadd.f32 %v1413_v20, %v1325_v5  ;;  %v2567_v15 = vadd.f32 %v1414_v38, %v1326_v23  ;;  %v2569_v60 = vadd.f32 %v1415_v37, %v1327_v34  ;;  %v2571_v56 = vadd.f32 %v1416_v11, %v1328_v6 }
  0xc1   : > { %v1429_v2 = vmul.f32 %v2363_v18, %v1428_v26  ;;  %v1430_v32 = vmul.f32 %v1428_v26, %v2231_v30  ;;  %v1431_v13 = vmul.f32 %v1428_v26, %v2374_v42  ;;  %v1432_v48 = vmul.f32 %v1428_v26, %v2507_v24 }
  0xc2   : > { %v1453_v0 = vmul.f32 %v2363_v18, %v1452_v31  ;;  %v1454_v5 = vmul.f32 %v1452_v31, %v2207_v19  ;;  %v1455_v23 = vmul.f32 %v1452_v31, %v2231_v30  ;;  %v1456_v34 = vmul.f32 %v1452_v31, %v2314_v49 }
  0xc3   : > { %v1437_v28 = vrot.slane %v1429_v2, 2  ;;  %v1438_v6 = vrot.slane %v1430_v32, 2  ;;  %v1439_v39 = vrot.slane %v1431_v13, 2  ;;  %v1440_v33 = vrot.slane %v1432_v48, 2 }
  0xc4   : > { %v1457_v55 = vmul.f32 %v1452_v31, %v2374_v42  ;;  %v1458_v59 = vmul.f32 %v1452_v31, %v2454_v35  ;;  %v1459_v17 = vmul.f32 %v1452_v31, %v2507_v24  ;;  %v1460_v47 = vmul.f32 %v1452_v31, %v190_v16 }
  0xc5   : > { %v1445_v51 = vadd.f32 %v1437_v28, %v1349_v63  ;;  %v1446_v36 = vadd.f32 %v1438_v6, %v1350_v53  ;;  %v1447_v21 = vadd.f32 %v1439_v39, %v1351_v50  ;;  %v1448_v40 = vadd.f32 %v1440_v33, %v1352_v41 }
  0xc6   : > { %v1469_v62 = vrot.slane %v1453_v0, 2  ;;  %v1470_v26 = vrot.slane %v1454_v5, 2  ;;  %v1472_v54 = vrot.slane %v1455_v23, 2  ;;  %v1473_v57 = vrot.slane %v1456_v34, 2 }
  0xc7   : > { %v1475_v7 = vrot.slane %v1457_v55, 2  ;;  %v1476_v8 = vrot.slane %v1458_v59, 2  ;;  %v1478_v45 = vrot.slane %v1459_v17, 2  ;;  %v1479_v46 = vrot.slane %v1460_v47, 2 }
  0xc8   : > { %v1471_v58 = vsel %vm514_vm1, %v1469_v62, %v1470_v26  ;;  %v1474_v31 = vsel %vm514_vm1, %v1472_v54, %v1473_v57  ;;  %v1493_v12 = vmul.f32 %v2363_v18, %v1646_v44  ;;  %v1494_v9 = vmul.f32 %v1646_v44, %v2207_v19 }
  0xc9   : > { %v1477_v63 = vsel %vm514_vm1, %v1475_v7, %v1476_v8  ;;  %v1480_v53 = vsel %vm514_vm1, %v1478_v45, %v1479_v46  ;;  %v1485_v50 = vadd.f32 %v1471_v58, %v2526_v61  ;;  %v1486_v41 = vadd.f32 %v1474_v31, %v2529_v52 }
  0xca   : > { %v1487_v43 = vadd.f32 %v1477_v63, %v2536_v1  ;;  %v1488_v10 = vadd.f32 %v1480_v53, %v2539_v29  ;;  %v1495_v27 = vmul.f32 %v1646_v44, %v2231_v30  ;;  %v1496_v20 = vmul.f32 %v1646_v44, %v2314_v49 }
  0xcb   : > { %v1497_v18 = vmul.f32 %v1646_v44, %v2374_v42  ;;  %v1498_v19 = vmul.f32 %v1646_v44, %v2454_v35  ;;  %v1499_v38 = vmul.f32 %v1646_v44, %v2507_v24  ;;  %v1500_v37 = vmul.f32 %v1646_v44, %v190_v16 }
  0xcc   : > { %v1509_v11 = vrot.slane %v1493_v12, 3  ;;  %v1510_v2 = vrot.slane %v1494_v9, 3  ;;  %v1512_v61 = vrot.slane %v1495_v27, 3  ;;  %v1513_v32 = vrot.slane %v1496_v20, 3 }
  0xcd   : > { %v1515_v52 = vrot.slane %v1497_v18, 3  ;;  %v1516_v13 = vrot.slane %v1498_v19, 3  ;;  %v1518_v1 = vrot.slane %v1499_v38, 3  ;;  %v1519_v48 = vrot.slane %v1500_v37, 3 }
  0xce   : > { %v1511_v29 = vsel %vm756_vm3, %v1509_v11, %v1510_v2  ;;  %v1514_v30 = vsel %vm756_vm3, %v1512_v61, %v1513_v32  ;;  %v1533_v49 = vrot.slane %v2565_v25, 6  ;;  %v1534_v42 = vrot.slane %v2567_v15, 6 }
  0xcf   : > { %v1517_v35 = vsel %vm756_vm3, %v1515_v52, %v1516_v13  ;;  %v1520_v24 = vsel %vm756_vm3, %v1518_v1, %v1519_v48  ;;  %v1525_v16 = vadd.f32 %v1511_v29, %v2554_v14  ;;  %v1526_v0 = vadd.f32 %v1514_v30, %v2557_v22 }
  0xd0   : > { %v1527_v5 = vadd.f32 %v1517_v35, %v2560_v3  ;;  %v1528_v23 = vadd.f32 %v1520_v24, %v2563_v4  ;;  %v1535_v34 = vrot.slane %v2569_v60, 6  ;;  %v1536_v28 = vrot.slane %v2571_v56, 6 }
  0xd1   : > { %v1549_v6 = vrot.slane %v1485_v50, 1  ;;  %v1550_v25 = vrot.slane %v1486_v41, 1  ;;  %v1551_v39 = vrot.slane %v1487_v43, 1  ;;  %v1552_v15 = vrot.slane %v1488_v10, 1 }
  0xd2   : > { %v1541_v33 = vadd.f32 %v1533_v49, %v1525_v16  ;;  %v1542_v55 = vadd.f32 %v1534_v42, %v1526_v0  ;;  %v1543_v14 = vadd.f32 %v1535_v34, %v1527_v5  ;;  %v1544_v47 = vadd.f32 %v1536_v28, %v1528_v23 }
  0xd3   : > { %v1557_v59 = vadd.f32 %v1549_v6, %v1445_v51  ;;  %v1558_v17 = vadd.f32 %v1550_v25, %v1446_v36  ;;  %v1559_v22 = vadd.f32 %v1551_v39, %v1447_v21  ;;  %v1560_v44 = vadd.f32 %v1552_v15, %v1448_v40 }
  0xd5   : > { %v1565_v3 = vrot.slane %v1557_v59, 7  ;;  %v1566_v62 = vrot.slane %v1558_v17, 7  ;;  %v1567_v4 = vrot.slane %v1559_v22, 7  ;;  %v1568_v60 = vrot.slane %v1560_v44, 7 }
  0xd7   : > { %v1573_v56 = vadd.f32 %v1565_v3, %v1541_v33  ;;  %v1574_v26 = vadd.f32 %v1566_v62, %v1542_v55  ;;  %v1575_v54 = vadd.f32 %v1567_v4, %v1543_v14  ;;  %v1576_v57 = vadd.f32 %v1568_v60, %v1544_v47 }
  0xd9   : > { %1578 = vst.msk [vmem:[%s170_s10 - $0x3] sm:$0x78] %vm1577_vm4, %v1573_v56  ;;  %1579 = vst.msk [vmem:[%s170_s10 + $0x1] sm:$0x78] %vm1577_vm4, %v1574_v26 }
  0xda   : > { %1580 = vst.msk [vmem:[%s170_s10 + $0x5] sm:$0x78] %vm1577_vm4, %v1575_v54  ;;  %1581 = vst.msk [vmem:[%s170_s10 + $0x9] sm:$0x78] %vm1577_vm4, %v1576_v57 }
  0xdb PF: > { %s13_s12 = sadd.s32 1, %s1668_s12  }
  0xdc   : > { %p10_p4 = scmp.ge.s32.totalorder %s13_s12, 4  }
  0xde   :  { %12 = sbr.rel (!%p10_p4) target bundleno = 1 (0x1), region = 62 }

// kernel: transmil_forward.15
= control target key start
LH: loop header
LB: loop body
LE: loop exit
PB: predicated region body
PF: predicated region fallthrough
CT: control target
= control target key end

     0   :  { %s4893_s24 = smov 0   ;;  %s6038_s0 = inlined_call_operand.vmem [shape: bf16[2,17,96], index: 0, kind: input, shape index: {}]   ;;  %s6039_s1 = inlined_call_operand.vmem [shape: f32[2,16,64], index: 1, kind: input, shape index: {}]   ;;  %s6040_s2 = inlined_call_operand.vmem [shape: f32[2,8,16,16], index: 2, kind: input, shape index: {}]   ;;  %s6041_s3 = inlined_call_operand.vmem [shape: f32[2,17,32], index: 3, kind: input, shape index: {}]   ;;  %s6042_s4 = inlined_call_operand.vmem [shape: f32[33,32], index: 4, kind: input, shape index: {}]   ;;  %s6043_s5 = inlined_call_operand.vmem [shape: bf16[32,32], index: 5, kind: input, shape index: {}]   ;;  %s6044_s6 = inlined_call_operand.vmem [shape: f32[1,32], index: 6, kind: input, shape index: {}]   ;;  %s6045_s7 = inlined_call_operand.vmem [shape: f32[2,17,32], index: 7, kind: output, shape index: {}]  }
   0x1 LB: > { %s4065_s25 = sadd.s32 4294967295, %s4818_s24   ;;  %p4069_p0 = scmp.ge.s32.totalorder %s4818_s24, 1  ;;  %s4818_s24 = sphi %s4893_s24, %s17_s24  }
   0x2   : > { %p267_p1 = scmp.lt.s32.totalorder %s4818_s24, 3 }
   0x4   : > { %p268_p2 = pnand %p4069_p0, %p267_p1 }
   0x6   : > { %271 = sbr.rel (%p268_p2) target bundleno = 6984 (0x1b48), region = 48 }
   0xd   : > { %p314_p3 = scmp.lt.s32.totalorder %s4065_s25, 1  ;;  %v4820_v0 = vmov 0.0   ;;  %vm4821_vm0 = vmmov 0   ;;  %s4822_s11 = smov 96   ;;  %vm381_vm1 = vcmask 31744   ;;  %vm531_vm2 = vcmask 138240  }
   0xe   : > { %4283 = vmatprep.subr.bf16.mxu1 %v4820_v0  ;;  %4287 = vmatprep.mubr.msk.bf16.mxu1 %vm4821_vm0, %v4820_v0  ;;  %vm442_vm3 = vcmask 130048   ;;  %vm449_vm4 = vcmask 122880   ;;  %s4823_s12 = smov 64   ;;  %s4824_s13 = smov 92   ;;  %vm575_vm5 = vcmask 1040384   ;;  %vm3391_vm6 = vcmask 1043456  }
   0xf   : > { %s6163_s25 = smov (!%p314_p3, %s4065_s25), 1  ;;  %s4825_s14 = smov 124   ;;  %vm3840_vm7 = vcmask 1046528   ;;  %vm3307_vm8 = vcmask 64512   ;;  %vm3311_vm9 = vcmask 97280   ;;  %vm3318_vm10 = vcmask 162816  }
  0x10   : > { %s4565_s26 = smul.u32 12, %s6163_s25  ;;  %s4151_s27 = sshll.u32 %s6163_s25, 4  ;;  %vm3869_vm11 = vcmask 1045504   ;;  %vm3322_vm12 = vcmask 195584   ;;  %vm3326_vm13 = vcmask 228352   ;;  %vm3909_vm14 = vcmask 261120  }
  0x11   : > { %s323_s30 = scalar_lea.vmem %s6039_s1, %s4151_s27  ;;  %s4152_s15 = sshll.u32 %s6163_s25, 7  ;;  %vm3972_vm15 = vcmask 253952  }
  0x12   : > { %s4912_s10 = scalar_lea.vmem %s6038_s0, %s4565_s26  ;;  %v343_v1 = vld [vmem:[%s323_s30] sm:$0xff]  ;;  %v344_v2 = vld [vmem:[%s323_s30 + $0x8] sm:$0xff]  ;;  %s4975_s18 = scalar_lea.vmem %s6040_s2, %s4152_s15 }
  0x13   : > { %v4915_v3 = vld [vmem:[%s4912_s10] sm:$0xff]   ;;  %v4917_v4 = vpack.c.bf16 %v344_v2, %v343_v1  ;;  %v342_v5 = vld [vmem:[%s4912_s10 + $0x8] sm:$0x1]  ;;  %s4827_s19 = smov 60   ;;  %s4828_s20 = smov 88  }
  0x14   : > { %477 = vrot.lane.b32.xlu0 %v4915_v3, %s4822_s11  ;;  %v4924_v6 = vcombine.low %v342_v5, %v342_v5  ;;  %4279 = vmatprep.mubr.msk.bf16.mxu0 %vm381_vm1, %v4915_v3  ;;  %s4829_s21 = smov 120   ;;  %s4830_s22 = smov 56  }
  0x15   : > { %379 = vrot.lane.b32.xlu1 %v4917_v4, %s4822_s11  ;;  %s4831_s23 = smov 84   ;;  %s4832_s26 = smov 116  }
  0x16   : > { %s4833_s27 = smov 52   ;;  %s4834_s28 = smov 80  }
  0x17   : > { %s4835_s29 = smov 112   ;;  %s4836_s30 = smov 48  }
  0x18   : > { %479 = vrot.lane.b32.xlu0 %v4924_v6, %s4822_s11  ;;  %s4837_s8 = smov 76   ;;  %s4838_s9 = smov 108  }
  0x19   : > { %s4839_s11 = smov 44   ;;  %s4842_s15 = smov 40  }
  0x1a   : > { %s4843_s16 = smov 68   ;;  %s4844_s17 = smov 100  }
  0x86   : > { %v478_v8 = vpop.permute.xlu0 %477 }
  0x87   : > { %v380_v7 = vpop.permute.xlu1 %379  ;;  %v485_v10 = vsel %vm381_vm1, %v478_v8, 0 }
  0x88   : > { %4557 = vmatprep.subr.msk.bf16.mxu0 %vm381_vm1, %v380_v7  ;;  %v389_v9 = vsel %vm381_vm1, %v380_v7, 0  ;;  %4284 = vmatpush3.bf16.xpose.msra.mxu1 %v485_v10 }
  0x89   : > { %4278 = vmatpush3.bf16.xpose.msra.mxu0 %v389_v9  ;;  %4285 = vmatprep.subr.bf16.mxu1 %v4820_v0 }
  0x8a   : > { %4291 = vmatprep.subr.bf16.mxu0 %v4820_v0  ;;  %v480_v11 = vpop.permute.xlu0 %479 }
  0x8b   : > { %v488_v12 = vsel %vm381_vm1, %v480_v11, 0 }
  0x90   : > { %4280 = vmatmul.mubr.msk.bf16.vlgmr.msra.gmra.mrb[0].mxu0 %vm381_vm1, %v4924_v6  ;;  %4286 = vmatpush3.bf16.xpose.msra.mxu1 %v488_v12  ;;  %v346_v12 = vld [vmem:[%s4975_s18] sm:$0xff] }
  0x91   : > { %4295 = vmatprep.mubr.msk.bf16.mxu0 %vm4821_vm0, %v4820_v0 }
  0x97   : > { %4288 = vmatmul.mubr.msk.bf16.vlgmr.msra.gmra.mrb[0].mxu1 %vm381_vm1, %v4917_v4 }
 0x163   : > { %v4281_v13 = vpop.f32.mrb[0].mxu0 }
 0x164   : > { %v425_v14 = vpop.f32.mrb[1].mxu0  ;;  %v441_v27 = vmul.f32 0.5, %v4281_v13  ;;  %v347_v13 = vld [vmem:[%s4975_s18 + $0x8] sm:$0xff] }
 0x165   : > { %v4282_v15 = vpop.f32.mrb[2].mxu0  ;;  %v439_v19 = vmul.f32 0.5, %v425_v14  ;;  %v4826_v14 = vmov 0  }
 0x166   : > { %v428_v16 = vpop.f32.mrb[3].mxu0  ;;  %v450_v28 = vsel %vm449_vm4, %v441_v27, -inf  ;;  %v4980_v15 = vsel %vm575_vm5, 65535, %v4826_v14 }
 0x167   : > { %v440_v17 = vmul.f32 0.5, %v428_v16  ;;  %v443_v26 = vsel %vm442_vm3, %v439_v19, -inf }
 0x169   : > { %v446_v25 = vsel %vm442_vm3, %v440_v17, -inf }
 0x16a   : > { %v524_v18 = vpop.f32.mrb[0].mxu1 }
 0x16b   : > { %v4289_v20 = vpop.f32.mrb[1].mxu1  ;;  %v532_v21 = vsel %vm531_vm2, %v524_v18, -inf }
 0x16c   : > { %533 = vmax.xlane.f32.xlu1 %v532_v21  ;;  %v527_v22 = vpop.f32.mrb[2].mxu1 }
 0x16d   : > { %v4290_v23 = vpop.f32.mrb[3].mxu1  ;;  %v535_v24 = vsel %vm531_vm2, %v527_v22, -inf }
 0x16e   : > { %536 = vmax.xlane.f32.xlu0 %v535_v24 }
 0x170   : > { %447 = vmax.xlane.f32.xlu1 %v446_v25 }
 0x172   : > { %444 = vmax.xlane.f32.xlu0 %v443_v26 }
 0x176   : > { %451 = vmax.xlane.f32.xlu0 %v450_v28 }
 0x1f9   : > { %v534_v29 = vpop.xlane.xlu1 %533 }
 0x1fa   : > { %v538_v37 = vmax.f32 %v534_v29, 0.0 }
 0x1fb   : > { %v537_v30 = vpop.xlane.xlu0 %536 }
 0x1fc   : > { %v539_v31 = vmax.f32 %v537_v30, 0.0  ;;  %v540_v42 = vsub.f32 %v524_v18, %v538_v37  ;;  %v552_v57 = vsub.f32 0.0, %v538_v37 }
 0x1fd   : > { %v448_v32 = vpop.xlane.xlu1 %447 }
 0x1fe   : > { %v541_v33 = vsub.f32 %v527_v22, %v539_v31  ;;  %v454_v34 = vsub.f32 %v440_v17, %v448_v32  ;;  %v542_v45 = vmul.f32 1.442695, %v540_v42  ;;  %v553_v56 = vsub.f32 0.0, %v539_v31 }
 0x1ff   : > { %v445_v35 = vpop.xlane.xlu0 %444  ;;  %v554_v59 = vmul.f32 1.442695, %v552_v57  ;;  %v362_v17 = vpack.c.bf16 %v347_v13, %v346_v12 }
 0x200   : > { %v458_v36 = vmul.f32 1.442695, %v454_v34  ;;  %v544_v38 = vmul.f32 1.442695, %v541_v33  ;;  %v453_v39 = vsub.f32 %v439_v19, %v445_v35  ;;  %v556_v58 = vmul.f32 1.442695, %v553_v56 }
 0x202   : > { %4618 = vpow2.f32 %v458_v36  ;;  %v456_v43 = vmul.f32 1.442695, %v453_v39 }
 0x203   : > { %v452_v40 = vpop.xlane.xlu0 %451  ;;  %4620 = vpow2.f32 %v544_v38 }
 0x204   : > { %v455_v41 = vsub.f32 %v441_v27, %v452_v40 }
 0x206   : > { %v460_v44 = vmul.f32 1.442695, %v455_v41 }
 0x208   : > { %4622 = vpow2.f32 %v460_v44 }
 0x209   : > { %4624 = vpow2.f32 %v456_v43 }
 0x20a   : > { %4626 = vpow2.f32 %v542_v45 }
 0x20b   : > { %4628 = vpow2.f32 %v556_v58 }
 0x20c   : > { %v4946_v46 = vpop.eup %4618  ;;  %4630 = vpow2.f32 %v554_v59 }
 0x20d   : > { %v465_v47 = vsel %vm442_vm3, %v4946_v46, 0.0  ;;  %v4950_v48 = vpop.eup %4620 }
 0x20e   : > { %466 = vadd.xlane.f32.xlu0 %v465_v47  ;;  %v549_v50 = vsel %vm531_vm2, %v4950_v48, 0.0 }
 0x212   : > { %v4952_v49 = vpop.eup %4622  ;;  %550 = vadd.xlane.f32.xlu0 %v549_v50 }
 0x213   : > { %v468_v51 = vsel %vm449_vm4, %v4952_v49, 0.0  ;;  %v4625_v52 = vpop.eup %4624 }
 0x214   : > { %469 = vadd.xlane.f32.xlu1 %v468_v51  ;;  %v462_v53 = vsel %vm442_vm3, %v4625_v52, 0.0  ;;  %v4627_v54 = vpop.eup %4626 }
 0x215   : > { %v546_v55 = vsel %vm531_vm2, %v4627_v54, 0.0  ;;  %v4629_v61 = vpop.eup %4628 }
 0x216   : > { %v559_v1 = vmul.f32 15.0, %v4629_v61  ;;  %v4631_v2 = vpop.eup %4630 }
 0x217   : > { %v558_v9 = vmul.f32 15.0, %v4631_v2 }
 0x218   : > { %463 = vadd.xlane.f32.xlu1 %v462_v53 }
 0x21c   : > { %547 = vadd.xlane.f32.xlu1 %v546_v55 }
 0x228   : > { %567 = vrot.lane.b32.xlu0 %v4915_v3, %s4823_s12 }
 0x22c   : > { %838 = vrot.lane.b32.xlu0 %v4924_v6, %s4824_s13 }
 0x22d   : > { %569 = vrot.lane.b32.xlu1 %v4924_v6, %s4823_s12 }
 0x230   : > { %834 = vrot.lane.b32.xlu0 %v4917_v4, %s4825_s14 }
 0x231   : > { %836 = vrot.lane.b32.xlu1 %v4915_v3, %s4824_s13 }
 0x234   : > { %737 = vrot.lane.b32.xlu0 %v4924_v6, %s4825_s14 }
 0x235   : > { %739 = vrot.lane.b32.xlu1 %v4917_v4, %s4824_s13  ;;  %s4840_s13 = smov 72  }
 0x239   : > { %735 = vrot.lane.b32.xlu1 %v4915_v3, %s4825_s14  ;;  %s4841_s14 = smov 104  }
 0x29b   : > { %v467_v60 = vpop.xlane.xlu0 %466 }
 0x29f   : > { %v551_v62 = vpop.xlane.xlu0 %550 }
 0x2a0   : > { %v561_v8 = vadd.f32 %v559_v1, %v551_v62 }
 0x2a1   : > { %v470_v63 = vpop.xlane.xlu1 %469 }
 0x2a3   : > { %v568_v7 = vpop.permute.xlu0 %567 }
 0x2a4   : > { %4292 = vmatpush3.bf16.msra.mxu0 %v568_v7 }
 0x2a5   : > { %v464_v5 = vpop.xlane.xlu1 %463  ;;  %4293 = vmatprep.subr.bf16.mxu0 %v4820_v0 }
 0x2a6   : > { %4632 = vrcp.f32 %v464_v5 }
 0x2a7   : > { %4634 = vrcp.f32 %v561_v8  ;;  %v839_v35 = vpop.permute.xlu0 %838 }
 0x2a8   : > { %4636 = vrcp.f32 %v467_v60  ;;  %v847_v51 = vsel %vm381_vm1, %v839_v35, 0 }
 0x2a9   : > { %v548_v10 = vpop.xlane.xlu1 %547 }
 0x2aa   : > { %v560_v11 = vadd.f32 %v558_v9, %v548_v10 }
 0x2ab   : > { %v835_v36 = vpop.permute.xlu0 %834 }
 0x2ac   : > { %4638 = vrcp.f32 %v560_v11 }
 0x2ad   : > { %v570_v16 = vpop.permute.xlu1 %569  ;;  %4640 = vrcp.f32 %v470_v63 }
 0x2ae   : > { %v579_v18 = vand.u32 %v4980_v15, %v570_v16 }
 0x2af   : > { %v738_v38 = vpop.permute.xlu0 %737 }
 0x2b0   : > { %4294 = vmatpush3.bf16.msra.mxu0 %v579_v18  ;;  %v4633_v19 = vpop.eup %4632 }
 0x2b1   : > { %4299 = vmatprep.subr.bf16.mxu0 %v362_v17  ;;  %v4635_v20 = vpop.eup %4634  ;;  %v472_v23 = vmul.f32 %v4633_v19, %v4625_v52  ;;  %v837_v32 = vpop.permute.xlu1 %836 }
 0x2b2   : > { %v4637_v21 = vpop.eup %4636  ;;  %v565_v24 = vmul.f32 %v4635_v20, %v4950_v48  ;;  %v844_v50 = vsel %vm381_vm1, %v837_v32, 0 }
 0x2b3   : > { %v474_v26 = vmul.f32 %v4637_v21, %v4946_v46 }
 0x2b5   : > { %v622_v29 = vpack.c.bf16 %v474_v26, %v472_v23  ;;  %v740_v33 = vpop.permute.xlu1 %739 }
 0x2b6   : > { %v4639_v22 = vpop.eup %4638  ;;  %v748_v34 = vsel %vm381_vm1, %v740_v33, 0 }
 0x2b7   : > { %v563_v25 = vmul.f32 %v4639_v22, %v4627_v54  ;;  %v4641_v28 = vpop.eup %4640 }
 0x2b8   : > { %v476_v30 = vmul.f32 %v4641_v28, %v4952_v49 }
 0x2b9   : > { %v566_v27 = vpack.c.bf16 %v565_v24, %v563_v25  ;;  %v736_v37 = vpop.permute.xlu1 %735 }
 0x2ba   : > { %v623_v31 = vpack.c.bf16 %v476_v30, %v476_v30 }
 0x2bb   : > { %4296 = vmatmul.mubr.msk.bf16.vlgmr.msra.gmra.mrb[4].mxu0 %vm531_vm2, %v566_v27 }
 0x2bc   : > { %4300 = vmatpush3.bf16.msra.mxu0 %v362_v17  ;;  %4301 = vmatprep.mubr.msk.bf16.mxu0 %vm442_vm3, %v622_v29 }
 0x2bd   : > { %4558 = vmatprep.subr.msk.bf16.mxu0 %vm381_vm1, %v740_v33 }
 0x2c3   : > { %4302 = vmatmul.mubr.msk.bf16.vlgmr.msra.gmra.mrb[8].mxu0 %vm442_vm3, %v623_v31 }
 0x2c4   : > { %4313 = vmatprep.mubr.msk.bf16.mxu0 %vm381_vm1, %v736_v37 }
 0x2c5   : > { %4312 = vmatpush3.bf16.xpose.msra.mxu0 %v748_v34 }
 0x2c6   : > { %4325 = vmatprep.subr.bf16.mxu0 %v4820_v0 }
 0x2cc   : > { %4314 = vmatmul.mubr.msk.bf16.vlgmr.msra.gmra.mrb[12].mxu0 %vm381_vm1, %v738_v38 }
 0x2cd   : > { %4329 = vmatprep.mubr.msk.bf16.mxu0 %vm4821_vm0, %v4820_v0 }
 0x38e   : > { %v615_v39 = vpop.f32.mrb[4].mxu0 }
 0x38f   : > { %v4297_v40 = vpop.f32.mrb[5].mxu0 }
 0x390   : > { %v618_v41 = vpop.f32.mrb[6].mxu0 }
 0x391   : > { %v680_v42 = vpack.c.bf16 %v618_v41, %v615_v39  ;;  %v4298_v43 = vpop.f32.mrb[7].mxu0 }
 0x393   : > { %4305 = vmatprep.subr.bf16.mxu1 %v680_v42 }
 0x394   : > { %4306 = vmatpush3.bf16.msra.mxu1 %v680_v42 }
 0x395   : > { %4317 = vmatprep.subr.bf16.mxu1 %v4820_v0 }
 0x396   : > { %v4303_v44 = vpop.f32.mrb[8].mxu0 }
 0x397   : > { %v664_v45 = vpop.f32.mrb[9].mxu0  ;;  %v679_v49 = vpack.c.bf16 %v4303_v44, %v4303_v44 }
 0x398   : > { %v4304_v46 = vpop.f32.mrb[10].mxu0 }
 0x399   : > { %v667_v47 = vpop.f32.mrb[11].mxu0 }
 0x39a   : > { %v678_v48 = vpack.c.bf16 %v667_v47, %v664_v45 }
 0x39c   : > { %4307 = vmatprep.mubr.msk.bf16.mxu1 %vm442_vm3, %v678_v48 }
 0x39d   : > { %4308 = vmatmul.mubr.msk.bf16.vlgmr.msra.gmra.mrb[4].mxu1 %vm442_vm3, %v679_v49 }
 0x39e   : > { %4318 = vmatpush3.bf16.xpose.msra.mxu1 %v844_v50  ;;  %4321 = vmatprep.mubr.msk.bf16.mxu1 %vm4821_vm0, %v4820_v0 }
 0x39f   : > { %4319 = vmatprep.subr.bf16.mxu1 %v4820_v0  ;;  %v4315_v52 = vpop.f32.mrb[12].mxu0 }
 0x3a0   : > { %v784_v53 = vpop.f32.mrb[13].mxu0  ;;  %v800_v10 = vmul.f32 0.5, %v4315_v52 }
 0x3a1   : > { %v4316_v54 = vpop.f32.mrb[14].mxu0  ;;  %v798_v62 = vmul.f32 0.5, %v784_v53 }
 0x3a2   : > { %v787_v55 = vpop.f32.mrb[15].mxu0  ;;  %v807_v11 = vsel %vm449_vm4, %v800_v10, -inf }
 0x3a3   : > { %v799_v60 = vmul.f32 0.5, %v787_v55  ;;  %v801_v9 = vsel %vm442_vm3, %v798_v62, -inf }
 0x3a5   : > { %v804_v8 = vsel %vm442_vm3, %v799_v60, -inf }
 0x3a6   : > { %4320 = vmatpush3.bf16.xpose.msra.mxu1 %v847_v51 }
 0x3ad   : > { %4322 = vmatmul.mubr.msk.bf16.vlgmr.msra.gmra.mrb[8].mxu1 %vm381_vm1, %v835_v36 }
 0x470   : > { %v5005_v56 = vpop.f32.mrb[4].mxu1 }
 0x471   : > { %6071 = vst [vmem:[#allocation2_spill] sm:$0xff] %v5005_v56  ;;  %v5007_v57 = vpop.f32.mrb[5].mxu1 }
 0x472   : > { %6072 = vst [vmem:[#allocation3_spill] sm:$0xff] %v5007_v57  ;;  %v4310_v58 = vpop.f32.mrb[6].mxu1 }
 0x473   : > { %v5009_v59 = vpop.f32.mrb[7].mxu1  ;;  %v348_v58 = vld [vmem:[%s4975_s18 + $0x10] sm:$0xff] }
 0x474   : > { %6073 = vst [vmem:[#allocation4_spill] sm:$0xff] %v5009_v59 }
 0x480   : > { %v883_v61 = vpop.f32.mrb[8].mxu1 }
 0x481   : > { %v4323_v63 = vpop.f32.mrb[9].mxu1  ;;  %v890_v1 = vsel %vm531_vm2, %v883_v61, -inf }
 0x482   : > { %891 = vmax.xlane.f32.xlu1 %v890_v1  ;;  %v886_v2 = vpop.f32.mrb[10].mxu1 }
 0x483   : > { %v4324_v5 = vpop.f32.mrb[11].mxu1  ;;  %v893_v7 = vsel %vm531_vm2, %v886_v2, -inf }
 0x484   : > { %894 = vmax.xlane.f32.xlu0 %v893_v7 }
 0x486   : > { %805 = vmax.xlane.f32.xlu1 %v804_v8 }
 0x488   : > { %802 = vmax.xlane.f32.xlu0 %v801_v9 }
 0x48c   : > { %808 = vmax.xlane.f32.xlu0 %v807_v11 }
 0x50f   : > { %v892_v12 = vpop.xlane.xlu1 %891 }
 0x510   : > { %v896_v18 = vmax.f32 %v892_v12, 0.0 }
 0x511   : > { %v895_v13 = vpop.xlane.xlu0 %894 }
 0x512   : > { %v897_v14 = vmax.f32 %v895_v13, 0.0  ;;  %v898_v25 = vsub.f32 %v883_v61, %v896_v18  ;;  %v910_v41 = vsub.f32 0.0, %v896_v18 }
 0x513   : > { %v806_v16 = vpop.xlane.xlu1 %805 }
 0x514   : > { %v899_v17 = vsub.f32 %v886_v2, %v897_v14  ;;  %v811_v19 = vsub.f32 %v799_v60, %v806_v16  ;;  %v900_v29 = vmul.f32 1.442695, %v898_v25  ;;  %v911_v40 = vsub.f32 0.0, %v897_v14  ;;  %v349_v60 = vld [vmem:[%s4975_s18 + $0x18] sm:$0xff] }
 0x515   : > { %v803_v20 = vpop.xlane.xlu0 %802  ;;  %v912_v43 = vmul.f32 1.442695, %v910_v41 }
 0x516   : > { %v810_v21 = vsub.f32 %v798_v62, %v803_v20  ;;  %v815_v22 = vmul.f32 1.442695, %v811_v19  ;;  %v902_v23 = vmul.f32 1.442695, %v899_v17  ;;  %v914_v42 = vmul.f32 1.442695, %v911_v40 }
 0x517   : > { %v363_v62 = vpack.c.bf16 %v349_v60, %v348_v58 }
 0x518   : > { %v813_v24 = vmul.f32 1.442695, %v810_v21  ;;  %4642 = vpow2.f32 %v815_v22 }
 0x519   : > { %v809_v26 = vpop.xlane.xlu0 %808 }
 0x51a   : > { %v812_v27 = vsub.f32 %v800_v10, %v809_v26  ;;  %4644 = vpow2.f32 %v813_v24 }
 0x51b   : > { %4646 = vpow2.f32 %v902_v23 }
 0x51c   : > { %v817_v28 = vmul.f32 1.442695, %v812_v27 }
 0x51e   : > { %4648 = vpow2.f32 %v817_v28 }
 0x51f   : > { %4650 = vpow2.f32 %v900_v29 }
 0x520   : > { %4652 = vpow2.f32 %v914_v42 }
 0x521   : > { %4654 = vpow2.f32 %v912_v43 }
 0x522   : > { %v5016_v30 = vpop.eup %4642 }
 0x523   : > { %v822_v32 = vsel %vm442_vm3, %v5016_v30, 0.0 }
 0x524   : > { %v4645_v31 = vpop.eup %4644  ;;  %823 = vadd.xlane.f32.xlu0 %v822_v32 }
 0x525   : > { %v4647_v33 = vpop.eup %4646  ;;  %v819_v34 = vsel %vm442_vm3, %v4645_v31, 0.0 }
 0x526   : > { %820 = vadd.xlane.f32.xlu1 %v819_v34  ;;  %v907_v36 = vsel %vm531_vm2, %v4647_v33, 0.0 }
 0x528   : > { %v5021_v35 = vpop.eup %4648  ;;  %908 = vadd.xlane.f32.xlu0 %v907_v36 }
 0x529   : > { %v825_v37 = vsel %vm449_vm4, %v5021_v35, 0.0  ;;  %v4651_v38 = vpop.eup %4650 }
 0x52a   : > { %826 = vadd.xlane.f32.xlu1 %v825_v37  ;;  %v904_v39 = vsel %vm531_vm2, %v4651_v38, 0.0  ;;  %v4653_v45 = vpop.eup %4652 }
 0x52b   : > { %v917_v47 = vmul.f32 15.0, %v4653_v45  ;;  %v4655_v49 = vpop.eup %4654 }
 0x52c   : > { %v916_v52 = vmul.f32 15.0, %v4655_v49 }
 0x52e   : > { %905 = vadd.xlane.f32.xlu1 %v904_v39 }
 0x53e   : > { %925 = vrot.lane.b32.xlu0 %v4915_v3, %s4827_s19 }
 0x53f   : > { %927 = vrot.lane.b32.xlu1 %v4924_v6, %s4827_s19  ;;  %s4845_s19 = smov 36  }
 0x542   : > { %1193 = vrot.lane.b32.xlu0 %v4924_v6, %s4828_s20 }
 0x543   : > { %1191 = vrot.lane.b32.xlu1 %v4915_v3, %s4828_s20 }
 0x546   : > { %1189 = vrot.lane.b32.xlu0 %v4917_v4, %s4829_s21 }
 0x547   : > { %1094 = vrot.lane.b32.xlu1 %v4917_v4, %s4828_s20  ;;  %s4846_s20 = smov 4  }
 0x54a   : > { %1092 = vrot.lane.b32.xlu0 %v4924_v6, %s4829_s21 }
 0x54b   : > { %1090 = vrot.lane.b32.xlu1 %v4915_v3, %s4829_s21  ;;  %s4847_s21 = smov 8  }
 0x5b1   : > { %v824_v44 = vpop.xlane.xlu0 %823 }
 0x5b3   : > { %v821_v46 = vpop.xlane.xlu1 %820 }
 0x5b4   : > { %4656 = vrcp.f32 %v821_v46 }
 0x5b5   : > { %v909_v48 = vpop.xlane.xlu0 %908 }
 0x5b6   : > { %v919_v51 = vadd.f32 %v917_v47, %v909_v48 }
 0x5b7   : > { %v827_v50 = vpop.xlane.xlu1 %826 }
 0x5b8   : > { %4658 = vrcp.f32 %v919_v51 }
 0x5b9   : > { %v926_v53 = vpop.permute.xlu0 %925  ;;  %4660 = vrcp.f32 %v824_v44 }
 0x5ba   : > { %4326 = vmatpush3.bf16.msra.mxu0 %v926_v53 }
 0x5bb   : > { %v906_v54 = vpop.xlane.xlu1 %905  ;;  %4327 = vmatprep.subr.bf16.mxu0 %v4820_v0 }
 0x5bc   : > { %v918_v55 = vadd.f32 %v916_v52, %v906_v54 }
 0x5bd   : > { %v1194_v21 = vpop.permute.xlu0 %1193 }
 0x5be   : > { %4662 = vrcp.f32 %v918_v55  ;;  %v4657_v1 = vpop.eup %4656  ;;  %v1202_v37 = vsel %vm381_vm1, %v1194_v21, 0 }
 0x5bf   : > { %v928_v61 = vpop.permute.xlu1 %927  ;;  %4664 = vrcp.f32 %v827_v50  ;;  %v829_v8 = vmul.f32 %v4657_v1, %v4645_v31 }
 0x5c0   : > { %v934_v63 = vand.u32 %v928_v61, %v4980_v15 }
 0x5c1   : > { %v1190_v22 = vpop.permute.xlu0 %1189 }
 0x5c2   : > { %4328 = vmatpush3.bf16.msra.mxu0 %v934_v63  ;;  %v4659_v2 = vpop.eup %4658 }
 0x5c3   : > { %4333 = vmatprep.subr.bf16.mxu0 %v363_v62  ;;  %v4661_v5 = vpop.eup %4660  ;;  %v923_v9 = vmul.f32 %v4659_v2, %v4647_v33  ;;  %v1192_v18 = vpop.permute.xlu1 %1191 }
 0x5c4   : > { %v831_v11 = vmul.f32 %v4661_v5, %v5016_v30  ;;  %v1199_v36 = vsel %vm381_vm1, %v1192_v18, 0 }
 0x5c5   : > { %v1093_v24 = vpop.permute.xlu0 %1092 }
 0x5c6   : > { %v977_v14 = vpack.c.bf16 %v831_v11, %v829_v8 }
 0x5c7   : > { %v1095_v19 = vpop.permute.xlu1 %1094 }
 0x5c8   : > { %v4663_v7 = vpop.eup %4662  ;;  %v1103_v20 = vsel %vm381_vm1, %v1095_v19, 0 }
 0x5c9   : > { %v921_v10 = vmul.f32 %v4663_v7, %v4651_v38  ;;  %v4665_v13 = vpop.eup %4664 }
 0x5ca   : > { %v833_v16 = vmul.f32 %v4665_v13, %v5021_v35 }
 0x5cb   : > { %v924_v12 = vpack.c.bf16 %v923_v9, %v921_v10  ;;  %v1091_v23 = vpop.permute.xlu1 %1090 }
 0x5cc   : > { %v978_v17 = vpack.c.bf16 %v833_v16, %v833_v16 }
 0x5cd   : > { %4330 = vmatmul.mubr.msk.bf16.vlgmr.msra.gmra.mrb[16].mxu0 %vm531_vm2, %v924_v12 }
 0x5ce   : > { %4334 = vmatpush3.bf16.msra.mxu0 %v363_v62  ;;  %4335 = vmatprep.mubr.msk.bf16.mxu0 %vm442_vm3, %v977_v14 }
 0x5cf   : > { %4559 = vmatprep.subr.msk.bf16.mxu0 %vm381_vm1, %v1095_v19 }
 0x5d5   : > { %4336 = vmatmul.mubr.msk.bf16.vlgmr.msra.gmra.mrb[20].mxu0 %vm442_vm3, %v978_v17 }
 0x5d6   : > { %4347 = vmatprep.mubr.msk.bf16.mxu0 %vm381_vm1, %v1091_v23 }
 0x5d7   : > { %4346 = vmatpush3.bf16.xpose.msra.mxu0 %v1103_v20 }
 0x5d8   : > { %4359 = vmatprep.subr.bf16.mxu0 %v4820_v0 }
 0x5de   : > { %4348 = vmatmul.mubr.msk.bf16.vlgmr.msra.gmra.mrb[24].mxu0 %vm381_vm1, %v1093_v24 }
 0x5df   : > { %4363 = vmatprep.mubr.msk.bf16.mxu0 %vm4821_vm0, %v4820_v0 }
 0x6a0   : > { %v970_v25 = vpop.f32.mrb[16].mxu0 }
 0x6a1   : > { %v4331_v26 = vpop.f32.mrb[17].mxu0 }
 0x6a2   : > { %v973_v27 = vpop.f32.mrb[18].mxu0 }
 0x6a3   : > { %v1035_v28 = vpack.c.bf16 %v973_v27, %v970_v25  ;;  %v4332_v29 = vpop.f32.mrb[19].mxu0 }
 0x6a5   : > { %4339 = vmatprep.subr.bf16.mxu1 %v1035_v28 }
 0x6a6   : > { %4340 = vmatpush3.bf16.msra.mxu1 %v1035_v28 }
 0x6a7   : > { %4351 = vmatprep.subr.bf16.mxu1 %v4820_v0 }
 0x6a8   : > { %v4337_v30 = vpop.f32.mrb[20].mxu0 }
 0x6a9   : > { %v1019_v31 = vpop.f32.mrb[21].mxu0  ;;  %v1034_v35 = vpack.c.bf16 %v4337_v30, %v4337_v30 }
 0x6aa   : > { %v4338_v32 = vpop.f32.mrb[22].mxu0 }
 0x6ab   : > { %v1022_v33 = vpop.f32.mrb[23].mxu0 }
 0x6ac   : > { %v1033_v34 = vpack.c.bf16 %v1022_v33, %v1019_v31 }
 0x6ae   : > { %4341 = vmatprep.mubr.msk.bf16.mxu1 %vm442_vm3, %v1033_v34 }
 0x6af   : > { %4342 = vmatmul.mubr.msk.bf16.vlgmr.msra.gmra.mrb[12].mxu1 %vm442_vm3, %v1034_v35 }
 0x6b0   : > { %4352 = vmatpush3.bf16.xpose.msra.mxu1 %v1199_v36  ;;  %4355 = vmatprep.mubr.msk.bf16.mxu1 %vm4821_vm0, %v4820_v0 }
 0x6b1   : > { %4353 = vmatprep.subr.bf16.mxu1 %v4820_v0  ;;  %v4349_v38 = vpop.f32.mrb[24].mxu0 }
 0x6b2   : > { %v1139_v39 = vpop.f32.mrb[25].mxu0  ;;  %v1155_v58 = vmul.f32 0.5, %v4349_v38 }
 0x6b3   : > { %v4350_v40 = vpop.f32.mrb[26].mxu0  ;;  %v1153_v48 = vmul.f32 0.5, %v1139_v39 }
 0x6b4   : > { %v1142_v41 = vpop.f32.mrb[27].mxu0  ;;  %v1162_v60 = vsel %vm449_vm4, %v1155_v58, -inf }
 0x6b5   : > { %v1154_v46 = vmul.f32 0.5, %v1142_v41  ;;  %v1156_v55 = vsel %vm442_vm3, %v1153_v48, -inf }
 0x6b7   : > { %v1159_v54 = vsel %vm442_vm3, %v1154_v46, -inf }
 0x6b8   : > { %4354 = vmatpush3.bf16.xpose.msra.mxu1 %v1202_v37 }
 0x6bf   : > { %4356 = vmatmul.mubr.msk.bf16.vlgmr.msra.gmra.mrb[16].mxu1 %vm381_vm1, %v1190_v22 }
 0x782   : > { %v5060_v42 = vpop.f32.mrb[12].mxu1 }
 0x783   : > { %v5062_v43 = vpop.f32.mrb[13].mxu1 }
 0x784   : > { %v4344_v44 = vpop.f32.mrb[14].mxu1 }
 0x785   : > { %v5064_v45 = vpop.f32.mrb[15].mxu1 }
 0x792   : > { %v1238_v47 = vpop.f32.mrb[16].mxu1 }
 0x793   : > { %v4357_v49 = vpop.f32.mrb[17].mxu1  ;;  %v1245_v50 = vsel %vm531_vm2, %v1238_v47, -inf }
 0x794   : > { %1246 = vmax.xlane.f32.xlu1 %v1245_v50  ;;  %v1241_v51 = vpop.f32.mrb[18].mxu1  ;;  %v351_v49 = vld [vmem:[%s4975_s18 + $0x28] sm:$0xff] }
 0x795   : > { %v4358_v52 = vpop.f32.mrb[19].mxu1  ;;  %v1248_v53 = vsel %vm531_vm2, %v1241_v51, -inf }
 0x796   : > { %1249 = vmax.xlane.f32.xlu0 %v1248_v53 }
 0x798   : > { %1160 = vmax.xlane.f32.xlu1 %v1159_v54 }
 0x79a   : > { %1157 = vmax.xlane.f32.xlu0 %v1156_v55 }
 0x79e   : > { %1163 = vmax.xlane.f32.xlu0 %v1162_v60 }
 0x821   : > { %v1247_v61 = vpop.xlane.xlu1 %1246 }
 0x822   : > { %v1251_v5 = vmax.f32 %v1247_v61, 0.0 }
 0x823   : > { %v1250_v62 = vpop.xlane.xlu0 %1249 }
 0x824   : > { %v1252_v63 = vmax.f32 %v1250_v62, 0.0  ;;  %v1253_v13 = vsub.f32 %v1238_v47, %v1251_v5  ;;  %v1265_v30 = vsub.f32 0.0, %v1251_v5 }
 0x825   : > { %v1161_v1 = vpop.xlane.xlu1 %1160 }
 0x826   : > { %v1254_v2 = vsub.f32 %v1241_v51, %v1252_v63  ;;  %v1166_v7 = vsub.f32 %v1154_v46, %v1161_v1  ;;  %v1255_v18 = vmul.f32 1.442695, %v1253_v13  ;;  %v1266_v29 = vsub.f32 0.0, %v1252_v63 }
 0x827   : > { %v1158_v8 = vpop.xlane.xlu0 %1157  ;;  %v1267_v32 = vmul.f32 1.442695, %v1265_v30 }
 0x828   : > { %v1165_v9 = vsub.f32 %v1153_v48, %v1158_v8  ;;  %v1170_v10 = vmul.f32 1.442695, %v1166_v7  ;;  %v1257_v11 = vmul.f32 1.442695, %v1254_v2  ;;  %v1269_v31 = vmul.f32 1.442695, %v1266_v29 }
 0x829   : > { %v350_v48 = vld [vmem:[%s4975_s18 + $0x20] sm:$0xff] }
 0x82a   : > { %v1168_v12 = vmul.f32 1.442695, %v1165_v9  ;;  %4666 = vpow2.f32 %v1170_v10  ;;  %v364_v51 = vpack.c.bf16 %v351_v49, %v350_v48 }
 0x82b   : > { %v1164_v14 = vpop.xlane.xlu0 %1163 }
 0x82c   : > { %v1167_v16 = vsub.f32 %v1155_v58, %v1164_v14  ;;  %4668 = vpow2.f32 %v1168_v12 }
 0x82d   : > { %4670 = vpow2.f32 %v1257_v11 }
 0x82e   : > { %v1172_v17 = vmul.f32 1.442695, %v1167_v16 }
 0x830   : > { %4672 = vpow2.f32 %v1172_v17 }
 0x831   : > { %4674 = vpow2.f32 %v1255_v18 }
 0x832   : > { %4676 = vpow2.f32 %v1269_v31 }
 0x833   : > { %4678 = vpow2.f32 %v1267_v32 }
 0x834   : > { %v5071_v19 = vpop.eup %4666 }
 0x835   : > { %v1177_v21 = vsel %vm442_vm3, %v5071_v19, 0.0 }
 0x836   : > { %v4669_v20 = vpop.eup %4668  ;;  %1178 = vadd.xlane.f32.xlu0 %v1177_v21 }
 0x837   : > { %v4671_v22 = vpop.eup %4670  ;;  %v1174_v23 = vsel %vm442_vm3, %v4669_v20, 0.0 }
 0x838   : > { %1175 = vadd.xlane.f32.xlu1 %v1174_v23  ;;  %v1262_v25 = vsel %vm531_vm2, %v4671_v22, 0.0 }
 0x83a   : > { %v5076_v24 = vpop.eup %4672  ;;  %1263 = vadd.xlane.f32.xlu0 %v1262_v25 }
 0x83b   : > { %v1180_v26 = vsel %vm449_vm4, %v5076_v24, 0.0  ;;  %v4675_v27 = vpop.eup %4674 }
 0x83c   : > { %1181 = vadd.xlane.f32.xlu1 %v1180_v26  ;;  %v1259_v28 = vsel %vm531_vm2, %v4675_v27, 0.0  ;;  %v4677_v34 = vpop.eup %4676 }
 0x83d   : > { %v1272_v36 = vmul.f32 15.0, %v4677_v34  ;;  %v4679_v38 = vpop.eup %4678 }
 0x83e   : > { %v1271_v41 = vmul.f32 15.0, %v4679_v38 }
 0x840   : > { %1260 = vadd.xlane.f32.xlu1 %v1259_v28 }
 0x850   : > { %1280 = vrot.lane.b32.xlu0 %v4915_v3, %s4830_s22 }
 0x851   : > { %1282 = vrot.lane.b32.xlu1 %v4924_v6, %s4830_s22  ;;  %s4850_s22 = smov 20  }
 0x854   : > { %1548 = vrot.lane.b32.xlu0 %v4924_v6, %s4831_s23 }
 0x855   : > { %1546 = vrot.lane.b32.xlu1 %v4915_v3, %s4831_s23 }
 0x858   : > { %1544 = vrot.lane.b32.xlu0 %v4917_v4, %s4832_s26 }
 0x859   : > { %1449 = vrot.lane.b32.xlu1 %v4917_v4, %s4831_s23  ;;  %s4851_s23 = smov 24  }
 0x85c   : > { %1447 = vrot.lane.b32.xlu0 %v4924_v6, %s4832_s26 }
 0x85d   : > { %1445 = vrot.lane.b32.xlu1 %v4915_v3, %s4832_s26 }
 0x8c3   : > { %v1179_v33 = vpop.xlane.xlu0 %1178 }
 0x8c5   : > { %v1176_v35 = vpop.xlane.xlu1 %1175 }
 0x8c6   : > { %4680 = vrcp.f32 %v1176_v35 }
 0x8c7   : > { %v1264_v37 = vpop.xlane.xlu0 %1263 }
 0x8c8   : > { %v1274_v40 = vadd.f32 %v1272_v36, %v1264_v37 }
 0x8c9   : > { %v1182_v39 = vpop.xlane.xlu1 %1181 }
 0x8ca   : > { %4682 = vrcp.f32 %v1274_v40 }
 0x8cb   : > { %v1281_v44 = vpop.permute.xlu0 %1280  ;;  %4684 = vrcp.f32 %v1179_v33 }
 0x8cc   : > { %4360 = vmatpush3.bf16.msra.mxu0 %v1281_v44 }
 0x8cd   : > { %v1261_v46 = vpop.xlane.xlu1 %1260  ;;  %4361 = vmatprep.subr.bf16.mxu0 %v4820_v0 }
 0x8ce   : > { %v1273_v47 = vadd.f32 %v1271_v41, %v1261_v46 }
 0x8cf   : > { %v1549_v12 = vpop.permute.xlu0 %1548 }
 0x8d0   : > { %4686 = vrcp.f32 %v1273_v47  ;;  %v4681_v53 = vpop.eup %4680  ;;  %v1557_v29 = vsel %vm381_vm1, %v1549_v12, 0 }
 0x8d1   : > { %v1283_v50 = vpop.permute.xlu1 %1282  ;;  %4688 = vrcp.f32 %v1182_v39  ;;  %v1184_v60 = vmul.f32 %v4681_v53, %v4669_v20 }
 0x8d2   : > { %v1289_v52 = vand.u32 %v1283_v50, %v4980_v15 }
 0x8d3   : > { %v1545_v13 = vpop.permute.xlu0 %1544 }
 0x8d4   : > { %4362 = vmatpush3.bf16.msra.mxu0 %v1289_v52  ;;  %v4683_v54 = vpop.eup %4682 }
 0x8d5   : > { %4367 = vmatprep.subr.bf16.mxu0 %v364_v51  ;;  %v4685_v55 = vpop.eup %4684  ;;  %v1278_v61 = vmul.f32 %v4683_v54, %v4671_v22  ;;  %v1547_v9 = vpop.permute.xlu1 %1546 }
 0x8d6   : > { %v1186_v63 = vmul.f32 %v4685_v55, %v5071_v19  ;;  %v1554_v28 = vsel %vm381_vm1, %v1547_v9, 0 }
 0x8d7   : > { %v1448_v16 = vpop.permute.xlu0 %1447 }
 0x8d8   : > { %v1332_v5 = vpack.c.bf16 %v1186_v63, %v1184_v60 }
 0x8d9   : > { %v1450_v10 = vpop.permute.xlu1 %1449 }
 0x8da   : > { %v4687_v58 = vpop.eup %4686  ;;  %v1458_v11 = vsel %vm381_vm1, %v1450_v10, 0 }
 0x8db   : > { %v1276_v62 = vmul.f32 %v4687_v58, %v4675_v27  ;;  %v4689_v2 = vpop.eup %4688 }
 0x8dc   : > { %v1188_v7 = vmul.f32 %v4689_v2, %v5076_v24 }
 0x8dd   : > { %v1279_v1 = vpack.c.bf16 %v1278_v61, %v1276_v62  ;;  %v1446_v14 = vpop.permute.xlu1 %1445 }
 0x8de   : > { %v1333_v8 = vpack.c.bf16 %v1188_v7, %v1188_v7 }
 0x8df   : > { %4364 = vmatmul.mubr.msk.bf16.vlgmr.msra.gmra.mrb[28].mxu0 %vm531_vm2, %v1279_v1 }
 0x8e0   : > { %4368 = vmatpush3.bf16.msra.mxu0 %v364_v51  ;;  %4369 = vmatprep.mubr.msk.bf16.mxu0 %vm442_vm3, %v1332_v5 }
 0x8e1   : > { %4560 = vmatprep.subr.msk.bf16.mxu0 %vm381_vm1, %v1450_v10 }
 0x8e7   : > { %4370 = vmatmul.mubr.msk.bf16.vlgmr.msra.gmra.mrb[32].mxu0 %vm442_vm3, %v1333_v8 }
 0x8e8   : > { %4381 = vmatprep.mubr.msk.bf16.mxu0 %vm381_vm1, %v1446_v14 }
 0x8e9   : > { %4380 = vmatpush3.bf16.xpose.msra.mxu0 %v1458_v11 }
 0x8ea   : > { %4393 = vmatprep.subr.bf16.mxu0 %v4820_v0 }
 0x8f0   : > { %4382 = vmatmul.mubr.msk.bf16.vlgmr.msra.gmra.mrb[36].mxu0 %vm381_vm1, %v1448_v16 }
 0x8f1   : > { %4397 = vmatprep.mubr.msk.bf16.mxu0 %vm4821_vm0, %v4820_v0 }
 0x9b2   : > { %v1325_v17 = vpop.f32.mrb[28].mxu0 }
 0x9b3   : > { %v4365_v18 = vpop.f32.mrb[29].mxu0 }
 0x9b4   : > { %v1328_v19 = vpop.f32.mrb[30].mxu0 }
 0x9b5   : > { %v1390_v20 = vpack.c.bf16 %v1328_v19, %v1325_v17  ;;  %v4366_v21 = vpop.f32.mrb[31].mxu0 }
 0x9b7   : > { %4373 = vmatprep.subr.bf16.mxu1 %v1390_v20 }
 0x9b8   : > { %4374 = vmatpush3.bf16.msra.mxu1 %v1390_v20 }
 0x9b9   : > { %4385 = vmatprep.subr.bf16.mxu1 %v4820_v0 }
 0x9ba   : > { %v4371_v22 = vpop.f32.mrb[32].mxu0 }
 0x9bb   : > { %v1374_v23 = vpop.f32.mrb[33].mxu0  ;;  %v1389_v27 = vpack.c.bf16 %v4371_v22, %v4371_v22 }
 0x9bc   : > { %v4372_v24 = vpop.f32.mrb[34].mxu0 }
 0x9bd   : > { %v1377_v25 = vpop.f32.mrb[35].mxu0 }
 0x9be   : > { %v1388_v26 = vpack.c.bf16 %v1377_v25, %v1374_v23 }
 0x9c0   : > { %4375 = vmatprep.mubr.msk.bf16.mxu1 %vm442_vm3, %v1388_v26 }
 0x9c1   : > { %4376 = vmatmul.mubr.msk.bf16.vlgmr.msra.gmra.mrb[20].mxu1 %vm442_vm3, %v1389_v27 }
 0x9c2   : > { %4386 = vmatpush3.bf16.xpose.msra.mxu1 %v1554_v28  ;;  %4389 = vmatprep.mubr.msk.bf16.mxu1 %vm4821_vm0, %v4820_v0 }
 0x9c3   : > { %4387 = vmatprep.subr.bf16.mxu1 %v4820_v0  ;;  %v4383_v30 = vpop.f32.mrb[36].mxu0 }
 0x9c4   : > { %v1494_v31 = vpop.f32.mrb[37].mxu0  ;;  %v1510_v51 = vmul.f32 0.5, %v4383_v30 }
 0x9c5   : > { %v4384_v32 = vpop.f32.mrb[38].mxu0  ;;  %v1508_v40 = vmul.f32 0.5, %v1494_v31 }
 0x9c6   : > { %v1497_v33 = vpop.f32.mrb[39].mxu0  ;;  %v1517_v52 = vsel %vm449_vm4, %v1510_v51, -inf }
 0x9c7   : > { %v1509_v38 = vmul.f32 0.5, %v1497_v33  ;;  %v1511_v50 = vsel %vm442_vm3, %v1508_v40, -inf }
 0x9c9   : > { %v1514_v49 = vsel %vm442_vm3, %v1509_v38, -inf }
 0x9ca   : > { %4388 = vmatpush3.bf16.xpose.msra.mxu1 %v1557_v29 }
 0x9d1   : > { %4390 = vmatmul.mubr.msk.bf16.vlgmr.msra.gmra.mrb[24].mxu1 %vm381_vm1, %v1545_v13 }
 0xa94   : > { %v5115_v34 = vpop.f32.mrb[20].mxu1 }
 0xa95   : > { %v5117_v35 = vpop.f32.mrb[21].mxu1 }
 0xa96   : > { %v4378_v36 = vpop.f32.mrb[22].mxu1 }
 0xa97   : > { %v5119_v37 = vpop.f32.mrb[23].mxu1 }
 0xaa4   : > { %v1593_v39 = vpop.f32.mrb[24].mxu1 }
 0xaa5   : > { %v4391_v41 = vpop.f32.mrb[25].mxu1  ;;  %v1600_v44 = vsel %vm531_vm2, %v1593_v39, -inf }
 0xaa6   : > { %1601 = vmax.xlane.f32.xlu1 %v1600_v44  ;;  %v1596_v46 = vpop.f32.mrb[26].mxu1 }
 0xaa7   : > { %v4392_v47 = vpop.f32.mrb[27].mxu1  ;;  %v1603_v48 = vsel %vm531_vm2, %v1596_v46, -inf }
 0xaa8   : > { %1604 = vmax.xlane.f32.xlu0 %v1603_v48  ;;  %v353_v47 = vld [vmem:[%s4975_s18 + $0x38] sm:$0xff] }
 0xaaa   : > { %1515 = vmax.xlane.f32.xlu1 %v1514_v49 }
 0xaac   : > { %1512 = vmax.xlane.f32.xlu0 %v1511_v50 }
 0xab0   : > { %1518 = vmax.xlane.f32.xlu0 %v1517_v52 }
 0xb33   : > { %v1602_v53 = vpop.xlane.xlu1 %1601 }
 0xb34   : > { %v1606_v61 = vmax.f32 %v1602_v53, 0.0 }
 0xb35   : > { %v1605_v54 = vpop.xlane.xlu0 %1604 }
 0xb36   : > { %v1607_v55 = vmax.f32 %v1605_v54, 0.0  ;;  %v1608_v8 = vsub.f32 %v1593_v39, %v1606_v61  ;;  %v1620_v25 = vsub.f32 0.0, %v1606_v61 }
 0xb37   : > { %v1516_v58 = vpop.xlane.xlu1 %1515 }
 0xb38   : > { %v1609_v60 = vsub.f32 %v1596_v46, %v1607_v55  ;;  %v1521_v62 = vsub.f32 %v1509_v38, %v1516_v58  ;;  %v1610_v12 = vmul.f32 1.442695, %v1608_v8  ;;  %v1621_v24 = vsub.f32 0.0, %v1607_v55  ;;  %v352_v46 = vld [vmem:[%s4975_s18 + $0x30] sm:$0xff] }
 0xb39   : > { %v1513_v63 = vpop.xlane.xlu0 %1512  ;;  %v1622_v27 = vmul.f32 1.442695, %v1620_v25  ;;  %v365_v49 = vpack.c.bf16 %v353_v47, %v352_v46 }
 0xb3a   : > { %v1520_v1 = vsub.f32 %v1508_v40, %v1513_v63  ;;  %v1525_v2 = vmul.f32 1.442695, %v1521_v62  ;;  %v1612_v5 = vmul.f32 1.442695, %v1609_v60  ;;  %v1624_v26 = vmul.f32 1.442695, %v1621_v24 }
 0xb3c   : > { %v1523_v7 = vmul.f32 1.442695, %v1520_v1  ;;  %4690 = vpow2.f32 %v1525_v2 }
 0xb3d   : > { %v1519_v9 = vpop.xlane.xlu0 %1518 }
 0xb3e   : > { %v1522_v10 = vsub.f32 %v1510_v51, %v1519_v9  ;;  %4692 = vpow2.f32 %v1523_v7 }
 0xb3f   : > { %4694 = vpow2.f32 %v1612_v5 }
 0xb40   : > { %v1527_v11 = vmul.f32 1.442695, %v1522_v10 }
 0xb42   : > { %4696 = vpow2.f32 %v1527_v11 }
 0xb43   : > { %4698 = vpow2.f32 %v1610_v12 }
 0xb44   : > { %4700 = vpow2.f32 %v1624_v26 }
 0xb45   : > { %4702 = vpow2.f32 %v1622_v27 }
 0xb46   : > { %v5126_v13 = vpop.eup %4690 }
 0xb47   : > { %v1532_v16 = vsel %vm442_vm3, %v5126_v13, 0.0 }
 0xb48   : > { %v4693_v14 = vpop.eup %4692  ;;  %1533 = vadd.xlane.f32.xlu0 %v1532_v16 }
 0xb49   : > { %v4695_v17 = vpop.eup %4694  ;;  %v1529_v18 = vsel %vm442_vm3, %v4693_v14, 0.0 }
 0xb4a   : > { %1530 = vadd.xlane.f32.xlu1 %v1529_v18  ;;  %v1617_v20 = vsel %vm531_vm2, %v4695_v17, 0.0 }
 0xb4c   : > { %v5131_v19 = vpop.eup %4696  ;;  %1618 = vadd.xlane.f32.xlu0 %v1617_v20 }
 0xb4d   : > { %v1535_v21 = vsel %vm449_vm4, %v5131_v19, 0.0  ;;  %v4699_v22 = vpop.eup %4698 }
 0xb4e   : > { %1536 = vadd.xlane.f32.xlu1 %v1535_v21  ;;  %v1614_v23 = vsel %vm531_vm2, %v4699_v22, 0.0  ;;  %v4701_v29 = vpop.eup %4700 }
 0xb4f   : > { %v1627_v31 = vmul.f32 15.0, %v4701_v29  ;;  %v4703_v33 = vpop.eup %4702 }
 0xb50   : > { %v1626_v39 = vmul.f32 15.0, %v4703_v33 }
 0xb52   : > { %1615 = vadd.xlane.f32.xlu1 %v1614_v23 }
 0xb62   : > { %1635 = vrot.lane.b32.xlu0 %v4915_v3, %s4833_s27 }
 0xb63   : > { %1637 = vrot.lane.b32.xlu1 %v4924_v6, %s4833_s27 }
 0xb66   : > { %1903 = vrot.lane.b32.xlu0 %v4924_v6, %s4834_s28 }
 0xb67   : > { %1901 = vrot.lane.b32.xlu1 %v4915_v3, %s4834_s28 }
 0xb6a   : > { %1899 = vrot.lane.b32.xlu0 %v4917_v4, %s4835_s29 }
 0xb6b   : > { %1804 = vrot.lane.b32.xlu1 %v4917_v4, %s4834_s28 }
 0xb6e   : > { %1802 = vrot.lane.b32.xlu0 %v4924_v6, %s4835_s29 }
 0xb6f   : > { %1800 = vrot.lane.b32.xlu1 %v4915_v3, %s4835_s29  ;;  %s4852_s29 = smov 28  }
 0xbd5   : > { %v1534_v28 = vpop.xlane.xlu0 %1533 }
 0xbd7   : > { %v1531_v30 = vpop.xlane.xlu1 %1530 }
 0xbd8   : > { %4704 = vrcp.f32 %v1531_v30 }
 0xbd9   : > { %v1619_v32 = vpop.xlane.xlu0 %1618 }
 0xbda   : > { %v1629_v38 = vadd.f32 %v1627_v31, %v1619_v32 }
 0xbdb   : > { %v1537_v36 = vpop.xlane.xlu1 %1536 }
 0xbdc   : > { %4706 = vrcp.f32 %v1629_v38 }
 0xbdd   : > { %v1636_v40 = vpop.permute.xlu0 %1635  ;;  %4708 = vrcp.f32 %v1534_v28 }
 0xbde   : > { %4394 = vmatpush3.bf16.msra.mxu0 %v1636_v40 }
 0xbdf   : > { %v1616_v41 = vpop.xlane.xlu1 %1615  ;;  %4395 = vmatprep.subr.bf16.mxu0 %v4820_v0 }
 0xbe0   : > { %v1628_v44 = vadd.f32 %v1626_v39, %v1616_v41 }
 0xbe1   : > { %v1904_v10 = vpop.permute.xlu0 %1903 }
 0xbe2   : > { %4710 = vrcp.f32 %v1628_v44  ;;  %v4705_v51 = vpop.eup %4704  ;;  %v1912_v27 = vsel %vm381_vm1, %v1904_v10, 0 }
 0xbe3   : > { %v1638_v48 = vpop.permute.xlu1 %1637  ;;  %4712 = vrcp.f32 %v1537_v36  ;;  %v1539_v55 = vmul.f32 %v4705_v51, %v4693_v14 }
 0xbe4   : > { %v1644_v50 = vand.u32 %v1638_v48, %v4980_v15 }
 0xbe5   : > { %v1900_v11 = vpop.permute.xlu0 %1899 }
 0xbe6   : > { %4396 = vmatpush3.bf16.msra.mxu0 %v1644_v50  ;;  %v4707_v52 = vpop.eup %4706 }
 0xbe7   : > { %4401 = vmatprep.subr.bf16.mxu0 %v365_v49  ;;  %v4709_v53 = vpop.eup %4708  ;;  %v1633_v58 = vmul.f32 %v4707_v52, %v4695_v17  ;;  %v1902_v7 = vpop.permute.xlu1 %1901 }
 0xbe8   : > { %v1541_v61 = vmul.f32 %v4709_v53, %v5126_v13  ;;  %v1909_v26 = vsel %vm381_vm1, %v1902_v7, 0 }
 0xbe9   : > { %v1803_v13 = vpop.permute.xlu0 %1802 }
 0xbea   : > { %v1687_v1 = vpack.c.bf16 %v1541_v61, %v1539_v55 }
 0xbeb   : > { %v1805_v8 = vpop.permute.xlu1 %1804 }
 0xbec   : > { %v4711_v54 = vpop.eup %4710  ;;  %v1813_v9 = vsel %vm381_vm1, %v1805_v8, 0 }
 0xbed   : > { %v1631_v60 = vmul.f32 %v4711_v54, %v4699_v22  ;;  %v4713_v63 = vpop.eup %4712 }
 0xbee   : > { %v1543_v2 = vmul.f32 %v4713_v63, %v5131_v19 }
 0xbef   : > { %v1634_v62 = vpack.c.bf16 %v1633_v58, %v1631_v60  ;;  %v1801_v12 = vpop.permute.xlu1 %1800 }
 0xbf0   : > { %v1688_v5 = vpack.c.bf16 %v1543_v2, %v1543_v2 }
 0xbf1   : > { %4398 = vmatmul.mubr.msk.bf16.vlgmr.msra.gmra.mrb[40].mxu0 %vm531_vm2, %v1634_v62 }
 0xbf2   : > { %4402 = vmatpush3.bf16.msra.mxu0 %v365_v49  ;;  %4403 = vmatprep.mubr.msk.bf16.mxu0 %vm442_vm3, %v1687_v1 }
 0xbf3   : > { %4561 = vmatprep.subr.msk.bf16.mxu0 %vm381_vm1, %v1805_v8 }
 0xbf9   : > { %4404 = vmatmul.mubr.msk.bf16.vlgmr.msra.gmra.mrb[44].mxu0 %vm442_vm3, %v1688_v5 }
 0xbfa   : > { %4415 = vmatprep.mubr.msk.bf16.mxu0 %vm381_vm1, %v1801_v12 }
 0xbfb   : > { %4414 = vmatpush3.bf16.xpose.msra.mxu0 %v1813_v9 }
 0xbfc   : > { %4427 = vmatprep.subr.bf16.mxu0 %v4820_v0 }
 0xc02   : > { %4416 = vmatmul.mubr.msk.bf16.vlgmr.msra.gmra.mrb[48].mxu0 %vm381_vm1, %v1803_v13 }
 0xc03   : > { %4431 = vmatprep.mubr.msk.bf16.mxu0 %vm4821_vm0, %v4820_v0 }
 0xcc4   : > { %v1680_v14 = vpop.f32.mrb[40].mxu0 }
 0xcc5   : > { %v4399_v16 = vpop.f32.mrb[41].mxu0 }
 0xcc6   : > { %v1683_v17 = vpop.f32.mrb[42].mxu0 }
 0xcc7   : > { %v1745_v18 = vpack.c.bf16 %v1683_v17, %v1680_v14  ;;  %v4400_v19 = vpop.f32.mrb[43].mxu0 }
 0xcc9   : > { %4407 = vmatprep.subr.bf16.mxu1 %v1745_v18 }
 0xcca   : > { %4408 = vmatpush3.bf16.msra.mxu1 %v1745_v18 }
 0xccb   : > { %4419 = vmatprep.subr.bf16.mxu1 %v4820_v0 }
 0xccc   : > { %v4405_v20 = vpop.f32.mrb[44].mxu0 }
 0xccd   : > { %v1729_v21 = vpop.f32.mrb[45].mxu0  ;;  %v1744_v25 = vpack.c.bf16 %v4405_v20, %v4405_v20 }
 0xcce   : > { %v4406_v22 = vpop.f32.mrb[46].mxu0 }
 0xccf   : > { %v1732_v23 = vpop.f32.mrb[47].mxu0 }
 0xcd0   : > { %v1743_v24 = vpack.c.bf16 %v1732_v23, %v1729_v21 }
 0xcd2   : > { %4409 = vmatprep.mubr.msk.bf16.mxu1 %vm442_vm3, %v1743_v24 }
 0xcd3   : > { %4410 = vmatmul.mubr.msk.bf16.vlgmr.msra.gmra.mrb[28].mxu1 %vm442_vm3, %v1744_v25 }
 0xcd4   : > { %4420 = vmatpush3.bf16.xpose.msra.mxu1 %v1909_v26  ;;  %4423 = vmatprep.mubr.msk.bf16.mxu1 %vm4821_vm0, %v4820_v0 }
 0xcd5   : > { %4421 = vmatprep.subr.bf16.mxu1 %v4820_v0  ;;  %v4417_v28 = vpop.f32.mrb[48].mxu0 }
 0xcd6   : > { %v1849_v29 = vpop.f32.mrb[49].mxu0  ;;  %v1865_v52 = vmul.f32 0.5, %v4417_v28 }
 0xcd7   : > { %v4418_v30 = vpop.f32.mrb[50].mxu0  ;;  %v1863_v41 = vmul.f32 0.5, %v1849_v29 }
 0xcd8   : > { %v1852_v31 = vpop.f32.mrb[51].mxu0  ;;  %v1872_v53 = vsel %vm449_vm4, %v1865_v52, -inf }
 0xcd9   : > { %v1864_v39 = vmul.f32 0.5, %v1852_v31  ;;  %v1866_v51 = vsel %vm442_vm3, %v1863_v41, -inf }
 0xcdb   : > { %v1869_v50 = vsel %vm442_vm3, %v1864_v39, -inf }
 0xcdc   : > { %4422 = vmatpush3.bf16.xpose.msra.mxu1 %v1912_v27 }
 0xce3   : > { %4424 = vmatmul.mubr.msk.bf16.vlgmr.msra.gmra.mrb[32].mxu1 %vm381_vm1, %v1900_v11 }
 0xda6   : > { %v5170_v32 = vpop.f32.mrb[28].mxu1 }
 0xda7   : > { %v5172_v33 = vpop.f32.mrb[29].mxu1 }
 0xda8   : > { %v4412_v36 = vpop.f32.mrb[30].mxu1 }
 0xda9   : > { %v5174_v38 = vpop.f32.mrb[31].mxu1 }
 0xdb6   : > { %v1948_v40 = vpop.f32.mrb[32].mxu1 }
 0xdb7   : > { %v4425_v44 = vpop.f32.mrb[33].mxu1  ;;  %v1955_v46 = vsel %vm531_vm2, %v1948_v40, -inf }
 0xdb8   : > { %1956 = vmax.xlane.f32.xlu1 %v1955_v46  ;;  %v1951_v47 = vpop.f32.mrb[34].mxu1 }
 0xdb9   : > { %v4426_v48 = vpop.f32.mrb[35].mxu1  ;;  %v1958_v49 = vsel %vm531_vm2, %v1951_v47, -inf }
 0xdba   : > { %1959 = vmax.xlane.f32.xlu0 %v1958_v49 }
 0xdbc   : > { %1870 = vmax.xlane.f32.xlu1 %v1869_v50  ;;  %v354_v50 = vld [vmem:[%s4975_s18 + $0x40] sm:$0xff] }
 0xdbe   : > { %1867 = vmax.xlane.f32.xlu0 %v1866_v51  ;;  %v355_v51 = vld [vmem:[%s4975_s18 + $0x48] sm:$0xff] }
 0xdc2   : > { %1873 = vmax.xlane.f32.xlu0 %v1872_v53  ;;  %v366_v53 = vpack.c.bf16 %v355_v51, %v354_v50 }
 0xe45   : > { %v1957_v54 = vpop.xlane.xlu1 %1956 }
 0xe46   : > { %v1961_v62 = vmax.f32 %v1957_v54, 0.0 }
 0xe47   : > { %v1960_v55 = vpop.xlane.xlu0 %1959 }
 0xe48   : > { %v1962_v58 = vmax.f32 %v1960_v55, 0.0  ;;  %v1963_v9 = vsub.f32 %v1948_v40, %v1961_v62  ;;  %v1975_v26 = vsub.f32 0.0, %v1961_v62 }
 0xe49   : > { %v1871_v60 = vpop.xlane.xlu1 %1870 }
 0xe4a   : > { %v1964_v61 = vsub.f32 %v1951_v47, %v1962_v58  ;;  %v1876_v63 = vsub.f32 %v1864_v39, %v1871_v60  ;;  %v1965_v13 = vmul.f32 1.442695, %v1963_v9  ;;  %v1976_v25 = vsub.f32 0.0, %v1962_v58 }
 0xe4b   : > { %v1868_v1 = vpop.xlane.xlu0 %1867  ;;  %v1977_v28 = vmul.f32 1.442695, %v1975_v26 }
 0xe4c   : > { %v1875_v2 = vsub.f32 %v1863_v41, %v1868_v1  ;;  %v1880_v5 = vmul.f32 1.442695, %v1876_v63  ;;  %v1967_v7 = vmul.f32 1.442695, %v1964_v61  ;;  %v1979_v27 = vmul.f32 1.442695, %v1976_v25 }
 0xe4e   : > { %v1878_v8 = vmul.f32 1.442695, %v1875_v2  ;;  %4714 = vpow2.f32 %v1880_v5 }
 0xe4f   : > { %v1874_v10 = vpop.xlane.xlu0 %1873 }
 0xe50   : > { %v1877_v11 = vsub.f32 %v1865_v52, %v1874_v10  ;;  %4716 = vpow2.f32 %v1878_v8 }
 0xe51   : > { %4718 = vpow2.f32 %v1967_v7 }
 0xe52   : > { %v1882_v12 = vmul.f32 1.442695, %v1877_v11 }
 0xe54   : > { %4720 = vpow2.f32 %v1882_v12 }
 0xe55   : > { %4722 = vpow2.f32 %v1965_v13 }
 0xe56   : > { %4724 = vpow2.f32 %v1979_v27 }
 0xe57   : > { %4726 = vpow2.f32 %v1977_v28 }
 0xe58   : > { %v5181_v14 = vpop.eup %4714 }
 0xe59   : > { %v1887_v17 = vsel %vm442_vm3, %v5181_v14, 0.0 }
 0xe5a   : > { %v4717_v16 = vpop.eup %4716  ;;  %1888 = vadd.xlane.f32.xlu0 %v1887_v17 }
 0xe5b   : > { %v4719_v18 = vpop.eup %4718  ;;  %v1884_v19 = vsel %vm442_vm3, %v4717_v16, 0.0 }
 0xe5c   : > { %1885 = vadd.xlane.f32.xlu1 %v1884_v19  ;;  %v1972_v21 = vsel %vm531_vm2, %v4719_v18, 0.0 }
 0xe5e   : > { %v5186_v20 = vpop.eup %4720  ;;  %1973 = vadd.xlane.f32.xlu0 %v1972_v21 }
 0xe5f   : > { %v1890_v22 = vsel %vm449_vm4, %v5186_v20, 0.0  ;;  %v4723_v23 = vpop.eup %4722 }
 0xe60   : > { %1891 = vadd.xlane.f32.xlu1 %v1890_v22  ;;  %v1969_v24 = vsel %vm531_vm2, %v4723_v23, 0.0  ;;  %v4725_v30 = vpop.eup %4724 }
 0xe61   : > { %v1982_v36 = vmul.f32 15.0, %v4725_v30  ;;  %v4727_v40 = vpop.eup %4726 }
 0xe62   : > { %v1981_v46 = vmul.f32 15.0, %v4727_v40 }
 0xe64   : > { %1970 = vadd.xlane.f32.xlu1 %v1969_v24 }
 0xe74   : > { %1990 = vrot.lane.b32.xlu0 %v4915_v3, %s4836_s30 }
 0xe75   : > { %1992 = vrot.lane.b32.xlu1 %v4924_v6, %s4836_s30 }
 0xe78   : > { %2258 = vrot.lane.b32.xlu0 %v4924_v6, %s4837_s8 }
 0xe79   : > { %2256 = vrot.lane.b32.xlu1 %v4915_v3, %s4837_s8 }
 0xe7c   : > { %2254 = vrot.lane.b32.xlu0 %v4917_v4, %s4838_s9 }
 0xe7d   : > { %2159 = vrot.lane.b32.xlu1 %v4917_v4, %s4837_s8 }
 0xe80   : > { %2157 = vrot.lane.b32.xlu0 %v4924_v6, %s4838_s9 }
 0xe81   : > { %2155 = vrot.lane.b32.xlu1 %v4915_v3, %s4838_s9 }
 0xee7   : > { %v1889_v29 = vpop.xlane.xlu0 %1888 }
 0xee9   : > { %v1886_v31 = vpop.xlane.xlu1 %1885 }
 0xeea   : > { %4728 = vrcp.f32 %v1886_v31 }
 0xeeb   : > { %v1974_v39 = vpop.xlane.xlu0 %1973 }
 0xeec   : > { %v1984_v44 = vadd.f32 %v1982_v36, %v1974_v39 }
 0xeed   : > { %v1892_v41 = vpop.xlane.xlu1 %1891 }
 0xeee   : > { %4730 = vrcp.f32 %v1984_v44 }
 0xeef   : > { %v1991_v47 = vpop.permute.xlu0 %1990  ;;  %4732 = vrcp.f32 %v1889_v29 }
 0xef0   : > { %4428 = vmatpush3.bf16.msra.mxu0 %v1991_v47 }
 0xef1   : > { %v1971_v48 = vpop.xlane.xlu1 %1970  ;;  %4429 = vmatprep.subr.bf16.mxu0 %v4820_v0 }
 0xef2   : > { %v1983_v49 = vadd.f32 %v1981_v46, %v1971_v48 }
 0xef4   : > { %4734 = vrcp.f32 %v1983_v49  ;;  %v4729_v55 = vpop.eup %4728 }
 0xef5   : > { %v1993_v52 = vpop.permute.xlu1 %1992  ;;  %4736 = vrcp.f32 %v1892_v41  ;;  %v1894_v62 = vmul.f32 %v4729_v55, %v4717_v16 }
 0xef6   : > { %v1999_v54 = vand.u32 %v1993_v52, %v4980_v15 }
 0xef8   : > { %4430 = vmatpush3.bf16.msra.mxu0 %v1999_v54  ;;  %v4731_v58 = vpop.eup %4730 }
 0xef9   : > { %4435 = vmatprep.subr.bf16.mxu0 %v366_v53  ;;  %v4733_v60 = vpop.eup %4732  ;;  %v1988_v63 = vmul.f32 %v4731_v58, %v4719_v18  ;;  %v2257_v11 = vpop.permute.xlu1 %2256 }
 0xefa   : > { %v1896_v2 = vmul.f32 %v4733_v60, %v5181_v14  ;;  %v2259_v14 = vpop.permute.xlu0 %2258  ;;  %v2264_v30 = vsel %vm381_vm1, %v2257_v11, 0 }
 0xefb   : > { %v2267_v31 = vsel %vm381_vm1, %v2259_v14, 0 }
 0xefc   : > { %v2042_v8 = vpack.c.bf16 %v1896_v2, %v1894_v62 }
 0xefd   : > { %v2160_v12 = vpop.permute.xlu1 %2159 }
 0xefe   : > { %v4735_v61 = vpop.eup %4734  ;;  %v2168_v13 = vsel %vm381_vm1, %v2160_v12, 0  ;;  %v2255_v16 = vpop.permute.xlu0 %2254 }
 0xeff   : > { %v1986_v1 = vmul.f32 %v4735_v61, %v4723_v23  ;;  %v4737_v7 = vpop.eup %4736 }
 0xf00   : > { %v1898_v9 = vmul.f32 %v4737_v7, %v5186_v20 }
 0xf01   : > { %v1989_v5 = vpack.c.bf16 %v1988_v63, %v1986_v1  ;;  %v2156_v17 = vpop.permute.xlu1 %2155 }
 0xf02   : > { %v2043_v10 = vpack.c.bf16 %v1898_v9, %v1898_v9  ;;  %v2158_v18 = vpop.permute.xlu0 %2157 }
 0xf03   : > { %4432 = vmatmul.mubr.msk.bf16.vlgmr.msra.gmra.mrb[52].mxu0 %vm531_vm2, %v1989_v5 }
 0xf04   : > { %4436 = vmatpush3.bf16.msra.mxu0 %v366_v53  ;;  %4437 = vmatprep.mubr.msk.bf16.mxu0 %vm442_vm3, %v2042_v8 }
 0xf05   : > { %4562 = vmatprep.subr.msk.bf16.mxu0 %vm381_vm1, %v2160_v12 }
 0xf0b   : > { %4438 = vmatmul.mubr.msk.bf16.vlgmr.msra.gmra.mrb[56].mxu0 %vm442_vm3, %v2043_v10 }
 0xf0c   : > { %4449 = vmatprep.mubr.msk.bf16.mxu0 %vm381_vm1, %v2156_v17 }
 0xf0d   : > { %4448 = vmatpush3.bf16.xpose.msra.mxu0 %v2168_v13 }
 0xf0e   : > { %4461 = vmatprep.subr.bf16.mxu0 %v4820_v0 }
 0xf14   : > { %4450 = vmatmul.mubr.msk.bf16.vlgmr.msra.gmra.mrb[60].mxu0 %vm381_vm1, %v2158_v18 }
 0xf15   : > { %4465 = vmatprep.mubr.msk.bf16.mxu0 %vm4821_vm0, %v4820_v0 }
 0xfd6   : > { %v2035_v19 = vpop.f32.mrb[52].mxu0 }
 0xfd7   : > { %v4433_v20 = vpop.f32.mrb[53].mxu0 }
 0xfd8   : > { %v2038_v21 = vpop.f32.mrb[54].mxu0 }
 0xfd9   : > { %v2100_v22 = vpack.c.bf16 %v2038_v21, %v2035_v19  ;;  %v4434_v23 = vpop.f32.mrb[55].mxu0 }
 0xfdb   : > { %4441 = vmatprep.subr.bf16.mxu1 %v2100_v22 }
 0xfdc   : > { %4442 = vmatpush3.bf16.msra.mxu1 %v2100_v22 }
 0xfdd   : > { %4453 = vmatprep.subr.bf16.mxu1 %v4820_v0 }
 0xfde   : > { %v4439_v24 = vpop.f32.mrb[56].mxu0 }
 0xfdf   : > { %v2084_v25 = vpop.f32.mrb[57].mxu0  ;;  %v2099_v29 = vpack.c.bf16 %v4439_v24, %v4439_v24 }
 0xfe0   : > { %v4440_v26 = vpop.f32.mrb[58].mxu0 }
 0xfe1   : > { %v2087_v27 = vpop.f32.mrb[59].mxu0 }
 0xfe2   : > { %v2098_v28 = vpack.c.bf16 %v2087_v27, %v2084_v25 }
 0xfe4   : > { %4443 = vmatprep.mubr.msk.bf16.mxu1 %vm442_vm3, %v2098_v28 }
 0xfe5   : > { %4444 = vmatmul.mubr.msk.bf16.vlgmr.msra.gmra.mrb[36].mxu1 %vm442_vm3, %v2099_v29 }
 0xfe6   : > { %4454 = vmatpush3.bf16.xpose.msra.mxu1 %v2264_v30  ;;  %4457 = vmatprep.mubr.msk.bf16.mxu1 %vm4821_vm0, %v4820_v0 }
 0xfe7   : > { %4455 = vmatprep.subr.bf16.mxu1 %v4820_v0  ;;  %v4451_v36 = vpop.f32.mrb[60].mxu0 }
 0xfe8   : > { %v2204_v39 = vpop.f32.mrb[61].mxu0  ;;  %v2220_v62 = vmul.f32 0.5, %v4451_v36 }
 0xfe9   : > { %v4452_v40 = vpop.f32.mrb[62].mxu0  ;;  %v2218_v51 = vmul.f32 0.5, %v2204_v39 }
 0xfea   : > { %v2207_v41 = vpop.f32.mrb[63].mxu0  ;;  %v2227_v63 = vsel %vm449_vm4, %v2220_v62, -inf }
 0xfeb   : > { %v2219_v49 = vmul.f32 0.5, %v2207_v41  ;;  %v2221_v61 = vsel %vm442_vm3, %v2218_v51, -inf }
 0xfed   : > { %v2224_v60 = vsel %vm442_vm3, %v2219_v49, -inf }
 0xfee   : > { %4456 = vmatpush3.bf16.xpose.msra.mxu1 %v2267_v31 }
 0xff5   : > { %4458 = vmatmul.mubr.msk.bf16.vlgmr.msra.gmra.mrb[40].mxu1 %vm381_vm1, %v2255_v16 }
0x10b8   : > { %v5225_v44 = vpop.f32.mrb[36].mxu1 }
0x10b9   : > { %v5227_v46 = vpop.f32.mrb[37].mxu1 }
0x10ba   : > { %v4446_v47 = vpop.f32.mrb[38].mxu1 }
0x10bb   : > { %v5229_v48 = vpop.f32.mrb[39].mxu1 }
0x10c8   : > { %v2303_v50 = vpop.f32.mrb[40].mxu1 }
0x10c9   : > { %v4459_v52 = vpop.f32.mrb[41].mxu1  ;;  %v2310_v53 = vsel %vm531_vm2, %v2303_v50, -inf }
0x10ca   : > { %2311 = vmax.xlane.f32.xlu1 %v2310_v53  ;;  %v2306_v54 = vpop.f32.mrb[42].mxu1 }
0x10cb   : > { %v4460_v55 = vpop.f32.mrb[43].mxu1  ;;  %v2313_v58 = vsel %vm531_vm2, %v2306_v54, -inf }
0x10cc   : > { %2314 = vmax.xlane.f32.xlu0 %v2313_v58 }
0x10ce   : > { %2225 = vmax.xlane.f32.xlu1 %v2224_v60 }
0x10d0   : > { %2222 = vmax.xlane.f32.xlu0 %v2221_v61 }
0x10d4   : > { %2228 = vmax.xlane.f32.xlu0 %v2227_v63  ;;  %v356_v63 = vld [vmem:[%s4975_s18 + $0x50] sm:$0xff] }
0x1157   : > { %v2312_v1 = vpop.xlane.xlu1 %2311 }
0x1158   : > { %v2316_v9 = vmax.f32 %v2312_v1, 0.0  ;;  %v357_v1 = vld [vmem:[%s4975_s18 + $0x58] sm:$0xff] }
0x1159   : > { %v2315_v2 = vpop.xlane.xlu0 %2314 }
0x115a   : > { %v2317_v5 = vmax.f32 %v2315_v2, 0.0  ;;  %v2318_v17 = vsub.f32 %v2303_v50, %v2316_v9  ;;  %v2330_v39 = vsub.f32 0.0, %v2316_v9 }
0x115b   : > { %v2226_v7 = vpop.xlane.xlu1 %2225 }
0x115c   : > { %v2319_v8 = vsub.f32 %v2306_v54, %v2317_v5  ;;  %v2231_v10 = vsub.f32 %v2219_v49, %v2226_v7  ;;  %v2320_v21 = vmul.f32 1.442695, %v2318_v17  ;;  %v2331_v36 = vsub.f32 0.0, %v2317_v5 }
0x115d   : > { %v2223_v11 = vpop.xlane.xlu0 %2222  ;;  %v2332_v41 = vmul.f32 1.442695, %v2330_v39  ;;  %v367_v5 = vpack.c.bf16 %v357_v1, %v356_v63 }
0x115e   : > { %v2230_v12 = vsub.f32 %v2218_v51, %v2223_v11  ;;  %v2235_v13 = vmul.f32 1.442695, %v2231_v10  ;;  %v2322_v14 = vmul.f32 1.442695, %v2319_v8  ;;  %v2334_v40 = vmul.f32 1.442695, %v2331_v36 }
0x1160   : > { %v2233_v16 = vmul.f32 1.442695, %v2230_v12  ;;  %4738 = vpow2.f32 %v2235_v13 }
0x1161   : > { %v2229_v18 = vpop.xlane.xlu0 %2228 }
0x1162   : > { %v2232_v19 = vsub.f32 %v2220_v62, %v2229_v18  ;;  %4740 = vpow2.f32 %v2233_v16 }
0x1163   : > { %4742 = vpow2.f32 %v2322_v14 }
0x1164   : > { %v2237_v20 = vmul.f32 1.442695, %v2232_v19 }
0x1166   : > { %4744 = vpow2.f32 %v2237_v20 }
0x1167   : > { %4746 = vpow2.f32 %v2320_v21 }
0x1168   : > { %4748 = vpow2.f32 %v2334_v40 }
0x1169   : > { %4750 = vpow2.f32 %v2332_v41 }
0x116a   : > { %v5236_v22 = vpop.eup %4738 }
0x116b   : > { %v2242_v24 = vsel %vm442_vm3, %v5236_v22, 0.0 }
0x116c   : > { %v4741_v23 = vpop.eup %4740  ;;  %2243 = vadd.xlane.f32.xlu0 %v2242_v24 }
0x116d   : > { %v4743_v25 = vpop.eup %4742  ;;  %v2239_v26 = vsel %vm442_vm3, %v4741_v23, 0.0 }
0x116e   : > { %2240 = vadd.xlane.f32.xlu1 %v2239_v26  ;;  %v2327_v28 = vsel %vm531_vm2, %v4743_v25, 0.0 }
0x1170   : > { %v5241_v27 = vpop.eup %4744  ;;  %2328 = vadd.xlane.f32.xlu0 %v2327_v28 }
0x1171   : > { %v2245_v29 = vsel %vm449_vm4, %v5241_v27, 0.0  ;;  %v4747_v30 = vpop.eup %4746 }
0x1172   : > { %2246 = vadd.xlane.f32.xlu1 %v2245_v29  ;;  %v2324_v31 = vsel %vm531_vm2, %v4747_v30, 0.0  ;;  %v4749_v49 = vpop.eup %4748 }
0x1173   : > { %v2337_v51 = vmul.f32 15.0, %v4749_v49  ;;  %v4751_v53 = vpop.eup %4750 }
0x1174   : > { %v2336_v58 = vmul.f32 15.0, %v4751_v53 }
0x1176   : > { %2325 = vadd.xlane.f32.xlu1 %v2324_v31 }
0x1186   : > { %2345 = vrot.lane.b32.xlu0 %v4915_v3, %s4839_s11 }
0x1187   : > { %2347 = vrot.lane.b32.xlu1 %v4924_v6, %s4839_s11 }
0x118a   : > { %2613 = vrot.lane.b32.xlu0 %v4924_v6, %s4840_s13 }
0x118b   : > { %2611 = vrot.lane.b32.xlu1 %v4915_v3, %s4840_s13 }
0x118e   : > { %2609 = vrot.lane.b32.xlu0 %v4917_v4, %s4841_s14 }
0x118f   : > { %2514 = vrot.lane.b32.xlu1 %v4917_v4, %s4840_s13 }
0x1192   : > { %2512 = vrot.lane.b32.xlu0 %v4924_v6, %s4841_s14 }
0x1193   : > { %2510 = vrot.lane.b32.xlu1 %v4915_v3, %s4841_s14 }
0x11f9   : > { %v2244_v47 = vpop.xlane.xlu0 %2243 }
0x11fb   : > { %v2241_v50 = vpop.xlane.xlu1 %2240 }
0x11fc   : > { %4752 = vrcp.f32 %v2241_v50 }
0x11fd   : > { %v2329_v52 = vpop.xlane.xlu0 %2328 }
0x11fe   : > { %v2339_v55 = vadd.f32 %v2337_v51, %v2329_v52 }
0x11ff   : > { %v2247_v54 = vpop.xlane.xlu1 %2246 }
0x1200   : > { %4754 = vrcp.f32 %v2339_v55 }
0x1201   : > { %v2346_v60 = vpop.permute.xlu0 %2345  ;;  %4756 = vrcp.f32 %v2244_v47 }
0x1202   : > { %4462 = vmatpush3.bf16.msra.mxu0 %v2346_v60 }
0x1203   : > { %v2326_v61 = vpop.xlane.xlu1 %2325  ;;  %4463 = vmatprep.subr.bf16.mxu0 %v4820_v0 }
0x1204   : > { %v2338_v62 = vadd.f32 %v2336_v58, %v2326_v61 }
0x1206   : > { %4758 = vrcp.f32 %v2338_v62  ;;  %v4753_v8 = vpop.eup %4752 }
0x1207   : > { %v2348_v2 = vpop.permute.xlu1 %2347  ;;  %4760 = vrcp.f32 %v2247_v54  ;;  %v2249_v12 = vmul.f32 %v4753_v8, %v4741_v23 }
0x1208   : > { %v2354_v7 = vand.u32 %v2348_v2, %v4980_v15 }
0x120a   : > { %4464 = vmatpush3.bf16.msra.mxu0 %v2354_v7  ;;  %v4755_v9 = vpop.eup %4754 }
0x120b   : > { %4469 = vmatprep.subr.bf16.mxu0 %v367_v5  ;;  %v4757_v10 = vpop.eup %4756  ;;  %v2343_v13 = vmul.f32 %v4755_v9, %v4743_v25  ;;  %v2612_v24 = vpop.permute.xlu1 %2611 }
0x120c   : > { %v2251_v16 = vmul.f32 %v4757_v10, %v5236_v22  ;;  %v2614_v22 = vpop.permute.xlu0 %2613  ;;  %v2619_v52 = vsel %vm381_vm1, %v2612_v24, 0 }
0x120d   : > { %v2622_v53 = vsel %vm381_vm1, %v2614_v22, 0 }
0x120e   : > { %v2397_v19 = vpack.c.bf16 %v2251_v16, %v2249_v12 }
0x120f   : > { %v2515_v26 = vpop.permute.xlu1 %2514 }
0x1210   : > { %v4759_v11 = vpop.eup %4758  ;;  %v2523_v23 = vsel %vm381_vm1, %v2515_v26, 0  ;;  %v2610_v25 = vpop.permute.xlu0 %2609 }
0x1211   : > { %v2341_v14 = vmul.f32 %v4759_v11, %v4747_v30  ;;  %v4761_v18 = vpop.eup %4760 }
0x1212   : > { %v2253_v20 = vmul.f32 %v4761_v18, %v5241_v27 }
0x1213   : > { %v2344_v17 = vpack.c.bf16 %v2343_v13, %v2341_v14  ;;  %v2511_v28 = vpop.permute.xlu1 %2510 }
0x1214   : > { %v2398_v21 = vpack.c.bf16 %v2253_v20, %v2253_v20  ;;  %v2513_v29 = vpop.permute.xlu0 %2512 }
0x1215   : > { %4466 = vmatmul.mubr.msk.bf16.vlgmr.msra.gmra.mrb[64].mxu0 %vm531_vm2, %v2344_v17 }
0x1216   : > { %4470 = vmatpush3.bf16.msra.mxu0 %v367_v5  ;;  %4471 = vmatprep.mubr.msk.bf16.mxu0 %vm442_vm3, %v2397_v19 }
0x1217   : > { %4563 = vmatprep.subr.msk.bf16.mxu0 %vm381_vm1, %v2515_v26 }
0x121d   : > { %4472 = vmatmul.mubr.msk.bf16.vlgmr.msra.gmra.mrb[68].mxu0 %vm442_vm3, %v2398_v21 }
0x121e   : > { %4483 = vmatprep.mubr.msk.bf16.mxu0 %vm381_vm1, %v2511_v28 }
0x121f   : > { %4482 = vmatpush3.bf16.xpose.msra.mxu0 %v2523_v23 }
0x1220   : > { %4495 = vmatprep.subr.bf16.mxu0 %v4820_v0 }
0x1226   : > { %4484 = vmatmul.mubr.msk.bf16.vlgmr.msra.gmra.mrb[72].mxu0 %vm381_vm1, %v2513_v29 }
0x1227   : > { %4499 = vmatprep.mubr.msk.bf16.mxu0 %vm4821_vm0, %v4820_v0 }
0x12e8   : > { %v2390_v27 = vpop.f32.mrb[64].mxu0 }
0x12e9   : > { %v4467_v30 = vpop.f32.mrb[65].mxu0 }
0x12ea   : > { %v2393_v31 = vpop.f32.mrb[66].mxu0 }
0x12eb   : > { %v2455_v36 = vpack.c.bf16 %v2393_v31, %v2390_v27  ;;  %v4468_v39 = vpop.f32.mrb[67].mxu0 }
0x12ed   : > { %4475 = vmatprep.subr.bf16.mxu1 %v2455_v36 }
0x12ee   : > { %4476 = vmatpush3.bf16.msra.mxu1 %v2455_v36 }
0x12ef   : > { %4487 = vmatprep.subr.bf16.mxu1 %v4820_v0 }
0x12f0   : > { %v4473_v40 = vpop.f32.mrb[68].mxu0 }
0x12f1   : > { %v2439_v41 = vpop.f32.mrb[69].mxu0  ;;  %v2454_v51 = vpack.c.bf16 %v4473_v40, %v4473_v40 }
0x12f2   : > { %v4474_v47 = vpop.f32.mrb[70].mxu0 }
0x12f3   : > { %v2442_v49 = vpop.f32.mrb[71].mxu0 }
0x12f4   : > { %v2453_v50 = vpack.c.bf16 %v2442_v49, %v2439_v41 }
0x12f6   : > { %4477 = vmatprep.mubr.msk.bf16.mxu1 %vm442_vm3, %v2453_v50 }
0x12f7   : > { %4478 = vmatmul.mubr.msk.bf16.vlgmr.msra.gmra.mrb[44].mxu1 %vm442_vm3, %v2454_v51 }
0x12f8   : > { %4488 = vmatpush3.bf16.xpose.msra.mxu1 %v2619_v52  ;;  %4491 = vmatprep.mubr.msk.bf16.mxu1 %vm4821_vm0, %v4820_v0 }
0x12f9   : > { %4489 = vmatprep.subr.bf16.mxu1 %v4820_v0  ;;  %v4485_v54 = vpop.f32.mrb[72].mxu0 }
0x12fa   : > { %v2559_v55 = vpop.f32.mrb[73].mxu0  ;;  %v2575_v16 = vmul.f32 0.5, %v4485_v54 }
0x12fb   : > { %v4486_v58 = vpop.f32.mrb[74].mxu0  ;;  %v2573_v7 = vmul.f32 0.5, %v2559_v55 }
0x12fc   : > { %v2562_v60 = vpop.f32.mrb[75].mxu0  ;;  %v2582_v17 = vsel %vm449_vm4, %v2575_v16, -inf }
0x12fd   : > { %v2574_v2 = vmul.f32 0.5, %v2562_v60  ;;  %v2576_v14 = vsel %vm442_vm3, %v2573_v7, -inf }
0x12ff   : > { %v2579_v13 = vsel %vm442_vm3, %v2574_v2, -inf }
0x1300   : > { %4490 = vmatpush3.bf16.xpose.msra.mxu1 %v2622_v53 }
0x1307   : > { %4492 = vmatmul.mubr.msk.bf16.vlgmr.msra.gmra.mrb[48].mxu1 %vm381_vm1, %v2610_v25 }
0x13ca   : > { %v5280_v61 = vpop.f32.mrb[44].mxu1 }
0x13cb   : > { %v5282_v62 = vpop.f32.mrb[45].mxu1 }
0x13cc   : > { %v4480_v63 = vpop.f32.mrb[46].mxu1 }
0x13cd   : > { %v5284_v1 = vpop.f32.mrb[47].mxu1 }
0x13da   : > { %v2658_v5 = vpop.f32.mrb[48].mxu1 }
0x13db   : > { %v4493_v8 = vpop.f32.mrb[49].mxu1  ;;  %v2665_v9 = vsel %vm531_vm2, %v2658_v5, -inf }
0x13dc   : > { %2666 = vmax.xlane.f32.xlu1 %v2665_v9  ;;  %v2661_v10 = vpop.f32.mrb[50].mxu1 }
0x13dd   : > { %v4494_v11 = vpop.f32.mrb[51].mxu1  ;;  %v2668_v12 = vsel %vm531_vm2, %v2661_v10, -inf }
0x13de   : > { %2669 = vmax.xlane.f32.xlu0 %v2668_v12 }
0x13e0   : > { %2580 = vmax.xlane.f32.xlu1 %v2579_v13 }
0x13e2   : > { %2577 = vmax.xlane.f32.xlu0 %v2576_v14 }
0x13e6   : > { %2583 = vmax.xlane.f32.xlu0 %v2582_v17 }
0x1469   : > { %v2667_v18 = vpop.xlane.xlu1 %2666 }
0x146a   : > { %v2671_v26 = vmax.f32 %v2667_v18, 0.0 }
0x146b   : > { %v2670_v19 = vpop.xlane.xlu0 %2669 }
0x146c   : > { %v2672_v20 = vmax.f32 %v2670_v19, 0.0  ;;  %v2673_v30 = vsub.f32 %v2658_v5, %v2671_v26  ;;  %v2685_v63 = vsub.f32 0.0, %v2671_v26  ;;  %v358_v19 = vld [vmem:[%s4975_s18 + $0x60] sm:$0xff] }
0x146d   : > { %v2581_v21 = vpop.xlane.xlu1 %2580 }
0x146e   : > { %v2674_v24 = vsub.f32 %v2661_v10, %v2672_v20  ;;  %v2586_v23 = vsub.f32 %v2574_v2, %v2581_v21  ;;  %v2675_v40 = vmul.f32 1.442695, %v2673_v30  ;;  %v2686_v60 = vsub.f32 0.0, %v2672_v20  ;;  %v359_v20 = vld [vmem:[%s4975_s18 + $0x68] sm:$0xff] }
0x146f   : > { %v2578_v22 = vpop.xlane.xlu0 %2577  ;;  %v2687_v5 = vmul.f32 1.442695, %v2685_v63 }
0x1470   : > { %v2585_v25 = vsub.f32 %v2573_v7, %v2578_v22  ;;  %v2590_v28 = vmul.f32 1.442695, %v2586_v23  ;;  %v2677_v29 = vmul.f32 1.442695, %v2674_v24  ;;  %v2689_v2 = vmul.f32 1.442695, %v2686_v60 }
0x1471   : > { %v368_v24 = vpack.c.bf16 %v359_v20, %v358_v19 }
0x1472   : > { %v2588_v27 = vmul.f32 1.442695, %v2585_v25  ;;  %4762 = vpow2.f32 %v2590_v28 }
0x1473   : > { %v2584_v31 = vpop.xlane.xlu0 %2583 }
0x1474   : > { %v2587_v36 = vsub.f32 %v2575_v16, %v2584_v31  ;;  %4764 = vpow2.f32 %v2588_v27 }
0x1475   : > { %4766 = vpow2.f32 %v2677_v29 }
0x1476   : > { %v2592_v39 = vmul.f32 1.442695, %v2587_v36 }
0x1478   : > { %4768 = vpow2.f32 %v2592_v39 }
0x1479   : > { %4770 = vpow2.f32 %v2675_v40 }
0x147a   : > { %4772 = vpow2.f32 %v2689_v2 }
0x147b   : > { %4774 = vpow2.f32 %v2687_v5 }
0x147c   : > { %v5291_v41 = vpop.eup %4762 }
0x147d   : > { %v2597_v49 = vsel %vm442_vm3, %v5291_v41, 0.0 }
0x147e   : > { %v4765_v47 = vpop.eup %4764  ;;  %2598 = vadd.xlane.f32.xlu0 %v2597_v49 }
0x147f   : > { %v4767_v50 = vpop.eup %4766  ;;  %v2594_v51 = vsel %vm442_vm3, %v4765_v47, 0.0 }
0x1480   : > { %2595 = vadd.xlane.f32.xlu1 %v2594_v51  ;;  %v2682_v53 = vsel %vm531_vm2, %v4767_v50, 0.0 }
0x1482   : > { %v5296_v52 = vpop.eup %4768  ;;  %2683 = vadd.xlane.f32.xlu0 %v2682_v53 }
0x1483   : > { %v2600_v54 = vsel %vm449_vm4, %v5296_v52, 0.0  ;;  %v4771_v55 = vpop.eup %4770 }
0x1484   : > { %2601 = vadd.xlane.f32.xlu1 %v2600_v54  ;;  %v2679_v58 = vsel %vm531_vm2, %v4771_v55, 0.0  ;;  %v4773_v8 = vpop.eup %4772 }
0x1485   : > { %v2692_v10 = vmul.f32 15.0, %v4773_v8  ;;  %v4775_v12 = vpop.eup %4774 }
0x1486   : > { %v2691_v14 = vmul.f32 15.0, %v4775_v12 }
0x1488   : > { %2680 = vadd.xlane.f32.xlu1 %v2679_v58 }
0x1498   : > { %2700 = vrot.lane.b32.xlu0 %v4915_v3, %s4842_s15 }
0x1499   : > { %2702 = vrot.lane.b32.xlu1 %v4924_v6, %s4842_s15 }
0x149c   : > { %2968 = vrot.lane.b32.xlu0 %v4924_v6, %s4843_s16 }
0x149d   : > { %2966 = vrot.lane.b32.xlu1 %v4915_v3, %s4843_s16 }
0x14a0   : > { %2964 = vrot.lane.b32.xlu0 %v4917_v4, %s4844_s17 }
0x14a1   : > { %2869 = vrot.lane.b32.xlu1 %v4917_v4, %s4843_s16 }
0x14a4   : > { %2867 = vrot.lane.b32.xlu0 %v4924_v6, %s4844_s17 }
0x14a5   : > { %2865 = vrot.lane.b32.xlu1 %v4915_v3, %s4844_s17 }
0x150b   : > { %v2599_v7 = vpop.xlane.xlu0 %2598 }
0x150d   : > { %v2596_v9 = vpop.xlane.xlu1 %2595 }
0x150e   : > { %4776 = vrcp.f32 %v2596_v9 }
0x150f   : > { %v2684_v11 = vpop.xlane.xlu0 %2683 }
0x1510   : > { %v2694_v4 = vadd.f32 %v2692_v10, %v2684_v11 }
0x1511   : > { %v2602_v13 = vpop.xlane.xlu1 %2601 }
0x1512   : > { %4778 = vrcp.f32 %v2694_v4 }
0x1513   : > { %v2701_v16 = vpop.permute.xlu0 %2700  ;;  %4780 = vrcp.f32 %v2599_v7 }
0x1514   : > { %4496 = vmatpush3.bf16.msra.mxu0 %v2701_v16 }
0x1515   : > { %v2681_v17 = vpop.xlane.xlu1 %2680  ;;  %4497 = vmatprep.subr.bf16.mxu0 %v4820_v0 }
0x1516   : > { %v2693_v18 = vadd.f32 %v2691_v14, %v2681_v17 }
0x1518   : > { %4782 = vrcp.f32 %v2693_v18  ;;  %v4777_v23 = vpop.eup %4776 }
0x1519   : > { %v2703_v21 = vpop.permute.xlu1 %2702  ;;  %4784 = vrcp.f32 %v2602_v13  ;;  %v2604_v29 = vmul.f32 %v4777_v23, %v4765_v47 }
0x151a   : > { %v2709_v26 = vand.u32 %v2703_v21, %v4980_v15 }
0x151c   : > { %4498 = vmatpush3.bf16.msra.mxu0 %v2709_v26  ;;  %v4779_v22 = vpop.eup %4778 }
0x151d   : > { %4503 = vmatprep.subr.bf16.mxu0 %v368_v24  ;;  %v4781_v25 = vpop.eup %4780  ;;  %v2698_v27 = vmul.f32 %v4779_v22, %v4767_v50  ;;  %v2967_v53 = vpop.permute.xlu1 %2966 }
0x151e   : > { %v2606_v31 = vmul.f32 %v4781_v25, %v5291_v41  ;;  %v2969_v41 = vpop.permute.xlu0 %2968  ;;  %v2974_v13 = vsel %vm381_vm1, %v2967_v53, 0 }
0x151f   : > { %v2977_v4 = vsel %vm381_vm1, %v2969_v41, 0 }
0x1520   : > { %v2752_v40 = vpack.c.bf16 %v2606_v31, %v2604_v29 }
0x1521   : > { %v2870_v54 = vpop.permute.xlu1 %2869 }
0x1522   : > { %v4783_v28 = vpop.eup %4782  ;;  %v2878_v47 = vsel %vm381_vm1, %v2870_v54, 0  ;;  %v2965_v50 = vpop.permute.xlu0 %2964 }
0x1523   : > { %v2696_v30 = vmul.f32 %v4783_v28, %v4771_v55  ;;  %v4785_v39 = vpop.eup %4784 }
0x1524   : > { %v2608_v49 = vmul.f32 %v4785_v39, %v5296_v52 }
0x1525   : > { %v2699_v36 = vpack.c.bf16 %v2698_v27, %v2696_v30  ;;  %v2866_v55 = vpop.permute.xlu1 %2865 }
0x1526   : > { %v2753_v51 = vpack.c.bf16 %v2608_v49, %v2608_v49  ;;  %v2868_v58 = vpop.permute.xlu0 %2867 }
0x1527   : > { %4500 = vmatmul.mubr.msk.bf16.vlgmr.msra.gmra.mrb[76].mxu0 %vm531_vm2, %v2699_v36 }
0x1528   : > { %4504 = vmatpush3.bf16.msra.mxu0 %v368_v24  ;;  %4505 = vmatprep.mubr.msk.bf16.mxu0 %vm442_vm3, %v2752_v40 }
0x1529   : > { %4564 = vmatprep.subr.msk.bf16.mxu0 %vm381_vm1, %v2870_v54 }
0x152f   : > { %4506 = vmatmul.mubr.msk.bf16.vlgmr.msra.gmra.mrb[80].mxu0 %vm442_vm3, %v2753_v51 }
0x1530   : > { %4517 = vmatprep.mubr.msk.bf16.mxu0 %vm381_vm1, %v2866_v55 }
0x1531   : > { %4516 = vmatpush3.bf16.xpose.msra.mxu0 %v2878_v47 }
0x1532   : > { %4529 = vmatprep.subr.bf16.mxu0 %v4820_v0 }
0x1538   : > { %4518 = vmatmul.mubr.msk.bf16.vlgmr.msra.gmra.mrb[84].mxu0 %vm381_vm1, %v2868_v58 }
0x1539   : > { %4533 = vmatprep.mubr.msk.bf16.mxu0 %vm4821_vm0, %v4820_v0 }
0x15fa   : > { %v2745_v52 = vpop.f32.mrb[76].mxu0 }
0x15fb   : > { %v4501_v60 = vpop.f32.mrb[77].mxu0 }
0x15fc   : > { %v2748_v63 = vpop.f32.mrb[78].mxu0 }
0x15fd   : > { %v2810_v2 = vpack.c.bf16 %v2748_v63, %v2745_v52  ;;  %v4502_v5 = vpop.f32.mrb[79].mxu0 }
0x15ff   : > { %4509 = vmatprep.subr.bf16.mxu1 %v2810_v2 }
0x1600   : > { %4510 = vmatpush3.bf16.msra.mxu1 %v2810_v2 }
0x1601   : > { %4521 = vmatprep.subr.bf16.mxu1 %v4820_v0 }
0x1602   : > { %v4507_v7 = vpop.f32.mrb[80].mxu0 }
0x1603   : > { %v2794_v8 = vpop.f32.mrb[81].mxu0  ;;  %v2809_v12 = vpack.c.bf16 %v4507_v7, %v4507_v7 }
0x1604   : > { %v4508_v9 = vpop.f32.mrb[82].mxu0 }
0x1605   : > { %v2797_v10 = vpop.f32.mrb[83].mxu0 }
0x1606   : > { %v2808_v11 = vpack.c.bf16 %v2797_v10, %v2794_v8 }
0x1608   : > { %4511 = vmatprep.mubr.msk.bf16.mxu1 %vm442_vm3, %v2808_v11 }
0x1609   : > { %4512 = vmatmul.mubr.msk.bf16.vlgmr.msra.gmra.mrb[52].mxu1 %vm442_vm3, %v2809_v12 }
0x160a   : > { %4522 = vmatpush3.bf16.xpose.msra.mxu1 %v2974_v13  ;;  %4525 = vmatprep.mubr.msk.bf16.mxu1 %vm4821_vm0, %v4820_v0 }
0x160b   : > { %4523 = vmatprep.subr.bf16.mxu1 %v4820_v0  ;;  %v4519_v14 = vpop.f32.mrb[84].mxu0 }
0x160c   : > { %v2914_v16 = vpop.f32.mrb[85].mxu0  ;;  %v2930_v39 = vmul.f32 0.5, %v4519_v14 }
0x160d   : > { %v4520_v17 = vpop.f32.mrb[86].mxu0  ;;  %v2928_v22 = vmul.f32 0.5, %v2914_v16 }
0x160e   : > { %v2917_v18 = vpop.f32.mrb[87].mxu0  ;;  %v2937_v40 = vsel %vm449_vm4, %v2930_v39, -inf }
0x160f   : > { %v2929_v26 = vmul.f32 0.5, %v2917_v18  ;;  %v2931_v36 = vsel %vm442_vm3, %v2928_v22, -inf }
0x1611   : > { %v2934_v31 = vsel %vm442_vm3, %v2929_v26, -inf }
0x1612   : > { %4524 = vmatpush3.bf16.xpose.msra.mxu1 %v2977_v4 }
0x1619   : > { %4526 = vmatmul.mubr.msk.bf16.vlgmr.msra.gmra.mrb[56].mxu1 %vm381_vm1, %v2965_v50 }
0x16dc   : > { %v5335_v19 = vpop.f32.mrb[52].mxu1 }
0x16dd   : > { %v5337_v20 = vpop.f32.mrb[53].mxu1 }
0x16de   : > { %v4514_v21 = vpop.f32.mrb[54].mxu1 }
0x16df   : > { %v5339_v24 = vpop.f32.mrb[55].mxu1 }
0x16ec   : > { %v3013_v23 = vpop.f32.mrb[56].mxu1 }
0x16ed   : > { %v4527_v25 = vpop.f32.mrb[57].mxu1  ;;  %v3020_v28 = vsel %vm531_vm2, %v3013_v23, -inf }
0x16ee   : > { %3021 = vmax.xlane.f32.xlu1 %v3020_v28  ;;  %v3016_v29 = vpop.f32.mrb[58].mxu1  ;;  %v4811_v25 = vld [vmem:[%s4912_s10 + $0x8] sm:$0x1] }
0x16ef   : > { %v4528_v27 = vpop.f32.mrb[59].mxu1  ;;  %v3023_v30 = vsel %vm531_vm2, %v3016_v29, -inf  ;;  %v3332_v28 = vunpack.c.l.bf16 %v4811_v25 }
0x16f0   : > { %3024 = vmax.xlane.f32.xlu0 %v3023_v30 }
0x16f2   : > { %2935 = vmax.xlane.f32.xlu1 %v2934_v31 }
0x16f4   : > { %2932 = vmax.xlane.f32.xlu0 %v2931_v36 }
0x16f8   : > { %2938 = vmax.xlane.f32.xlu0 %v2937_v40 }
0x177b   : > { %v5346_v49 = vpop.xlane.xlu1 %3021 }
0x177c   : > { %v3026_v41 = vmax.f32 %v5346_v49, 0.0 }
0x177d   : > { %v5348_v51 = vpop.xlane.xlu0 %3024 }
0x177e   : > { %v3027_v53 = vmax.f32 %v5348_v51, 0.0  ;;  %v3028_v2 = vsub.f32 %v3013_v23, %v3026_v41 }
0x177f   : > { %v2936_v54 = vpop.xlane.xlu1 %2935 }
0x1780   : > { %v3029_v47 = vsub.f32 %v3016_v29, %v3027_v53  ;;  %v2941_v50 = vsub.f32 %v2929_v26, %v2936_v54  ;;  %v3030_v9 = vmul.f32 1.442695, %v3028_v2  ;;  %v4810_v26 = vld [vmem:[%s4912_s10] sm:$0xff]   ;;  %s4848_s10 = smov 12  }
0x1781   : > { %v2933_v55 = vpop.xlane.xlu0 %2932  ;;  %v3330_v23 = vunpack.c.l.bf16 %v4810_v26 }
0x1782   : > { %v2940_v58 = vsub.f32 %v2928_v22, %v2933_v55  ;;  %v2945_v52 = vmul.f32 1.442695, %v2941_v50  ;;  %v3032_v60 = vmul.f32 1.442695, %v3029_v47  ;;  %v3331_v22 = vunpack.c.h.bf16 %v4810_v26 }
0x1784   : > { %v2943_v63 = vmul.f32 1.442695, %v2940_v58  ;;  %4786 = vpow2.f32 %v2945_v52  ;;  %v4608_v29 = vpack.i.bf16 %v3331_v22, %v3330_v23  ;;  %v3346_v22 = vld [vmem:[%s6042_s4] sm:$0xff] }
0x1785   : > { %v2939_v5 = vpop.xlane.xlu0 %2938 }
0x1786   : > { %v2942_v7 = vsub.f32 %v2930_v39, %v2939_v5  ;;  %4788 = vpow2.f32 %v2943_v63 }
0x1787   : > { %4790 = vpow2.f32 %v3032_v60 }
0x1788   : > { %v2947_v8 = vmul.f32 1.442695, %v2942_v7 }
0x178a   : > { %4792 = vpow2.f32 %v2947_v8 }
0x178b   : > { %4794 = vpow2.f32 %v3030_v9 }
0x178e   : > { %v5356_v10 = vpop.eup %4786 }
0x178f   : > { %v2952_v12 = vsel %vm442_vm3, %v5356_v10, 0.0 }
0x1790   : > { %v5358_v11 = vpop.eup %4788  ;;  %2953 = vadd.xlane.f32.xlu0 %v2952_v12 }
0x1791   : > { %v5362_v13 = vpop.eup %4790  ;;  %v2949_v4 = vsel %vm442_vm3, %v5358_v11, 0.0 }
0x1792   : > { %2950 = vadd.xlane.f32.xlu1 %v2949_v4  ;;  %v3037_v16 = vsel %vm531_vm2, %v5362_v13, 0.0 }
0x1794   : > { %v5366_v14 = vpop.eup %4792  ;;  %3038 = vadd.xlane.f32.xlu0 %v3037_v16  ;;  %v3351_v16 = vlaneseq }
0x1795   : > { %v2955_v17 = vsel %vm449_vm4, %v5366_v14, 0.0  ;;  %v5372_v18 = vpop.eup %4794 }
0x1796   : > { %2956 = vadd.xlane.f32.xlu1 %v2955_v17  ;;  %v3034_v21 = vsel %vm531_vm2, %v5372_v18, 0.0  ;;  %v3352_v17 = vshrl.u32 %v3351_v16, 7 }
0x1798   : > { %v5428_v26 = vsub.s32 6, %v3352_v17  ;;  %v5430_v23 = vsub.s32 7, %v3352_v17  ;;  %v5435_v25 = vsub.s32 0, %v3352_v17 }
0x179a   : > { %3035 = vadd.xlane.f32.xlu1 %v3034_v21  ;;  %v5426_v21 = vsub.s32 5, %v3352_v17 }
0x17aa   : > { %3055 = vrot.lane.b32.xlu0 %v4915_v3, %s4845_s19  ;;  %v3041_v3 = vsub.f32 0.0, %v3027_v53 }
0x17ab   : > { %3057 = vrot.lane.b32.xlu1 %v4924_v6, %s4845_s19  ;;  %v3040_v6 = vsub.f32 0.0, %v3026_v41 }
0x17ae   : > { %3340 = vrot.lane.b32.xlu0 %v3332_v28, %s4823_s12  ;;  %v5437_v28 = vsub.s32 1, %v3352_v17 }
0x17af   : > { %4609 = vrot.lane.b32.xlu1 %v4608_v29, %s4823_s12  ;;  %s4849_s12 = smov 16  }
0x17b2   : > { %3225 = vrot.lane.b32.xlu0 %v5064_v45, %s4846_s20 }
0x17b3   : > { %3223 = vrot.lane.b32.xlu1 %v5062_v43, %s4846_s20  ;;  %v3042_v43 = vmul.f32 1.442695, %v3040_v6  ;;  %v5445_v6 = vsub.s32 2, %v3352_v17 }
0x17b6   : > { %3235 = vrot.lane.b32.xlu0 %v5117_v35, %s4847_s21 }
0x17b7   : > { %3227 = vrot.lane.b32.xlu1 %v5060_v42, %s4846_s20  ;;  %v3044_v42 = vmul.f32 1.442695, %v3041_v3  ;;  %v5443_v3 = vrot.slane %v3346_v22, %v5426_v21  ;;  %s4566_s20 = smul.u32 24, %s6163_s25 }
0x17b9   : > { %4796 = vpow2.f32 %v3044_v42  ;;  %v5448_v42 = vrot.slane %v3346_v22, %v5428_v26  ;;  %s338_s27 = scalar_lea.vmem %s6045_s7, %s4566_s20 }
0x17ba   : > { %3239 = vrot.lane.b32.xlu0 %v5115_v34, %s4847_s21  ;;  %4798 = vpow2.f32 %v3042_v43  ;;  %v5450_v43 = vsub.s32 3, %v3352_v17 }
0x17bb   : > { %3237 = vrot.lane.b32.xlu1 %v5119_v37, %s4847_s21 }
0x17be   : > { %3249 = vrot.lane.b32.xlu0 %v5174_v38, %s4848_s10 }
0x17bf   : > { %3247 = vrot.lane.b32.xlu1 %v5172_v33, %s4848_s10 }
0x17c2   : > { %3259 = vrot.lane.b32.xlu0 %v5227_v46, %s4849_s12 }
0x17c3   : > { %3251 = vrot.lane.b32.xlu1 %v5170_v32, %s4848_s10  ;;  %v4797_v34 = vpop.eup %4796 }
0x17c4   : > { %v3047_v37 = vmul.f32 15.0, %v4797_v34  ;;  %v4799_v33 = vpop.eup %4798  ;;  %v5456_v34 = vrot.slane %v3346_v22, %v5435_v25 }
0x17c6   : > { %3263 = vrot.lane.b32.xlu0 %v5225_v44, %s4849_s12 }
0x17c7   : > { %3261 = vrot.lane.b32.xlu1 %v5229_v48, %s4849_s12  ;;  %v3046_v48 = vmul.f32 15.0, %v4799_v33  ;;  %v5468_v33 = vrot.slane %v3346_v22, %v5445_v6  ;;  %s333_s12 = scalar_lea.vmem %s6041_s3, %s4566_s20 }
0x17ca   : > { %3273 = vrot.lane.b32.xlu0 %v5284_v1, %s4850_s22  ;;  %v360_v1 = vld [vmem:[%s4975_s18 + $0x70] sm:$0xff] }
0x17cb   : > { %3271 = vrot.lane.b32.xlu1 %v5282_v62, %s4850_s22 }
0x17ce   : > { %3283 = vrot.lane.b32.xlu0 %v5337_v20, %s4851_s23 }
0x17cf   : > { %3275 = vrot.lane.b32.xlu1 %v5280_v61, %s4850_s22 }
0x17d2   : > { %3287 = vrot.lane.b32.xlu0 %v5335_v19, %s4851_s23  ;;  %v361_v19 = vld [vmem:[%s4975_s18 + $0x78] sm:$0xff] }
0x17d3   : > { %3285 = vrot.lane.b32.xlu1 %v5339_v24, %s4851_s23  ;;  %v369_v24 = vpack.c.bf16 %v361_v19, %v360_v1 }
0x181d   : > { %v2954_v45 = vpop.xlane.xlu0 %2953 }
0x181f   : > { %v2951_v35 = vpop.xlane.xlu1 %2950 }
0x1820   : > { %4800 = vrcp.f32 %v2951_v35  ;;  %v5459_v35 = vrot.slane %v3346_v22, %v5437_v28 }
0x1821   : > { %v3039_v32 = vpop.xlane.xlu0 %3038 }
0x1822   : > { %v3049_v44 = vadd.f32 %v3047_v37, %v3039_v32  ;;  %v5465_v32 = vmul.f32 0.0, %v5443_v3  ;;  %v5489_v1 = vmul.f32 0.0, %v5459_v35 }
0x1823   : > { %v2957_v38 = vpop.xlane.xlu1 %2956 }
0x1824   : > { %4802 = vrcp.f32 %v3049_v44  ;;  %v3347_v44 = vld [vmem:[%s6042_s4 + $0x8] sm:$0xff] }
0x1825   : > { %v3056_v46 = vpop.permute.xlu0 %3055  ;;  %4804 = vrcp.f32 %v2954_v45  ;;  %v5453_v45 = vrot.slane %v3346_v22, %v5430_v23 }
0x1826   : > { %4530 = vmatpush3.bf16.msra.mxu0 %v3056_v46  ;;  %v5477_v46 = vrot.slane %v3346_v22, %v5450_v43 }
0x1827   : > { %v3036_v61 = vpop.xlane.xlu1 %3035  ;;  %4531 = vmatprep.subr.bf16.mxu0 %v4820_v0 }
0x1828   : > { %v3048_v62 = vadd.f32 %v3046_v48, %v3036_v61  ;;  %v5480_v48 = vmul.f32 0.0, %v5453_v45  ;;  %v5483_v61 = vmul.f32 0.0, %v5456_v34 }
0x182a   : > { %4806 = vrcp.f32 %v3048_v62  ;;  %v4801_v30 = vpop.eup %4800  ;;  %v5486_v62 = vrot.slane %v3347_v44, %v5435_v25 }
0x182b   : > { %v3058_v20 = vpop.permute.xlu1 %3057  ;;  %4808 = vrcp.f32 %v2957_v38  ;;  %v2959_v40 = vmul.f32 %v4801_v30, %v5358_v11  ;;  %v4616_v11 = vld [vmem:[%s6043_s5 + $0x8] sm:$0xff]   ;;  %v5471_v38 = vmul.f32 0.0, %v5448_v42 }
0x182c   : > { %v3064_v27 = vand.u32 %v3058_v20, %v4980_v15  ;;  %v6049_v20 = vrot.slane %v5465_v32, 4 }
0x182d   : > { %v6047_v30 = vrot.slane %v5471_v38, 4 }
0x182e   : > { %4532 = vmatpush3.bf16.msra.mxu0 %v3064_v27  ;;  %v4803_v31 = vpop.eup %4802  ;;  %v5497_v27 = vmul.f32 0.0, %v5468_v33 }
0x182f   : > { %4537 = vmatprep.subr.bf16.mxu0 %v369_v24  ;;  %v4805_v36 = vpop.eup %4804  ;;  %v3053_v49 = vmul.f32 %v4803_v31, %v5362_v13  ;;  %v5501_v31 = vrot.slane %v3347_v44, %v5445_v6 }
0x1830   : > { %v2961_v51 = vmul.f32 %v4805_v36, %v5356_v10  ;;  %v4615_v10 = vld [vmem:[%s6043_s5] sm:$0xff]   ;;  %v5504_v36 = vmul.f32 0.0, %v5477_v46 }
0x1832   : > { %v3107_v47 = vpack.c.bf16 %v2961_v51, %v2959_v40  ;;  %v5508_v40 = vrot.slane %v3347_v44, %v5450_v43  ;;  %v5515_v51 = vrot.slane %v3347_v44, %v5426_v21 }
0x1834   : > { %v4807_v39 = vpop.eup %4806 }
0x1835   : > { %v3051_v0 = vmul.f32 %v4807_v39, %v5372_v18  ;;  %v4809_v54 = vpop.eup %4808  ;;  %v5424_v18 = vsub.s32 4, %v3352_v17  ;;  %v6048_v39 = vrot.slane %v5480_v48, 4 }
0x1836   : > { %v2963_v15 = vmul.f32 %v4809_v54, %v5366_v14  ;;  %v3417_v54 = vadd.f32 %v6049_v20, %v5489_v1 }
0x1837   : > { %v3054_v53 = vpack.c.bf16 %v3053_v49, %v3051_v0  ;;  %v5440_v29 = vrot.slane %v3346_v22, %v5424_v18  ;;  %v3460_v49 = vmul.f32 0.0, %v5486_v62  ;;  %v5512_v0 = vrot.slane %v3347_v44, %v5424_v18  ;;  %v3349_v22 = vld [vmem:[%s6042_s4 + $0x18] sm:$0xff] }
0x1838   : > { %v3108_v41 = vpack.c.bf16 %v2963_v15, %v2963_v15  ;;  %v5525_v15 = vrot.slane %v3347_v44, %v5428_v26  ;;  %v5664_v57 = vrot.slane %v3349_v22, %v5428_v26 }
0x1839   : > { %4534 = vmatmul.mubr.msk.bf16.vlgmr.msra.gmra.mrb[88].mxu0 %vm531_vm2, %v3054_v53  ;;  %v5462_v37 = vmul.f32 0.0, %v5440_v29 }
0x183a   : > { %4538 = vmatpush3.bf16.msra.mxu0 %v369_v24  ;;  %4539 = vmatprep.mubr.msk.bf16.mxu0 %vm442_vm3, %v3107_v47  ;;  %v5494_v24 = vrot.slane %v3347_v44, %v5437_v28  ;;  %6087 = vst [vmem:[#allocation18_spill] sm:$0xff] %v5664_v57 }
0x183b   : > { %4549 = vmatprep.subr.bf16.mxu0 %v4615_v10  ;;  %v6046_v19 = vrot.slane %v5462_v37, 4 }
0x183c   : > { %v3470_v47 = vmul.f32 0.0, %v5494_v24 }
0x183d   : > { %v3399_v53 = vadd.f32 %v6046_v19, %v5483_v61  ;;  %v5602_v19 = vrot.slane %v3349_v22, %v5424_v18 }
0x183f   : > { %6077 = vst [vmem:[#allocation8_spill] sm:$0xff] %v5602_v19 }
0x1841   : > { %4540 = vmatmul.mubr.msk.bf16.vlgmr.msra.gmra.mrb[92].mxu0 %vm442_vm3, %v3108_v41  ;;  %v3435_v41 = vadd.f32 %v6047_v30, %v5497_v27  ;;  %v5621_v30 = vrot.slane %v3349_v22, %v5450_v43 }
0x1842   : > { %4550 = vmatpush3.bf16.msra.mxu0 %v4615_v10 }
0x1843   : > { %4551 = vmatprep.subr.bf16.mxu0 %v4616_v11  ;;  %6080 = vst [vmem:[#allocation11_spill] sm:$0xff] %v5621_v30  ;;  %v5676_v59 = vmul.f32 0.0, %v5621_v30 }
0x1845   : > { %6090 = vst [vmem:[#allocation21_spill] sm:$0xff] %v5676_v59  ;;  %v6094_v59 = vrot.slane %v5480_v48, 4 }
0x1846   : > { %4552 = vmatpush3.bf16.msra.mxu0 %v4616_v11  ;;  %v5554_v11 = vadd.f32 %v3460_v49, %v3399_v53 }
0x190c   : > { %v3100_v50 = vpop.f32.mrb[88].mxu0 }
0x190d   : > { %v4535_v55 = vpop.f32.mrb[89].mxu0 }
0x190e   : > { %v3103_v58 = vpop.f32.mrb[90].mxu0  ;;  %v5532_v55 = vrot.slane %v3347_v44, %v5430_v23 }
0x190f   : > { %v3165_v52 = vpack.c.bf16 %v3103_v58, %v3100_v50  ;;  %v4536_v60 = vpop.f32.mrb[91].mxu0  ;;  %v3480_v50 = vmul.f32 0.0, %v5501_v31  ;;  %v3341_v58 = vpop.permute.xlu0 %3340 }
0x1910   : > { %v3348_v60 = vld [vmem:[%s6042_s4 + $0x10] sm:$0xff] }
0x1911   : > { %4543 = vmatprep.subr.bf16.mxu1 %v3165_v52  ;;  %v5567_v16 = vrot.slane %v3348_v60, %v5450_v43  ;;  %v5570_v17 = vrot.slane %v3348_v60, %v5426_v21  ;;  %v5578_v49 = vrot.slane %v3348_v60, %v5435_v25  ;;  %v5581_v53 = vrot.slane %v3348_v60, %v5437_v28 }
0x1912   : > { %4544 = vmatpush3.bf16.msra.mxu1 %v3165_v52  ;;  %v4610_v52 = vpop.permute.xlu1 %4609  ;;  %v5630_v20 = vrot.slane %v3348_v60, %v5424_v18 }
0x1913   : > { %v5552_v10 = vunpack.i.l.bf16 %v4610_v52 }
0x1914   : > { %v4541_v63 = vpop.f32.mrb[92].mxu0 }
0x1915   : > { %v3149_v2 = vpop.f32.mrb[93].mxu0  ;;  %v3164_v9 = vpack.c.bf16 %v4541_v63, %v4541_v63  ;;  %v3453_v63 = vadd.f32 %v6048_v39, %v5504_v36  ;;  %v3443_v39 = vmul.f32 %v5552_v10, %v5453_v45  ;;  %v5641_v43 = vmul.f32 %v5552_v10, %v5448_v42 }
0x1916   : > { %v4542_v5 = vpop.f32.mrb[94].mxu0  ;;  %v5648_v45 = vrot.slane %v3349_v22, %v5435_v25  ;;  %v5667_v25 = vrot.slane %v3349_v22, %v5430_v23 }
0x1917   : > { %v3152_v7 = vpop.f32.mrb[95].mxu0  ;;  %v5542_v5 = vsel %vm575_vm5, %v3341_v58, 0.0  ;;  %v5592_v58 = vrot.slane %v3349_v22, %v5426_v21  ;;  %v6098_v48 = vrot.slane %v5641_v43, 4 }
0x1918   : > { %v3163_v8 = vpack.c.bf16 %v3152_v7, %v3149_v2  ;;  %v3490_v2 = vmul.f32 0.0, %v5508_v40  ;;  %6074 = vst [vmem:[#allocation5_spill] sm:$0xff] %v5542_v5  ;;  %v5544_v7 = vunpack.i.h.bf16 %v4610_v52  ;;  %v5611_v21 = vmul.f32 %v5570_v17, %v5542_v5  ;;  %6083 = vst [vmem:[#allocation14_spill] sm:$0xff] %v5648_v45 }
0x1919   : > { %6075 = vst [vmem:[#allocation6_spill] sm:$0xff] %v5592_v58  ;;  %v5614_v52 = vrot.slane %v3349_v22, %v5445_v6  ;;  %v5637_v56 = vmul.f32 0.0, %v5592_v58  ;;  %6088 = vst [vmem:[#allocation19_spill] sm:$0xff] %v5667_v25  ;;  %v3564_v45 = vmul.f32 %v5552_v10, %v5532_v55 }
0x191a   : > { %4545 = vmatprep.mubr.msk.bf16.mxu1 %vm442_vm3, %v3163_v8  ;;  %v5547_v8 = vmul.f32 0.0, %v5512_v0  ;;  %v5575_v44 = vadd.f32 %v3490_v2, %v3453_v63  ;;  %v5596_v63 = vrot.slane %v3348_v60, %v5430_v23  ;;  %v5599_v2 = vrot.slane %v3349_v22, %v5437_v28 }
0x191b   : > { %4546 = vmatmul.mubr.msk.bf16.vlgmr.msra.gmra.mrb[60].mxu1 %vm442_vm3, %v3164_v9  ;;  %v5550_v9 = vmul.f32 0.0, %v5515_v51  ;;  %6078 = vst [vmem:[#allocation9_spill] sm:$0xff] %v5614_v52  ;;  %6082 = vst [vmem:[#allocation13_spill] sm:$0xff] %v5637_v56  ;;  %v5661_v42 = vmul.f32 %v5614_v52, %v5542_v5  ;;  %v5698_v52 = vmul.f32 %v5667_v25, %v5542_v5 }
0x191c   : > { %6076 = vst [vmem:[#allocation7_spill] sm:$0xff] %v5599_v2  ;;  %v5652_v18 = vmul.f32 %v5599_v2, %v5542_v5  ;;  %v3448_v2 = vrot.slane %v3443_v39, 4  ;;  %v3522_v39 = vmul.f32 %v5552_v10, %v5515_v51  ;;  %v3380_v22 = vmul.f32 %v5552_v10, %v5477_v46 }
0x191d   : > { %6086 = vst [vmem:[#allocation17_spill] sm:$0xff] %v5661_v42  ;;  %v5694_v42 = vmul.f32 0.0, %v5664_v57 }
0x191e   : > { %6084 = vst [vmem:[#allocation15_spill] sm:$0xff] %v5652_v18  ;;  %v5672_v18 = vmul.f32 %v5621_v30, %v5542_v5  ;;  %v6095_v30 = vrot.slane %v5637_v56, 4  ;;  %v3528_v56 = vrot.slane %v3522_v39, 4  ;;  %v3492_v39 = vmul.f32 %v5544_v7, %v5508_v40 }
0x1920   : > { %6089 = vst [vmem:[#allocation20_spill] sm:$0xff] %v5672_v18  ;;  %v3449_v18 = vsel %vm3391_vm6, %v6094_v59, %v3448_v2  ;;  %v6099_v59 = vrot.slane %v5471_v38, 4  ;;  %v3455_v38 = vadd.f32 %v3448_v2, %v3380_v22  ;;  %v5753_v2 = vpop.permute.xlu1 %3223 }
0x1921   : > { %6100 = vst [vmem:[#allocation24_spill] sm:$0xff] %v5753_v2 }
0x19ee   : > { %v4547_v12 = vpop.f32.mrb[60].mxu1 }
0x19ef   : > { %v3206_v13 = vpop.f32.mrb[61].mxu1 }
0x19f0   : > { %3295 = vrot.lane.b32.xlu1 %v3206_v13, %s4852_s29  ;;  %v4548_v4 = vpop.f32.mrb[62].mxu1  ;;  %v5559_v13 = vmul.f32 0.0, %v5525_v15 }
0x19f1   : > { %v3209_v14 = vpop.f32.mrb[63].mxu1  ;;  %v5561_v4 = vadd.f32 %v3480_v50, %v3435_v41  ;;  %v5589_v50 = vrot.slane %v3348_v60, %v5445_v6  ;;  %v5607_v41 = vmul.f32 %v5567_v16, %v5542_v5  ;;  %v5634_v6 = vmul.f32 %v5592_v58, %v5542_v5 }
0x19f2   : > { %3297 = vrot.lane.b32.xlu0 %v3209_v14, %s4852_s29  ;;  %v5564_v14 = vmul.f32 0.0, %v5532_v55  ;;  %v5685_v58 = vmul.f32 %v5552_v10, %v5512_v0 }
0x19f3   : > { %6081 = vst [vmem:[#allocation12_spill] sm:$0xff] %v5634_v6  ;;  %v6096_v46 = vrot.slane %v5634_v6, 4  ;;  %v3543_v6 = vmul.f32 %v5552_v10, %v5525_v15 }
0x19f4   : > { %3299 = vrot.lane.b32.xlu1 %v4547_v12, %s4852_s29  ;;  %v5556_v12 = vadd.f32 %v3470_v47, %v3417_v54  ;;  %v5584_v54 = vrot.slane %v3348_v60, %v5428_v26  ;;  %v5625_v47 = vmul.f32 %v5552_v10, %v5443_v3  ;;  %v5645_v3 = vmul.f32 %v5596_v63, %v5542_v5 }
0x19f5   : > { %v5656_v60 = vmul.f32 %v5602_v19, %v5542_v5  ;;  %6091 = vst [vmem:[#allocation22_spill] sm:$0xff] %v5685_v58  ;;  %v5691_v19 = vmul.f32 %v5664_v57, %v5542_v5  ;;  %v6093_v26 = vrot.slane %v5465_v32, 4  ;;  %v5712_v57 = vmul.f32 %v5544_v7, %v5515_v51 }
0x19f6   : > { %v5618_v28 = vmul.f32 %v5584_v54, %v5542_v5  ;;  %v6092_v23 = vrot.slane %v5625_v47, 4  ;;  %v5721_v5 = vsel %vm3391_vm6, %v6096_v46, %v6095_v30  ;;  %v5724_v32 = vmul.f32 0.0, %v5667_v25 }
0x19f7   : > { %6085 = vst [vmem:[#allocation16_spill] sm:$0xff] %v5656_v60  ;;  %6097 = vst [vmem:[#allocation23_spill] sm:$0xff] %v5721_v5  ;;  %v3431_v51 = vsel %vm3391_vm6, %v6099_v59, %v6098_v48  ;;  %v5738_v30 = vmul.f32 %v5544_v7, %v5525_v15  ;;  %v3454_v5 = vadd.f32 %v3449_v18, %v5504_v36  ;;  %v6101_v18 = vrot.slane %v5685_v58, 4 }
0x19f8   : > { %6079 = vst [vmem:[#allocation10_spill] sm:$0xff] %v5618_v28  ;;  %v3413_v60 = vsel %vm3391_vm6, %v6093_v26, %v6092_v23  ;;  %v3565_v26 = vmul.f32 %v5544_v7, %v5532_v55  ;;  %v3471_v48 = vmul.f32 %v5552_v10, %v5494_v24  ;;  %v3491_v55 = vmul.f32 %v5552_v10, %v5508_v40  ;;  %v5767_v28 = vpop.permute.xlu0 %3225 }
0x19f9   : > { %v3418_v46 = vadd.f32 %v3413_v60, %v5489_v1  ;;  %v3570_v23 = vrot.slane %v3564_v45, 4  ;;  %v3436_v25 = vadd.f32 %v3431_v51, %v5497_v27  ;;  %v3481_v1 = vmul.f32 %v5552_v10, %v5501_v31  ;;  %6104 = vst [vmem:[#allocation25_spill] sm:$0xff] %v5767_v28 }
0x19fa   : > { %v3572_v36 = vrot.slane %v3565_v26, 4  ;;  %v6102_v60 = vrot.slane %v5547_v8, 4  ;;  %v6103_v40 = vrot.slane %v5550_v9, 4  ;;  %v3549_v59 = vrot.slane %v3543_v6, 4 }
0x19fb   : > { %v6070_v15 = vrot.slane %v5738_v30, 4  ;;  %v3474_v2 = vadd.f32 %v3471_v48, %v3418_v46  ;;  %v3494_v58 = vadd.f32 %v3491_v55, %v3454_v5  ;;  %v3495_v8 = vadd.f32 %v3492_v39, %v3455_v38 }
0x19fc   : > { %v3508_v22 = vsel %vm3391_vm6, %v6102_v60, %v6101_v18  ;;  %v3529_v45 = vsel %vm3391_vm6, %v6103_v40, %v3528_v56  ;;  %v6105_v18 = vrot.slane %v5712_v57, 4  ;;  %v6106_v60 = vrot.slane %v5564_v14, 4 }
0x19fd   : > { %v3484_v40 = vadd.f32 %v3481_v1, %v3436_v25  ;;  %v3514_v27 = vadd.f32 %v3508_v22, %v5554_v11  ;;  %v3535_v51 = vadd.f32 %v3529_v45, %v5556_v12  ;;  %v3573_v26 = vsel %vm3391_vm6, %v3570_v23, %v3572_v36 }
0x19fe   : > { %v3531_v9 = vsel %vm3391_vm6, %v3528_v56, %v6105_v18  ;;  %v3571_v6 = vsel %vm3391_vm6, %v6106_v60, %v3570_v23  ;;  %v6107_v46 = vrot.slane %v5559_v13, 4  ;;  %v3552_v38 = vsel %vm3391_vm6, %v3549_v59, %v6070_v15 }
0x19ff   : > { %v3584_v56 = vmul.f32 %v5552_v10, %v5578_v49  ;;  %v3594_v14 = vmul.f32 %v5552_v10, %v5581_v53  ;;  %v6108_v11 = vrot.slane %v5694_v42, 4  ;;  %v6109_v12 = vrot.slane %v5691_v19, 4 }
0x1a00   : > { %v3550_v5 = vsel %vm3391_vm6, %v6107_v46, %v3549_v59  ;;  %v6110_v13 = vrot.slane %v5724_v32, 4  ;;  %v6111_v23 = vrot.slane %v5698_v52, 4  ;;  %v3536_v55 = vadd.f32 %v3531_v9, %v3474_v2  ;;  %v5803_v59 = vpop.permute.xlu1 %3227  ;;  %v5816_v2 = vpop.permute.xlu0 %3235 }
0x1a01   : > { %v5793_v25 = vsel %vm3391_vm6, %v6109_v12, %v6108_v11  ;;  %v3577_v39 = vadd.f32 %v3571_v6, %v5575_v44  ;;  %6112 = vst [vmem:[#allocation26_spill] sm:$0xff] %v5803_v59  ;;  %v3578_v1 = vadd.f32 %v3573_v26, %v3494_v58  ;;  %v3579_v22 = vadd.f32 %v3572_v36, %v3495_v8 }
0x1a02   : > { %v5800_v48 = vsel %vm3391_vm6, %v6111_v23, %v6110_v13  ;;  %v3624_v45 = vmul.f32 %v5552_v10, %v5630_v20  ;;  %v5809_v18 = vmul.f32 %v5544_v7, %v5630_v20  ;;  %v3556_v60 = vadd.f32 %v3550_v5, %v5561_v4 }
0x1a03   : > { %v3557_v46 = vadd.f32 %v3552_v38, %v3484_v40  ;;  %v3595_v11 = vmul.f32 %v5544_v7, %v5581_v53  ;;  %v3388_v44 = vmul.f32 %v5552_v10, %v5440_v29  ;;  %v3587_v58 = vadd.f32 %v3584_v56, %v3514_v27 }
0x1a04   : > { %v3597_v36 = vadd.f32 %v3594_v14, %v3535_v51  ;;  %v3604_v26 = vmul.f32 %v5552_v10, %v5589_v50  ;;  %v3605_v8 = vmul.f32 %v5544_v7, %v5589_v50  ;;  %v3645_v4 = vmul.f32 %v5552_v10, %v5570_v17  ;;  %v5846_v28 = vpop.permute.xlu0 %3239 }
0x1a05   : > { %v3646_v9 = vmul.f32 %v5544_v7, %v5570_v17  ;;  %v3666_v6 = vmul.f32 %v5552_v10, %v5584_v54  ;;  %v3667_v29 = vmul.f32 %v5544_v7, %v5584_v54  ;;  %v3630_v27 = vrot.slane %v3624_v45, 4  ;;  %v5841_v54 = vpop.permute.xlu1 %3237 }
0x1a06   : > { %v3688_v40 = vmul.f32 %v5544_v7, %v5596_v63  ;;  %v3364_v5 = vmul.f32 %v5552_v10, %v5459_v35  ;;  %v3614_v38 = vmul.f32 %v5552_v10, %v5567_v16  ;;  %v3615_v17 = vmul.f32 %v5544_v7, %v5567_v16  ;;  %6113 = vst [vmem:[#allocation27_spill] sm:$0xff] %v5841_v54 }
0x1a07   : > { %v3372_v56 = vmul.f32 %v5552_v10, %v5468_v33  ;;  %v3394_v14 = vrot.slane %v3388_v44, 4  ;;  %v3598_v12 = vadd.f32 %v3595_v11, %v3536_v55  ;;  %v3607_v13 = vadd.f32 %v3604_v26, %v3556_v60 }
0x1a08   : > { %v3619_v23 = vadd.f32 %v5607_v41, %v3579_v22  ;;  %v3687_v45 = vmul.f32 %v5552_v10, %v5596_v63  ;;  %v3651_v35 = vrot.slane %v3645_v4, 4  ;;  %v3652_v15 = vrot.slane %v3646_v9, 4 }
0x1a09   : > { %v3672_v51 = vrot.slane %v3666_v6, 4  ;;  %v3673_v59 = vrot.slane %v3667_v29, 4  ;;  %v6114_v16 = vrot.slane %v5809_v18, 4  ;;  %v3694_v44 = vrot.slane %v3688_v40, 4 }
0x1a0a   : > { %v6115_v54 = vrot.slane %v5625_v47, 4  ;;  %v3472_v41 = vmul.f32 %v5544_v7, %v5494_v24  ;;  %v6116_v22 = vrot.slane %v5462_v37, 4  ;;  %v6117_v60 = vrot.slane %v5641_v43, 4 }
0x1a0b   : > { %v3632_v33 = vsel %vm3391_vm6, %v3630_v27, %v6114_v16  ;;  %v3482_v26 = vmul.f32 %v5544_v7, %v5501_v31  ;;  %v3502_v4 = vmul.f32 %v5544_v7, %v5512_v0  ;;  %v3608_v9 = vadd.f32 %v3605_v8, %v3557_v46  ;;  %v5872_v31 = vpop.permute.xlu1 %3247 }
0x1a0c   : > { %v3419_v55 = vadd.f32 %v6115_v54, %v3364_v5  ;;  %v3395_v63 = vsel %vm3391_vm6, %v6116_v22, %v3394_v14  ;;  %v3437_v11 = vadd.f32 %v6117_v60, %v3372_v56  ;;  %v3617_v6 = vadd.f32 %v3614_v38, %v3577_v39 }
0x1a0d   : > { %v3618_v47 = vadd.f32 %v3615_v17, %v3578_v1  ;;  %v3356_v29 = vmul.f32 %v5552_v10, %v5456_v34  ;;  %v3653_v24 = vsel %vm3391_vm6, %v3651_v35, %v3652_v15  ;;  %v6118_v37 = vrot.slane %v5611_v21, 4  ;;  %v5883_v17 = vpop.permute.xlu0 %3249 }
0x1a0e   : > { %v3693_v43 = vrot.slane %v3687_v45, 4  ;;  %v6119_v40 = vrot.slane %v5645_v3, 4  ;;  %v5874_v56 = vadd.f32 %v3632_v33, %v3587_v58  ;;  %v3400_v34 = vadd.f32 %v3395_v63, %v5483_v61  ;;  %v6121_v45 = vld [vmem:[#allocation10_spill] sm:$0xff]  ;;  %v6123_v33 = vld [vmem:[#allocation19_spill] sm:$0xff] }
0x1a0f   : > { %v3655_v27 = vsel %vm3391_vm6, %v3652_v15, %v6118_v37  ;;  %v3461_v1 = vmul.f32 %v5552_v10, %v5486_v62  ;;  %v3674_v46 = vsel %vm3391_vm6, %v3672_v51, %v3673_v59  ;;  %v3475_v15 = vadd.f32 %v3472_v41, %v3419_v55  ;;  %v6124_v41 = vld [vmem:[#allocation5_spill] sm:$0xff]  ;;  %v6131_v37 = vld [vmem:[#allocation20_spill] sm:$0xff] }
0x1a10   : > { %v3703_v5 = vadd.f32 %v6119_v40, %v3619_v23  ;;  %v6120_v0 = vmov %v6119_v40  ;;  %v3485_v8 = vadd.f32 %v3482_v26, %v3437_v11  ;;  %v3509_v38 = vrot.slane %v3502_v4, 4  ;;  %v5906_v26 = vpop.permute.xlu1 %3251 }
0x1a11   : > { %v3697_v39 = vsel %vm3391_vm6, %v3694_v44, %v6120_v0  ;;  %v3659_v54 = vadd.f32 %v3653_v24, %v3597_v36  ;;  %v3660_v23 = vadd.f32 %v3655_v27, %v3598_v12  ;;  %v3401_v58 = vadd.f32 %v3394_v14, %v3356_v29  ;;  %v6125_v12 = vld [vmem:[#allocation22_spill] sm:$0xff]  ;;  %v5915_v0 = vpop.permute.xlu0 %3259 }
0x1a12   : > { %v3462_v3 = vmul.f32 %v5544_v7, %v5486_v62  ;;  %v6122_v35 = vrot.slane %v6121_v45, 4  ;;  %v3695_v16 = vsel %vm3391_vm6, %v3693_v43, %v3694_v44  ;;  %v3702_v10 = vadd.f32 %v3697_v39, %v3618_v47  ;;  %v6129_v47 = vld [vmem:[#allocation11_spill] sm:$0xff]  ;;  %v6130_v24 = vld [vmem:[#allocation14_spill] sm:$0xff] }
0x1a13   : > { %v3811_v51 = vmul.f32 %v5544_v7, %v6123_v33  ;;  %v3680_v55 = vadd.f32 %v3674_v46, %v3607_v13  ;;  %v3596_v22 = vmul.f32 %v5581_v53, %v6124_v41  ;;  %v3606_v36 = vmul.f32 %v5589_v50, %v6124_v41  ;;  %v6132_v43 = vld [vmem:[#allocation6_spill] sm:$0xff]  ;;  %v6135_v46 = vld [vmem:[#allocation9_spill] sm:$0xff] }
0x1a14   : > { %v3676_v61 = vsel %vm3391_vm6, %v3673_v59, %v6122_v35  ;;  %v3464_v14 = vadd.f32 %v3461_v1, %v3400_v34  ;;  %v3626_v62 = vmul.f32 %v5630_v20, %v6124_v41  ;;  %v6126_v63 = vrot.slane %v6125_v12, 4 }
0x1a15   : > { %v6127_v44 = vrot.slane %v5712_v57, 4  ;;  %v6128_v11 = vrot.slane %v5738_v30, 4  ;;  %v3681_v53 = vadd.f32 %v3676_v61, %v3608_v9  ;;  %v3701_v4 = vadd.f32 %v3695_v16, %v3617_v6  ;;  %v6133_v30 = vld [vmem:[#allocation7_spill] sm:$0xff]  ;;  %v6134_v9 = vld [vmem:[#allocation21_spill] sm:$0xff]  ;;  %v6136_v61 = vld [vmem:[#allocation18_spill] sm:$0xff] }
0x1a16   : > { %v3510_v59 = vsel %vm3391_vm6, %v6126_v63, %v3509_v38  ;;  %v3738_v50 = vmul.f32 %v5544_v7, %v6129_v47  ;;  %v3465_v29 = vadd.f32 %v3462_v3, %v3401_v58  ;;  %v3708_v20 = vmul.f32 %v5544_v7, %v6130_v24  ;;  %v5948_v47 = vpop.permute.xlu0 %3263 }
0x1a17   : > { %v3537_v60 = vadd.f32 %v6127_v44, %v3475_v15  ;;  %v3558_v13 = vadd.f32 %v6128_v11, %v3485_v8  ;;  %v3742_v27 = vadd.f32 %v6131_v37, %v3702_v10  ;;  %v3769_v57 = vmul.f32 %v5544_v7, %v6132_v43 }
0x1a18   : > { %v3817_v40 = vrot.slane %v3811_v51, 4  ;;  %v3718_v39 = vmul.f32 %v5544_v7, %v6133_v30  ;;  %v3743_v6 = vadd.f32 %v6134_v9, %v3703_v5  ;;  %v3515_v34 = vadd.f32 %v3510_v59, %v3464_v14  ;;  %v6137_v51 = vld [vmem:[#allocation8_spill] sm:$0xff] }
0x1a19   : > { %v3585_v1 = vmul.f32 %v5544_v7, %v5578_v49  ;;  %v3728_v15 = vmul.f32 %v5544_v7, %v6135_v46  ;;  %v3633_v8 = vrot.slane %v3626_v62, 4  ;;  %v3599_v58 = vadd.f32 %v3596_v22, %v3537_v60  ;;  %v5934_v22 = vpop.permute.xlu1 %3261  ;;  %v6145_v9 = vld [vmem:[#allocation12_spill] sm:$0xff] }
0x1a1a   : > { %v3609_v3 = vadd.f32 %v3606_v36, %v3558_v13  ;;  %v3741_v35 = vadd.f32 %v3738_v50, %v3701_v4  ;;  %v3790_v16 = vmul.f32 %v5544_v7, %v6136_v61  ;;  %v3586_v10 = vmul.f32 %v5578_v49, %v6124_v41 }
0x1a1b   : > { %v3516_v33 = vadd.f32 %v3509_v38, %v3465_v29  ;;  %v3748_v5 = vmul.f32 %v5544_v7, %v6137_v51  ;;  %v3775_v14 = vrot.slane %v3769_v57, 4  ;;  %v6138_v12 = vrot.slane %v5698_v52, 4 }
0x1a1c   : > { %v3826_v62 = vadd.f32 %v5800_v48, %v3742_v27  ;;  %v6139_v36 = vrot.slane %v5724_v32, 4  ;;  %v3720_v44 = vmul.f32 0.0, %v6133_v30  ;;  %v3730_v49 = vmul.f32 0.0, %v6135_v46  ;;  %v6143_v32 = vld [vmem:[#allocation15_spill] sm:$0xff] }
0x1a1d   : > { %v3819_v63 = vsel %vm3391_vm6, %v3817_v40, %v6138_v12  ;;  %v3588_v38 = vadd.f32 %v3585_v1, %v3515_v34  ;;  %v3750_v60 = vmul.f32 0.0, %v6137_v51  ;;  %v6140_v7 = vrot.slane %v5809_v18, 4  ;;  %v6144_v40 = vld [vmem:[#allocation17_spill] sm:$0xff]  ;;  %v4143_v51 = vld [vmem:[%s6042_s4 + $0x20] ss:$0 sm:$0xff] }
0x1a1e   : > { %v3827_v59 = vadd.f32 %v6139_v36, %v3743_v6  ;;  %v6141_v11 = vrot.slane %v5611_v21, 4  ;;  %v6142_v48 = vrot.slane %v6121_v45, 4  ;;  %v3722_v50 = vadd.f32 %v6143_v32, %v3660_v23 }
0x1a1f   : > { %v3634_v52 = vsel %vm3391_vm6, %v6140_v7, %v3633_v8  ;;  %v3796_v29 = vrot.slane %v3790_v16, 4  ;;  %v3825_v37 = vadd.f32 %v3819_v63, %v3741_v35  ;;  %v3589_v27 = vadd.f32 %v3586_v10, %v3516_v33  ;;  %v3272_v35 = vpop.permute.xlu1 %3271  ;;  %v6148_v16 = vld [vmem:[#allocation23_spill] sm:$0xff]  ;;  %v5963_v33 = vpop.permute.xlu0 %3273 }
0x1a20   : > { %v3661_v13 = vadd.f32 %v6141_v11, %v3599_v58  ;;  %v3682_v4 = vadd.f32 %v6142_v48, %v3609_v3  ;;  %v3721_v43 = vadd.f32 %v3718_v39, %v3659_v54  ;;  %v3731_v57 = vadd.f32 %v3728_v15, %v3680_v55  ;;  %v6156_v11 = vld [vmem:[#allocation3_spill] sm:$0xff] }
0x1a21   : > { %v3732_v30 = vadd.f32 %v6144_v40, %v3681_v53  ;;  %v3754_v18 = vrot.slane %v3748_v5, 4  ;;  %v6146_v6 = vrot.slane %v6145_v9, 4  ;;  %v3856_v34 = vrot.slane %v3826_v62, 1  ;;  %v6149_v5 = vld [vmem:[#allocation16_spill] sm:$0xff]  ;;  %v6157_v9 = vld [vmem:[#allocation25_spill] sm:$0xff] }
0x1a22   : > { %v3709_v45 = vmul.f32 %v6130_v24, %v6124_v41  ;;  %v3639_v1 = vadd.f32 %v3634_v52, %v3588_v38  ;;  %v3858_v46 = vrot.slane %v3827_v59, 1  ;;  %v3757_v58 = vrot.slane %v3750_v60, 4  ;;  %v6155_v52 = vld [vmem:[#allocation24_spill] sm:$0xff] }
0x1a23   : > { %v3777_v21 = vsel %vm3391_vm6, %v3775_v14, %v6146_v6  ;;  %v3723_v23 = vadd.f32 %v3720_v44, %v3661_v13  ;;  %v3733_v3 = vadd.f32 %v3730_v49, %v3682_v4  ;;  %v6147_v54 = vrot.slane %v5691_v19, 4  ;;  %v3276_v4 = vpop.permute.xlu1 %3275  ;;  %v6158_v6 = vld [vmem:[#allocation4_spill] sm:$0xff] }
0x1a24   : > { %v3855_v53 = vrot.slane %v3825_v37, 1  ;;  %v3710_v39 = vmul.f32 0.0, %v6130_v24  ;;  %v3640_v15 = vadd.f32 %v3633_v8, %v3589_v27  ;;  %v3711_v61 = vadd.f32 %v3708_v20, %v5874_v56  ;;  %v6152_v20 = vld [vmem:[#allocation13_spill] sm:$0xff] }
0x1a25   : > { %v3798_v55 = vsel %vm3391_vm6, %v3796_v29, %v6147_v54  ;;  %v3784_v10 = vadd.f32 %v6148_v16, %v3722_v50  ;;  %v6150_v14 = vrot.slane %v6149_v5, 4  ;;  %v3783_v12 = vadd.f32 %v3777_v21, %v3721_v43  ;;  %v6159_v21 = vld [vmem:[#allocation26_spill] sm:$0xff] }
0x1a26   : > { %v3805_v63 = vadd.f32 %v5793_v25, %v3732_v30  ;;  %v3712_v24 = vadd.f32 %v3709_v45, %v3639_v1  ;;  %v3804_v8 = vadd.f32 %v3798_v55, %v3731_v57  ;;  %v6153_v36 = vrot.slane %v6152_v20, 4  ;;  %v3284_v30 = vpop.permute.xlu0 %3283 }
0x1a27   : > { %v3756_v19 = vsel %vm3391_vm6, %v3754_v18, %v6150_v14  ;;  %v6151_v62 = vmov %v6150_v14  ;;  %v6154_v44 = vrot.slane %v5694_v42, 4  ;;  %v3857_v38 = vsel %vm3840_vm7, %v3855_v53, %v3856_v34 }
0x1a28   : > { %v3758_v56 = vsel %vm3391_vm6, %v6151_v62, %v3757_v58  ;;  %v3785_v59 = vadd.f32 %v6153_v36, %v3723_v23  ;;  %v3859_v60 = vsel %vm3840_vm7, %v3856_v34, %v3858_v46  ;;  %v3713_v7 = vadd.f32 %v3710_v39, %v3640_v15  ;;  %v6160_v34 = vld [vmem:[#allocation2_spill] sm:$0xff]  ;;  %v6161_v23 = vld [vmem:[#allocation27_spill] sm:$0xff] }
0x1a29   : > { %v3806_v49 = vadd.f32 %v6154_v44, %v3733_v3  ;;  %v3304_v25 = vsel %vm381_vm1, %v6156_v11, %v6155_v52  ;;  %v3832_v13 = vmul.f32 %v4143_v51, %v6124_v41  ;;  %v3842_v48 = vrot.slane %v3784_v10, 1 }
0x1a2a   : > { %v3762_v32 = vadd.f32 %v3756_v19, %v3711_v61  ;;  %v3841_v50 = vrot.slane %v3783_v12, 1  ;;  %v3833_v29 = vmul.f32 0.0, %v4143_v51  ;;  %v3763_v37 = vadd.f32 %v3758_v56, %v3712_v24  ;;  %v3288_v19 = vpop.permute.xlu0 %3287 }
0x1a2b   : > { %v3863_v42 = vadd.f32 %v3857_v38, %v3804_v8  ;;  %v3864_v27 = vadd.f32 %v3859_v60, %v3805_v63  ;;  %v3844_v43 = vrot.slane %v3785_v59, 1  ;;  %v3865_v57 = vadd.f32 %v3858_v46, %v3806_v49 }
0x1a2c   : > { %v3308_v40 = vsel %vm3307_vm8, %v3304_v25, %v5816_v2  ;;  %v3764_v18 = vadd.f32 %v3757_v58, %v3713_v7  ;;  %v3305_v41 = vsel %vm381_vm1, %v6158_v6, %v6157_v9  ;;  %v3306_v45 = vsel %vm381_vm1, %v6160_v34, %v6159_v21 }
0x1a2d   : > { %v3312_v1 = vsel %vm3311_vm9, %v3308_v40, %v5872_v31  ;;  %v3309_v46 = vsel %vm3307_vm8, %v3305_v41, %v6161_v23  ;;  %v3834_v3 = vadd.f32 %v3832_v13, %v3762_v32  ;;  %v3843_v2 = vsel %vm3840_vm7, %v3841_v50, %v3842_v48  ;;  %v3286_v31 = vpop.permute.xlu1 %3285  ;;  %v4144_v13 = vld [vmem:[%s6044_s6] ss:$0 sm:$0xff] }
0x1a2e   : > { %v3835_v54 = vadd.f32 %v3833_v29, %v3763_v37  ;;  %v3870_v58 = vrot.slane %v3863_v42, 2  ;;  %v3871_v55 = vrot.slane %v3864_v27, 2  ;;  %v3845_v53 = vsel %vm3840_vm7, %v3842_v48, %v3844_v43 }
0x1a2f   : > { %v3873_v39 = vrot.slane %v3865_v57, 2  ;;  %v3310_v15 = vsel %vm3307_vm8, %v3306_v45, %v5846_v28  ;;  %v3315_v61 = vsel %vm442_vm3, %v3312_v1, %v5915_v0  ;;  %v3836_v16 = vadd.f32 %v3833_v29, %v3764_v18  ;;  %v3964_v29 = vld [vmem:[%s333_s12] sm:$0xff]  ;;  %v3965_v57 = vld [vmem:[%s333_s12 + $0x8] sm:$0xff] }
0x1a30   : > { %v3314_v10 = vsel %vm3311_vm9, %v3310_v15, %v5906_v26  ;;  %v3313_v51 = vsel %vm3311_vm9, %v3309_v46, %v5883_v17  ;;  %v3319_v5 = vsel %vm3318_vm10, %v3315_v61, %v3272_v35  ;;  %v3849_v28 = vadd.f32 %v3843_v2, %v3834_v3 }
0x1a31   : > { %v3316_v14 = vsel %vm442_vm3, %v3313_v51, %v5934_v22  ;;  %v3850_v12 = vadd.f32 %v3845_v53, %v3835_v54  ;;  %v3872_v0 = vsel %vm3869_vm11, %v3870_v58, %v3871_v55  ;;  %v3874_v63 = vsel %vm3869_vm11, %v3871_v55, %v3873_v39 }
0x1a32   : > { %v3317_v24 = vsel %vm442_vm3, %v3314_v10, %v5948_v47  ;;  %v3323_v26 = vsel %vm3322_vm12, %v3319_v5, %v3284_v30  ;;  %v3851_v62 = vadd.f32 %v3844_v43, %v3836_v16  ;;  %v3320_v35 = vsel %vm3318_vm10, %v3316_v14, %v5963_v33 }
0x1a33   : > { %v3321_v17 = vsel %vm3318_vm10, %v3317_v24, %v3276_v4  ;;  %v3324_v56 = vsel %vm3322_vm12, %v3320_v35, %v3286_v31  ;;  %v3878_v20 = vadd.f32 %v3872_v0, %v3849_v28  ;;  %v3879_v59 = vadd.f32 %v3874_v63, %v3850_v12  ;;  %v3966_v4 = vld [vmem:[%s333_s12 + $0x10] sm:$0x1] }
0x1a34   : > { %v3325_v38 = vsel %vm3322_vm12, %v3321_v17, %v3288_v19  ;;  %v3880_v7 = vadd.f32 %v3873_v39, %v3851_v62 }
0x1a62   : > { %v3296_v8 = vpop.permute.xlu1 %3295 }
0x1a63   : > { %v3327_v22 = vsel %vm3326_vm13, %v3323_v26, %v3296_v8 }
0x1a64   : > { %v3298_v36 = vpop.permute.xlu0 %3297  ;;  %v3881_v47 = vadd.f32 %v3878_v20, %v3327_v22 }
0x1a65   : > { %v3328_v44 = vsel %vm3326_vm13, %v3324_v56, %v3298_v36 }
0x1a66   : > { %v3882_v49 = vadd.f32 %v3879_v59, %v3328_v44  ;;  %v3300_v60 = vpop.permute.xlu1 %3299 }
0x1a67   : > { %v3329_v52 = vsel %vm3326_vm13, %v3325_v38, %v3300_v60 }
0x1a68   : > { %v3888_v33 = vpack.c.bf16 %v3882_v49, %v3881_v47  ;;  %v3883_v11 = vadd.f32 %v3880_v7, %v3329_v52 }
0x1a6a   : > { %v3889_v25 = vpack.c.bf16 %v3883_v11, %v3883_v11  ;;  %4553 = vmatprep.mubr.msk.bf16.mxu0 %vm3909_vm14, %v3888_v33 }
0x1a6c   : > { %4554 = vmatmul.mubr.msk.bf16.vlgmr.msra.gmra.mrb[96].mxu0 %vm3909_vm14, %v3889_v25 }
0x1b3f   : > { %v4555_v48 = vpop.f32.mrb[96].mxu0 }
0x1b40   : > { %v3959_v32 = vadd.f32 %v4555_v48, %v4144_v13  ;;  %v3950_v50 = vpop.f32.mrb[97].mxu0 }
0x1b41   : > { %v3951_v37 = vadd.f32 %v4144_v13, %v3950_v50  ;;  %v4556_v42 = vpop.f32.mrb[98].mxu0 }
0x1b42   : > { %v3969_v27 = vadd.f32 %v3966_v4, %v3959_v32  ;;  %v3953_v43 = vpop.f32.mrb[99].mxu0 }
0x1b43   : > { %v3967_v40 = vadd.f32 %v3964_v29, %v3951_v37  ;;  %v3954_v30 = vadd.f32 %v4144_v13, %v3953_v43 }
0x1b44   : > { %3973 = vst.msk [vmem:[%s338_s27 + $0x10] sm:$0x1] %vm3972_vm15, %v3969_v27 }
0x1b45   : > { %3970 = vst.msk [vmem:[%s338_s27] sm:$0xff] %vm3909_vm14, %v3967_v40  ;;  %v3968_v18 = vadd.f32 %v3965_v57, %v3954_v30 }
0x1b47   : > { %3971 = vst.msk [vmem:[%s338_s27 + $0x8] sm:$0xff] %vm3909_vm14, %v3968_v18 }
0x1b48 PF: > { %s17_s24 = sadd.s32 1, %s4818_s24  }
0x1b49   : > { %p14_p4 = scmp.ge.s32.totalorder %s17_s24, 4  }
0x1b4b   :  { %16 = sbr.rel (!%p14_p4) target bundleno = 1 (0x1), region = 87 }

</bundles_post_ra>
